<compile_context>
chip_gen: v7x
topology: tpu7x:2x2x1
jax: 0.10.0
libtpu: 0.0.40
codegen_flags: <defaults>
</compile_context>

<pallas_src>
import math

import jax
import jax.numpy as jnp
from jax.experimental import pallas as pl
from jax.experimental.pallas import tpu as pltpu

_BN_EPS = 1e-5


def _pad(k, p=None):
    if p is None:
        p = k // 2 if isinstance(k, int) else [x // 2 for x in k]
    return p


def _round_up(x, m):
    return (x + m - 1) // m * m


# ----------------------------------------------------------------------------
# Pallas kernel: one (TM, K) x (K, 128) matmul + folded-BN + SiLU epilogue.
# ----------------------------------------------------------------------------
def _gemm_bn_silu_kernel(a_ref, w_ref, scale_ref, bias_ref, o_ref):
    # bf16 operands, f32 MXU accumulation.
    acc = jnp.dot(a_ref[...], w_ref[...], preferred_element_type=jnp.float32)
    # folded eval-mode BatchNorm, then SiLU, in f32.
    y = acc * scale_ref[...] + bias_ref[...]
    o_ref[...] = (y * jax.nn.sigmoid(y)).astype(o_ref.dtype)


def _gemm_bn_silu(a, b, scale, bias, *, tm_max=512, tn=128):
    """(M, K) @ (K, C2) with per-column scale/bias + SiLU. Returns f32 (M, C2)."""
    m, kc = a.shape
    c2 = b.shape[1]

    tm = min(tm_max, _round_up(m, 8))
    m_p = _round_up(m, tm)
    kc_p = _round_up(kc, 8)          # sublane-align the contraction dim
    c2_p = _round_up(c2, tn)         # lane-dense output (multiple of 128)

    a_p = jnp.pad(a.astype(jnp.bfloat16), ((0, m_p - m), (0, kc_p - kc)))
    b_p = jnp.pad(b.astype(jnp.bfloat16), ((0, kc_p - kc), (0, c2_p - c2)))
    scale_p = jnp.pad(scale.astype(jnp.float32), (0, c2_p - c2)).reshape(1, c2_p)
    bias_p = jnp.pad(bias.astype(jnp.float32), (0, c2_p - c2)).reshape(1, c2_p)

    out = pl.pallas_call(
        _gemm_bn_silu_kernel,
        out_shape=jax.ShapeDtypeStruct((m_p, c2_p), jnp.float32),
        grid_spec=pltpu.PrefetchScalarGridSpec(
            num_scalar_prefetch=0,
            grid=(m_p // tm, c2_p // tn),
            in_specs=[
                pl.BlockSpec((tm, kc_p), lambda i, j: (i, 0)),
                pl.BlockSpec((kc_p, tn), lambda i, j: (0, j)),
                pl.BlockSpec((1, tn), lambda i, j: (0, j)),
                pl.BlockSpec((1, tn), lambda i, j: (0, j)),
            ],
            out_specs=pl.BlockSpec((tm, tn), lambda i, j: (i, j)),
        ),
        compiler_params=pltpu.CompilerParams(
            dimension_semantics=("parallel", "parallel")),
    )(a_p, b_p, scale_p, bias_p)

    return out[:m, :c2]


# ----------------------------------------------------------------------------
# im2col (wrapper glue, NHWC) + Conv-BN-SiLU front-ends.
# ----------------------------------------------------------------------------
def _im2col_nhwc(x, k, s, pad):
    """x: (N, H, W, C1) -> ((N*Ho*Wo, K*K*C1), Ho, Wo); tap order (kh, kw, c1)."""
    n, h, w, c1 = x.shape
    ho = (h + 2 * pad - k) // s + 1
    wo = (w + 2 * pad - k) // s + 1
    if pad:
        x = jnp.pad(x, ((0, 0), (pad, pad), (pad, pad), (0, 0)))
    if k == 1 and s == 1:
        return x.reshape(n * ho * wo, c1), ho, wo
    taps = []
    for ih in range(k):
        for iw in range(k):
            taps.append(jax.lax.slice(
                x,
                (0, ih, iw, 0),
                (n, ih + (ho - 1) * s + 1, iw + (wo - 1) * s + 1, c1),
                (1, s, s, 1)))
    cols = jnp.concatenate(taps, axis=-1)            # (N, Ho, Wo, K*K*C1)
    return cols.reshape(n * ho * wo, k * k * c1), ho, wo


def conv_bn_silu_pallas(p, x_nhwc):
    """Conv2d(no bias) + eval-mode BN + SiLU via the Pallas GEMM kernel (NHWC)."""
    k, s, pad = p['k'], p['s'], p['p']
    c2 = p['w'].shape[0]
    n = x_nhwc.shape[0]
    cols, ho, wo = _im2col_nhwc(x_nhwc, k, s, pad)
    # (C2, C1, KH, KW) -> (KH*KW*C1, C2), matching im2col tap order.
    w_mat = jnp.transpose(p['w'], (2, 3, 1, 0)).reshape(cols.shape[1], c2)
    scale = p['gamma'] / jnp.sqrt(p['var'] + _BN_EPS)
    bias = p['beta'] - p['mean'] * scale
    y = _gemm_bn_silu(cols, w_mat, scale, bias)      # (M, C2) f32
    return y.reshape(n, ho, wo, c2)


def conv_bn_silu_ref(p, x_nhwc):
    """Pure-JAX reference with the same bf16-operand / f32-accumulate contract."""
    k, s, pad = p['k'], p['s'], p['p']
    w_hwio = jnp.transpose(p['w'], (2, 3, 1, 0))
    y = jax.lax.conv_general_dilated(
        x_nhwc.astype(jnp.bfloat16), w_hwio.astype(jnp.bfloat16),
        window_strides=(s, s), padding=((pad, pad), (pad, pad)),
        dimension_numbers=("NHWC", "HWIO", "NHWC"),
        preferred_element_type=jnp.float32)
    scale = p['gamma'] / jnp.sqrt(p['var'] + _BN_EPS)
    bias = p['beta'] - p['mean'] * scale
    y = y * scale + bias
    return y * jax.nn.sigmoid(y)


def _maxpool_nhwc(x, k):
    # TODO(synk): left as XLA reduce_window glue; padded cells behave like -inf
    # exactly as nn.MaxPool2d's implicit padding.
    pad = k // 2
    return jax.lax.reduce_window(
        x, -jnp.inf, jax.lax.max,
        window_dimensions=(1, k, k, 1),
        window_strides=(1, 1, 1, 1),
        padding=((0, 0), (pad, pad), (pad, pad), (0, 0)))


# ----------------------------------------------------------------------------
# BACKBONE structure (params + forward), NHWC internally.
# ----------------------------------------------------------------------------
def _init_conv(key, c1, c2, k=1, s=1, p=None):
    kw, kg, kb, km, kv = jax.random.split(key, 5)
    fan_in = c1 * k * k
    bound = 1.0 / math.sqrt(fan_in)
    return {
        'w': jax.random.uniform(kw, (c2, c1, k, k),
                                minval=-bound, maxval=bound, dtype=jnp.float32),
        'gamma': 1.0 + 0.1 * jax.random.normal(kg, (c2,), jnp.float32),
        'beta': 0.1 * jax.random.normal(kb, (c2,), jnp.float32),
        'mean': 0.1 * jax.random.normal(km, (c2,), jnp.float32),
        'var': jnp.abs(1.0 + 0.1 * jax.random.normal(kv, (c2,), jnp.float32)),
        'k': k, 's': s, 'p': _pad(k, p),
    }


def _init_bottleneck(key, c1, c2, shortcut=True, e=0.5):
    c_ = int(c2 * e)
    k1, k2 = jax.random.split(key)
    return {'cv1': _init_conv(k1, c1, c_, 1, 1),
            'cv2': _init_conv(k2, c_, c2, 3, 1),
            'add': bool(shortcut and c1 == c2)}


def _init_c3(key, c1, c2, n=1, shortcut=True, e=0.5):
    c_ = int(c2 * e)
    keys = jax.random.split(key, 3 + n)
    return {'cv1': _init_conv(keys[0], c1, c_, 1, 1),
            'cv2': _init_conv(keys[1], c1, c_, 1, 1),
            'cv3': _init_conv(keys[2], 2 * c_, c2, 1, 1),
            'm': [_init_bottleneck(keys[3 + i], c_, c_, shortcut, e=1.0)
                  for i in range(n)]}


def _init_sppf(key, c1, c2, k=5):
    c_ = c1 // 2
    k1, k2 = jax.random.split(key)
    return {'cv1': _init_conv(k1, c1, c_, 1, 1),
            'cv2': _init_conv(k2, c_ * 4, c2, 1, 1),
            'k': k}


def init_backbone(key, filters, depths):
    f = filters
    keys = jax.random.split(key, 10)
    return {
        'b0': _init_conv(keys[0], f[0], f[1], 6, 2, 2),
        'b1': _init_conv(keys[1], f[1], f[2], 3, 2),
        'b2': _init_c3(keys[2], f[2], f[2], depths[0]),
        'b3': _init_conv(keys[3], f[2], f[3], 3, 2),
        'b4': _init_c3(keys[4], f[3], f[3], depths[1]),
        'b5': _init_conv(keys[5], f[3], f[4], 3, 2),
        'b6': _init_c3(keys[6], f[4], f[4], depths[2]),
        'b7': _init_conv(keys[7], f[4], f[5], 3, 2),
        'b8': _init_c3(keys[8], f[5], f[5], depths[0]),
        'b9': _init_sppf(keys[9], f[5], f[5], 5),
    }


def _bottleneck_fwd(p, x, conv_fn):
    y = conv_fn(p['cv2'], conv_fn(p['cv1'], x))
    return x + y if p['add'] else y


def _c3_fwd(p, x, conv_fn):
    y1 = conv_fn(p['cv1'], x)
    for bp in p['m']:
        y1 = _bottleneck_fwd(bp, y1, conv_fn)
    y2 = conv_fn(p['cv2'], x)
    return conv_fn(p['cv3'], jnp.concatenate([y1, y2], axis=-1))


def _sppf_fwd(p, x, conv_fn):
    x = conv_fn(p['cv1'], x)
    y1 = _maxpool_nhwc(x, p['k'])
    y2 = _maxpool_nhwc(y1, p['k'])
    y3 = _maxpool_nhwc(y2, p['k'])
    return conv_fn(p['cv2'], jnp.concatenate([x, y1, y2, y3], axis=-1))


def backbone_forward(params, x_nchw, conv_fn):
    """x_nchw: (N, C, H, W). Returns (b4, b6, b9) in NCHW like the PyTorch module."""
    x = jnp.transpose(x_nchw, (0, 2, 3, 1)).astype(jnp.float32)   # NHWC once
    b0 = conv_fn(params['b0'], x)
    b1 = conv_fn(params['b1'], b0)
    b2 = _c3_fwd(params['b2'], b1, conv_fn)
    b3 = conv_fn(params['b3'], b2)
    b4 = _c3_fwd(params['b4'], b3, conv_fn)
    b5 = conv_fn(params['b5'], b4)
    b6 = _c3_fwd(params['b6'], b5, conv_fn)
    b7 = conv_fn(params['b7'], b6)
    b8 = _c3_fwd(params['b8'], b7, conv_fn)
    b9 = _sppf_fwd(params['b9'], b8, conv_fn)
    to_nchw = lambda t: jnp.transpose(t, (0, 3, 1, 2))
    return to_nchw(b4), to_nchw(b6), to_nchw(b9)


# ----------------------------------------------------------------------------
if __name__ == "__main__":
    # Small YOLOv5-style config: filters[0] is the input channel count.
    filters = [3, 8, 16, 32, 64, 64]
    depths = [1, 1, 1]

    key = jax.random.PRNGKey(0)
    k_params, k_x = jax.random.split(key)
    params = init_backbone(k_params, filters, depths)
    x = jax.random.normal(k_x, (2, filters[0], 64, 64), dtype=jnp.float32)

    fwd_pallas = jax.jit(lambda xx: backbone_forward(params, xx, conv_bn_silu_pallas))
    fwd_ref = jax.jit(lambda xx: backbone_forward(params, xx, conv_bn_silu_ref))

    out = jax.block_until_ready(fwd_pallas(x))
    ref = jax.block_until_ready(fwd_ref(x))

    expected_shapes = [(2, 32, 8, 8), (2, 64, 4, 4), (2, 64, 2, 2)]
    for o, r, es in zip(out, ref, expected_shapes):
        assert o.shape == es, (o.shape, es)
        max_err = float(jnp.max(jnp.abs(o - r)))
        assert jnp.allclose(o, r, atol=3e-3, rtol=3e-3), max_err

    print("KERNEL_OK")
</pallas_src>

<mosaic_0001>
module attributes {stable_mosaic.version = 11 : i64} {
  func.func @_gemm_bn_silu_kernel(%arg0: i32, %arg1: i32, %arg2: memref<512x112xbf16, #tpu.memory_space<vmem>>, %arg3: memref<112x128xbf16, #tpu.memory_space<vmem>>, %arg4: memref<1x128xf32, #tpu.memory_space<vmem>>, %arg5: memref<1x128xf32, #tpu.memory_space<vmem>>, %arg6: memref<512x128xf32, #tpu.memory_space<vmem>>) attributes {dimension_semantics = [#tpu.dimension_semantics<parallel>, #tpu.dimension_semantics<parallel>], iteration_bounds = array<i64: 4, 1>, scalar_prefetch = 0 : i64, scratch_operands = 0 : i64, tpu.core_type = #tpu.core_type<tc>, window_params = [{transform_indices = @transform_0, window_bounds = array<i64: 512, 112>}, {transform_indices = @transform_1, window_bounds = array<i64: 112, 128>}, {transform_indices = @transform_2, window_bounds = array<i64: 1, 128>}, {transform_indices = @transform_3, window_bounds = array<i64: 1, 128>}, {transform_indices = @transform_4, window_bounds = array<i64: 512, 128>}]} {
    %c0 = arith.constant 0 : index
    %c0_0 = arith.constant 0 : index
    %0 = vector.load %arg2[%c0, %c0_0] : memref<512x112xbf16, #tpu.memory_space<vmem>>, vector<512x112xbf16>
    %c0_1 = arith.constant 0 : index
    %c0_2 = arith.constant 0 : index
    %1 = vector.load %arg3[%c0_1, %c0_2] : memref<112x128xbf16, #tpu.memory_space<vmem>>, vector<112x128xbf16>
    %cst = arith.constant dense<0.000000e+00> : vector<512x128xf32>
    %2 = tpu.matmul %0, %1, %cst {dimension_numbers = #tpu.dot_dimension_numbers<[1], [0], [0], [1], [0, 0, 1, 1], [], []>} : vector<512x112xbf16>, vector<112x128xbf16>, vector<512x128xf32> -> vector<512x128xf32>
    %c0_3 = arith.constant 0 : index
    %c0_4 = arith.constant 0 : index
    %3 = vector.load %arg4[%c0_3, %c0_4] : memref<1x128xf32, #tpu.memory_space<vmem>>, vector<1x128xf32>
    %4 = vector.broadcast %3 : vector<1x128xf32> to vector<512x128xf32>
    %5 = arith.mulf %2, %4 : vector<512x128xf32>
    %c0_5 = arith.constant 0 : index
    %c0_6 = arith.constant 0 : index
    %6 = vector.load %arg5[%c0_5, %c0_6] : memref<1x128xf32, #tpu.memory_space<vmem>>, vector<1x128xf32>
    %7 = vector.broadcast %6 : vector<1x128xf32> to vector<512x128xf32>
    %8 = arith.addf %5, %7 : vector<512x128xf32>
    %9 = arith.negf %8 : vector<512x128xf32>
    %10 = math.exp %9 : vector<512x128xf32>
    %cst_7 = arith.constant 1.000000e+00 : f32
    %11 = vector.broadcast %cst_7 : f32 to vector<512x128xf32>
    %12 = arith.addf %11, %10 : vector<512x128xf32>
    %13 = arith.divf %11, %12 : vector<512x128xf32>
    %14 = arith.mulf %8, %13 : vector<512x128xf32>
    %c0_8 = arith.constant 0 : index
    %c0_9 = arith.constant 0 : index
    %15 = vector.load %arg6[%c0_8, %c0_9] : memref<512x128xf32, #tpu.memory_space<vmem>>, vector<512x128xf32>
    tpu.vector_store %arg6[%c0_8, %c0_9], %14 {strides = array<i32>} : memref<512x128xf32, #tpu.memory_space<vmem>>, vector<512x128xf32>,
    return
  }
  func.func @transform_0(%arg0: i32, %arg1: i32) -> (i32, i32) {
    %c0_i32 = arith.constant 0 : i32
    %c0_i32_0 = arith.constant 0 : i32
    return %arg0, %c0_i32 : i32, i32
  }
  func.func @transform_1(%arg0: i32, %arg1: i32) -> (i32, i32) {
    %c0_i32 = arith.constant 0 : i32
    %c0_i32_0 = arith.constant 0 : i32
    return %c0_i32, %arg1 : i32, i32
  }
  func.func @transform_2(%arg0: i32, %arg1: i32) -> (i32, i32) {
    %c0_i32 = arith.constant 0 : i32
    %c0_i32_0 = arith.constant 0 : i32
    return %c0_i32, %arg1 : i32, i32
  }
  func.func @transform_3(%arg0: i32, %arg1: i32) -> (i32, i32) {
    %c0_i32 = arith.constant 0 : i32
    %c0_i32_0 = arith.constant 0 : i32
    return %c0_i32, %arg1 : i32, i32
  }
  func.func @transform_4(%arg0: i32, %arg1: i32) -> (i32, i32) {
    %c0_i32 = arith.constant 0 : i32
    return %arg0, %arg1 : i32, i32
  }
}

module attributes {stable_mosaic.version = 11 : i64} {
  func.func @_gemm_bn_silu_kernel(%arg0: i32, %arg1: i32, %arg2: memref<512x72xbf16, #tpu.memory_space<vmem>>, %arg3: memref<72x128xbf16, #tpu.memory_space<vmem>>, %arg4: memref<1x128xf32, #tpu.memory_space<vmem>>, %arg5: memref<1x128xf32, #tpu.memory_space<vmem>>, %arg6: memref<512x128xf32, #tpu.memory_space<vmem>>) attributes {dimension_semantics = [#tpu.dimension_semantics<parallel>, #tpu.dimension_semantics<parallel>], iteration_bounds = array<i64: 1, 1>, scalar_prefetch = 0 : i64, scratch_operands = 0 : i64, tpu.core_type = #tpu.core_type<tc>, window_params = [{transform_indices = @transform_0, window_bounds = array<i64: 512, 72>}, {transform_indices = @transform_1, window_bounds = array<i64: 72, 128>}, {transform_indices = @transform_2, window_bounds = array<i64: 1, 128>}, {transform_indices = @transform_3, window_bounds = array<i64: 1, 128>}, {transform_indices = @transform_4, window_bounds = array<i64: 512, 128>}]} {
    %c0 = arith.constant 0 : index
    %c0_0 = arith.constant 0 : index
    %0 = vector.load %arg2[%c0, %c0_0] : memref<512x72xbf16, #tpu.memory_space<vmem>>, vector<512x72xbf16>
    %c0_1 = arith.constant 0 : index
    %c0_2 = arith.constant 0 : index
    %1 = vector.load %arg3[%c0_1, %c0_2] : memref<72x128xbf16, #tpu.memory_space<vmem>>, vector<72x128xbf16>
    %cst = arith.constant dense<0.000000e+00> : vector<512x128xf32>
    %2 = tpu.matmul %0, %1, %cst {dimension_numbers = #tpu.dot_dimension_numbers<[1], [0], [0], [1], [0, 0, 1, 1], [], []>} : vector<512x72xbf16>, vector<72x128xbf16>, vector<512x128xf32> -> vector<512x128xf32>
    %c0_3 = arith.constant 0 : index
    %c0_4 = arith.constant 0 : index
    %3 = vector.load %arg4[%c0_3, %c0_4] : memref<1x128xf32, #tpu.memory_space<vmem>>, vector<1x128xf32>
    %4 = vector.broadcast %3 : vector<1x128xf32> to vector<512x128xf32>
    %5 = arith.mulf %2, %4 : vector<512x128xf32>
    %c0_5 = arith.constant 0 : index
    %c0_6 = arith.constant 0 : index
    %6 = vector.load %arg5[%c0_5, %c0_6] : memref<1x128xf32, #tpu.memory_space<vmem>>, vector<1x128xf32>
    %7 = vector.broadcast %6 : vector<1x128xf32> to vector<512x128xf32>
    %8 = arith.addf %5, %7 : vector<512x128xf32>
    %9 = arith.negf %8 : vector<512x128xf32>
    %10 = math.exp %9 : vector<512x128xf32>
    %cst_7 = arith.constant 1.000000e+00 : f32
    %11 = vector.broadcast %cst_7 : f32 to vector<512x128xf32>
    %12 = arith.addf %11, %10 : vector<512x128xf32>
    %13 = arith.divf %11, %12 : vector<512x128xf32>
    %14 = arith.mulf %8, %13 : vector<512x128xf32>
    %c0_8 = arith.constant 0 : index
    %c0_9 = arith.constant 0 : index
    %15 = vector.load %arg6[%c0_8, %c0_9] : memref<512x128xf32, #tpu.memory_space<vmem>>, vector<512x128xf32>
    tpu.vector_store %arg6[%c0_8, %c0_9], %14 {strides = array<i32>} : memref<512x128xf32, #tpu.memory_space<vmem>>, vector<512x128xf32>,
    return
  }
  func.func @transform_0(%arg0: i32, %arg1: i32) -> (i32, i32) {
    %c0_i32 = arith.constant 0 : i32
    %c0_i32_0 = arith.constant 0 : i32
    return %arg0, %c0_i32 : i32, i32
  }
  func.func @transform_1(%arg0: i32, %arg1: i32) -> (i32, i32) {
    %c0_i32 = arith.constant 0 : i32
    %c0_i32_0 = arith.constant 0 : i32
    return %c0_i32, %arg1 : i32, i32
  }
  func.func @transform_2(%arg0: i32, %arg1: i32) -> (i32, i32) {
    %c0_i32 = arith.constant 0 : i32
    %c0_i32_0 = arith.constant 0 : i32
    return %c0_i32, %arg1 : i32, i32
  }
  func.func @transform_3(%arg0: i32, %arg1: i32) -> (i32, i32) {
    %c0_i32 = arith.constant 0 : i32
    %c0_i32_0 = arith.constant 0 : i32
    return %c0_i32, %arg1 : i32, i32
  }
  func.func @transform_4(%arg0: i32, %arg1: i32) -> (i32, i32) {
    %c0_i32 = arith.constant 0 : i32
    return %arg0, %arg1 : i32, i32
  }
}

module attributes {stable_mosaic.version = 11 : i64} {
  func.func @_gemm_bn_silu_kernel(%arg0: i32, %arg1: i32, %arg2: memref<512x16xbf16, #tpu.memory_space<vmem>>, %arg3: memref<16x128xbf16, #tpu.memory_space<vmem>>, %arg4: memref<1x128xf32, #tpu.memory_space<vmem>>, %arg5: memref<1x128xf32, #tpu.memory_space<vmem>>, %arg6: memref<512x128xf32, #tpu.memory_space<vmem>>) attributes {dimension_semantics = [#tpu.dimension_semantics<parallel>, #tpu.dimension_semantics<parallel>], iteration_bounds = array<i64: 1, 1>, scalar_prefetch = 0 : i64, scratch_operands = 0 : i64, tpu.core_type = #tpu.core_type<tc>, window_params = [{transform_indices = @transform_0, window_bounds = array<i64: 512, 16>}, {transform_indices = @transform_1, window_bounds = array<i64: 16, 128>}, {transform_indices = @transform_2, window_bounds = array<i64: 1, 128>}, {transform_indices = @transform_3, window_bounds = array<i64: 1, 128>}, {transform_indices = @transform_4, window_bounds = array<i64: 512, 128>}]} {
    %c0 = arith.constant 0 : index
    %c0_0 = arith.constant 0 : index
    %0 = vector.load %arg2[%c0, %c0_0] : memref<512x16xbf16, #tpu.memory_space<vmem>>, vector<512x16xbf16>
    %c0_1 = arith.constant 0 : index
    %c0_2 = arith.constant 0 : index
    %1 = vector.load %arg3[%c0_1, %c0_2] : memref<16x128xbf16, #tpu.memory_space<vmem>>, vector<16x128xbf16>
    %cst = arith.constant dense<0.000000e+00> : vector<512x128xf32>
    %2 = tpu.matmul %0, %1, %cst {dimension_numbers = #tpu.dot_dimension_numbers<[1], [0], [0], [1], [0, 0, 1, 1], [], []>} : vector<512x16xbf16>, vector<16x128xbf16>, vector<512x128xf32> -> vector<512x128xf32>
    %c0_3 = arith.constant 0 : index
    %c0_4 = arith.constant 0 : index
    %3 = vector.load %arg4[%c0_3, %c0_4] : memref<1x128xf32, #tpu.memory_space<vmem>>, vector<1x128xf32>
    %4 = vector.broadcast %3 : vector<1x128xf32> to vector<512x128xf32>
    %5 = arith.mulf %2, %4 : vector<512x128xf32>
    %c0_5 = arith.constant 0 : index
    %c0_6 = arith.constant 0 : index
    %6 = vector.load %arg5[%c0_5, %c0_6] : memref<1x128xf32, #tpu.memory_space<vmem>>, vector<1x128xf32>
    %7 = vector.broadcast %6 : vector<1x128xf32> to vector<512x128xf32>
    %8 = arith.addf %5, %7 : vector<512x128xf32>
    %9 = arith.negf %8 : vector<512x128xf32>
    %10 = math.exp %9 : vector<512x128xf32>
    %cst_7 = arith.constant 1.000000e+00 : f32
    %11 = vector.broadcast %cst_7 : f32 to vector<512x128xf32>
    %12 = arith.addf %11, %10 : vector<512x128xf32>
    %13 = arith.divf %11, %12 : vector<512x128xf32>
    %14 = arith.mulf %8, %13 : vector<512x128xf32>
    %c0_8 = arith.constant 0 : index
    %c0_9 = arith.constant 0 : index
    %15 = vector.load %arg6[%c0_8, %c0_9] : memref<512x128xf32, #tpu.memory_space<vmem>>, vector<512x128xf32>
    tpu.vector_store %arg6[%c0_8, %c0_9], %14 {strides = array<i32>} : memref<512x128xf32, #tpu.memory_space<vmem>>, vector<512x128xf32>,
    return
  }
  func.func @transform_0(%arg0: i32, %arg1: i32) -> (i32, i32) {
    %c0_i32 = arith.constant 0 : i32
    %c0_i32_0 = arith.constant 0 : i32
    return %arg0, %c0_i32 : i32, i32
  }
  func.func @transform_1(%arg0: i32, %arg1: i32) -> (i32, i32) {
    %c0_i32 = arith.constant 0 : i32
    %c0_i32_0 = arith.constant 0 : i32
    return %c0_i32, %arg1 : i32, i32
  }
  func.func @transform_2(%arg0: i32, %arg1: i32) -> (i32, i32) {
    %c0_i32 = arith.constant 0 : i32
    %c0_i32_0 = arith.constant 0 : i32
    return %c0_i32, %arg1 : i32, i32
  }
  func.func @transform_3(%arg0: i32, %arg1: i32) -> (i32, i32) {
    %c0_i32 = arith.constant 0 : i32
    %c0_i32_0 = arith.constant 0 : i32
    return %c0_i32, %arg1 : i32, i32
  }
  func.func @transform_4(%arg0: i32, %arg1: i32) -> (i32, i32) {
    %c0_i32 = arith.constant 0 : i32
    return %arg0, %arg1 : i32, i32
  }
}

module attributes {stable_mosaic.version = 11 : i64} {
  func.func @_gemm_bn_silu_kernel(%arg0: i32, %arg1: i32, %arg2: memref<512x8xbf16, #tpu.memory_space<vmem>>, %arg3: memref<8x128xbf16, #tpu.memory_space<vmem>>, %arg4: memref<1x128xf32, #tpu.memory_space<vmem>>, %arg5: memref<1x128xf32, #tpu.memory_space<vmem>>, %arg6: memref<512x128xf32, #tpu.memory_space<vmem>>) attributes {dimension_semantics = [#tpu.dimension_semantics<parallel>, #tpu.dimension_semantics<parallel>], iteration_bounds = array<i64: 1, 1>, scalar_prefetch = 0 : i64, scratch_operands = 0 : i64, tpu.core_type = #tpu.core_type<tc>, window_params = [{transform_indices = @transform_0, window_bounds = array<i64: 512, 8>}, {transform_indices = @transform_1, window_bounds = array<i64: 8, 128>}, {transform_indices = @transform_2, window_bounds = array<i64: 1, 128>}, {transform_indices = @transform_3, window_bounds = array<i64: 1, 128>}, {transform_indices = @transform_4, window_bounds = array<i64: 512, 128>}]} {
    %c0 = arith.constant 0 : index
    %c0_0 = arith.constant 0 : index
    %0 = vector.load %arg2[%c0, %c0_0] : memref<512x8xbf16, #tpu.memory_space<vmem>>, vector<512x8xbf16>
    %c0_1 = arith.constant 0 : index
    %c0_2 = arith.constant 0 : index
    %1 = vector.load %arg3[%c0_1, %c0_2] : memref<8x128xbf16, #tpu.memory_space<vmem>>, vector<8x128xbf16>
    %cst = arith.constant dense<0.000000e+00> : vector<512x128xf32>
    %2 = tpu.matmul %0, %1, %cst {dimension_numbers = #tpu.dot_dimension_numbers<[1], [0], [0], [1], [0, 0, 1, 1], [], []>} : vector<512x8xbf16>, vector<8x128xbf16>, vector<512x128xf32> -> vector<512x128xf32>
    %c0_3 = arith.constant 0 : index
    %c0_4 = arith.constant 0 : index
    %3 = vector.load %arg4[%c0_3, %c0_4] : memref<1x128xf32, #tpu.memory_space<vmem>>, vector<1x128xf32>
    %4 = vector.broadcast %3 : vector<1x128xf32> to vector<512x128xf32>
    %5 = arith.mulf %2, %4 : vector<512x128xf32>
    %c0_5 = arith.constant 0 : index
    %c0_6 = arith.constant 0 : index
    %6 = vector.load %arg5[%c0_5, %c0_6] : memref<1x128xf32, #tpu.memory_space<vmem>>, vector<1x128xf32>
    %7 = vector.broadcast %6 : vector<1x128xf32> to vector<512x128xf32>
    %8 = arith.addf %5, %7 : vector<512x128xf32>
    %9 = arith.negf %8 : vector<512x128xf32>
    %10 = math.exp %9 : vector<512x128xf32>
    %cst_7 = arith.constant 1.000000e+00 : f32
    %11 = vector.broadcast %cst_7 : f32 to vector<512x128xf32>
    %12 = arith.addf %11, %10 : vector<512x128xf32>
    %13 = arith.divf %11, %12 : vector<512x128xf32>
    %14 = arith.mulf %8, %13 : vector<512x128xf32>
    %c0_8 = arith.constant 0 : index
    %c0_9 = arith.constant 0 : index
    %15 = vector.load %arg6[%c0_8, %c0_9] : memref<512x128xf32, #tpu.memory_space<vmem>>, vector<512x128xf32>
    tpu.vector_store %arg6[%c0_8, %c0_9], %14 {strides = array<i32>} : memref<512x128xf32, #tpu.memory_space<vmem>>, vector<512x128xf32>,
    return
  }
  func.func @transform_0(%arg0: i32, %arg1: i32) -> (i32, i32) {
    %c0_i32 = arith.constant 0 : i32
    %c0_i32_0 = arith.constant 0 : i32
    return %arg0, %c0_i32 : i32, i32
  }
  func.func @transform_1(%arg0: i32, %arg1: i32) -> (i32, i32) {
    %c0_i32 = arith.constant 0 : i32
    %c0_i32_0 = arith.constant 0 : i32
    return %c0_i32, %arg1 : i32, i32
  }
  func.func @transform_2(%arg0: i32, %arg1: i32) -> (i32, i32) {
    %c0_i32 = arith.constant 0 : i32
    %c0_i32_0 = arith.constant 0 : i32
    return %c0_i32, %arg1 : i32, i32
  }
  func.func @transform_3(%arg0: i32, %arg1: i32) -> (i32, i32) {
    %c0_i32 = arith.constant 0 : i32
    %c0_i32_0 = arith.constant 0 : i32
    return %c0_i32, %arg1 : i32, i32
  }
  func.func @transform_4(%arg0: i32, %arg1: i32) -> (i32, i32) {
    %c0_i32 = arith.constant 0 : i32
    return %arg0, %arg1 : i32, i32
  }
}

module attributes {stable_mosaic.version = 11 : i64} {
  func.func @_gemm_bn_silu_kernel(%arg0: i32, %arg1: i32, %arg2: memref<128x32xbf16, #tpu.memory_space<vmem>>, %arg3: memref<32x128xbf16, #tpu.memory_space<vmem>>, %arg4: memref<1x128xf32, #tpu.memory_space<vmem>>, %arg5: memref<1x128xf32, #tpu.memory_space<vmem>>, %arg6: memref<128x128xf32, #tpu.memory_space<vmem>>) attributes {dimension_semantics = [#tpu.dimension_semantics<parallel>, #tpu.dimension_semantics<parallel>], iteration_bounds = array<i64: 1, 1>, scalar_prefetch = 0 : i64, scratch_operands = 0 : i64, tpu.core_type = #tpu.core_type<tc>, window_params = [{transform_indices = @transform_0, window_bounds = array<i64: 128, 32>}, {transform_indices = @transform_1, window_bounds = array<i64: 32, 128>}, {transform_indices = @transform_2, window_bounds = array<i64: 1, 128>}, {transform_indices = @transform_3, window_bounds = array<i64: 1, 128>}, {transform_indices = @transform_4, window_bounds = array<i64: 128, 128>}]} {
    %c0 = arith.constant 0 : index
    %c0_0 = arith.constant 0 : index
    %0 = vector.load %arg2[%c0, %c0_0] : memref<128x32xbf16, #tpu.memory_space<vmem>>, vector<128x32xbf16>
    %c0_1 = arith.constant 0 : index
    %c0_2 = arith.constant 0 : index
    %1 = vector.load %arg3[%c0_1, %c0_2] : memref<32x128xbf16, #tpu.memory_space<vmem>>, vector<32x128xbf16>
    %cst = arith.constant dense<0.000000e+00> : vector<128x128xf32>
    %2 = tpu.matmul %0, %1, %cst {dimension_numbers = #tpu.dot_dimension_numbers<[1], [0], [0], [1], [0, 0, 1, 1], [], []>} : vector<128x32xbf16>, vector<32x128xbf16>, vector<128x128xf32> -> vector<128x128xf32>
    %c0_3 = arith.constant 0 : index
    %c0_4 = arith.constant 0 : index
    %3 = vector.load %arg4[%c0_3, %c0_4] : memref<1x128xf32, #tpu.memory_space<vmem>>, vector<1x128xf32>
    %4 = vector.broadcast %3 : vector<1x128xf32> to vector<128x128xf32>
    %5 = arith.mulf %2, %4 : vector<128x128xf32>
    %c0_5 = arith.constant 0 : index
    %c0_6 = arith.constant 0 : index
    %6 = vector.load %arg5[%c0_5, %c0_6] : memref<1x128xf32, #tpu.memory_space<vmem>>, vector<1x128xf32>
    %7 = vector.broadcast %6 : vector<1x128xf32> to vector<128x128xf32>
    %8 = arith.addf %5, %7 : vector<128x128xf32>
    %9 = arith.negf %8 : vector<128x128xf32>
    %10 = math.exp %9 : vector<128x128xf32>
    %cst_7 = arith.constant 1.000000e+00 : f32
    %11 = vector.broadcast %cst_7 : f32 to vector<128x128xf32>
    %12 = arith.addf %11, %10 : vector<128x128xf32>
    %13 = arith.divf %11, %12 : vector<128x128xf32>
    %14 = arith.mulf %8, %13 : vector<128x128xf32>
    %c0_8 = arith.constant 0 : index
    %c0_9 = arith.constant 0 : index
    %15 = vector.load %arg6[%c0_8, %c0_9] : memref<128x128xf32, #tpu.memory_space<vmem>>, vector<128x128xf32>
    tpu.vector_store %arg6[%c0_8, %c0_9], %14 {strides = array<i32>} : memref<128x128xf32, #tpu.memory_space<vmem>>, vector<128x128xf32>,
    return
  }
  func.func @transform_0(%arg0: i32, %arg1: i32) -> (i32, i32) {
    %c0_i32 = arith.constant 0 : i32
    %c0_i32_0 = arith.constant 0 : i32
    return %arg0, %c0_i32 : i32, i32
  }
  func.func @transform_1(%arg0: i32, %arg1: i32) -> (i32, i32) {
    %c0_i32 = arith.constant 0 : i32
    %c0_i32_0 = arith.constant 0 : i32
    return %c0_i32, %arg1 : i32, i32
  }
  func.func @transform_2(%arg0: i32, %arg1: i32) -> (i32, i32) {
    %c0_i32 = arith.constant 0 : i32
    %c0_i32_0 = arith.constant 0 : i32
    return %c0_i32, %arg1 : i32, i32
  }
  func.func @transform_3(%arg0: i32, %arg1: i32) -> (i32, i32) {
    %c0_i32 = arith.constant 0 : i32
    %c0_i32_0 = arith.constant 0 : i32
    return %c0_i32, %arg1 : i32, i32
  }
  func.func @transform_4(%arg0: i32, %arg1: i32) -> (i32, i32) {
    %c0_i32 = arith.constant 0 : i32
    return %arg0, %arg1 : i32, i32
  }
}

module attributes {stable_mosaic.version = 11 : i64} {
  func.func @_gemm_bn_silu_kernel(%arg0: i32, %arg1: i32, %arg2: memref<128x144xbf16, #tpu.memory_space<vmem>>, %arg3: memref<144x128xbf16, #tpu.memory_space<vmem>>, %arg4: memref<1x128xf32, #tpu.memory_space<vmem>>, %arg5: memref<1x128xf32, #tpu.memory_space<vmem>>, %arg6: memref<128x128xf32, #tpu.memory_space<vmem>>) attributes {dimension_semantics = [#tpu.dimension_semantics<parallel>, #tpu.dimension_semantics<parallel>], iteration_bounds = array<i64: 1, 1>, scalar_prefetch = 0 : i64, scratch_operands = 0 : i64, tpu.core_type = #tpu.core_type<tc>, window_params = [{transform_indices = @transform_0, window_bounds = array<i64: 128, 144>}, {transform_indices = @transform_1, window_bounds = array<i64: 144, 128>}, {transform_indices = @transform_2, window_bounds = array<i64: 1, 128>}, {transform_indices = @transform_3, window_bounds = array<i64: 1, 128>}, {transform_indices = @transform_4, window_bounds = array<i64: 128, 128>}]} {
    %c0 = arith.constant 0 : index
    %c0_0 = arith.constant 0 : index
    %0 = vector.load %arg2[%c0, %c0_0] : memref<128x144xbf16, #tpu.memory_space<vmem>>, vector<128x144xbf16>
    %c0_1 = arith.constant 0 : index
    %c0_2 = arith.constant 0 : index
    %1 = vector.load %arg3[%c0_1, %c0_2] : memref<144x128xbf16, #tpu.memory_space<vmem>>, vector<144x128xbf16>
    %cst = arith.constant dense<0.000000e+00> : vector<128x128xf32>
    %2 = tpu.matmul %0, %1, %cst {dimension_numbers = #tpu.dot_dimension_numbers<[1], [0], [0], [1], [0, 0, 1, 1], [], []>} : vector<128x144xbf16>, vector<144x128xbf16>, vector<128x128xf32> -> vector<128x128xf32>
    %c0_3 = arith.constant 0 : index
    %c0_4 = arith.constant 0 : index
    %3 = vector.load %arg4[%c0_3, %c0_4] : memref<1x128xf32, #tpu.memory_space<vmem>>, vector<1x128xf32>
    %4 = vector.broadcast %3 : vector<1x128xf32> to vector<128x128xf32>
    %5 = arith.mulf %2, %4 : vector<128x128xf32>
    %c0_5 = arith.constant 0 : index
    %c0_6 = arith.constant 0 : index
    %6 = vector.load %arg5[%c0_5, %c0_6] : memref<1x128xf32, #tpu.memory_space<vmem>>, vector<1x128xf32>
    %7 = vector.broadcast %6 : vector<1x128xf32> to vector<128x128xf32>
    %8 = arith.addf %5, %7 : vector<128x128xf32>
    %9 = arith.negf %8 : vector<128x128xf32>
    %10 = math.exp %9 : vector<128x128xf32>
    %cst_7 = arith.constant 1.000000e+00 : f32
    %11 = vector.broadcast %cst_7 : f32 to vector<128x128xf32>
    %12 = arith.addf %11, %10 : vector<128x128xf32>
    %13 = arith.divf %11, %12 : vector<128x128xf32>
    %14 = arith.mulf %8, %13 : vector<128x128xf32>
    %c0_8 = arith.constant 0 : index
    %c0_9 = arith.constant 0 : index
    %15 = vector.load %arg6[%c0_8, %c0_9] : memref<128x128xf32, #tpu.memory_space<vmem>>, vector<128x128xf32>
    tpu.vector_store %arg6[%c0_8, %c0_9], %14 {strides = array<i32>} : memref<128x128xf32, #tpu.memory_space<vmem>>, vector<128x128xf32>,
    return
  }
  func.func @transform_0(%arg0: i32, %arg1: i32) -> (i32, i32) {
    %c0_i32 = arith.constant 0 : i32
    %c0_i32_0 = arith.constant 0 : i32
    return %arg0, %c0_i32 : i32, i32
  }
  func.func @transform_1(%arg0: i32, %arg1: i32) -> (i32, i32) {
    %c0_i32 = arith.constant 0 : i32
    %c0_i32_0 = arith.constant 0 : i32
    return %c0_i32, %arg1 : i32, i32
  }
  func.func @transform_2(%arg0: i32, %arg1: i32) -> (i32, i32) {
    %c0_i32 = arith.constant 0 : i32
    %c0_i32_0 = arith.constant 0 : i32
    return %c0_i32, %arg1 : i32, i32
  }
  func.func @transform_3(%arg0: i32, %arg1: i32) -> (i32, i32) {
    %c0_i32 = arith.constant 0 : i32
    %c0_i32_0 = arith.constant 0 : i32
    return %c0_i32, %arg1 : i32, i32
  }
  func.func @transform_4(%arg0: i32, %arg1: i32) -> (i32, i32) {
    %c0_i32 = arith.constant 0 : i32
    return %arg0, %arg1 : i32, i32
  }
}

module attributes {stable_mosaic.version = 11 : i64} {
  func.func @_gemm_bn_silu_kernel(%arg0: i32, %arg1: i32, %arg2: memref<128x16xbf16, #tpu.memory_space<vmem>>, %arg3: memref<16x128xbf16, #tpu.memory_space<vmem>>, %arg4: memref<1x128xf32, #tpu.memory_space<vmem>>, %arg5: memref<1x128xf32, #tpu.memory_space<vmem>>, %arg6: memref<128x128xf32, #tpu.memory_space<vmem>>) attributes {dimension_semantics = [#tpu.dimension_semantics<parallel>, #tpu.dimension_semantics<parallel>], iteration_bounds = array<i64: 1, 1>, scalar_prefetch = 0 : i64, scratch_operands = 0 : i64, tpu.core_type = #tpu.core_type<tc>, window_params = [{transform_indices = @transform_0, window_bounds = array<i64: 128, 16>}, {transform_indices = @transform_1, window_bounds = array<i64: 16, 128>}, {transform_indices = @transform_2, window_bounds = array<i64: 1, 128>}, {transform_indices = @transform_3, window_bounds = array<i64: 1, 128>}, {transform_indices = @transform_4, window_bounds = array<i64: 128, 128>}]} {
    %c0 = arith.constant 0 : index
    %c0_0 = arith.constant 0 : index
    %0 = vector.load %arg2[%c0, %c0_0] : memref<128x16xbf16, #tpu.memory_space<vmem>>, vector<128x16xbf16>
    %c0_1 = arith.constant 0 : index
    %c0_2 = arith.constant 0 : index
    %1 = vector.load %arg3[%c0_1, %c0_2] : memref<16x128xbf16, #tpu.memory_space<vmem>>, vector<16x128xbf16>
    %cst = arith.constant dense<0.000000e+00> : vector<128x128xf32>
    %2 = tpu.matmul %0, %1, %cst {dimension_numbers = #tpu.dot_dimension_numbers<[1], [0], [0], [1], [0, 0, 1, 1], [], []>} : vector<128x16xbf16>, vector<16x128xbf16>, vector<128x128xf32> -> vector<128x128xf32>
    %c0_3 = arith.constant 0 : index
    %c0_4 = arith.constant 0 : index
    %3 = vector.load %arg4[%c0_3, %c0_4] : memref<1x128xf32, #tpu.memory_space<vmem>>, vector<1x128xf32>
    %4 = vector.broadcast %3 : vector<1x128xf32> to vector<128x128xf32>
    %5 = arith.mulf %2, %4 : vector<128x128xf32>
    %c0_5 = arith.constant 0 : index
    %c0_6 = arith.constant 0 : index
    %6 = vector.load %arg5[%c0_5, %c0_6] : memref<1x128xf32, #tpu.memory_space<vmem>>, vector<1x128xf32>
    %7 = vector.broadcast %6 : vector<1x128xf32> to vector<128x128xf32>
    %8 = arith.addf %5, %7 : vector<128x128xf32>
    %9 = arith.negf %8 : vector<128x128xf32>
    %10 = math.exp %9 : vector<128x128xf32>
    %cst_7 = arith.constant 1.000000e+00 : f32
    %11 = vector.broadcast %cst_7 : f32 to vector<128x128xf32>
    %12 = arith.addf %11, %10 : vector<128x128xf32>
    %13 = arith.divf %11, %12 : vector<128x128xf32>
    %14 = arith.mulf %8, %13 : vector<128x128xf32>
    %c0_8 = arith.constant 0 : index
    %c0_9 = arith.constant 0 : index
    %15 = vector.load %arg6[%c0_8, %c0_9] : memref<128x128xf32, #tpu.memory_space<vmem>>, vector<128x128xf32>
    tpu.vector_store %arg6[%c0_8, %c0_9], %14 {strides = array<i32>} : memref<128x128xf32, #tpu.memory_space<vmem>>, vector<128x128xf32>,
    return
  }
  func.func @transform_0(%arg0: i32, %arg1: i32) -> (i32, i32) {
    %c0_i32 = arith.constant 0 : i32
    %c0_i32_0 = arith.constant 0 : i32
    return %arg0, %c0_i32 : i32, i32
  }
  func.func @transform_1(%arg0: i32, %arg1: i32) -> (i32, i32) {
    %c0_i32 = arith.constant 0 : i32
    %c0_i32_0 = arith.constant 0 : i32
    return %c0_i32, %arg1 : i32, i32
  }
  func.func @transform_2(%arg0: i32, %arg1: i32) -> (i32, i32) {
    %c0_i32 = arith.constant 0 : i32
    %c0_i32_0 = arith.constant 0 : i32
    return %c0_i32, %arg1 : i32, i32
  }
  func.func @transform_3(%arg0: i32, %arg1: i32) -> (i32, i32) {
    %c0_i32 = arith.constant 0 : i32
    %c0_i32_0 = arith.constant 0 : i32
    return %c0_i32, %arg1 : i32, i32
  }
  func.func @transform_4(%arg0: i32, %arg1: i32) -> (i32, i32) {
    %c0_i32 = arith.constant 0 : i32
    return %arg0, %arg1 : i32, i32
  }
}

module attributes {stable_mosaic.version = 11 : i64} {
  func.func @_gemm_bn_silu_kernel(%arg0: i32, %arg1: i32, %arg2: memref<128x32xbf16, #tpu.memory_space<vmem>>, %arg3: memref<32x128xbf16, #tpu.memory_space<vmem>>, %arg4: memref<1x128xf32, #tpu.memory_space<vmem>>, %arg5: memref<1x128xf32, #tpu.memory_space<vmem>>, %arg6: memref<128x128xf32, #tpu.memory_space<vmem>>) attributes {dimension_semantics = [#tpu.dimension_semantics<parallel>, #tpu.dimension_semantics<parallel>], iteration_bounds = array<i64: 1, 1>, scalar_prefetch = 0 : i64, scratch_operands = 0 : i64, tpu.core_type = #tpu.core_type<tc>, window_params = [{transform_indices = @transform_0, window_bounds = array<i64: 128, 32>}, {transform_indices = @transform_1, window_bounds = array<i64: 32, 128>}, {transform_indices = @transform_2, window_bounds = array<i64: 1, 128>}, {transform_indices = @transform_3, window_bounds = array<i64: 1, 128>}, {transform_indices = @transform_4, window_bounds = array<i64: 128, 128>}]} {
    %c0 = arith.constant 0 : index
    %c0_0 = arith.constant 0 : index
    %0 = vector.load %arg2[%c0, %c0_0] : memref<128x32xbf16, #tpu.memory_space<vmem>>, vector<128x32xbf16>
    %c0_1 = arith.constant 0 : index
    %c0_2 = arith.constant 0 : index
    %1 = vector.load %arg3[%c0_1, %c0_2] : memref<32x128xbf16, #tpu.memory_space<vmem>>, vector<32x128xbf16>
    %cst = arith.constant dense<0.000000e+00> : vector<128x128xf32>
    %2 = tpu.matmul %0, %1, %cst {dimension_numbers = #tpu.dot_dimension_numbers<[1], [0], [0], [1], [0, 0, 1, 1], [], []>} : vector<128x32xbf16>, vector<32x128xbf16>, vector<128x128xf32> -> vector<128x128xf32>
    %c0_3 = arith.constant 0 : index
    %c0_4 = arith.constant 0 : index
    %3 = vector.load %arg4[%c0_3, %c0_4] : memref<1x128xf32, #tpu.memory_space<vmem>>, vector<1x128xf32>
    %4 = vector.broadcast %3 : vector<1x128xf32> to vector<128x128xf32>
    %5 = arith.mulf %2, %4 : vector<128x128xf32>
    %c0_5 = arith.constant 0 : index
    %c0_6 = arith.constant 0 : index
    %6 = vector.load %arg5[%c0_5, %c0_6] : memref<1x128xf32, #tpu.memory_space<vmem>>, vector<1x128xf32>
    %7 = vector.broadcast %6 : vector<1x128xf32> to vector<128x128xf32>
    %8 = arith.addf %5, %7 : vector<128x128xf32>
    %9 = arith.negf %8 : vector<128x128xf32>
    %10 = math.exp %9 : vector<128x128xf32>
    %cst_7 = arith.constant 1.000000e+00 : f32
    %11 = vector.broadcast %cst_7 : f32 to vector<128x128xf32>
    %12 = arith.addf %11, %10 : vector<128x128xf32>
    %13 = arith.divf %11, %12 : vector<128x128xf32>
    %14 = arith.mulf %8, %13 : vector<128x128xf32>
    %c0_8 = arith.constant 0 : index
    %c0_9 = arith.constant 0 : index
    %15 = vector.load %arg6[%c0_8, %c0_9] : memref<128x128xf32, #tpu.memory_space<vmem>>, vector<128x128xf32>
    tpu.vector_store %arg6[%c0_8, %c0_9], %14 {strides = array<i32>} : memref<128x128xf32, #tpu.memory_space<vmem>>, vector<128x128xf32>,
    return
  }
  func.func @transform_0(%arg0: i32, %arg1: i32) -> (i32, i32) {
    %c0_i32 = arith.constant 0 : i32
    %c0_i32_0 = arith.constant 0 : i32
    return %arg0, %c0_i32 : i32, i32
  }
  func.func @transform_1(%arg0: i32, %arg1: i32) -> (i32, i32) {
    %c0_i32 = arith.constant 0 : i32
    %c0_i32_0 = arith.constant 0 : i32
    return %c0_i32, %arg1 : i32, i32
  }
  func.func @transform_2(%arg0: i32, %arg1: i32) -> (i32, i32) {
    %c0_i32 = arith.constant 0 : i32
    %c0_i32_0 = arith.constant 0 : i32
    return %c0_i32, %arg1 : i32, i32
  }
  func.func @transform_3(%arg0: i32, %arg1: i32) -> (i32, i32) {
    %c0_i32 = arith.constant 0 : i32
    %c0_i32_0 = arith.constant 0 : i32
    return %c0_i32, %arg1 : i32, i32
  }
  func.func @transform_4(%arg0: i32, %arg1: i32) -> (i32, i32) {
    %c0_i32 = arith.constant 0 : i32
    return %arg0, %arg1 : i32, i32
  }
}

module attributes {stable_mosaic.version = 11 : i64} {
  func.func @_gemm_bn_silu_kernel(%arg0: i32, %arg1: i32, %arg2: memref<32x288xbf16, #tpu.memory_space<vmem>>, %arg3: memref<288x128xbf16, #tpu.memory_space<vmem>>, %arg4: memref<1x128xf32, #tpu.memory_space<vmem>>, %arg5: memref<1x128xf32, #tpu.memory_space<vmem>>, %arg6: memref<32x128xf32, #tpu.memory_space<vmem>>) attributes {dimension_semantics = [#tpu.dimension_semantics<parallel>, #tpu.dimension_semantics<parallel>], iteration_bounds = array<i64: 1, 1>, scalar_prefetch = 0 : i64, scratch_operands = 0 : i64, tpu.core_type = #tpu.core_type<tc>, window_params = [{transform_indices = @transform_0, window_bounds = array<i64: 32, 288>}, {transform_indices = @transform_1, window_bounds = array<i64: 288, 128>}, {transform_indices = @transform_2, window_bounds = array<i64: 1, 128>}, {transform_indices = @transform_3, window_bounds = array<i64: 1, 128>}, {transform_indices = @transform_4, window_bounds = array<i64: 32, 128>}]} {
    %c0 = arith.constant 0 : index
    %c0_0 = arith.constant 0 : index
    %0 = vector.load %arg2[%c0, %c0_0] : memref<32x288xbf16, #tpu.memory_space<vmem>>, vector<32x288xbf16>
    %c0_1 = arith.constant 0 : index
    %c0_2 = arith.constant 0 : index
    %1 = vector.load %arg3[%c0_1, %c0_2] : memref<288x128xbf16, #tpu.memory_space<vmem>>, vector<288x128xbf16>
    %cst = arith.constant dense<0.000000e+00> : vector<32x128xf32>
    %2 = tpu.matmul %0, %1, %cst {dimension_numbers = #tpu.dot_dimension_numbers<[1], [0], [0], [1], [0, 0, 1, 1], [], []>} : vector<32x288xbf16>, vector<288x128xbf16>, vector<32x128xf32> -> vector<32x128xf32>
    %c0_3 = arith.constant 0 : index
    %c0_4 = arith.constant 0 : index
    %3 = vector.load %arg4[%c0_3, %c0_4] : memref<1x128xf32, #tpu.memory_space<vmem>>, vector<1x128xf32>
    %4 = vector.broadcast %3 : vector<1x128xf32> to vector<32x128xf32>
    %5 = arith.mulf %2, %4 : vector<32x128xf32>
    %c0_5 = arith.constant 0 : index
    %c0_6 = arith.constant 0 : index
    %6 = vector.load %arg5[%c0_5, %c0_6] : memref<1x128xf32, #tpu.memory_space<vmem>>, vector<1x128xf32>
    %7 = vector.broadcast %6 : vector<1x128xf32> to vector<32x128xf32>
    %8 = arith.addf %5, %7 : vector<32x128xf32>
    %9 = arith.negf %8 : vector<32x128xf32>
    %10 = math.exp %9 : vector<32x128xf32>
    %cst_7 = arith.constant 1.000000e+00 : f32
    %11 = vector.broadcast %cst_7 : f32 to vector<32x128xf32>
    %12 = arith.addf %11, %10 : vector<32x128xf32>
    %13 = arith.divf %11, %12 : vector<32x128xf32>
    %14 = arith.mulf %8, %13 : vector<32x128xf32>
    %c0_8 = arith.constant 0 : index
    %c0_9 = arith.constant 0 : index
    %15 = vector.load %arg6[%c0_8, %c0_9] : memref<32x128xf32, #tpu.memory_space<vmem>>, vector<32x128xf32>
    tpu.vector_store %arg6[%c0_8, %c0_9], %14 {strides = array<i32>} : memref<32x128xf32, #tpu.memory_space<vmem>>, vector<32x128xf32>,
    return
  }
  func.func @transform_0(%arg0: i32, %arg1: i32) -> (i32, i32) {
    %c0_i32 = arith.constant 0 : i32
    %c0_i32_0 = arith.constant 0 : i32
    return %arg0, %c0_i32 : i32, i32
  }
  func.func @transform_1(%arg0: i32, %arg1: i32) -> (i32, i32) {
    %c0_i32 = arith.constant 0 : i32
    %c0_i32_0 = arith.constant 0 : i32
    return %c0_i32, %arg1 : i32, i32
  }
  func.func @transform_2(%arg0: i32, %arg1: i32) -> (i32, i32) {
    %c0_i32 = arith.constant 0 : i32
    %c0_i32_0 = arith.constant 0 : i32
    return %c0_i32, %arg1 : i32, i32
  }
  func.func @transform_3(%arg0: i32, %arg1: i32) -> (i32, i32) {
    %c0_i32 = arith.constant 0 : i32
    %c0_i32_0 = arith.constant 0 : i32
    return %c0_i32, %arg1 : i32, i32
  }
  func.func @transform_4(%arg0: i32, %arg1: i32) -> (i32, i32) {
    %c0_i32 = arith.constant 0 : i32
    return %arg0, %arg1 : i32, i32
  }
}

module attributes {stable_mosaic.version = 11 : i64} {
  func.func @_gemm_bn_silu_kernel(%arg0: i32, %arg1: i32, %arg2: memref<32x64xbf16, #tpu.memory_space<vmem>>, %arg3: memref<64x128xbf16, #tpu.memory_space<vmem>>, %arg4: memref<1x128xf32, #tpu.memory_space<vmem>>, %arg5: memref<1x128xf32, #tpu.memory_space<vmem>>, %arg6: memref<32x128xf32, #tpu.memory_space<vmem>>) attributes {dimension_semantics = [#tpu.dimension_semantics<parallel>, #tpu.dimension_semantics<parallel>], iteration_bounds = array<i64: 1, 1>, scalar_prefetch = 0 : i64, scratch_operands = 0 : i64, tpu.core_type = #tpu.core_type<tc>, window_params = [{transform_indices = @transform_0, window_bounds = array<i64: 32, 64>}, {transform_indices = @transform_1, window_bounds = array<i64: 64, 128>}, {transform_indices = @transform_2, window_bounds = array<i64: 1, 128>}, {transform_indices = @transform_3, window_bounds = array<i64: 1, 128>}, {transform_indices = @transform_4, window_bounds = array<i64: 32, 128>}]} {
    %c0 = arith.constant 0 : index
    %c0_0 = arith.constant 0 : index
    %0 = vector.load %arg2[%c0, %c0_0] : memref<32x64xbf16, #tpu.memory_space<vmem>>, vector<32x64xbf16>
    %c0_1 = arith.constant 0 : index
    %c0_2 = arith.constant 0 : index
    %1 = vector.load %arg3[%c0_1, %c0_2] : memref<64x128xbf16, #tpu.memory_space<vmem>>, vector<64x128xbf16>
    %cst = arith.constant dense<0.000000e+00> : vector<32x128xf32>
    %2 = tpu.matmul %0, %1, %cst {dimension_numbers = #tpu.dot_dimension_numbers<[1], [0], [0], [1], [0, 0, 1, 1], [], []>} : vector<32x64xbf16>, vector<64x128xbf16>, vector<32x128xf32> -> vector<32x128xf32>
    %c0_3 = arith.constant 0 : index
    %c0_4 = arith.constant 0 : index
    %3 = vector.load %arg4[%c0_3, %c0_4] : memref<1x128xf32, #tpu.memory_space<vmem>>, vector<1x128xf32>
    %4 = vector.broadcast %3 : vector<1x128xf32> to vector<32x128xf32>
    %5 = arith.mulf %2, %4 : vector<32x128xf32>
    %c0_5 = arith.constant 0 : index
    %c0_6 = arith.constant 0 : index
    %6 = vector.load %arg5[%c0_5, %c0_6] : memref<1x128xf32, #tpu.memory_space<vmem>>, vector<1x128xf32>
    %7 = vector.broadcast %6 : vector<1x128xf32> to vector<32x128xf32>
    %8 = arith.addf %5, %7 : vector<32x128xf32>
    %9 = arith.negf %8 : vector<32x128xf32>
    %10 = math.exp %9 : vector<32x128xf32>
    %cst_7 = arith.constant 1.000000e+00 : f32
    %11 = vector.broadcast %cst_7 : f32 to vector<32x128xf32>
    %12 = arith.addf %11, %10 : vector<32x128xf32>
    %13 = arith.divf %11, %12 : vector<32x128xf32>
    %14 = arith.mulf %8, %13 : vector<32x128xf32>
    %c0_8 = arith.constant 0 : index
    %c0_9 = arith.constant 0 : index
    %15 = vector.load %arg6[%c0_8, %c0_9] : memref<32x128xf32, #tpu.memory_space<vmem>>, vector<32x128xf32>
    tpu.vector_store %arg6[%c0_8, %c0_9], %14 {strides = array<i32>} : memref<32x128xf32, #tpu.memory_space<vmem>>, vector<32x128xf32>,
    return
  }
  func.func @transform_0(%arg0: i32, %arg1: i32) -> (i32, i32) {
    %c0_i32 = arith.constant 0 : i32
    %c0_i32_0 = arith.constant 0 : i32
    return %arg0, %c0_i32 : i32, i32
  }
  func.func @transform_1(%arg0: i32, %arg1: i32) -> (i32, i32) {
    %c0_i32 = arith.constant 0 : i32
    %c0_i32_0 = arith.constant 0 : i32
    return %c0_i32, %arg1 : i32, i32
  }
  func.func @transform_2(%arg0: i32, %arg1: i32) -> (i32, i32) {
    %c0_i32 = arith.constant 0 : i32
    %c0_i32_0 = arith.constant 0 : i32
    return %c0_i32, %arg1 : i32, i32
  }
  func.func @transform_3(%arg0: i32, %arg1: i32) -> (i32, i32) {
    %c0_i32 = arith.constant 0 : i32
    %c0_i32_0 = arith.constant 0 : i32
    return %c0_i32, %arg1 : i32, i32
  }
  func.func @transform_4(%arg0: i32, %arg1: i32) -> (i32, i32) {
    %c0_i32 = arith.constant 0 : i32
    return %arg0, %arg1 : i32, i32
  }
}

module attributes {stable_mosaic.version = 11 : i64} {
  func.func @_gemm_bn_silu_kernel(%arg0: i32, %arg1: i32, %arg2: memref<32x32xbf16, #tpu.memory_space<vmem>>, %arg3: memref<32x128xbf16, #tpu.memory_space<vmem>>, %arg4: memref<1x128xf32, #tpu.memory_space<vmem>>, %arg5: memref<1x128xf32, #tpu.memory_space<vmem>>, %arg6: memref<32x128xf32, #tpu.memory_space<vmem>>) attributes {dimension_semantics = [#tpu.dimension_semantics<parallel>, #tpu.dimension_semantics<parallel>], iteration_bounds = array<i64: 1, 1>, scalar_prefetch = 0 : i64, scratch_operands = 0 : i64, tpu.core_type = #tpu.core_type<tc>, window_params = [{transform_indices = @transform_0, window_bounds = array<i64: 32, 32>}, {transform_indices = @transform_1, window_bounds = array<i64: 32, 128>}, {transform_indices = @transform_2, window_bounds = array<i64: 1, 128>}, {transform_indices = @transform_3, window_bounds = array<i64: 1, 128>}, {transform_indices = @transform_4, window_bounds = array<i64: 32, 128>}]} {
    %c0 = arith.constant 0 : index
    %c0_0 = arith.constant 0 : index
    %0 = vector.load %arg2[%c0, %c0_0] : memref<32x32xbf16, #tpu.memory_space<vmem>>, vector<32x32xbf16>
    %c0_1 = arith.constant 0 : index
    %c0_2 = arith.constant 0 : index
    %1 = vector.load %arg3[%c0_1, %c0_2] : memref<32x128xbf16, #tpu.memory_space<vmem>>, vector<32x128xbf16>
    %cst = arith.constant dense<0.000000e+00> : vector<32x128xf32>
    %2 = tpu.matmul %0, %1, %cst {dimension_numbers = #tpu.dot_dimension_numbers<[1], [0], [0], [1], [0, 0, 1, 1], [], []>} : vector<32x32xbf16>, vector<32x128xbf16>, vector<32x128xf32> -> vector<32x128xf32>
    %c0_3 = arith.constant 0 : index
    %c0_4 = arith.constant 0 : index
    %3 = vector.load %arg4[%c0_3, %c0_4] : memref<1x128xf32, #tpu.memory_space<vmem>>, vector<1x128xf32>
    %4 = vector.broadcast %3 : vector<1x128xf32> to vector<32x128xf32>
    %5 = arith.mulf %2, %4 : vector<32x128xf32>
    %c0_5 = arith.constant 0 : index
    %c0_6 = arith.constant 0 : index
    %6 = vector.load %arg5[%c0_5, %c0_6] : memref<1x128xf32, #tpu.memory_space<vmem>>, vector<1x128xf32>
    %7 = vector.broadcast %6 : vector<1x128xf32> to vector<32x128xf32>
    %8 = arith.addf %5, %7 : vector<32x128xf32>
    %9 = arith.negf %8 : vector<32x128xf32>
    %10 = math.exp %9 : vector<32x128xf32>
    %cst_7 = arith.constant 1.000000e+00 : f32
    %11 = vector.broadcast %cst_7 : f32 to vector<32x128xf32>
    %12 = arith.addf %11, %10 : vector<32x128xf32>
    %13 = arith.divf %11, %12 : vector<32x128xf32>
    %14 = arith.mulf %8, %13 : vector<32x128xf32>
    %c0_8 = arith.constant 0 : index
    %c0_9 = arith.constant 0 : index
    %15 = vector.load %arg6[%c0_8, %c0_9] : memref<32x128xf32, #tpu.memory_space<vmem>>, vector<32x128xf32>
    tpu.vector_store %arg6[%c0_8, %c0_9], %14 {strides = array<i32>} : memref<32x128xf32, #tpu.memory_space<vmem>>, vector<32x128xf32>,
    return
  }
  func.func @transform_0(%arg0: i32, %arg1: i32) -> (i32, i32) {
    %c0_i32 = arith.constant 0 : i32
    %c0_i32_0 = arith.constant 0 : i32
    return %arg0, %c0_i32 : i32, i32
  }
  func.func @transform_1(%arg0: i32, %arg1: i32) -> (i32, i32) {
    %c0_i32 = arith.constant 0 : i32
    %c0_i32_0 = arith.constant 0 : i32
    return %c0_i32, %arg1 : i32, i32
  }
  func.func @transform_2(%arg0: i32, %arg1: i32) -> (i32, i32) {
    %c0_i32 = arith.constant 0 : i32
    %c0_i32_0 = arith.constant 0 : i32
    return %c0_i32, %arg1 : i32, i32
  }
  func.func @transform_3(%arg0: i32, %arg1: i32) -> (i32, i32) {
    %c0_i32 = arith.constant 0 : i32
    %c0_i32_0 = arith.constant 0 : i32
    return %c0_i32, %arg1 : i32, i32
  }
  func.func @transform_4(%arg0: i32, %arg1: i32) -> (i32, i32) {
    %c0_i32 = arith.constant 0 : i32
    return %arg0, %arg1 : i32, i32
  }
}

module attributes {stable_mosaic.version = 11 : i64} {
  func.func @_gemm_bn_silu_kernel(%arg0: i32, %arg1: i32, %arg2: memref<8x576xbf16, #tpu.memory_space<vmem>>, %arg3: memref<576x128xbf16, #tpu.memory_space<vmem>>, %arg4: memref<1x128xf32, #tpu.memory_space<vmem>>, %arg5: memref<1x128xf32, #tpu.memory_space<vmem>>, %arg6: memref<8x128xf32, #tpu.memory_space<vmem>>) attributes {dimension_semantics = [#tpu.dimension_semantics<parallel>, #tpu.dimension_semantics<parallel>], iteration_bounds = array<i64: 1, 1>, scalar_prefetch = 0 : i64, scratch_operands = 0 : i64, tpu.core_type = #tpu.core_type<tc>, window_params = [{transform_indices = @transform_0, window_bounds = array<i64: 8, 576>}, {transform_indices = @transform_1, window_bounds = array<i64: 576, 128>}, {transform_indices = @transform_2, window_bounds = array<i64: 1, 128>}, {transform_indices = @transform_3, window_bounds = array<i64: 1, 128>}, {transform_indices = @transform_4, window_bounds = array<i64: 8, 128>}]} {
    %c0 = arith.constant 0 : index
    %c0_0 = arith.constant 0 : index
    %0 = vector.load %arg2[%c0, %c0_0] : memref<8x576xbf16, #tpu.memory_space<vmem>>, vector<8x576xbf16>
    %c0_1 = arith.constant 0 : index
    %c0_2 = arith.constant 0 : index
    %1 = vector.load %arg3[%c0_1, %c0_2] : memref<576x128xbf16, #tpu.memory_space<vmem>>, vector<576x128xbf16>
    %cst = arith.constant dense<0.000000e+00> : vector<8x128xf32>
    %2 = tpu.matmul %0, %1, %cst {dimension_numbers = #tpu.dot_dimension_numbers<[1], [0], [0], [1], [0, 0, 1, 1], [], []>} : vector<8x576xbf16>, vector<576x128xbf16>, vector<8x128xf32> -> vector<8x128xf32>
    %c0_3 = arith.constant 0 : index
    %c0_4 = arith.constant 0 : index
    %3 = vector.load %arg4[%c0_3, %c0_4] : memref<1x128xf32, #tpu.memory_space<vmem>>, vector<1x128xf32>
    %4 = vector.broadcast %3 : vector<1x128xf32> to vector<8x128xf32>
    %5 = arith.mulf %2, %4 : vector<8x128xf32>
    %c0_5 = arith.constant 0 : index
    %c0_6 = arith.constant 0 : index
    %6 = vector.load %arg5[%c0_5, %c0_6] : memref<1x128xf32, #tpu.memory_space<vmem>>, vector<1x128xf32>
    %7 = vector.broadcast %6 : vector<1x128xf32> to vector<8x128xf32>
    %8 = arith.addf %5, %7 : vector<8x128xf32>
    %9 = arith.negf %8 : vector<8x128xf32>
    %10 = math.exp %9 : vector<8x128xf32>
    %cst_7 = arith.constant 1.000000e+00 : f32
    %11 = vector.broadcast %cst_7 : f32 to vector<8x128xf32>
    %12 = arith.addf %11, %10 : vector<8x128xf32>
    %13 = arith.divf %11, %12 : vector<8x128xf32>
    %14 = arith.mulf %8, %13 : vector<8x128xf32>
    %c0_8 = arith.constant 0 : index
    %c0_9 = arith.constant 0 : index
    %15 = vector.load %arg6[%c0_8, %c0_9] : memref<8x128xf32, #tpu.memory_space<vmem>>, vector<8x128xf32>
    tpu.vector_store %arg6[%c0_8, %c0_9], %14 {strides = array<i32>} : memref<8x128xf32, #tpu.memory_space<vmem>>, vector<8x128xf32>,
    return
  }
  func.func @transform_0(%arg0: i32, %arg1: i32) -> (i32, i32) {
    %c0_i32 = arith.constant 0 : i32
    %c0_i32_0 = arith.constant 0 : i32
    return %arg0, %c0_i32 : i32, i32
  }
  func.func @transform_1(%arg0: i32, %arg1: i32) -> (i32, i32) {
    %c0_i32 = arith.constant 0 : i32
    %c0_i32_0 = arith.constant 0 : i32
    return %c0_i32, %arg1 : i32, i32
  }
  func.func @transform_2(%arg0: i32, %arg1: i32) -> (i32, i32) {
    %c0_i32 = arith.constant 0 : i32
    %c0_i32_0 = arith.constant 0 : i32
    return %c0_i32, %arg1 : i32, i32
  }
  func.func @transform_3(%arg0: i32, %arg1: i32) -> (i32, i32) {
    %c0_i32 = arith.constant 0 : i32
    %c0_i32_0 = arith.constant 0 : i32
    return %c0_i32, %arg1 : i32, i32
  }
  func.func @transform_4(%arg0: i32, %arg1: i32) -> (i32, i32) {
    %c0_i32 = arith.constant 0 : i32
    return %arg0, %arg1 : i32, i32
  }
}

module attributes {stable_mosaic.version = 11 : i64} {
  func.func @_gemm_bn_silu_kernel(%arg0: i32, %arg1: i32, %arg2: memref<8x64xbf16, #tpu.memory_space<vmem>>, %arg3: memref<64x128xbf16, #tpu.memory_space<vmem>>, %arg4: memref<1x128xf32, #tpu.memory_space<vmem>>, %arg5: memref<1x128xf32, #tpu.memory_space<vmem>>, %arg6: memref<8x128xf32, #tpu.memory_space<vmem>>) attributes {dimension_semantics = [#tpu.dimension_semantics<parallel>, #tpu.dimension_semantics<parallel>], iteration_bounds = array<i64: 1, 1>, scalar_prefetch = 0 : i64, scratch_operands = 0 : i64, tpu.core_type = #tpu.core_type<tc>, window_params = [{transform_indices = @transform_0, window_bounds = array<i64: 8, 64>}, {transform_indices = @transform_1, window_bounds = array<i64: 64, 128>}, {transform_indices = @transform_2, window_bounds = array<i64: 1, 128>}, {transform_indices = @transform_3, window_bounds = array<i64: 1, 128>}, {transform_indices = @transform_4, window_bounds = array<i64: 8, 128>}]} {
    %c0 = arith.constant 0 : index
    %c0_0 = arith.constant 0 : index
    %0 = vector.load %arg2[%c0, %c0_0] : memref<8x64xbf16, #tpu.memory_space<vmem>>, vector<8x64xbf16>
    %c0_1 = arith.constant 0 : index
    %c0_2 = arith.constant 0 : index
    %1 = vector.load %arg3[%c0_1, %c0_2] : memref<64x128xbf16, #tpu.memory_space<vmem>>, vector<64x128xbf16>
    %cst = arith.constant dense<0.000000e+00> : vector<8x128xf32>
    %2 = tpu.matmul %0, %1, %cst {dimension_numbers = #tpu.dot_dimension_numbers<[1], [0], [0], [1], [0, 0, 1, 1], [], []>} : vector<8x64xbf16>, vector<64x128xbf16>, vector<8x128xf32> -> vector<8x128xf32>
    %c0_3 = arith.constant 0 : index
    %c0_4 = arith.constant 0 : index
    %3 = vector.load %arg4[%c0_3, %c0_4] : memref<1x128xf32, #tpu.memory_space<vmem>>, vector<1x128xf32>
    %4 = vector.broadcast %3 : vector<1x128xf32> to vector<8x128xf32>
    %5 = arith.mulf %2, %4 : vector<8x128xf32>
    %c0_5 = arith.constant 0 : index
    %c0_6 = arith.constant 0 : index
    %6 = vector.load %arg5[%c0_5, %c0_6] : memref<1x128xf32, #tpu.memory_space<vmem>>, vector<1x128xf32>
    %7 = vector.broadcast %6 : vector<1x128xf32> to vector<8x128xf32>
    %8 = arith.addf %5, %7 : vector<8x128xf32>
    %9 = arith.negf %8 : vector<8x128xf32>
    %10 = math.exp %9 : vector<8x128xf32>
    %cst_7 = arith.constant 1.000000e+00 : f32
    %11 = vector.broadcast %cst_7 : f32 to vector<8x128xf32>
    %12 = arith.addf %11, %10 : vector<8x128xf32>
    %13 = arith.divf %11, %12 : vector<8x128xf32>
    %14 = arith.mulf %8, %13 : vector<8x128xf32>
    %c0_8 = arith.constant 0 : index
    %c0_9 = arith.constant 0 : index
    %15 = vector.load %arg6[%c0_8, %c0_9] : memref<8x128xf32, #tpu.memory_space<vmem>>, vector<8x128xf32>
    tpu.vector_store %arg6[%c0_8, %c0_9], %14 {strides = array<i32>} : memref<8x128xf32, #tpu.memory_space<vmem>>, vector<8x128xf32>,
    return
  }
  func.func @transform_0(%arg0: i32, %arg1: i32) -> (i32, i32) {
    %c0_i32 = arith.constant 0 : i32
    %c0_i32_0 = arith.constant 0 : i32
    return %arg0, %c0_i32 : i32, i32
  }
  func.func @transform_1(%arg0: i32, %arg1: i32) -> (i32, i32) {
    %c0_i32 = arith.constant 0 : i32
    %c0_i32_0 = arith.constant 0 : i32
    return %c0_i32, %arg1 : i32, i32
  }
  func.func @transform_2(%arg0: i32, %arg1: i32) -> (i32, i32) {
    %c0_i32 = arith.constant 0 : i32
    %c0_i32_0 = arith.constant 0 : i32
    return %c0_i32, %arg1 : i32, i32
  }
  func.func @transform_3(%arg0: i32, %arg1: i32) -> (i32, i32) {
    %c0_i32 = arith.constant 0 : i32
    %c0_i32_0 = arith.constant 0 : i32
    return %c0_i32, %arg1 : i32, i32
  }
  func.func @transform_4(%arg0: i32, %arg1: i32) -> (i32, i32) {
    %c0_i32 = arith.constant 0 : i32
    return %arg0, %arg1 : i32, i32
  }
}

module attributes {stable_mosaic.version = 11 : i64} {
  func.func @_gemm_bn_silu_kernel(%arg0: i32, %arg1: i32, %arg2: memref<8x32xbf16, #tpu.memory_space<vmem>>, %arg3: memref<32x128xbf16, #tpu.memory_space<vmem>>, %arg4: memref<1x128xf32, #tpu.memory_space<vmem>>, %arg5: memref<1x128xf32, #tpu.memory_space<vmem>>, %arg6: memref<8x128xf32, #tpu.memory_space<vmem>>) attributes {dimension_semantics = [#tpu.dimension_semantics<parallel>, #tpu.dimension_semantics<parallel>], iteration_bounds = array<i64: 1, 1>, scalar_prefetch = 0 : i64, scratch_operands = 0 : i64, tpu.core_type = #tpu.core_type<tc>, window_params = [{transform_indices = @transform_0, window_bounds = array<i64: 8, 32>}, {transform_indices = @transform_1, window_bounds = array<i64: 32, 128>}, {transform_indices = @transform_2, window_bounds = array<i64: 1, 128>}, {transform_indices = @transform_3, window_bounds = array<i64: 1, 128>}, {transform_indices = @transform_4, window_bounds = array<i64: 8, 128>}]} {
    %c0 = arith.constant 0 : index
    %c0_0 = arith.constant 0 : index
    %0 = vector.load %arg2[%c0, %c0_0] : memref<8x32xbf16, #tpu.memory_space<vmem>>, vector<8x32xbf16>
    %c0_1 = arith.constant 0 : index
    %c0_2 = arith.constant 0 : index
    %1 = vector.load %arg3[%c0_1, %c0_2] : memref<32x128xbf16, #tpu.memory_space<vmem>>, vector<32x128xbf16>
    %cst = arith.constant dense<0.000000e+00> : vector<8x128xf32>
    %2 = tpu.matmul %0, %1, %cst {dimension_numbers = #tpu.dot_dimension_numbers<[1], [0], [0], [1], [0, 0, 1, 1], [], []>} : vector<8x32xbf16>, vector<32x128xbf16>, vector<8x128xf32> -> vector<8x128xf32>
    %c0_3 = arith.constant 0 : index
    %c0_4 = arith.constant 0 : index
    %3 = vector.load %arg4[%c0_3, %c0_4] : memref<1x128xf32, #tpu.memory_space<vmem>>, vector<1x128xf32>
    %4 = vector.broadcast %3 : vector<1x128xf32> to vector<8x128xf32>
    %5 = arith.mulf %2, %4 : vector<8x128xf32>
    %c0_5 = arith.constant 0 : index
    %c0_6 = arith.constant 0 : index
    %6 = vector.load %arg5[%c0_5, %c0_6] : memref<1x128xf32, #tpu.memory_space<vmem>>, vector<1x128xf32>
    %7 = vector.broadcast %6 : vector<1x128xf32> to vector<8x128xf32>
    %8 = arith.addf %5, %7 : vector<8x128xf32>
    %9 = arith.negf %8 : vector<8x128xf32>
    %10 = math.exp %9 : vector<8x128xf32>
    %cst_7 = arith.constant 1.000000e+00 : f32
    %11 = vector.broadcast %cst_7 : f32 to vector<8x128xf32>
    %12 = arith.addf %11, %10 : vector<8x128xf32>
    %13 = arith.divf %11, %12 : vector<8x128xf32>
    %14 = arith.mulf %8, %13 : vector<8x128xf32>
    %c0_8 = arith.constant 0 : index
    %c0_9 = arith.constant 0 : index
    %15 = vector.load %arg6[%c0_8, %c0_9] : memref<8x128xf32, #tpu.memory_space<vmem>>, vector<8x128xf32>
    tpu.vector_store %arg6[%c0_8, %c0_9], %14 {strides = array<i32>} : memref<8x128xf32, #tpu.memory_space<vmem>>, vector<8x128xf32>,
    return
  }
  func.func @transform_0(%arg0: i32, %arg1: i32) -> (i32, i32) {
    %c0_i32 = arith.constant 0 : i32
    %c0_i32_0 = arith.constant 0 : i32
    return %arg0, %c0_i32 : i32, i32
  }
  func.func @transform_1(%arg0: i32, %arg1: i32) -> (i32, i32) {
    %c0_i32 = arith.constant 0 : i32
    %c0_i32_0 = arith.constant 0 : i32
    return %c0_i32, %arg1 : i32, i32
  }
  func.func @transform_2(%arg0: i32, %arg1: i32) -> (i32, i32) {
    %c0_i32 = arith.constant 0 : i32
    %c0_i32_0 = arith.constant 0 : i32
    return %c0_i32, %arg1 : i32, i32
  }
  func.func @transform_3(%arg0: i32, %arg1: i32) -> (i32, i32) {
    %c0_i32 = arith.constant 0 : i32
    %c0_i32_0 = arith.constant 0 : i32
    return %c0_i32, %arg1 : i32, i32
  }
  func.func @transform_4(%arg0: i32, %arg1: i32) -> (i32, i32) {
    %c0_i32 = arith.constant 0 : i32
    return %arg0, %arg1 : i32, i32
  }
}

module attributes {stable_mosaic.version = 11 : i64} {
  func.func @_gemm_bn_silu_kernel(%arg0: i32, %arg1: i32, %arg2: memref<8x64xbf16, #tpu.memory_space<vmem>>, %arg3: memref<64x128xbf16, #tpu.memory_space<vmem>>, %arg4: memref<1x128xf32, #tpu.memory_space<vmem>>, %arg5: memref<1x128xf32, #tpu.memory_space<vmem>>, %arg6: memref<8x128xf32, #tpu.memory_space<vmem>>) attributes {dimension_semantics = [#tpu.dimension_semantics<parallel>, #tpu.dimension_semantics<parallel>], iteration_bounds = array<i64: 1, 1>, scalar_prefetch = 0 : i64, scratch_operands = 0 : i64, tpu.core_type = #tpu.core_type<tc>, window_params = [{transform_indices = @transform_0, window_bounds = array<i64: 8, 64>}, {transform_indices = @transform_1, window_bounds = array<i64: 64, 128>}, {transform_indices = @transform_2, window_bounds = array<i64: 1, 128>}, {transform_indices = @transform_3, window_bounds = array<i64: 1, 128>}, {transform_indices = @transform_4, window_bounds = array<i64: 8, 128>}]} {
    %c0 = arith.constant 0 : index
    %c0_0 = arith.constant 0 : index
    %0 = vector.load %arg2[%c0, %c0_0] : memref<8x64xbf16, #tpu.memory_space<vmem>>, vector<8x64xbf16>
    %c0_1 = arith.constant 0 : index
    %c0_2 = arith.constant 0 : index
    %1 = vector.load %arg3[%c0_1, %c0_2] : memref<64x128xbf16, #tpu.memory_space<vmem>>, vector<64x128xbf16>
    %cst = arith.constant dense<0.000000e+00> : vector<8x128xf32>
    %2 = tpu.matmul %0, %1, %cst {dimension_numbers = #tpu.dot_dimension_numbers<[1], [0], [0], [1], [0, 0, 1, 1], [], []>} : vector<8x64xbf16>, vector<64x128xbf16>, vector<8x128xf32> -> vector<8x128xf32>
    %c0_3 = arith.constant 0 : index
    %c0_4 = arith.constant 0 : index
    %3 = vector.load %arg4[%c0_3, %c0_4] : memref<1x128xf32, #tpu.memory_space<vmem>>, vector<1x128xf32>
    %4 = vector.broadcast %3 : vector<1x128xf32> to vector<8x128xf32>
    %5 = arith.mulf %2, %4 : vector<8x128xf32>
    %c0_5 = arith.constant 0 : index
    %c0_6 = arith.constant 0 : index
    %6 = vector.load %arg5[%c0_5, %c0_6] : memref<1x128xf32, #tpu.memory_space<vmem>>, vector<1x128xf32>
    %7 = vector.broadcast %6 : vector<1x128xf32> to vector<8x128xf32>
    %8 = arith.addf %5, %7 : vector<8x128xf32>
    %9 = arith.negf %8 : vector<8x128xf32>
    %10 = math.exp %9 : vector<8x128xf32>
    %cst_7 = arith.constant 1.000000e+00 : f32
    %11 = vector.broadcast %cst_7 : f32 to vector<8x128xf32>
    %12 = arith.addf %11, %10 : vector<8x128xf32>
    %13 = arith.divf %11, %12 : vector<8x128xf32>
    %14 = arith.mulf %8, %13 : vector<8x128xf32>
    %c0_8 = arith.constant 0 : index
    %c0_9 = arith.constant 0 : index
    %15 = vector.load %arg6[%c0_8, %c0_9] : memref<8x128xf32, #tpu.memory_space<vmem>>, vector<8x128xf32>
    tpu.vector_store %arg6[%c0_8, %c0_9], %14 {strides = array<i32>} : memref<8x128xf32, #tpu.memory_space<vmem>>, vector<8x128xf32>,
    return
  }
  func.func @transform_0(%arg0: i32, %arg1: i32) -> (i32, i32) {
    %c0_i32 = arith.constant 0 : i32
    %c0_i32_0 = arith.constant 0 : i32
    return %arg0, %c0_i32 : i32, i32
  }
  func.func @transform_1(%arg0: i32, %arg1: i32) -> (i32, i32) {
    %c0_i32 = arith.constant 0 : i32
    %c0_i32_0 = arith.constant 0 : i32
    return %c0_i32, %arg1 : i32, i32
  }
  func.func @transform_2(%arg0: i32, %arg1: i32) -> (i32, i32) {
    %c0_i32 = arith.constant 0 : i32
    %c0_i32_0 = arith.constant 0 : i32
    return %c0_i32, %arg1 : i32, i32
  }
  func.func @transform_3(%arg0: i32, %arg1: i32) -> (i32, i32) {
    %c0_i32 = arith.constant 0 : i32
    %c0_i32_0 = arith.constant 0 : i32
    return %c0_i32, %arg1 : i32, i32
  }
  func.func @transform_4(%arg0: i32, %arg1: i32) -> (i32, i32) {
    %c0_i32 = arith.constant 0 : i32
    return %arg0, %arg1 : i32, i32
  }
}

module attributes {stable_mosaic.version = 11 : i64} {
  func.func @_gemm_bn_silu_kernel(%arg0: i32, %arg1: i32, %arg2: memref<8x288xbf16, #tpu.memory_space<vmem>>, %arg3: memref<288x128xbf16, #tpu.memory_space<vmem>>, %arg4: memref<1x128xf32, #tpu.memory_space<vmem>>, %arg5: memref<1x128xf32, #tpu.memory_space<vmem>>, %arg6: memref<8x128xf32, #tpu.memory_space<vmem>>) attributes {dimension_semantics = [#tpu.dimension_semantics<parallel>, #tpu.dimension_semantics<parallel>], iteration_bounds = array<i64: 1, 1>, scalar_prefetch = 0 : i64, scratch_operands = 0 : i64, tpu.core_type = #tpu.core_type<tc>, window_params = [{transform_indices = @transform_0, window_bounds = array<i64: 8, 288>}, {transform_indices = @transform_1, window_bounds = array<i64: 288, 128>}, {transform_indices = @transform_2, window_bounds = array<i64: 1, 128>}, {transform_indices = @transform_3, window_bounds = array<i64: 1, 128>}, {transform_indices = @transform_4, window_bounds = array<i64: 8, 128>}]} {
    %c0 = arith.constant 0 : index
    %c0_0 = arith.constant 0 : index
    %0 = vector.load %arg2[%c0, %c0_0] : memref<8x288xbf16, #tpu.memory_space<vmem>>, vector<8x288xbf16>
    %c0_1 = arith.constant 0 : index
    %c0_2 = arith.constant 0 : index
    %1 = vector.load %arg3[%c0_1, %c0_2] : memref<288x128xbf16, #tpu.memory_space<vmem>>, vector<288x128xbf16>
    %cst = arith.constant dense<0.000000e+00> : vector<8x128xf32>
    %2 = tpu.matmul %0, %1, %cst {dimension_numbers = #tpu.dot_dimension_numbers<[1], [0], [0], [1], [0, 0, 1, 1], [], []>} : vector<8x288xbf16>, vector<288x128xbf16>, vector<8x128xf32> -> vector<8x128xf32>
    %c0_3 = arith.constant 0 : index
    %c0_4 = arith.constant 0 : index
    %3 = vector.load %arg4[%c0_3, %c0_4] : memref<1x128xf32, #tpu.memory_space<vmem>>, vector<1x128xf32>
    %4 = vector.broadcast %3 : vector<1x128xf32> to vector<8x128xf32>
    %5 = arith.mulf %2, %4 : vector<8x128xf32>
    %c0_5 = arith.constant 0 : index
    %c0_6 = arith.constant 0 : index
    %6 = vector.load %arg5[%c0_5, %c0_6] : memref<1x128xf32, #tpu.memory_space<vmem>>, vector<1x128xf32>
    %7 = vector.broadcast %6 : vector<1x128xf32> to vector<8x128xf32>
    %8 = arith.addf %5, %7 : vector<8x128xf32>
    %9 = arith.negf %8 : vector<8x128xf32>
    %10 = math.exp %9 : vector<8x128xf32>
    %cst_7 = arith.constant 1.000000e+00 : f32
    %11 = vector.broadcast %cst_7 : f32 to vector<8x128xf32>
    %12 = arith.addf %11, %10 : vector<8x128xf32>
    %13 = arith.divf %11, %12 : vector<8x128xf32>
    %14 = arith.mulf %8, %13 : vector<8x128xf32>
    %c0_8 = arith.constant 0 : index
    %c0_9 = arith.constant 0 : index
    %15 = vector.load %arg6[%c0_8, %c0_9] : memref<8x128xf32, #tpu.memory_space<vmem>>, vector<8x128xf32>
    tpu.vector_store %arg6[%c0_8, %c0_9], %14 {strides = array<i32>} : memref<8x128xf32, #tpu.memory_space<vmem>>, vector<8x128xf32>,
    return
  }
  func.func @transform_0(%arg0: i32, %arg1: i32) -> (i32, i32) {
    %c0_i32 = arith.constant 0 : i32
    %c0_i32_0 = arith.constant 0 : i32
    return %arg0, %c0_i32 : i32, i32
  }
  func.func @transform_1(%arg0: i32, %arg1: i32) -> (i32, i32) {
    %c0_i32 = arith.constant 0 : i32
    %c0_i32_0 = arith.constant 0 : i32
    return %c0_i32, %arg1 : i32, i32
  }
  func.func @transform_2(%arg0: i32, %arg1: i32) -> (i32, i32) {
    %c0_i32 = arith.constant 0 : i32
    %c0_i32_0 = arith.constant 0 : i32
    return %c0_i32, %arg1 : i32, i32
  }
  func.func @transform_3(%arg0: i32, %arg1: i32) -> (i32, i32) {
    %c0_i32 = arith.constant 0 : i32
    %c0_i32_0 = arith.constant 0 : i32
    return %c0_i32, %arg1 : i32, i32
  }
  func.func @transform_4(%arg0: i32, %arg1: i32) -> (i32, i32) {
    %c0_i32 = arith.constant 0 : i32
    return %arg0, %arg1 : i32, i32
  }
}

module attributes {stable_mosaic.version = 11 : i64} {
  func.func @_gemm_bn_silu_kernel(%arg0: i32, %arg1: i32, %arg2: memref<8x128xbf16, #tpu.memory_space<vmem>>, %arg3: memref<128x128xbf16, #tpu.memory_space<vmem>>, %arg4: memref<1x128xf32, #tpu.memory_space<vmem>>, %arg5: memref<1x128xf32, #tpu.memory_space<vmem>>, %arg6: memref<8x128xf32, #tpu.memory_space<vmem>>) attributes {dimension_semantics = [#tpu.dimension_semantics<parallel>, #tpu.dimension_semantics<parallel>], iteration_bounds = array<i64: 1, 1>, scalar_prefetch = 0 : i64, scratch_operands = 0 : i64, tpu.core_type = #tpu.core_type<tc>, window_params = [{transform_indices = @transform_0, window_bounds = array<i64: 8, 128>}, {transform_indices = @transform_1, window_bounds = array<i64: 128, 128>}, {transform_indices = @transform_2, window_bounds = array<i64: 1, 128>}, {transform_indices = @transform_3, window_bounds = array<i64: 1, 128>}, {transform_indices = @transform_4, window_bounds = array<i64: 8, 128>}]} {
    %c0 = arith.constant 0 : index
    %c0_0 = arith.constant 0 : index
    %0 = vector.load %arg2[%c0, %c0_0] : memref<8x128xbf16, #tpu.memory_space<vmem>>, vector<8x128xbf16>
    %c0_1 = arith.constant 0 : index
    %c0_2 = arith.constant 0 : index
    %1 = vector.load %arg3[%c0_1, %c0_2] : memref<128x128xbf16, #tpu.memory_space<vmem>>, vector<128x128xbf16>
    %cst = arith.constant dense<0.000000e+00> : vector<8x128xf32>
    %2 = tpu.matmul %0, %1, %cst {dimension_numbers = #tpu.dot_dimension_numbers<[1], [0], [0], [1], [0, 0, 1, 1], [], []>} : vector<8x128xbf16>, vector<128x128xbf16>, vector<8x128xf32> -> vector<8x128xf32>
    %c0_3 = arith.constant 0 : index
    %c0_4 = arith.constant 0 : index
    %3 = vector.load %arg4[%c0_3, %c0_4] : memref<1x128xf32, #tpu.memory_space<vmem>>, vector<1x128xf32>
    %4 = vector.broadcast %3 : vector<1x128xf32> to vector<8x128xf32>
    %5 = arith.mulf %2, %4 : vector<8x128xf32>
    %c0_5 = arith.constant 0 : index
    %c0_6 = arith.constant 0 : index
    %6 = vector.load %arg5[%c0_5, %c0_6] : memref<1x128xf32, #tpu.memory_space<vmem>>, vector<1x128xf32>
    %7 = vector.broadcast %6 : vector<1x128xf32> to vector<8x128xf32>
    %8 = arith.addf %5, %7 : vector<8x128xf32>
    %9 = arith.negf %8 : vector<8x128xf32>
    %10 = math.exp %9 : vector<8x128xf32>
    %cst_7 = arith.constant 1.000000e+00 : f32
    %11 = vector.broadcast %cst_7 : f32 to vector<8x128xf32>
    %12 = arith.addf %11, %10 : vector<8x128xf32>
    %13 = arith.divf %11, %12 : vector<8x128xf32>
    %14 = arith.mulf %8, %13 : vector<8x128xf32>
    %c0_8 = arith.constant 0 : index
    %c0_9 = arith.constant 0 : index
    %15 = vector.load %arg6[%c0_8, %c0_9] : memref<8x128xf32, #tpu.memory_space<vmem>>, vector<8x128xf32>
    tpu.vector_store %arg6[%c0_8, %c0_9], %14 {strides = array<i32>} : memref<8x128xf32, #tpu.memory_space<vmem>>, vector<8x128xf32>,
    return
  }
  func.func @transform_0(%arg0: i32, %arg1: i32) -> (i32, i32) {
    %c0_i32 = arith.constant 0 : i32
    %c0_i32_0 = arith.constant 0 : i32
    return %arg0, %c0_i32 : i32, i32
  }
  func.func @transform_1(%arg0: i32, %arg1: i32) -> (i32, i32) {
    %c0_i32 = arith.constant 0 : i32
    %c0_i32_0 = arith.constant 0 : i32
    return %c0_i32, %arg1 : i32, i32
  }
  func.func @transform_2(%arg0: i32, %arg1: i32) -> (i32, i32) {
    %c0_i32 = arith.constant 0 : i32
    %c0_i32_0 = arith.constant 0 : i32
    return %c0_i32, %arg1 : i32, i32
  }
  func.func @transform_3(%arg0: i32, %arg1: i32) -> (i32, i32) {
    %c0_i32 = arith.constant 0 : i32
    %c0_i32_0 = arith.constant 0 : i32
    return %c0_i32, %arg1 : i32, i32
  }
  func.func @transform_4(%arg0: i32, %arg1: i32) -> (i32, i32) {
    %c0_i32 = arith.constant 0 : i32
    return %arg0, %arg1 : i32, i32
  }
}

</mosaic_0001>

<bundles_post_ra>
// kernel: _lambda_.27
= control target key start
LH: loop header
LB: loop body
LE: loop exit
PB: predicated region body
PF: predicated region fallthrough
CT: control target
= control target key end

     0   :  { %s2353_s15 = smov 0   ;;  %s2355_s16 = smov 0   ;;  %s3064_s0 = inlined_call_operand.vmem [shape: bf16[2048,112], index: 0, kind: input, shape index: {}]   ;;  %s3065_s1 = inlined_call_operand.vmem [shape: bf16[112,128], index: 1, kind: input, shape index: {}]   ;;  %s3066_s2 = inlined_call_operand.vmem [shape: f32[1,128], index: 2, kind: input, shape index: {}]   ;;  %s3067_s3 = inlined_call_operand.vmem [shape: f32[1,128], index: 3, kind: input, shape index: {}]   ;;  %s3068_s4 = inlined_call_operand.vmem [shape: f32[2048,128], index: 4, kind: output, shape index: {}]  }
   0x1   :  { %s2357_s17 = smov 0  }
   0x2 LB: > { %s26_s18 = sadd.s32 1, %s2322_s16  ;;  %p1708_p0 = scmp.ge.s32.totalorder %s2326_s17, 1  ;;  %s2326_s17 = sphi %s2357_s17, %s14_s17   ;;  %s2322_s16 = sphi %s2355_s16, %s3072_s16   ;;  %s2318_s15 = sphi %s2353_s15, %s3071_s15  }
   0x3   : > { %p28_p1 = scmp.ge.s32.totalorder %s26_s18, 4  ;;  %p202_p2 = scmp.lt.s32.totalorder %s2326_s17, 5 }
   0x5   : > { %s3074_s18 = smov (%p28_p1, %s26_s18), 0  ;;  %p203_p3 = pnand %p1708_p0, %p202_p2 }
   0x7   : > { %206 = sbr.rel (%p203_p3) target bundleno = 406 (0x196), region = 36 }
   0xe   : > { %v2007_v0 = vld [vmem:[%s3065_s1] sm:$0xff]   ;;  %s1709_s21 = sshll.u32 %s2318_s15, 6  ;;  %v2008_v1 = vld [vmem:[%s3065_s1 + $0x8] sm:$0xff]   ;;  %v2009_v2 = vld [vmem:[%s3065_s1 + $0x10] sm:$0xff]   ;;  %vm547_vm0 = vcmask 916480  }
   0xf   : > { %p242_p4 = scmp.lt.s32.totalorder %s1709_s21, 255  ;;  %1891 = vmatprep.subr.bf16.mxu0 %v2007_v0  ;;  %1969 = vmatprep.subr.bf16.mxu1 %v2007_v0  ;;  %v2010_v3 = vld [vmem:[%s3065_s1 + $0x18] sm:$0xff]   ;;  %v2011_v6 = vld [vmem:[%s3065_s1 + $0x20] sm:$0xff]   ;;  %v2012_v7 = vld [vmem:[%s3065_s1 + $0x28] sm:$0xff]  }
  0x10   : > { %1892 = vmatpush3.bf16.msra.mxu0 %v2007_v0  ;;  %1976 = vmatpush3.bf16.msra.mxu1 %v2007_v0  ;;  %v2013_v8 = vld [vmem:[%s3065_s1 + $0x30] sm:$0xff]   ;;  %v2467_v39 = vld [vmem:[%s3066_s2] ss:$0 sm:$0xff] }
  0x11   : > { %s3076_s21 = smov (!%p242_p4, %s1709_s21), 255  ;;  %1893 = vmatprep.subr.bf16.mxu0 %v2008_v1  ;;  %1970 = vmatprep.subr.bf16.mxu1 %v2008_v1  ;;  %v2472_v41 = vld [vmem:[%s3067_s3] ss:$0 sm:$0xff] }
  0x12   : > { %s1710_s26 = sshll.u32 %s3076_s21, 2  ;;  %s1712_s19 = sshll.u32 %s3076_s21, 3 }
  0x13   : > { %s2389_s5 = scalar_lea.vmem %s3064_s0, %s1710_s26  ;;  %s2588_s22 = scalar_lea.vmem %s3068_s4, %s1712_s19 }
  0x14   : > { %1894 = vmatpush3.bf16.msra.mxu0 %v2008_v1  ;;  %1977 = vmatpush3.bf16.msra.mxu1 %v2008_v1  ;;  %v2014_v4 = vld [vmem:[%s2389_s5] sm:$0xff]   ;;  %v2016_v9 = vld [vmem:[%s2389_s5 + $0x8] sm:$0xff]   ;;  %v2018_v11 = vld [vmem:[%s2389_s5 + $0x10] sm:$0xff]  }
  0x15   : > { %1895 = vmatprep.subr.bf16.mxu0 %v2009_v2  ;;  %1971 = vmatprep.subr.bf16.mxu1 %v2009_v2  ;;  %v2015_v5 = vld [vmem:[%s2389_s5 + $0x80] sm:$0xff]   ;;  %v2017_v10 = vld [vmem:[%s2389_s5 + $0x88] sm:$0xff]   ;;  %v2019_v12 = vld [vmem:[%s2389_s5 + $0x90] sm:$0xff]  }
  0x16   : > { %1905 = vmatprep.mubr.msk.bf16.mxu0 %vm547_vm0, %v2014_v4  ;;  %1937 = vmatprep.mubr.msk.bf16.mxu1 %vm547_vm0, %v2015_v5  ;;  %v2020_v13 = vld [vmem:[%s2389_s5 + $0x18] sm:$0xff]   ;;  %v2022_v15 = vld [vmem:[%s2389_s5 + $0x20] sm:$0xff]   ;;  %v2024_v17 = vld [vmem:[%s2389_s5 + $0x28] sm:$0xff]  }
  0x17   : > { %v2021_v14 = vld [vmem:[%s2389_s5 + $0x98] sm:$0xff]   ;;  %v2023_v16 = vld [vmem:[%s2389_s5 + $0xa0] sm:$0xff]   ;;  %v2025_v18 = vld [vmem:[%s2389_s5 + $0xa8] sm:$0xff]  }
  0x18   : > { %1896 = vmatpush3.bf16.msra.mxu0 %v2009_v2  ;;  %1978 = vmatpush3.bf16.msra.mxu1 %v2009_v2  ;;  %v2026_v19 = vld [vmem:[%s2389_s5 + $0x30] sm:$0xff]   ;;  %v2028_v21 = vld [vmem:[%s2389_s5 + $0x38] sm:$0xff]   ;;  %v2030_v23 = vld [vmem:[%s2389_s5 + $0x40] sm:$0xff]  }
  0x19   : > { %1897 = vmatprep.subr.bf16.mxu0 %v2010_v3  ;;  %1972 = vmatprep.subr.bf16.mxu1 %v2010_v3  ;;  %v2027_v20 = vld [vmem:[%s2389_s5 + $0xb0] sm:$0xff]   ;;  %v2029_v22 = vld [vmem:[%s2389_s5 + $0xb8] sm:$0xff]   ;;  %v2031_v24 = vld [vmem:[%s2389_s5 + $0xc0] sm:$0xff]  }
  0x1a   : > { %v2032_v25 = vld [vmem:[%s2389_s5 + $0x48] sm:$0xff]   ;;  %v2034_v27 = vld [vmem:[%s2389_s5 + $0x50] sm:$0xff]   ;;  %v2036_v29 = vld [vmem:[%s2389_s5 + $0x58] sm:$0xff]  }
  0x1b   : > { %v2033_v26 = vld [vmem:[%s2389_s5 + $0xc8] sm:$0xff]   ;;  %v2035_v28 = vld [vmem:[%s2389_s5 + $0xd0] sm:$0xff]   ;;  %v2037_v30 = vld [vmem:[%s2389_s5 + $0xd8] sm:$0xff]  }
  0x1c   : > { %1898 = vmatpush3.bf16.msra.mxu0 %v2010_v3  ;;  %1979 = vmatpush3.bf16.msra.mxu1 %v2010_v3  ;;  %v2038_v31 = vld [vmem:[%s2389_s5 + $0x60] sm:$0xff]   ;;  %v2040_v33 = vld [vmem:[%s2389_s5 + $0x68] sm:$0xff]   ;;  %v2042_v35 = vld [vmem:[%s2389_s5 + $0x70] sm:$0xff]  }
  0x1d   : > { %1899 = vmatprep.subr.bf16.mxu0 %v2011_v6  ;;  %1973 = vmatprep.subr.bf16.mxu1 %v2011_v6  ;;  %v2039_v32 = vld [vmem:[%s2389_s5 + $0xe0] sm:$0xff]   ;;  %v2041_v34 = vld [vmem:[%s2389_s5 + $0xe8] sm:$0xff]   ;;  %v2043_v36 = vld [vmem:[%s2389_s5 + $0xf0] sm:$0xff]  }
  0x1e   : > { %v2044_v37 = vld [vmem:[%s2389_s5 + $0x78] sm:$0xff]  }
  0x1f   : > { %v2045_v38 = vld [vmem:[%s2389_s5 + $0xf8] sm:$0xff]  }
  0x20   : > { %1900 = vmatpush3.bf16.msra.mxu0 %v2011_v6  ;;  %1980 = vmatpush3.bf16.msra.mxu1 %v2011_v6 }
  0x21   : > { %1901 = vmatprep.subr.bf16.mxu0 %v2012_v7  ;;  %1974 = vmatprep.subr.bf16.mxu1 %v2012_v7 }
  0x24   : > { %1902 = vmatpush3.bf16.msra.mxu0 %v2012_v7  ;;  %1981 = vmatpush3.bf16.msra.mxu1 %v2012_v7 }
  0x25   : > { %1903 = vmatprep.subr.bf16.mxu0 %v2013_v8  ;;  %1975 = vmatprep.subr.bf16.mxu1 %v2013_v8 }
  0x28   : > { %1904 = vmatpush3.bf16.msra.mxu0 %v2013_v8  ;;  %1982 = vmatpush3.bf16.msra.mxu1 %v2013_v8 }
  0x2b   : > { %1906 = vmatmul.mubr.msk.bf16.vlgmr.msra.gmra.mrb[0].mxu0 %vm547_vm0, %v2016_v9  ;;  %1938 = vmatmul.mubr.msk.bf16.vlgmr.msra.gmra.mrb[0].mxu1 %vm547_vm0, %v2017_v10 }
  0x2c   : > { %1909 = vmatprep.mubr.msk.bf16.mxu0 %vm547_vm0, %v2018_v11  ;;  %1941 = vmatprep.mubr.msk.bf16.mxu1 %vm547_vm0, %v2019_v12 }
  0x33   : > { %1910 = vmatmul.mubr.msk.bf16.gmra.mrb[4].mxu0 %vm547_vm0, %v2020_v13  ;;  %1942 = vmatmul.mubr.msk.bf16.gmra.mrb[4].mxu1 %vm547_vm0, %v2021_v14 }
  0x34   : > { %1913 = vmatprep.mubr.msk.bf16.mxu0 %vm547_vm0, %v2022_v15  ;;  %1945 = vmatprep.mubr.msk.bf16.mxu1 %vm547_vm0, %v2023_v16 }
  0x3b   : > { %1914 = vmatmul.mubr.msk.bf16.gmra.mrb[8].mxu0 %vm547_vm0, %v2024_v17  ;;  %1946 = vmatmul.mubr.msk.bf16.gmra.mrb[8].mxu1 %vm547_vm0, %v2025_v18 }
  0x3c   : > { %1917 = vmatprep.mubr.msk.bf16.mxu0 %vm547_vm0, %v2026_v19  ;;  %1949 = vmatprep.mubr.msk.bf16.mxu1 %vm547_vm0, %v2027_v20 }
  0x43   : > { %1918 = vmatmul.mubr.msk.bf16.gmra.mrb[12].mxu0 %vm547_vm0, %v2028_v21  ;;  %1950 = vmatmul.mubr.msk.bf16.gmra.mrb[12].mxu1 %vm547_vm0, %v2029_v22 }
  0x44   : > { %1921 = vmatprep.mubr.msk.bf16.mxu0 %vm547_vm0, %v2030_v23  ;;  %1953 = vmatprep.mubr.msk.bf16.mxu1 %vm547_vm0, %v2031_v24 }
  0x4b   : > { %1922 = vmatmul.mubr.msk.bf16.gmra.mrb[16].mxu0 %vm547_vm0, %v2032_v25  ;;  %1954 = vmatmul.mubr.msk.bf16.gmra.mrb[16].mxu1 %vm547_vm0, %v2033_v26 }
  0x4c   : > { %1925 = vmatprep.mubr.msk.bf16.mxu0 %vm547_vm0, %v2034_v27  ;;  %1957 = vmatprep.mubr.msk.bf16.mxu1 %vm547_vm0, %v2035_v28 }
  0x53   : > { %1926 = vmatmul.mubr.msk.bf16.gmra.mrb[20].mxu0 %vm547_vm0, %v2036_v29  ;;  %1958 = vmatmul.mubr.msk.bf16.gmra.mrb[20].mxu1 %vm547_vm0, %v2037_v30 }
  0x54   : > { %1929 = vmatprep.mubr.msk.bf16.mxu0 %vm547_vm0, %v2038_v31  ;;  %1961 = vmatprep.mubr.msk.bf16.mxu1 %vm547_vm0, %v2039_v32 }
  0x5b   : > { %1930 = vmatmul.mubr.msk.bf16.gmra.mrb[24].mxu0 %vm547_vm0, %v2040_v33  ;;  %1962 = vmatmul.mubr.msk.bf16.gmra.mrb[24].mxu1 %vm547_vm0, %v2041_v34 }
  0x5c   : > { %1933 = vmatprep.mubr.msk.bf16.mxu0 %vm547_vm0, %v2042_v35  ;;  %1965 = vmatprep.mubr.msk.bf16.mxu1 %vm547_vm0, %v2043_v36 }
  0x63   : > { %1934 = vmatmul.mubr.msk.bf16.gmra.mrb[28].mxu0 %vm547_vm0, %v2044_v37  ;;  %1966 = vmatmul.mubr.msk.bf16.gmra.mrb[28].mxu1 %vm547_vm0, %v2045_v38 }
  0xfe   : > { %v1907_v40 = vpop.f32.mrb[0].mxu0  ;;  %v1939_v42 = vpop.f32.mrb[0].mxu1 }
  0xff   : > { %v942_v43 = vmul.f32 %v1907_v40, %v2467_v39  ;;  %v974_v44 = vmul.f32 %v1939_v42, %v2467_v39  ;;  %v678_v45 = vpop.f32.mrb[1].mxu0  ;;  %v806_v46 = vpop.f32.mrb[1].mxu1 }
 0x100   : > { %v940_v47 = vmul.f32 %v2467_v39, %v678_v45  ;;  %v972_v48 = vmul.f32 %v2467_v39, %v806_v46  ;;  %v1908_v49 = vpop.f32.mrb[2].mxu0  ;;  %v1940_v50 = vpop.f32.mrb[2].mxu1 }
 0x101   : > { %v2479_v51 = vadd.f32 %v2472_v41, %v942_v43  ;;  %v2482_v52 = vadd.f32 %v2472_v41, %v974_v44  ;;  %v943_v53 = vmul.f32 %v1908_v49, %v2467_v39  ;;  %v975_v54 = vmul.f32 %v1940_v50, %v2467_v39  ;;  %v681_v55 = vpop.f32.mrb[3].mxu0  ;;  %v809_v56 = vpop.f32.mrb[3].mxu1 }
 0x102   : > { %v2487_v57 = vadd.f32 %v2472_v41, %v940_v47  ;;  %v2490_v58 = vadd.f32 %v2472_v41, %v972_v48  ;;  %v941_v59 = vmul.f32 %v2467_v39, %v681_v55  ;;  %v973_v60 = vmul.f32 %v2467_v39, %v809_v56 }
 0x103   : > { %v1788_v61 = vmul.f32 -1.442695, %v2479_v51  ;;  %v1820_v62 = vmul.f32 -1.442695, %v2482_v52  ;;  %v2497_v63 = vadd.f32 %v2472_v41, %v943_v53  ;;  %v2500_v0 = vadd.f32 %v2472_v41, %v975_v54 }
 0x104   : > { %v1786_v1 = vmul.f32 -1.442695, %v2487_v57  ;;  %v1818_v2 = vmul.f32 -1.442695, %v2490_v58  ;;  %v2505_v3 = vadd.f32 %v2472_v41, %v941_v59  ;;  %v2508_v4 = vadd.f32 %v2472_v41, %v973_v60 }
 0x105   : > { %2046 = vpow2.f32 %v1788_v61  ;;  %v1789_v5 = vmul.f32 -1.442695, %v2497_v63  ;;  %v1821_v6 = vmul.f32 -1.442695, %v2500_v0 }
 0x106   : > { %2048 = vpow2.f32 %v1820_v62  ;;  %v1911_v7 = vpop.f32.mrb[4].mxu0  ;;  %v1943_v8 = vpop.f32.mrb[4].mxu1  ;;  %v1787_v9 = vmul.f32 -1.442695, %v2505_v3  ;;  %v1819_v14 = vmul.f32 -1.442695, %v2508_v4 }
 0x107   : > { %2050 = vpow2.f32 %v1786_v1  ;;  %v946_v10 = vmul.f32 %v1911_v7, %v2467_v39  ;;  %v978_v11 = vmul.f32 %v1943_v8, %v2467_v39  ;;  %v694_v12 = vpop.f32.mrb[5].mxu0  ;;  %v822_v13 = vpop.f32.mrb[5].mxu1 }
 0x108   : > { %2052 = vpow2.f32 %v1818_v2  ;;  %v944_v15 = vmul.f32 %v2467_v39, %v694_v12  ;;  %v976_v16 = vmul.f32 %v2467_v39, %v822_v13  ;;  %v1912_v17 = vpop.f32.mrb[6].mxu0  ;;  %v1944_v18 = vpop.f32.mrb[6].mxu1 }
 0x109   : > { %2054 = vpow2.f32 %v1789_v5  ;;  %v2519_v19 = vadd.f32 %v2472_v41, %v946_v10  ;;  %v2522_v20 = vadd.f32 %v2472_v41, %v978_v11  ;;  %v947_v21 = vmul.f32 %v1912_v17, %v2467_v39  ;;  %v697_v22 = vpop.f32.mrb[7].mxu0  ;;  %v825_v23 = vpop.f32.mrb[7].mxu1 }
 0x10a   : > { %2056 = vpow2.f32 %v1821_v6  ;;  %v2526_v24 = vadd.f32 %v2472_v41, %v944_v15  ;;  %v2529_v25 = vadd.f32 %v2472_v41, %v976_v16  ;;  %v979_v35 = vmul.f32 %v1944_v18, %v2467_v39 }
 0x10b   : > { %2058 = vpow2.f32 %v1787_v9  ;;  %v1792_v26 = vmul.f32 -1.442695, %v2519_v19  ;;  %v1824_v27 = vmul.f32 -1.442695, %v2522_v20  ;;  %v2534_v28 = vadd.f32 %v2472_v41, %v947_v21 }
 0x10c   : > { %2060 = vpow2.f32 %v1819_v14  ;;  %v1790_v29 = vmul.f32 -1.442695, %v2526_v24  ;;  %v1822_v30 = vmul.f32 -1.442695, %v2529_v25  ;;  %v945_v42 = vmul.f32 %v2467_v39, %v697_v22 }
 0x10d   : > { %2062 = vpow2.f32 %v1792_v26  ;;  %v1793_v31 = vmul.f32 -1.442695, %v2534_v28  ;;  %v977_v47 = vmul.f32 %v2467_v39, %v825_v23  ;;  %v2545_v56 = vadd.f32 %v2472_v41, %v979_v35 }
 0x10e   : > { %2064 = vpow2.f32 %v1824_v27  ;;  %v1915_v32 = vpop.f32.mrb[8].mxu0  ;;  %v1947_v33 = vpop.f32.mrb[8].mxu1  ;;  %v2549_v62 = vadd.f32 %v2472_v41, %v945_v42 }
 0x10f   : > { %v2047_v34 = vpop.eup %2046  ;;  %2066 = vpow2.f32 %v1790_v29  ;;  %v710_v36 = vpop.f32.mrb[9].mxu0  ;;  %v950_v59 = vmul.f32 %v1915_v32, %v2467_v39  ;;  %v982_v1 = vmul.f32 %v1947_v33, %v2467_v39  ;;  %v2553_v6 = vadd.f32 %v2472_v41, %v977_v47 }
 0x110   : > { %v838_v37 = vpop.f32.mrb[9].mxu1  ;;  %v2049_v38 = vpop.eup %2048  ;;  %v1269_v40 = vadd.f32 1.0, %v2047_v34  ;;  %2068 = vpow2.f32 %v1822_v30  ;;  %v948_v9 = vmul.f32 %v2467_v39, %v710_v36  ;;  %v1825_v14 = vmul.f32 -1.442695, %v2545_v56 }
 0x111   : > { %v1916_v43 = vpop.f32.mrb[10].mxu0  ;;  %v1948_v44 = vpop.f32.mrb[10].mxu1  ;;  %v1301_v46 = vadd.f32 1.0, %v2049_v38  ;;  %2070 = vpow2.f32 %v1793_v31  ;;  %v2558_v15 = vadd.f32 %v2472_v41, %v950_v59  ;;  %v1791_v22 = vmul.f32 -1.442695, %v2549_v62 }
 0x112   : > { %v2051_v45 = vpop.eup %2050  ;;  %v713_v48 = vpop.f32.mrb[11].mxu0  ;;  %2072 = vrcp.f32 %v1269_v40  ;;  %v2566_v23 = vadd.f32 %v2472_v41, %v982_v1  ;;  %v1823_v31 = vmul.f32 -1.442695, %v2553_v6  ;;  %v980_v32 = vmul.f32 %v2467_v39, %v838_v37 }
 0x113   : > { %v2053_v49 = vpop.eup %2052  ;;  %v1267_v50 = vadd.f32 1.0, %v2051_v45  ;;  %v2542_v53 = vpop.f32.mrb[11].mxu1  ;;  %2074 = vrcp.f32 %v1301_v46  ;;  %v2580_v38 = vadd.f32 %v2472_v41, %v948_v9  ;;  %v951_v40 = vmul.f32 %v1916_v43, %v2467_v39 }
 0x114   : > { %v2055_v54 = vpop.eup %2054  ;;  %v1299_v55 = vadd.f32 1.0, %v2053_v49  ;;  %v1796_v46 = vmul.f32 -1.442695, %v2558_v15  ;;  %v983_v47 = vmul.f32 %v1948_v44, %v2467_v39  ;;  %v949_v43 = vmul.f32 %v2467_v39, %v713_v48 }
 0x115   : > { %v2057_v60 = vpop.eup %2056  ;;  %2076 = vrcp.f32 %v1267_v50  ;;  %v1270_v61 = vadd.f32 1.0, %v2055_v54  ;;  %v1828_v50 = vmul.f32 -1.442695, %v2566_v23  ;;  %v2594_v59 = vadd.f32 %v2472_v41, %v980_v32 }
 0x116   : > { %v2059_v2 = vpop.eup %2058  ;;  %2078 = vrcp.f32 %v1299_v55  ;;  %v1302_v5 = vadd.f32 1.0, %v2057_v60  ;;  %v1919_v10 = vpop.f32.mrb[12].mxu0  ;;  %v981_v44 = vmul.f32 %v2467_v39, %v2542_v53  ;;  %v2600_v1 = vadd.f32 %v2472_v41, %v951_v40 }
 0x117   : > { %v2061_v7 = vpop.eup %2060  ;;  %2080 = vrcp.f32 %v1270_v61  ;;  %v1268_v8 = vadd.f32 1.0, %v2059_v2  ;;  %v1951_v11 = vpop.f32.mrb[12].mxu1  ;;  %v954_v48 = vmul.f32 %v1919_v10, %v2467_v39  ;;  %v2610_v53 = vadd.f32 %v2472_v41, %v983_v47 }
 0x118   : > { %v2063_v12 = vpop.eup %2062  ;;  %2082 = vrcp.f32 %v1302_v5  ;;  %v1300_v13 = vadd.f32 1.0, %v2061_v7  ;;  %v2560_v16 = vpop.f32.mrb[13].mxu0 }
 0x119   : > { %v2562_v17 = vpop.f32.mrb[13].mxu1  ;;  %v2065_v18 = vpop.eup %2064  ;;  %2084 = vrcp.f32 %v1268_v8  ;;  %v1273_v21 = vadd.f32 1.0, %v2063_v12 }
 0x11a   : > { %v2568_v26 = vpop.f32.mrb[14].mxu0  ;;  %v2570_v27 = vpop.f32.mrb[14].mxu1  ;;  %2086 = vrcp.f32 %v1300_v13  ;;  %v1305_v30 = vadd.f32 1.0, %v2065_v18  ;;  %v1794_v13 = vmul.f32 -1.442695, %v2580_v38 }
 0x11b   : > { %v2067_v29 = vpop.eup %2066  ;;  %v2575_v33 = vpop.f32.mrb[15].mxu0  ;;  %2088 = vrcp.f32 %v1273_v21 }
 0x11c   : > { %v2577_v34 = vpop.f32.mrb[15].mxu1  ;;  %v2069_v35 = vpop.eup %2068  ;;  %v1271_v36 = vadd.f32 1.0, %v2067_v29  ;;  %2090 = vrcp.f32 %v1305_v30  ;;  %v1826_v29 = vmul.f32 -1.442695, %v2594_v59 }
 0x11d   : > { %v2071_v42 = vpop.eup %2070  ;;  %v1303_v45 = vadd.f32 1.0, %v2069_v35 }
 0x11e   : > { %v2073_v37 = vpop.eup %2072  ;;  %2092 = vrcp.f32 %v1271_v36  ;;  %v1274_v49 = vadd.f32 1.0, %v2071_v42  ;;  %v2603_v2 = vpop.f32.mrb[16].mxu0  ;;  %v1797_v36 = vmul.f32 -1.442695, %v2600_v1  ;;  %v1829_v42 = vmul.f32 -1.442695, %v2610_v53 }
 0x11f   : > { %v2075_v54 = vpop.eup %2074  ;;  %v1461_v55 = vmul.f32 %v2073_v37, %v2479_v51  ;;  %2094 = vrcp.f32 %v1303_v45  ;;  %v2605_v51 = vpop.f32.mrb[16].mxu1 }
 0x120   : > { %v2077_v60 = vpop.eup %2076  ;;  %v1493_v61 = vmul.f32 %v2075_v54, %v2482_v52  ;;  %2096 = vrcp.f32 %v1274_v49  ;;  %v986_v52 = vmul.f32 %v1951_v11, %v2467_v39  ;;  %v2613_v8 = vpop.f32.mrb[17].mxu0 }
 0x121   : > { %v2079_v5 = vpop.eup %2078  ;;  %1525 = vst [vmem:[%s2588_s22 + $0x10] sm:$0xff] %v1461_v55  ;;  %v1459_v7 = vmul.f32 %v2077_v60, %v2487_v57  ;;  %2098 = vpow2.f32 %v1825_v14  ;;  %v2615_v9 = vpop.f32.mrb[17].mxu1  ;;  %v2621_v57 = vadd.f32 %v2472_v41, %v949_v43 }
 0x122   : > { %v2081_v10 = vpop.eup %2080  ;;  %1557 = vst [vmem:[%s2588_s22 + $0x110] sm:$0xff] %v1493_v61  ;;  %v1491_v12 = vmul.f32 %v2079_v5, %v2490_v58  ;;  %2100 = vpow2.f32 %v1791_v22  ;;  %v2623_v14 = vpop.f32.mrb[18].mxu0  ;;  %v2631_v58 = vadd.f32 %v2472_v41, %v981_v44  ;;  %v2647_v45 = vadd.f32 %v2472_v41, %v986_v52 }
 0x123   : > { %v2625_v18 = vpop.f32.mrb[18].mxu1  ;;  %v2083_v11 = vpop.eup %2082  ;;  %1523 = vst [vmem:[%s2588_s22] sm:$0xff] %v1459_v7  ;;  %v1462_v21 = vmul.f32 %v2081_v10, %v2497_v63  ;;  %2102 = vpow2.f32 %v1823_v31  ;;  %v2641_v63 = vadd.f32 %v2472_v41, %v954_v48 }
 0x124   : > { %v2633_v22 = vpop.f32.mrb[19].mxu0  ;;  %v2635_v30 = vpop.f32.mrb[19].mxu1  ;;  %1555 = vst [vmem:[%s2588_s22 + $0x100] sm:$0xff] %v1491_v12  ;;  %v1494_v35 = vmul.f32 %v2083_v11, %v2500_v0  ;;  %2104 = vpow2.f32 %v1796_v46  ;;  %v1795_v46 = vmul.f32 -1.442695, %v2621_v57  ;;  %v952_v12 = vmul.f32 %v2467_v39, %v2560_v16 }
 0x125   : > { %v2085_v32 = vpop.eup %2084  ;;  %1526 = vst [vmem:[%s2588_s22 + $0x18] sm:$0xff] %v1462_v21  ;;  %2106 = vpow2.f32 %v1828_v50  ;;  %v1800_v54 = vmul.f32 -1.442695, %v2641_v63  ;;  %v1832_v60 = vmul.f32 -1.442695, %v2647_v45 }
 0x126   : > { %v2087_v31 = vpop.eup %2086  ;;  %v1460_v40 = vmul.f32 %v2085_v32, %v2505_v3  ;;  %1558 = vst [vmem:[%s2588_s22 + $0x118] sm:$0xff] %v1494_v35  ;;  %2108 = vpow2.f32 %v1794_v13  ;;  %v1827_v3 = vmul.f32 -1.442695, %v2631_v58  ;;  %v2660_v55 = vpop.f32.mrb[20].mxu1 }
 0x127   : > { %v2089_v47 = vpop.eup %2088  ;;  %v1492_v0 = vmul.f32 %v2087_v31, %v2508_v4  ;;  %2110 = vpow2.f32 %v1826_v29  ;;  %v2658_v4 = vpop.f32.mrb[20].mxu0  ;;  %v984_v29 = vmul.f32 %v2467_v39, %v2562_v17  ;;  %v987_v31 = vmul.f32 %v2570_v27, %v2467_v39 }
 0x128   : > { %v2091_v37 = vpop.eup %2090  ;;  %1524 = vst [vmem:[%s2588_s22 + $0x8] sm:$0xff] %v1460_v40  ;;  %v1465_v49 = vmul.f32 %v2089_v47, %v2519_v19  ;;  %2112 = vpow2.f32 %v1797_v36  ;;  %v2665_v61 = vpop.f32.mrb[21].mxu0  ;;  %v2692_v47 = vadd.f32 %v2472_v41, %v952_v12  ;;  %v953_v17 = vmul.f32 %v2467_v39, %v2575_v33 }
 0x129   : > { %v2093_v50 = vpop.eup %2092  ;;  %1556 = vst [vmem:[%s2588_s22 + $0x108] sm:$0xff] %v1492_v0  ;;  %v1497_v43 = vmul.f32 %v2091_v37, %v2522_v20  ;;  %2114 = vpow2.f32 %v1829_v42  ;;  %v2667_v48 = vpop.f32.mrb[21].mxu1 }
 0x12a   : > { %v2095_v44 = vpop.eup %2094  ;;  %1529 = vst [vmem:[%s2588_s22 + $0x30] sm:$0xff] %v1465_v49  ;;  %v1463_v19 = vmul.f32 %v2093_v50, %v2526_v24  ;;  %2116 = vpow2.f32 %v1795_v46  ;;  %v2671_v7 = vpop.f32.mrb[22].mxu0  ;;  %v2719_v12 = vadd.f32 %v2472_v41, %v953_v17 }
 0x12b   : > { %v2097_v20 = vpop.eup %2096  ;;  %1561 = vst [vmem:[%s2588_s22 + $0x130] sm:$0xff] %v1497_v43  ;;  %v1495_v5 = vmul.f32 %v2095_v44, %v2529_v25  ;;  %v2673_v52 = vpop.f32.mrb[22].mxu1  ;;  %2118 = vpow2.f32 %v1827_v3 }
 0x12c   : > { %v2099_v10 = vpop.eup %2098  ;;  %1527 = vst [vmem:[%s2588_s22 + $0x20] sm:$0xff] %v1463_v19  ;;  %v1466_v24 = vmul.f32 %v2097_v20, %v2534_v28  ;;  %v2679_v13 = vpop.f32.mrb[23].mxu0  ;;  %2120 = vpow2.f32 %v1800_v54  ;;  %v955_v28 = vmul.f32 %v2568_v26, %v2467_v39  ;;  %v2697_v26 = vadd.f32 %v2472_v41, %v984_v29 }
 0x12d   : > { %v2681_v11 = vpop.f32.mrb[23].mxu1  ;;  %v2101_v21 = vpop.eup %2100  ;;  %1559 = vst [vmem:[%s2588_s22 + $0x120] sm:$0xff] %v1495_v5  ;;  %v1306_v25 = vadd.f32 1.0, %v2099_v10  ;;  %2122 = vpow2.f32 %v1832_v60  ;;  %v2711_v19 = vadd.f32 %v2472_v41, %v987_v31 }
 0x12e   : > { %v2103_v32 = vpop.eup %2102  ;;  %1530 = vst [vmem:[%s2588_s22 + $0x38] sm:$0xff] %v1466_v24  ;;  %v1272_v35 = vadd.f32 1.0, %v2101_v21  ;;  %v2699_v37 = vpop.f32.mrb[24].mxu0  ;;  %v2704_v50 = vadd.f32 %v2472_v41, %v955_v28  ;;  %v1798_v24 = vmul.f32 -1.442695, %v2692_v47  ;;  %v985_v28 = vmul.f32 %v2467_v39, %v2577_v34 }
 0x12f   : > { %v2105_v36 = vpop.eup %2104  ;;  %2124 = vrcp.f32 %v1306_v25  ;;  %v1304_v16 = vadd.f32 1.0, %v2103_v32  ;;  %v2701_v49 = vpop.f32.mrb[24].mxu1  ;;  %v1799_v34 = vmul.f32 -1.442695, %v2719_v12 }
 0x130   : > { %v2107_v40 = vpop.eup %2106  ;;  %2126 = vrcp.f32 %v1272_v35  ;;  %v1277_v42 = vadd.f32 1.0, %v2105_v36  ;;  %v2706_v43 = vpop.f32.mrb[25].mxu0  ;;  %v1830_v35 = vmul.f32 -1.442695, %v2697_v26  ;;  %v1801_v31 = vmul.f32 -1.442695, %v2704_v50 }
 0x131   : > { %v2109_v0 = vpop.eup %2108  ;;  %2128 = vrcp.f32 %v1304_v16  ;;  %v1309_v46 = vadd.f32 1.0, %v2107_v40  ;;  %v2708_v54 = vpop.f32.mrb[25].mxu1  ;;  %v958_v40 = vmul.f32 %v2603_v2, %v2467_v39  ;;  %v2738_v2 = vadd.f32 %v2472_v41, %v985_v28 }
 0x132   : > { %v2111_v27 = vpop.eup %2110  ;;  %2130 = vrcp.f32 %v1277_v42  ;;  %v1275_v3 = vadd.f32 1.0, %v2109_v0  ;;  %v2713_v60 = vpop.f32.mrb[26].mxu0  ;;  %v1833_v0 = vmul.f32 -1.442695, %v2711_v19 }
 0x133   : > { %v2113_v33 = vpop.eup %2112  ;;  %2132 = vrcp.f32 %v1309_v46  ;;  %v1307_v44 = vadd.f32 1.0, %v2111_v27  ;;  %v2715_v20 = vpop.f32.mrb[26].mxu1  ;;  %v990_v46 = vmul.f32 %v2605_v51, %v2467_v39 }
 0x134   : > { %v2115_v5 = vpop.eup %2114  ;;  %2134 = vrcp.f32 %v1275_v3  ;;  %v1278_v10 = vadd.f32 1.0, %v2113_v33  ;;  %v2721_v21 = vpop.f32.mrb[27].mxu0  ;;  %v956_v33 = vmul.f32 %v2467_v39, %v2613_v8  ;;  %v2748_v8 = vadd.f32 %v2472_v41, %v958_v40 }
 0x135   : > { %v2723_v25 = vpop.f32.mrb[27].mxu1  ;;  %v2117_v29 = vpop.eup %2116  ;;  %2136 = vrcp.f32 %v1307_v44  ;;  %v1310_v32 = vadd.f32 1.0, %v2115_v5 }
 0x136   : > { %v2119_v36 = vpop.eup %2118  ;;  %2138 = vrcp.f32 %v1278_v10  ;;  %v1276_v16 = vadd.f32 1.0, %v2117_v29  ;;  %v988_v10 = vmul.f32 %v2467_v39, %v2615_v9  ;;  %v2742_v29 = vpop.f32.mrb[28].mxu0 }
 0x137   : > { %v2121_v42 = vpop.eup %2120  ;;  %2140 = vrcp.f32 %v1310_v32  ;;  %v1308_v17 = vadd.f32 1.0, %v2119_v36  ;;  %v2744_v51 = vpop.f32.mrb[28].mxu1 }
 0x138   : > { %v2123_v27 = vpop.eup %2122  ;;  %2142 = vrcp.f32 %v1276_v16  ;;  %v1281_v3 = vadd.f32 1.0, %v2121_v42  ;;  %v959_v16 = vmul.f32 %v2623_v14, %v2467_v39  ;;  %v2752_v28 = vpop.f32.mrb[29].mxu0 }
 0x139   : > { %v2125_v44 = vpop.eup %2124  ;;  %2144 = vrcp.f32 %v1308_v17  ;;  %v1313_v5 = vadd.f32 1.0, %v2123_v27  ;;  %v2754_v42 = vpop.f32.mrb[29].mxu1  ;;  %v2758_v27 = vadd.f32 %v2472_v41, %v990_v46 }
 0x13a   : > { %v2127_v32 = vpop.eup %2126  ;;  %v1498_v36 = vmul.f32 %v2125_v44, %v2545_v56  ;;  %2146 = vrcp.f32 %v1281_v3  ;;  %3069 = vst [vmem:[#allocation2_spill] sm:$0xff] %v2754_v42  ;;  %v991_v56 = vmul.f32 %v2625_v18, %v2467_v39  ;;  %v2762_v40 = vpop.f32.mrb[30].mxu0  ;;  %v2769_v42 = vadd.f32 %v2472_v41, %v956_v33 }
 0x13b   : > { %v2129_v9 = vpop.eup %2128  ;;  %v1464_v17 = vmul.f32 %v2127_v32, %v2549_v62  ;;  %2148 = vrcp.f32 %v1313_v5  ;;  %v2764_v3 = vpop.f32.mrb[30].mxu1  ;;  %v957_v62 = vmul.f32 %v2467_v39, %v2633_v22 }
 0x13c   : > { %v2131_v14 = vpop.eup %2130  ;;  %1562 = vst [vmem:[%s2588_s22 + $0x138] sm:$0xff] %v1498_v36  ;;  %v1496_v44 = vmul.f32 %v2129_v9, %v2553_v6  ;;  %2150 = vpow2.f32 %v1798_v24  ;;  %v2773_v46 = vpop.f32.mrb[31].mxu0  ;;  %v1831_v6 = vmul.f32 -1.442695, %v2738_v2  ;;  %v2781_v24 = vadd.f32 %v2472_v41, %v988_v10 }
 0x13d   : > { %v2775_v18 = vpop.f32.mrb[31].mxu1  ;;  %v2133_v5 = vpop.eup %2132  ;;  %1528 = vst [vmem:[%s2588_s22 + $0x28] sm:$0xff] %v1464_v17  ;;  %v1469_v32 = vmul.f32 %v2131_v14, %v2558_v15  ;;  %2152 = vpow2.f32 %v1830_v35  ;;  %v1804_v36 = vmul.f32 -1.442695, %v2748_v8  ;;  %v2787_v9 = vadd.f32 %v2472_v41, %v959_v16 }
 0x13e   : > { %v2135_v33 = vpop.eup %2134  ;;  %1560 = vst [vmem:[%s2588_s22 + $0x128] sm:$0xff] %v1496_v44  ;;  %v1501_v22 = vmul.f32 %v2133_v5, %v2566_v23  ;;  %2154 = vpow2.f32 %v1801_v31  ;;  %v1836_v35 = vmul.f32 -1.442695, %v2758_v27  ;;  %v2793_v10 = vadd.f32 %v2472_v41, %v991_v56 }
 0x13f   : > { %v2137_v17 = vpop.eup %2136  ;;  %1533 = vst [vmem:[%s2588_s22 + $0x50] sm:$0xff] %v1469_v32  ;;  %v1467_v15 = vmul.f32 %v2135_v33, %v2580_v38  ;;  %2156 = vpow2.f32 %v1833_v0  ;;  %v1802_v31 = vmul.f32 -1.442695, %v2769_v42  ;;  %v2799_v16 = vadd.f32 %v2472_v41, %v957_v62 }
 0x140   : > { %v2139_v14 = vpop.eup %2138  ;;  %1565 = vst [vmem:[%s2588_s22 + $0x150] sm:$0xff] %v1501_v22  ;;  %v1499_v23 = vmul.f32 %v2137_v17, %v2594_v59  ;;  %2158 = vpow2.f32 %v1799_v34  ;;  %v1834_v0 = vmul.f32 -1.442695, %v2781_v24  ;;  %v1805_v59 = vmul.f32 -1.442695, %v2787_v9 }
 0x141   : > { %v2141_v44 = vpop.eup %2140  ;;  %1531 = vst [vmem:[%s2588_s22 + $0x40] sm:$0xff] %v1467_v15  ;;  %v1470_v38 = vmul.f32 %v2139_v14, %v2600_v1  ;;  %2160 = vpow2.f32 %v1831_v6  ;;  %v1837_v32 = vmul.f32 -1.442695, %v2793_v10  ;;  %v1803_v33 = vmul.f32 -1.442695, %v2799_v16 }
 0x142   : > { %v2143_v56 = vpop.eup %2142  ;;  %1563 = vst [vmem:[%s2588_s22 + $0x140] sm:$0xff] %v1499_v23  ;;  %v1502_v5 = vmul.f32 %v2141_v44, %v2610_v53  ;;  %2162 = vpow2.f32 %v1804_v36  ;;  %v989_v17 = vmul.f32 %v2467_v39, %v2635_v30  ;;  %v960_v30 = vmul.f32 %v2467_v39, %v2665_v61 }
 0x143   : > { %v2145_v34 = vpop.eup %2144  ;;  %1534 = vst [vmem:[%s2588_s22 + $0x58] sm:$0xff] %v1470_v38  ;;  %v1468_v62 = vmul.f32 %v2143_v56, %v2621_v57  ;;  %2164 = vpow2.f32 %v1836_v35  ;;  %v962_v35 = vmul.f32 %v2658_v4, %v2467_v39  ;;  %v992_v4 = vmul.f32 %v2467_v39, %v2667_v48 }
 0x144   : > { %v2147_v1 = vpop.eup %2146  ;;  %1566 = vst [vmem:[%s2588_s22 + $0x158] sm:$0xff] %v1502_v5  ;;  %v1500_v6 = vmul.f32 %v2145_v34, %v2631_v58  ;;  %2166 = vpow2.f32 %v1802_v31 }
 0x145   : > { %v2149_v53 = vpop.eup %2148  ;;  %1532 = vst [vmem:[%s2588_s22 + $0x48] sm:$0xff] %v1468_v62  ;;  %v1473_v22 = vmul.f32 %v2147_v1, %v2641_v63  ;;  %2168 = vpow2.f32 %v1834_v0  ;;  %v994_v63 = vmul.f32 %v2660_v55, %v2467_v39  ;;  %v2828_v0 = vadd.f32 %v2472_v41, %v989_v17 }
 0x146   : > { %v2151_v36 = vpop.eup %2150  ;;  %1564 = vst [vmem:[%s2588_s22 + $0x148] sm:$0xff] %v1500_v6  ;;  %v1505_v57 = vmul.f32 %v2149_v53, %v2647_v45  ;;  %2170 = vpow2.f32 %v1805_v59  ;;  %v2833_v55 = vadd.f32 %v2472_v41, %v962_v35  ;;  %v2839_v1 = vadd.f32 %v2472_v41, %v960_v30 }
 0x147   : > { %v2153_v15 = vpop.eup %2152  ;;  %1537 = vst [vmem:[%s2588_s22 + $0x70] sm:$0xff] %v1473_v22  ;;  %v1279_v58 = vadd.f32 1.0, %v2151_v36  ;;  %2172 = vpow2.f32 %v1837_v32  ;;  %v2836_v61 = vadd.f32 %v2472_v41, %v994_v63  ;;  %v2843_v53 = vadd.f32 %v2472_v41, %v992_v4 }
 0x148   : > { %v2155_v14 = vpop.eup %2154  ;;  %1569 = vst [vmem:[%s2588_s22 + $0x170] sm:$0xff] %v1505_v57  ;;  %v1311_v23 = vadd.f32 1.0, %v2153_v15  ;;  %2174 = vpow2.f32 %v1803_v33  ;;  %v1835_v33 = vmul.f32 -1.442695, %v2828_v0  ;;  %v1808_v57 = vmul.f32 -1.442695, %v2833_v55 }
 0x149   : > { %v2157_v31 = vpop.eup %2156  ;;  %2176 = vrcp.f32 %v1279_v58  ;;  %v1282_v45 = vadd.f32 1.0, %v2155_v14  ;;  %v963_v17 = vmul.f32 %v2671_v7, %v2467_v39  ;;  %v1840_v35 = vmul.f32 -1.442695, %v2836_v61 }
 0x14a   : > { %v2159_v44 = vpop.eup %2158  ;;  %2178 = vrcp.f32 %v1311_v23  ;;  %v1314_v38 = vadd.f32 1.0, %v2157_v31  ;;  %v995_v14 = vmul.f32 %v2673_v52, %v2467_v39  ;;  %v1806_v31 = vmul.f32 -1.442695, %v2839_v1 }
 0x14b   : > { %v2161_v56 = vpop.eup %2160  ;;  %2180 = vrcp.f32 %v1282_v45  ;;  %v1280_v5 = vadd.f32 1.0, %v2159_v44  ;;  %v961_v45 = vmul.f32 %v2467_v39, %v2679_v13  ;;  %v1838_v7 = vmul.f32 -1.442695, %v2843_v53 }
 0x14c   : > { %v2163_v59 = vpop.eup %2162  ;;  %2182 = vrcp.f32 %v1314_v38  ;;  %v1312_v34 = vadd.f32 1.0, %v2161_v56  ;;  %v993_v38 = vmul.f32 %v2467_v39, %v2681_v11  ;;  %v2858_v56 = vadd.f32 %v2472_v41, %v963_v17 }
 0x14d   : > { %v2165_v62 = vpop.eup %2164  ;;  %2184 = vrcp.f32 %v1280_v5  ;;  %v1285_v32 = vadd.f32 1.0, %v2163_v59  ;;  %v966_v5 = vmul.f32 %v2699_v37, %v2467_v39  ;;  %v998_v11 = vmul.f32 %v2701_v49, %v2467_v39 }
 0x14e   : > { %v2167_v6 = vpop.eup %2166  ;;  %2186 = vrcp.f32 %v1312_v34  ;;  %v1317_v48 = vadd.f32 1.0, %v2165_v62  ;;  %v2864_v34 = vadd.f32 %v2472_v41, %v995_v14  ;;  %v964_v37 = vmul.f32 %v2467_v39, %v2706_v43 }
 0x14f   : > { %v2169_v22 = vpop.eup %2168  ;;  %2188 = vrcp.f32 %v1285_v32  ;;  %v1283_v36 = vadd.f32 1.0, %v2167_v6  ;;  %v2870_v6 = vadd.f32 %v2472_v41, %v961_v45  ;;  %v1809_v43 = vmul.f32 -1.442695, %v2858_v56 }
 0x150   : > { %v2171_v15 = vpop.eup %2170  ;;  %2190 = vrcp.f32 %v1317_v48  ;;  %v1315_v58 = vadd.f32 1.0, %v2169_v22  ;;  %v2877_v22 = vadd.f32 %v2472_v41, %v993_v38  ;;  %v2885_v17 = vadd.f32 %v2472_v41, %v966_v5 }
 0x151   : > { %v2173_v23 = vpop.eup %2172  ;;  %2192 = vrcp.f32 %v1283_v36  ;;  %v1286_v63 = vadd.f32 1.0, %v2171_v15  ;;  %v1841_v15 = vmul.f32 -1.442695, %v2864_v34  ;;  %v2897_v14 = vadd.f32 %v2472_v41, %v964_v37 }
 0x152   : > { %v2175_v30 = vpop.eup %2174  ;;  %2194 = vrcp.f32 %v1315_v58  ;;  %v1318_v44 = vadd.f32 1.0, %v2173_v23 }
 0x153   : > { %v2177_v4 = vpop.eup %2176  ;;  %2196 = vrcp.f32 %v1286_v63  ;;  %v1284_v52 = vadd.f32 1.0, %v2175_v30  ;;  %v1810_v38 = vmul.f32 -1.442695, %v2897_v14 }
 0x154   : > { %v2179_v59 = vpop.eup %2178  ;;  %v1471_v13 = vmul.f32 %v2177_v4, %v2692_v47  ;;  %2198 = vrcp.f32 %v1318_v44 }
 0x155   : > { %v2181_v62 = vpop.eup %2180  ;;  %v1503_v32 = vmul.f32 %v2179_v59, %v2697_v26  ;;  %2200 = vrcp.f32 %v1284_v52  ;;  %v996_v26 = vmul.f32 %v2467_v39, %v2708_v54  ;;  %v2891_v54 = vadd.f32 %v2472_v41, %v998_v11 }
 0x156   : > { %v2183_v47 = vpop.eup %2182  ;;  %1535 = vst [vmem:[%s2588_s22 + $0x60] sm:$0xff] %v1471_v13  ;;  %v1474_v48 = vmul.f32 %v2181_v62, %v2704_v50  ;;  %2202 = vpow2.f32 %v1835_v33  ;;  %v967_v13 = vmul.f32 %v2713_v60, %v2467_v39  ;;  %v2927_v62 = vld [vmem:[%s3066_s2] ss:$0 sm:$0xff] }
 0x157   : > { %v2185_v49 = vpop.eup %2184  ;;  %1567 = vst [vmem:[%s2588_s22 + $0x160] sm:$0xff] %v1503_v32  ;;  %v1506_v36 = vmul.f32 %v2183_v47, %v2711_v19  ;;  %2204 = vpow2.f32 %v1808_v57  ;;  %v1807_v57 = vmul.f32 -1.442695, %v2870_v6  ;;  %v2903_v63 = vadd.f32 %v2472_v41, %v996_v26 }
 0x158   : > { %v2187_v50 = vpop.eup %2186  ;;  %1538 = vst [vmem:[%s2588_s22 + $0x78] sm:$0xff] %v1474_v48  ;;  %v1472_v33 = vmul.f32 %v2185_v49, %v2719_v12  ;;  %2206 = vpow2.f32 %v1840_v35  ;;  %v1839_v35 = vmul.f32 -1.442695, %v2877_v22  ;;  %v997_v47 = vmul.f32 %v2927_v62, %v2723_v25 }
 0x159   : > { %v2189_v58 = vpop.eup %2188  ;;  %1570 = vst [vmem:[%s2588_s22 + $0x178] sm:$0xff] %v1506_v36  ;;  %v1504_v19 = vmul.f32 %v2187_v50, %v2738_v2  ;;  %2208 = vpow2.f32 %v1806_v31  ;;  %v1812_v31 = vmul.f32 -1.442695, %v2885_v17  ;;  %v1842_v52 = vmul.f32 -1.442695, %v2903_v63 }
 0x15a   : > { %v2191_v23 = vpop.eup %2190  ;;  %1536 = vst [vmem:[%s2588_s22 + $0x68] sm:$0xff] %v1472_v33  ;;  %v1477_v12 = vmul.f32 %v2189_v58, %v2748_v8  ;;  %2210 = vpow2.f32 %v1838_v7  ;;  %v1844_v8 = vmul.f32 -1.442695, %v2891_v54 }
 0x15b   : > { %v2193_v45 = vpop.eup %2192  ;;  %1568 = vst [vmem:[%s2588_s22 + $0x168] sm:$0xff] %v1504_v19  ;;  %v1509_v2 = vmul.f32 %v2191_v23, %v2758_v27  ;;  %2212 = vpow2.f32 %v1809_v43 }
 0x15c   : > { %v2195_v30 = vpop.eup %2194  ;;  %1541 = vst [vmem:[%s2588_s22 + $0x90] sm:$0xff] %v1477_v12  ;;  %v1475_v44 = vmul.f32 %v2193_v45, %v2769_v42  ;;  %2214 = vpow2.f32 %v1841_v15 }
 0x15d   : > { %v2197_v7 = vpop.eup %2196  ;;  %1573 = vst [vmem:[%s2588_s22 + $0x190] sm:$0xff] %v1509_v2  ;;  %v1507_v41 = vmul.f32 %v2195_v30, %v2781_v24  ;;  %2216 = vpow2.f32 %v1807_v57  ;;  %v1002_v30 = vmul.f32 %v2927_v62, %v2744_v51 }
 0x15e   : > { %v2199_v27 = vpop.eup %2198  ;;  %1539 = vst [vmem:[%s2588_s22 + $0x80] sm:$0xff] %v1475_v44  ;;  %v1478_v4 = vmul.f32 %v2197_v7, %v2787_v9  ;;  %2218 = vpow2.f32 %v1839_v35  ;;  %v970_v35 = vmul.f32 %v2927_v62, %v2742_v29 }
 0x15f   : > { %v2201_v42 = vpop.eup %2200  ;;  %1571 = vst [vmem:[%s2588_s22 + $0x180] sm:$0xff] %v1507_v41  ;;  %v1510_v5 = vmul.f32 %v2199_v27, %v2793_v10  ;;  %2220 = vpow2.f32 %v1812_v31  ;;  %v999_v10 = vmul.f32 %v2927_v62, %v2715_v20  ;;  %v2939_v20 = vld [vmem:[%s3067_s3] ss:$0 sm:$0xff]  ;;  %v968_v41 = vmul.f32 %v2927_v62, %v2752_v28 }
 0x160   : > { %v2203_v59 = vpop.eup %2202  ;;  %1542 = vst [vmem:[%s2588_s22 + $0x98] sm:$0xff] %v1478_v4  ;;  %v1476_v24 = vmul.f32 %v2201_v42, %v2799_v16  ;;  %2222 = vpow2.f32 %v1844_v8  ;;  %v965_v16 = vmul.f32 %v2927_v62, %v2721_v21  ;;  %v2942_v49 = vadd.f32 %v2939_v20, %v967_v13  ;;  %v3070_v4 = vld [vmem:[#allocation2_spill] sm:$0xff] }
 0x161   : > { %v2205_v11 = vpop.eup %2204  ;;  %1574 = vst [vmem:[%s2588_s22 + $0x198] sm:$0xff] %v1510_v5  ;;  %v1316_v9 = vadd.f32 1.0, %v2203_v59  ;;  %2224 = vpow2.f32 %v1810_v38  ;;  %v2945_v43 = vadd.f32 %v2939_v20, %v999_v10  ;;  %v2951_v19 = vadd.f32 %v2939_v20, %v997_v47 }
 0x162   : > { %v2207_v32 = vpop.eup %2206  ;;  %1540 = vst [vmem:[%s2588_s22 + $0x88] sm:$0xff] %v1476_v24  ;;  %v1289_v37 = vadd.f32 1.0, %v2205_v11  ;;  %2226 = vpow2.f32 %v1842_v52  ;;  %v2948_v33 = vadd.f32 %v2939_v20, %v965_v16  ;;  %v1813_v12 = vmul.f32 -1.442695, %v2942_v49 }
 0x163   : > { %v2209_v39 = vpop.eup %2208  ;;  %2228 = vrcp.f32 %v1316_v9  ;;  %v1321_v60 = vadd.f32 1.0, %v2207_v32  ;;  %v1845_v31 = vmul.f32 -1.442695, %v2945_v43  ;;  %v1843_v29 = vmul.f32 -1.442695, %v2951_v19 }
 0x164   : > { %v2211_v48 = vpop.eup %2210  ;;  %2230 = vrcp.f32 %v1289_v37  ;;  %v1287_v26 = vadd.f32 1.0, %v2209_v39  ;;  %v1811_v7 = vmul.f32 -1.442695, %v2948_v33  ;;  %v1000_v52 = vmul.f32 %v2927_v62, %v3070_v4 }
 0x165   : > { %v2213_v36 = vpop.eup %2212  ;;  %2232 = vrcp.f32 %v1321_v60  ;;  %v1319_v21 = vadd.f32 1.0, %v2211_v48  ;;  %v2966_v51 = vadd.f32 %v2939_v20, %v970_v35  ;;  %v971_v59 = vmul.f32 %v2927_v62, %v2762_v40 }
 0x166   : > { %v2215_v50 = vpop.eup %2214  ;;  %2234 = vrcp.f32 %v1287_v26  ;;  %v1290_v25 = vadd.f32 1.0, %v2213_v36  ;;  %v2971_v13 = vadd.f32 %v2939_v20, %v1002_v30  ;;  %v1003_v11 = vmul.f32 %v2927_v62, %v2764_v3 }
 0x167   : > { %v2217_v15 = vpop.eup %2216  ;;  %2236 = vrcp.f32 %v1319_v21  ;;  %v1322_v58 = vadd.f32 1.0, %v2215_v50  ;;  %v2977_v32 = vadd.f32 %v2939_v20, %v968_v41  ;;  %v969_v40 = vmul.f32 %v2927_v62, %v2773_v46 }
 0x168   : > { %v2219_v57 = vpop.eup %2218  ;;  %2238 = vrcp.f32 %v1290_v25  ;;  %v1288_v23 = vadd.f32 1.0, %v2217_v15  ;;  %v2983_v39 = vadd.f32 %v2939_v20, %v1000_v52  ;;  %v1001_v3 = vmul.f32 %v2927_v62, %v2775_v18 }
 0x169   : > { %v2221_v45 = vpop.eup %2220  ;;  %2240 = vrcp.f32 %v1322_v58  ;;  %v1320_v2 = vadd.f32 1.0, %v2219_v57  ;;  %v1816_v47 = vmul.f32 -1.442695, %v2966_v51  ;;  %v2991_v46 = vadd.f32 %v2939_v20, %v971_v59 }
 0x16a   : > { %v2223_v44 = vpop.eup %2222  ;;  %2242 = vrcp.f32 %v1288_v23  ;;  %v1293_v8 = vadd.f32 1.0, %v2221_v45  ;;  %v1848_v26 = vmul.f32 -1.442695, %v2971_v13  ;;  %v2997_v18 = vadd.f32 %v2939_v20, %v1003_v11 }
 0x16b   : > { %v2225_v38 = vpop.eup %2224  ;;  %2244 = vrcp.f32 %v1320_v2  ;;  %v1325_v27 = vadd.f32 1.0, %v2223_v44  ;;  %v1814_v36 = vmul.f32 -1.442695, %v2977_v32  ;;  %v3003_v21 = vadd.f32 %v2939_v20, %v969_v40 }
 0x16c   : > { %v2227_v42 = vpop.eup %2226  ;;  %2246 = vrcp.f32 %v1293_v8  ;;  %v1291_v5 = vadd.f32 1.0, %v2225_v38  ;;  %v1846_v25 = vmul.f32 -1.442695, %v2983_v39  ;;  %v3009_v15 = vadd.f32 %v2939_v20, %v1001_v3 }
 0x16d   : > { %v2229_v24 = vpop.eup %2228  ;;  %2248 = vrcp.f32 %v1325_v27  ;;  %v1323_v28 = vadd.f32 1.0, %v2227_v42  ;;  %v1817_v57 = vmul.f32 -1.442695, %v2991_v46 }
 0x16e   : > { %v2231_v9 = vpop.eup %2230  ;;  %v1508_v10 = vmul.f32 %v2229_v24, %v2828_v0  ;;  %2250 = vrcp.f32 %v1291_v5 }
 0x16f   : > { %v2233_v37 = vpop.eup %2232  ;;  %v1481_v16 = vmul.f32 %v2231_v9, %v2833_v55  ;;  %2252 = vrcp.f32 %v1323_v28 }
 0x170   : > { %v2235_v0 = vpop.eup %2234  ;;  %1572 = vst [vmem:[%s2588_s22 + $0x188] sm:$0xff] %v1508_v10  ;;  %v1513_v60 = vmul.f32 %v2233_v37, %v2836_v61  ;;  %2254 = vpow2.f32 %v1813_v12 }
 0x171   : > { %v2237_v55 = vpop.eup %2236  ;;  %1545 = vst [vmem:[%s2588_s22 + $0xb0] sm:$0xff] %v1481_v16  ;;  %v1479_v48 = vmul.f32 %v2235_v0, %v2839_v1  ;;  %2256 = vpow2.f32 %v1845_v31 }
 0x172   : > { %v2239_v62 = vpop.eup %2238  ;;  %1577 = vst [vmem:[%s2588_s22 + $0x1b0] sm:$0xff] %v1513_v60  ;;  %v1511_v61 = vmul.f32 %v2237_v55, %v2843_v53  ;;  %2258 = vpow2.f32 %v1811_v7 }
 0x173   : > { %v2241_v50 = vpop.eup %2240  ;;  %1543 = vst [vmem:[%s2588_s22 + $0xa0] sm:$0xff] %v1479_v48  ;;  %v1482_v1 = vmul.f32 %v2239_v62, %v2858_v56  ;;  %2260 = vpow2.f32 %v1843_v29  ;;  %v1849_v56 = vmul.f32 -1.442695, %v2997_v18 }
 0x174   : > { %v2243_v58 = vpop.eup %2242  ;;  %1575 = vst [vmem:[%s2588_s22 + $0x1a0] sm:$0xff] %v1511_v61  ;;  %v1514_v53 = vmul.f32 %v2241_v50, %v2864_v34  ;;  %2262 = vpow2.f32 %v1816_v47  ;;  %v1815_v34 = vmul.f32 -1.442695, %v3003_v21 }
 0x175   : > { %v2245_v23 = vpop.eup %2244  ;;  %1546 = vst [vmem:[%s2588_s22 + $0xb8] sm:$0xff] %v1482_v1  ;;  %v1480_v12 = vmul.f32 %v2243_v58, %v2870_v6  ;;  %2264 = vpow2.f32 %v1848_v26  ;;  %v1847_v6 = vmul.f32 -1.442695, %v3009_v15 }
 0x176   : > { %v2247_v35 = vpop.eup %2246  ;;  %1578 = vst [vmem:[%s2588_s22 + $0x1b8] sm:$0xff] %v1514_v53  ;;  %v1512_v20 = vmul.f32 %v2245_v23, %v2877_v22  ;;  %2266 = vpow2.f32 %v1814_v36 }
 0x177   : > { %v2249_v45 = vpop.eup %2248  ;;  %1544 = vst [vmem:[%s2588_s22 + $0xa8] sm:$0xff] %v1480_v12  ;;  %v1485_v2 = vmul.f32 %v2247_v35, %v2885_v17  ;;  %2268 = vpow2.f32 %v1846_v25 }
 0x178   : > { %v2251_v31 = vpop.eup %2250  ;;  %1576 = vst [vmem:[%s2588_s22 + $0x1a8] sm:$0xff] %v1512_v20  ;;  %v1517_v30 = vmul.f32 %v2249_v45, %v2891_v54  ;;  %2270 = vpow2.f32 %v1817_v57 }
 0x179   : > { %v2253_v44 = vpop.eup %2252  ;;  %1549 = vst [vmem:[%s2588_s22 + $0xd0] sm:$0xff] %v1485_v2  ;;  %v1483_v22 = vmul.f32 %v2251_v31, %v2897_v14  ;;  %2272 = vpow2.f32 %v1849_v56 }
 0x17a   : > { %v2255_v8 = vpop.eup %2254  ;;  %1581 = vst [vmem:[%s2588_s22 + $0x1d0] sm:$0xff] %v1517_v30  ;;  %v1515_v7 = vmul.f32 %v2253_v44, %v2903_v63  ;;  %2274 = vpow2.f32 %v1815_v34 }
 0x17b   : > { %v2257_v17 = vpop.eup %2256  ;;  %1547 = vst [vmem:[%s2588_s22 + $0xc0] sm:$0xff] %v1483_v22  ;;  %v1294_v41 = vadd.f32 1.0, %v2255_v8  ;;  %2276 = vpow2.f32 %v1847_v6 }
 0x17c   : > { %v2259_v38 = vpop.eup %2258  ;;  %1579 = vst [vmem:[%s2588_s22 + $0x1c0] sm:$0xff] %v1515_v7  ;;  %v1326_v27 = vadd.f32 1.0, %v2257_v17 }
 0x17d   : > { %v2261_v29 = vpop.eup %2260  ;;  %2278 = vrcp.f32 %v1294_v41  ;;  %v1292_v54 = vadd.f32 1.0, %v2259_v38 }
 0x17e   : > { %v2263_v4 = vpop.eup %2262  ;;  %2280 = vrcp.f32 %v1326_v27  ;;  %v1324_v52 = vadd.f32 1.0, %v2261_v29 }
 0x17f   : > { %v2265_v14 = vpop.eup %2264  ;;  %2282 = vrcp.f32 %v1292_v54  ;;  %v1297_v42 = vadd.f32 1.0, %v2263_v4 }
 0x180   : > { %v2267_v5 = vpop.eup %2266  ;;  %2284 = vrcp.f32 %v1324_v52  ;;  %v1329_v63 = vadd.f32 1.0, %v2265_v14 }
 0x181   : > { %v2269_v59 = vpop.eup %2268  ;;  %2286 = vrcp.f32 %v1297_v42  ;;  %v1295_v24 = vadd.f32 1.0, %v2267_v5 }
 0x182   : > { %v2271_v28 = vpop.eup %2270  ;;  %2288 = vrcp.f32 %v1329_v63  ;;  %v1327_v11 = vadd.f32 1.0, %v2269_v59 }
 0x183   : > { %v2273_v9 = vpop.eup %2272  ;;  %2290 = vrcp.f32 %v1295_v24  ;;  %v1298_v10 = vadd.f32 1.0, %v2271_v28 }
 0x184   : > { %v2275_v40 = vpop.eup %2274  ;;  %2292 = vrcp.f32 %v1327_v11  ;;  %v1330_v37 = vadd.f32 1.0, %v2273_v9 }
 0x185   : > { %v2277_v16 = vpop.eup %2276  ;;  %2294 = vrcp.f32 %v1298_v10  ;;  %v1296_v3 = vadd.f32 1.0, %v2275_v40 }
 0x186   : > { %2296 = vrcp.f32 %v1330_v37  ;;  %v1328_v0 = vadd.f32 1.0, %v2277_v16 }
 0x187   : > { %v2279_v60 = vpop.eup %2278  ;;  %2298 = vrcp.f32 %v1296_v3 }
 0x188   : > { %v2281_v47 = vpop.eup %2280  ;;  %v1486_v55 = vmul.f32 %v2279_v60, %v2942_v49  ;;  %2300 = vrcp.f32 %v1328_v0 }
 0x189   : > { %v2283_v48 = vpop.eup %2282  ;;  %v1518_v26 = vmul.f32 %v2281_v47, %v2945_v43 }
 0x18a   : > { %v2285_v62 = vpop.eup %2284  ;;  %1550 = vst [vmem:[%s2588_s22 + $0xd8] sm:$0xff] %v1486_v55  ;;  %v1484_v61 = vmul.f32 %v2283_v48, %v2948_v33 }
 0x18b   : > { %v2287_v36 = vpop.eup %2286  ;;  %1582 = vst [vmem:[%s2588_s22 + $0x1d8] sm:$0xff] %v1518_v26  ;;  %v1516_v50 = vmul.f32 %v2285_v62, %v2951_v19 }
 0x18c   : > { %v2289_v1 = vpop.eup %2288  ;;  %1548 = vst [vmem:[%s2588_s22 + $0xc8] sm:$0xff] %v1484_v61  ;;  %v1489_v49 = vmul.f32 %v2287_v36, %v2966_v51 }
 0x18d   : > { %v2291_v25 = vpop.eup %2290  ;;  %1580 = vst [vmem:[%s2588_s22 + $0x1c8] sm:$0xff] %v1516_v50  ;;  %v1521_v43 = vmul.f32 %v2289_v1, %v2971_v13 }
 0x18e   : > { %v2293_v58 = vpop.eup %2292  ;;  %1553 = vst [vmem:[%s2588_s22 + $0xf0] sm:$0xff] %v1489_v49  ;;  %v1487_v33 = vmul.f32 %v2291_v25, %v2977_v32 }
 0x18f   : > { %v2295_v53 = vpop.eup %2294  ;;  %1585 = vst [vmem:[%s2588_s22 + $0x1f0] sm:$0xff] %v1521_v43  ;;  %v1519_v19 = vmul.f32 %v2293_v58, %v2983_v39 }
 0x190   : > { %v2297_v57 = vpop.eup %2296  ;;  %1551 = vst [vmem:[%s2588_s22 + $0xe0] sm:$0xff] %v1487_v33  ;;  %v1490_v51 = vmul.f32 %v2295_v53, %v2991_v46 }
 0x191   : > { %v2299_v23 = vpop.eup %2298  ;;  %1583 = vst [vmem:[%s2588_s22 + $0x1e0] sm:$0xff] %v1519_v19  ;;  %v1522_v12 = vmul.f32 %v2297_v57, %v2997_v18 }
 0x192   : > { %v2301_v13 = vpop.eup %2300  ;;  %1554 = vst [vmem:[%s2588_s22 + $0xf8] sm:$0xff] %v1490_v51  ;;  %v1488_v56 = vmul.f32 %v2299_v23, %v3003_v21 }
 0x193   : > { %1586 = vst [vmem:[%s2588_s22 + $0x1f8] sm:$0xff] %v1522_v12  ;;  %v1520_v32 = vmul.f32 %v2301_v13, %v3009_v15 }
 0x194   : > { %1552 = vst [vmem:[%s2588_s22 + $0xe8] sm:$0xff] %v1488_v56 }
 0x195   : > { %1584 = vst [vmem:[%s2588_s22 + $0x1e8] sm:$0xff] %v1520_v32 }
 0x196 PF: > { %s14_s17 = sadd.s32 1, %s2326_s17   ;;  %s3071_s15 = smov %s2322_s16 }
 0x197   : > { %p11_p5 = scmp.ge.s32.totalorder %s14_s17, 6   ;;  %s3072_s16 = smov %s3074_s18 }
 0x199   :  { %13 = sbr.rel (!%p11_p5) target bundleno = 2 (0x2), region = 75 }

// kernel: _lambda_.28
= control target key start
LH: loop header
LB: loop body
LE: loop exit
PB: predicated region body
PF: predicated region fallthrough
CT: control target
= control target key end

     0   :  { %vm278_vm0 = vcmask 588800   ;;  %vm375_vm1 = vcmask 1043456   ;;  %s2745_s1 = inlined_call_operand.vmem [shape: bf16[72,128], index: 1, kind: input, shape index: {}]   ;;  %s2746_s0 = inlined_call_operand.vmem [shape: bf16[512,72], index: 0, kind: input, shape index: {}]   ;;  %s2747_s2 = inlined_call_operand.vmem [shape: f32[1,128], index: 2, kind: input, shape index: {}]   ;;  %s2748_s3 = inlined_call_operand.vmem [shape: f32[1,128], index: 3, kind: input, shape index: {}]   ;;  %s2749_s4 = inlined_call_operand.vmem [shape: f32[512,128], index: 4, kind: output, shape index: {}]  }
   0x1   :  { %v1584_v0 = vld [vmem:[%s2745_s1] sm:$0xff]   ;;  %v1585_v1 = vld [vmem:[%s2745_s1 + $0x8] sm:$0xff]   ;;  %v1586_v2 = vld [vmem:[%s2745_s1 + $0x10] sm:$0xff]  }
   0x2   :  { %1498 = vmatprep.subr.bf16.mxu0 %v1584_v0  ;;  %1572 = vmatprep.subr.bf16.mxu1 %v1584_v0  ;;  %v1589_v3 = vld [vmem:[%s2746_s0] sm:$0xff]   ;;  %v1587_v5 = vld [vmem:[%s2745_s1 + $0x18] sm:$0xff]   ;;  %v1591_v8 = vld [vmem:[%s2746_s0 + $0x8] sm:$0xff]  }
   0x3   :  { %1499 = vmatpush3.bf16.msra.mxu0 %v1584_v0  ;;  %1577 = vmatpush3.bf16.msra.mxu1 %v1584_v0  ;;  %v1590_v4 = vld [vmem:[%s2746_s0 + $0x80] sm:$0xff]   ;;  %v1592_v9 = vld [vmem:[%s2746_s0 + $0x88] sm:$0xff]   ;;  %v1593_v10 = vld [vmem:[%s2746_s0 + $0x10] sm:$0xff]  }
   0x4   :  { %1500 = vmatprep.subr.bf16.mxu0 %v1585_v1  ;;  %1573 = vmatprep.subr.bf16.mxu1 %v1585_v1  ;;  %v1588_v6 = vld [vmem:[%s2745_s1 + $0x20] ss:$0 sps:$4 sm:$0xff]   ;;  %v1594_v11 = vld [vmem:[%s2746_s0 + $0x90] sm:$0xff]   ;;  %v1595_v12 = vld [vmem:[%s2746_s0 + $0x18] sm:$0xff]  }
   0x5   :  { %1508 = vmatprep.mubr.msk.bf16.mxu0 %vm278_vm0, %v1589_v3  ;;  %1540 = vmatprep.mubr.msk.bf16.mxu1 %vm278_vm0, %v1590_v4  ;;  %v377_v7 = vsel %vm375_vm1, %v1588_v6, 0  ;;  %v1596_v13 = vld [vmem:[%s2746_s0 + $0x98] sm:$0xff]   ;;  %v1597_v14 = vld [vmem:[%s2746_s0 + $0x20] sm:$0xff]   ;;  %v1599_v16 = vld [vmem:[%s2746_s0 + $0x28] sm:$0xff]  }
   0x6   :  { %v1598_v15 = vld [vmem:[%s2746_s0 + $0xa0] sm:$0xff]   ;;  %v1600_v17 = vld [vmem:[%s2746_s0 + $0xa8] sm:$0xff]   ;;  %v1601_v18 = vld [vmem:[%s2746_s0 + $0x30] sm:$0xff]  }
   0x7   :  { %1501 = vmatpush3.bf16.msra.mxu0 %v1585_v1  ;;  %1578 = vmatpush3.bf16.msra.mxu1 %v1585_v1  ;;  %v1602_v19 = vld [vmem:[%s2746_s0 + $0xb0] sm:$0xff]   ;;  %v1603_v20 = vld [vmem:[%s2746_s0 + $0x38] sm:$0xff]   ;;  %v1605_v22 = vld [vmem:[%s2746_s0 + $0x40] sm:$0xff]  }
   0x8   :  { %1502 = vmatprep.subr.bf16.mxu0 %v1586_v2  ;;  %1574 = vmatprep.subr.bf16.mxu1 %v1586_v2  ;;  %v1604_v21 = vld [vmem:[%s2746_s0 + $0xb8] sm:$0xff]   ;;  %v1606_v23 = vld [vmem:[%s2746_s0 + $0xc0] sm:$0xff]   ;;  %v1607_v24 = vld [vmem:[%s2746_s0 + $0x48] sm:$0xff]  }
   0x9   :  { %v1608_v25 = vld [vmem:[%s2746_s0 + $0xc8] sm:$0xff]   ;;  %v1609_v26 = vld [vmem:[%s2746_s0 + $0x50] sm:$0xff]   ;;  %v1611_v28 = vld [vmem:[%s2746_s0 + $0x58] sm:$0xff]  }
   0xa   :  { %v1610_v27 = vld [vmem:[%s2746_s0 + $0xd0] sm:$0xff]   ;;  %v1612_v29 = vld [vmem:[%s2746_s0 + $0xd8] sm:$0xff]   ;;  %v1613_v30 = vld [vmem:[%s2746_s0 + $0x60] sm:$0xff]  }
   0xb   :  { %1503 = vmatpush3.bf16.msra.mxu0 %v1586_v2  ;;  %1579 = vmatpush3.bf16.msra.mxu1 %v1586_v2  ;;  %v1614_v31 = vld [vmem:[%s2746_s0 + $0xe0] sm:$0xff]   ;;  %v1615_v32 = vld [vmem:[%s2746_s0 + $0x68] sm:$0xff]   ;;  %v1617_v34 = vld [vmem:[%s2746_s0 + $0x70] sm:$0xff]  }
   0xc   :  { %1504 = vmatprep.subr.bf16.mxu0 %v1587_v5  ;;  %1575 = vmatprep.subr.bf16.mxu1 %v1587_v5  ;;  %v1616_v33 = vld [vmem:[%s2746_s0 + $0xe8] sm:$0xff]   ;;  %v1618_v35 = vld [vmem:[%s2746_s0 + $0xf0] sm:$0xff]   ;;  %v1619_v36 = vld [vmem:[%s2746_s0 + $0x78] sm:$0xff]  }
   0xd   :  { %v1620_v37 = vld [vmem:[%s2746_s0 + $0xf8] sm:$0xff]   ;;  %v2050_v38 = vld [vmem:[%s2747_s2] ss:$0 sm:$0xff] }
   0xe   :  { %v2055_v40 = vld [vmem:[%s2748_s3] ss:$0 sm:$0xff] }
   0xf   :  { %1505 = vmatpush3.bf16.msra.mxu0 %v1587_v5  ;;  %1580 = vmatpush3.bf16.msra.mxu1 %v1587_v5 }
  0x10   :  { %1582 = vmatprep.subr.msk.bf16.mxu0 %vm375_vm1, %v1588_v6  ;;  %1583 = vmatprep.subr.msk.bf16.mxu1 %vm375_vm1, %v1588_v6 }
  0x13   :  { %1507 = vmatpush3.bf16.msra.mxu0 %v377_v7  ;;  %1581 = vmatpush3.bf16.msra.mxu1 %v377_v7 }
  0x16   :  { %1509 = vmatmul.mubr.msk.bf16.vlgmr.msra.gmra.mrb[0].mxu0 %vm278_vm0, %v1591_v8  ;;  %1541 = vmatmul.mubr.msk.bf16.vlgmr.msra.gmra.mrb[0].mxu1 %vm278_vm0, %v1592_v9 }
  0x17   :  { %1512 = vmatprep.mubr.msk.bf16.mxu0 %vm278_vm0, %v1593_v10  ;;  %1544 = vmatprep.mubr.msk.bf16.mxu1 %vm278_vm0, %v1594_v11 }
  0x1e   :  { %1513 = vmatmul.mubr.msk.bf16.gmra.mrb[4].mxu0 %vm278_vm0, %v1595_v12  ;;  %1545 = vmatmul.mubr.msk.bf16.gmra.mrb[4].mxu1 %vm278_vm0, %v1596_v13 }
  0x1f   :  { %1516 = vmatprep.mubr.msk.bf16.mxu0 %vm278_vm0, %v1597_v14  ;;  %1548 = vmatprep.mubr.msk.bf16.mxu1 %vm278_vm0, %v1598_v15 }
  0x26   :  { %1517 = vmatmul.mubr.msk.bf16.gmra.mrb[8].mxu0 %vm278_vm0, %v1599_v16  ;;  %1549 = vmatmul.mubr.msk.bf16.gmra.mrb[8].mxu1 %vm278_vm0, %v1600_v17 }
  0x27   :  { %1520 = vmatprep.mubr.msk.bf16.mxu0 %vm278_vm0, %v1601_v18  ;;  %1552 = vmatprep.mubr.msk.bf16.mxu1 %vm278_vm0, %v1602_v19 }
  0x2e   :  { %1521 = vmatmul.mubr.msk.bf16.gmra.mrb[12].mxu0 %vm278_vm0, %v1603_v20  ;;  %1553 = vmatmul.mubr.msk.bf16.gmra.mrb[12].mxu1 %vm278_vm0, %v1604_v21 }
  0x2f   :  { %1524 = vmatprep.mubr.msk.bf16.mxu0 %vm278_vm0, %v1605_v22  ;;  %1556 = vmatprep.mubr.msk.bf16.mxu1 %vm278_vm0, %v1606_v23 }
  0x36   :  { %1525 = vmatmul.mubr.msk.bf16.gmra.mrb[16].mxu0 %vm278_vm0, %v1607_v24  ;;  %1557 = vmatmul.mubr.msk.bf16.gmra.mrb[16].mxu1 %vm278_vm0, %v1608_v25 }
  0x37   :  { %1528 = vmatprep.mubr.msk.bf16.mxu0 %vm278_vm0, %v1609_v26  ;;  %1560 = vmatprep.mubr.msk.bf16.mxu1 %vm278_vm0, %v1610_v27 }
  0x3e   :  { %1529 = vmatmul.mubr.msk.bf16.gmra.mrb[20].mxu0 %vm278_vm0, %v1611_v28  ;;  %1561 = vmatmul.mubr.msk.bf16.gmra.mrb[20].mxu1 %vm278_vm0, %v1612_v29 }
  0x3f   :  { %1532 = vmatprep.mubr.msk.bf16.mxu0 %vm278_vm0, %v1613_v30  ;;  %1564 = vmatprep.mubr.msk.bf16.mxu1 %vm278_vm0, %v1614_v31 }
  0x46   :  { %1533 = vmatmul.mubr.msk.bf16.gmra.mrb[24].mxu0 %vm278_vm0, %v1615_v32  ;;  %1565 = vmatmul.mubr.msk.bf16.gmra.mrb[24].mxu1 %vm278_vm0, %v1616_v33 }
  0x47   :  { %1536 = vmatprep.mubr.msk.bf16.mxu0 %vm278_vm0, %v1617_v34  ;;  %1568 = vmatprep.mubr.msk.bf16.mxu1 %vm278_vm0, %v1618_v35 }
  0x4e   :  { %1537 = vmatmul.mubr.msk.bf16.gmra.mrb[28].mxu0 %vm278_vm0, %v1619_v36  ;;  %1569 = vmatmul.mubr.msk.bf16.gmra.mrb[28].mxu1 %vm278_vm0, %v1620_v37 }
  0xe9   :  { %v1510_v39 = vpop.f32.mrb[0].mxu0  ;;  %v1542_v41 = vpop.f32.mrb[0].mxu1 }
  0xea   :  { %v677_v42 = vmul.f32 %v1510_v39, %v2050_v38  ;;  %v709_v43 = vmul.f32 %v1542_v41, %v2050_v38  ;;  %v413_v44 = vpop.f32.mrb[1].mxu0  ;;  %v541_v45 = vpop.f32.mrb[1].mxu1 }
  0xeb   :  { %v675_v46 = vmul.f32 %v2050_v38, %v413_v44  ;;  %v707_v47 = vmul.f32 %v2050_v38, %v541_v45  ;;  %v1511_v48 = vpop.f32.mrb[2].mxu0  ;;  %v1543_v49 = vpop.f32.mrb[2].mxu1 }
  0xec   :  { %v2062_v50 = vadd.f32 %v2055_v40, %v677_v42  ;;  %v2065_v51 = vadd.f32 %v2055_v40, %v709_v43  ;;  %v678_v52 = vmul.f32 %v1511_v48, %v2050_v38  ;;  %v710_v53 = vmul.f32 %v1543_v49, %v2050_v38  ;;  %v416_v54 = vpop.f32.mrb[3].mxu0  ;;  %v544_v55 = vpop.f32.mrb[3].mxu1 }
  0xed   :  { %v2070_v56 = vadd.f32 %v2055_v40, %v675_v46  ;;  %v2073_v57 = vadd.f32 %v2055_v40, %v707_v47  ;;  %v676_v58 = vmul.f32 %v2050_v38, %v416_v54  ;;  %v708_v59 = vmul.f32 %v2050_v38, %v544_v55 }
  0xee   :  { %v1399_v60 = vmul.f32 -1.442695, %v2062_v50  ;;  %v1431_v61 = vmul.f32 -1.442695, %v2065_v51  ;;  %v2080_v62 = vadd.f32 %v2055_v40, %v678_v52  ;;  %v2083_v63 = vadd.f32 %v2055_v40, %v710_v53 }
  0xef   :  { %v1397_v0 = vmul.f32 -1.442695, %v2070_v56  ;;  %v1429_v1 = vmul.f32 -1.442695, %v2073_v57  ;;  %v2088_v2 = vadd.f32 %v2055_v40, %v676_v58  ;;  %v2091_v3 = vadd.f32 %v2055_v40, %v708_v59 }
  0xf0   :  { %1621 = vpow2.f32 %v1399_v60  ;;  %v1400_v4 = vmul.f32 -1.442695, %v2080_v62  ;;  %v1432_v5 = vmul.f32 -1.442695, %v2083_v63 }
  0xf1   :  { %1623 = vpow2.f32 %v1431_v61  ;;  %v1514_v6 = vpop.f32.mrb[4].mxu0  ;;  %v1546_v7 = vpop.f32.mrb[4].mxu1  ;;  %v1398_v8 = vmul.f32 -1.442695, %v2088_v2  ;;  %v1430_v13 = vmul.f32 -1.442695, %v2091_v3 }
  0xf2   :  { %1625 = vpow2.f32 %v1397_v0  ;;  %v681_v9 = vmul.f32 %v1514_v6, %v2050_v38  ;;  %v713_v10 = vmul.f32 %v1546_v7, %v2050_v38  ;;  %v429_v11 = vpop.f32.mrb[5].mxu0  ;;  %v557_v12 = vpop.f32.mrb[5].mxu1 }
  0xf3   :  { %1627 = vpow2.f32 %v1429_v1  ;;  %v679_v14 = vmul.f32 %v2050_v38, %v429_v11  ;;  %v711_v15 = vmul.f32 %v2050_v38, %v557_v12  ;;  %v1515_v16 = vpop.f32.mrb[6].mxu0  ;;  %v1547_v17 = vpop.f32.mrb[6].mxu1 }
  0xf4   :  { %1629 = vpow2.f32 %v1400_v4  ;;  %v2102_v18 = vadd.f32 %v2055_v40, %v681_v9  ;;  %v2105_v19 = vadd.f32 %v2055_v40, %v713_v10  ;;  %v682_v20 = vmul.f32 %v1515_v16, %v2050_v38  ;;  %v432_v21 = vpop.f32.mrb[7].mxu0  ;;  %v560_v22 = vpop.f32.mrb[7].mxu1 }
  0xf5   :  { %1631 = vpow2.f32 %v1432_v5  ;;  %v2109_v23 = vadd.f32 %v2055_v40, %v679_v14  ;;  %v2112_v24 = vadd.f32 %v2055_v40, %v711_v15  ;;  %v714_v34 = vmul.f32 %v1547_v17, %v2050_v38 }
  0xf6   :  { %1633 = vpow2.f32 %v1398_v8  ;;  %v1403_v25 = vmul.f32 -1.442695, %v2102_v18  ;;  %v1435_v26 = vmul.f32 -1.442695, %v2105_v19  ;;  %v2117_v27 = vadd.f32 %v2055_v40, %v682_v20 }
  0xf7   :  { %1635 = vpow2.f32 %v1430_v13  ;;  %v1401_v28 = vmul.f32 -1.442695, %v2109_v23  ;;  %v1433_v29 = vmul.f32 -1.442695, %v2112_v24  ;;  %v680_v41 = vmul.f32 %v2050_v38, %v432_v21 }
  0xf8   :  { %1637 = vpow2.f32 %v1403_v25  ;;  %v1404_v30 = vmul.f32 -1.442695, %v2117_v27  ;;  %v712_v46 = vmul.f32 %v2050_v38, %v560_v22  ;;  %v2126_v55 = vadd.f32 %v2055_v40, %v714_v34 }
  0xf9   :  { %1639 = vpow2.f32 %v1435_v26  ;;  %v1518_v31 = vpop.f32.mrb[8].mxu0  ;;  %v1550_v32 = vpop.f32.mrb[8].mxu1  ;;  %v2130_v61 = vadd.f32 %v2055_v40, %v680_v41 }
  0xfa   :  { %v1622_v33 = vpop.eup %1621  ;;  %1641 = vpow2.f32 %v1401_v28  ;;  %v445_v35 = vpop.f32.mrb[9].mxu0  ;;  %v685_v58 = vmul.f32 %v1518_v31, %v2050_v38  ;;  %v717_v0 = vmul.f32 %v1550_v32, %v2050_v38  ;;  %v2134_v5 = vadd.f32 %v2055_v40, %v712_v46 }
  0xfb   :  { %v573_v36 = vpop.f32.mrb[9].mxu1  ;;  %v1624_v37 = vpop.eup %1623  ;;  %v1004_v39 = vadd.f32 1.0, %v1622_v33  ;;  %1643 = vpow2.f32 %v1433_v29  ;;  %v683_v8 = vmul.f32 %v2050_v38, %v445_v35  ;;  %v1436_v13 = vmul.f32 -1.442695, %v2126_v55 }
  0xfc   :  { %v1519_v42 = vpop.f32.mrb[10].mxu0  ;;  %v1551_v43 = vpop.f32.mrb[10].mxu1  ;;  %v1036_v45 = vadd.f32 1.0, %v1624_v37  ;;  %1645 = vpow2.f32 %v1404_v30  ;;  %v2139_v14 = vadd.f32 %v2055_v40, %v685_v58  ;;  %v1402_v21 = vmul.f32 -1.442695, %v2130_v61 }
  0xfd   :  { %v1626_v44 = vpop.eup %1625  ;;  %v448_v47 = vpop.f32.mrb[11].mxu0  ;;  %1647 = vrcp.f32 %v1004_v39  ;;  %v2147_v22 = vadd.f32 %v2055_v40, %v717_v0  ;;  %v1434_v30 = vmul.f32 -1.442695, %v2134_v5  ;;  %v715_v31 = vmul.f32 %v2050_v38, %v573_v36 }
  0xfe   :  { %v1628_v48 = vpop.eup %1627  ;;  %v1002_v49 = vadd.f32 1.0, %v1626_v44  ;;  %v576_v52 = vpop.f32.mrb[11].mxu1  ;;  %1649 = vrcp.f32 %v1036_v45  ;;  %v2160_v37 = vadd.f32 %v2055_v40, %v683_v8  ;;  %v686_v39 = vmul.f32 %v1519_v42, %v2050_v38 }
  0xff   :  { %v1630_v53 = vpop.eup %1629  ;;  %v1034_v54 = vadd.f32 1.0, %v1628_v48  ;;  %v1407_v45 = vmul.f32 -1.442695, %v2139_v14  ;;  %v718_v46 = vmul.f32 %v1551_v43, %v2050_v38  ;;  %v2169_v42 = vadd.f32 %v2055_v40, %v715_v31 }
 0x100   :  { %v1632_v59 = vpop.eup %1631  ;;  %1651 = vrcp.f32 %v1002_v49  ;;  %v1005_v60 = vadd.f32 1.0, %v1630_v53  ;;  %v1439_v49 = vmul.f32 -1.442695, %v2147_v22  ;;  %v684_v53 = vmul.f32 %v2050_v38, %v448_v47 }
 0x101   :  { %v1634_v1 = vpop.eup %1633  ;;  %1653 = vrcp.f32 %v1034_v54  ;;  %v1037_v4 = vadd.f32 1.0, %v1632_v59  ;;  %v1522_v9 = vpop.f32.mrb[12].mxu0  ;;  %v716_v59 = vmul.f32 %v2050_v38, %v576_v52  ;;  %v2174_v43 = vadd.f32 %v2055_v40, %v686_v39 }
 0x102   :  { %v1636_v6 = vpop.eup %1635  ;;  %1655 = vrcp.f32 %v1005_v60  ;;  %v1003_v7 = vadd.f32 1.0, %v1634_v1  ;;  %v1554_v10 = vpop.f32.mrb[12].mxu1  ;;  %v689_v1 = vmul.f32 %v1522_v9, %v2050_v38 }
 0x103   :  { %v1638_v11 = vpop.eup %1637  ;;  %1657 = vrcp.f32 %v1037_v4  ;;  %v1035_v12 = vadd.f32 1.0, %v1636_v6  ;;  %v2141_v15 = vpop.f32.mrb[13].mxu0  ;;  %v721_v6 = vmul.f32 %v1554_v10, %v2050_v38 }
 0x104   :  { %v2143_v16 = vpop.f32.mrb[13].mxu1  ;;  %v1640_v17 = vpop.eup %1639  ;;  %1659 = vrcp.f32 %v1003_v7  ;;  %v1008_v20 = vadd.f32 1.0, %v1638_v11 }
 0x105   :  { %v2149_v25 = vpop.f32.mrb[14].mxu0  ;;  %v2151_v26 = vpop.f32.mrb[14].mxu1  ;;  %1661 = vrcp.f32 %v1035_v12  ;;  %v1040_v29 = vadd.f32 1.0, %v1640_v17  ;;  %v2199_v12 = vadd.f32 %v2055_v40, %v684_v53 }
 0x106   :  { %v1642_v28 = vpop.eup %1641  ;;  %v2155_v32 = vpop.f32.mrb[15].mxu0  ;;  %1663 = vrcp.f32 %v1008_v20 }
 0x107   :  { %v2157_v33 = vpop.f32.mrb[15].mxu1  ;;  %v1644_v34 = vpop.eup %1643  ;;  %v1006_v35 = vadd.f32 1.0, %v1642_v28  ;;  %1665 = vrcp.f32 %v1040_v29 }
 0x108   :  { %v1646_v41 = vpop.eup %1645  ;;  %v1038_v44 = vadd.f32 1.0, %v1644_v34 }
 0x109   :  { %v1648_v36 = vpop.eup %1647  ;;  %1667 = vrcp.f32 %v1006_v35  ;;  %v1009_v48 = vadd.f32 1.0, %v1646_v41  ;;  %v2177_v4 = vpop.f32.mrb[16].mxu0 }
 0x10a   :  { %v1650_v54 = vpop.eup %1649  ;;  %v1196_v58 = vmul.f32 %v1648_v36, %v2062_v50  ;;  %1669 = vrcp.f32 %v1038_v44  ;;  %v2179_v47 = vpop.f32.mrb[16].mxu1  ;;  %v2231_v44 = vadd.f32 %v2055_v40, %v721_v6 }
 0x10b   :  { %v1652_v60 = vpop.eup %1651  ;;  %v1228_v0 = vmul.f32 %v1650_v54, %v2065_v51  ;;  %1671 = vrcp.f32 %v1009_v48  ;;  %v2186_v51 = vadd.f32 %v2055_v40, %v718_v46  ;;  %v2189_v7 = vpop.f32.mrb[17].mxu0  ;;  %v1406_v46 = vmul.f32 -1.442695, %v2199_v12 }
 0x10c   :  { %v1654_v50 = vpop.eup %1653  ;;  %1260 = vst [vmem:[%s2749_s4 + $0x10] sm:$0xff] %v1196_v58  ;;  %v1194_v52 = vmul.f32 %v1652_v60, %v2070_v56  ;;  %1673 = vpow2.f32 %v1436_v13  ;;  %v2191_v8 = vpop.f32.mrb[17].mxu1  ;;  %v1405_v56 = vmul.f32 -1.442695, %v2160_v37  ;;  %v1443_v60 = vmul.f32 -1.442695, %v2231_v44 }
 0x10d   :  { %v1656_v9 = vpop.eup %1655  ;;  %1292 = vst [vmem:[%s2749_s4 + $0x110] sm:$0xff] %v1228_v0  ;;  %v1226_v11 = vmul.f32 %v1654_v50, %v2073_v57  ;;  %1675 = vpow2.f32 %v1402_v21  ;;  %v2201_v13 = vpop.f32.mrb[18].mxu0  ;;  %v1437_v57 = vmul.f32 -1.442695, %v2169_v42  ;;  %v2211_v21 = vadd.f32 %v2055_v40, %v716_v59 }
 0x10e   :  { %v2203_v10 = vpop.f32.mrb[18].mxu1  ;;  %v1658_v17 = vpop.eup %1657  ;;  %1258 = vst [vmem:[%s2749_s4] sm:$0xff] %v1194_v52  ;;  %v1197_v20 = vmul.f32 %v1656_v9, %v2080_v62  ;;  %1677 = vpow2.f32 %v1434_v30  ;;  %v1408_v62 = vmul.f32 -1.442695, %v2174_v43  ;;  %v2223_v30 = vadd.f32 %v2055_v40, %v689_v1 }
 0x10f   :  { %v2213_v28 = vpop.f32.mrb[19].mxu0  ;;  %v2215_v29 = vpop.f32.mrb[19].mxu1  ;;  %1290 = vst [vmem:[%s2749_s4 + $0x100] sm:$0xff] %v1226_v11  ;;  %v1229_v34 = vmul.f32 %v1658_v17, %v2083_v63  ;;  %1679 = vpow2.f32 %v1407_v45  ;;  %v1440_v41 = vmul.f32 -1.442695, %v2186_v51  ;;  %v687_v11 = vmul.f32 %v2050_v38, %v2141_v15 }
 0x110   :  { %v1660_v31 = vpop.eup %1659  ;;  %1261 = vst [vmem:[%s2749_s4 + $0x18] sm:$0xff] %v1197_v20  ;;  %1681 = vpow2.f32 %v1439_v49  ;;  %v1438_v48 = vmul.f32 -1.442695, %v2211_v21  ;;  %v1411_v53 = vmul.f32 -1.442695, %v2223_v30  ;;  %v690_v15 = vmul.f32 %v2149_v25, %v2050_v38 }
 0x111   :  { %v1662_v35 = vpop.eup %1661  ;;  %v1195_v39 = vmul.f32 %v1660_v31, %v2088_v2  ;;  %1293 = vst [vmem:[%s2749_s4 + $0x118] sm:$0xff] %v1229_v34  ;;  %1683 = vpow2.f32 %v1405_v56  ;;  %v2248_v54 = vpop.f32.mrb[20].mxu0 }
 0x112   :  { %v1664_v63 = vpop.eup %1663  ;;  %v1227_v45 = vmul.f32 %v1662_v35, %v2091_v3  ;;  %1685 = vpow2.f32 %v1437_v57  ;;  %v2250_v58 = vpop.f32.mrb[20].mxu1  ;;  %v719_v57 = vmul.f32 %v2050_v38, %v2143_v16  ;;  %v722_v35 = vmul.f32 %v2151_v26, %v2050_v38 }
 0x113   :  { %v1666_v36 = vpop.eup %1665  ;;  %1259 = vst [vmem:[%s2749_s4 + $0x8] sm:$0xff] %v1195_v39  ;;  %v1200_v2 = vmul.f32 %v1664_v63, %v2102_v18  ;;  %1687 = vpow2.f32 %v1408_v62  ;;  %v2257_v0 = vpop.f32.mrb[21].mxu0  ;;  %v2292_v16 = vadd.f32 %v2055_v40, %v687_v11  ;;  %v688_v63 = vmul.f32 %v2050_v38, %v2155_v32 }
 0x114   :  { %v1668_v49 = vpop.eup %1667  ;;  %1291 = vst [vmem:[%s2749_s4 + $0x108] sm:$0xff] %v1227_v45  ;;  %v1232_v3 = vmul.f32 %v1666_v36, %v2105_v19  ;;  %1689 = vpow2.f32 %v1440_v41  ;;  %v2259_v19 = vpop.f32.mrb[21].mxu1  ;;  %v2297_v25 = vadd.f32 %v2055_v40, %v719_v57 }
 0x115   :  { %v1670_v59 = vpop.eup %1669  ;;  %1264 = vst [vmem:[%s2749_s4 + $0x30] sm:$0xff] %v1200_v2  ;;  %v1198_v18 = vmul.f32 %v1668_v49, %v2109_v23  ;;  %1691 = vpow2.f32 %v1406_v46  ;;  %v2265_v52 = vpop.f32.mrb[22].mxu0  ;;  %v2304_v49 = vadd.f32 %v2055_v40, %v690_v15  ;;  %v2319_v11 = vadd.f32 %v2055_v40, %v688_v63 }
 0x116   :  { %v1672_v1 = vpop.eup %1671  ;;  %1296 = vst [vmem:[%s2749_s4 + $0x130] sm:$0xff] %v1232_v3  ;;  %v1230_v50 = vmul.f32 %v1670_v59, %v2112_v24  ;;  %v2267_v6 = vpop.f32.mrb[22].mxu1  ;;  %1693 = vpow2.f32 %v1438_v48  ;;  %v720_v15 = vmul.f32 %v2050_v38, %v2157_v33 }
 0x117   :  { %v1674_v23 = vpop.eup %1673  ;;  %1262 = vst [vmem:[%s2749_s4 + $0x20] sm:$0xff] %v1198_v18  ;;  %v1201_v9 = vmul.f32 %v1672_v1, %v2117_v27  ;;  %v2275_v56 = vpop.f32.mrb[23].mxu0  ;;  %1695 = vpow2.f32 %v1411_v53  ;;  %v2311_v18 = vadd.f32 %v2055_v40, %v722_v35  ;;  %v1412_v35 = vmul.f32 -1.442695, %v2304_v49 }
 0x118   :  { %v2277_v17 = vpop.f32.mrb[23].mxu1  ;;  %v1676_v24 = vpop.eup %1675  ;;  %1294 = vst [vmem:[%s2749_s4 + $0x120] sm:$0xff] %v1230_v50  ;;  %v1041_v20 = vadd.f32 1.0, %v1674_v23  ;;  %1697 = vpow2.f32 %v1443_v60  ;;  %v1410_v33 = vmul.f32 -1.442695, %v2319_v11 }
 0x119   :  { %v1678_v31 = vpop.eup %1677  ;;  %1265 = vst [vmem:[%s2749_s4 + $0x38] sm:$0xff] %v1201_v9  ;;  %v1007_v27 = vadd.f32 1.0, %v1676_v24  ;;  %v2299_v36 = vpop.f32.mrb[24].mxu0  ;;  %v1409_v9 = vmul.f32 -1.442695, %v2292_v16 }
 0x11a   :  { %v1680_v34 = vpop.eup %1679  ;;  %1699 = vrcp.f32 %v1041_v20  ;;  %v1039_v62 = vadd.f32 1.0, %v1678_v31  ;;  %v2301_v2 = vpop.f32.mrb[24].mxu1 }
 0x11b   :  { %v1682_v39 = vpop.eup %1681  ;;  %1701 = vrcp.f32 %v1007_v27  ;;  %v1012_v41 = vadd.f32 1.0, %v1680_v34  ;;  %v2306_v3 = vpop.f32.mrb[25].mxu0  ;;  %v1441_v27 = vmul.f32 -1.442695, %v2297_v25 }
 0x11c   :  { %v1684_v45 = vpop.eup %1683  ;;  %1703 = vrcp.f32 %v1039_v62  ;;  %v1044_v46 = vadd.f32 1.0, %v1682_v39  ;;  %v2308_v53 = vpop.f32.mrb[25].mxu1  ;;  %v693_v39 = vmul.f32 %v2177_v4, %v2050_v38  ;;  %v2338_v4 = vadd.f32 %v2055_v40, %v720_v15 }
 0x11d   :  { %v1686_v26 = vpop.eup %1685  ;;  %1705 = vrcp.f32 %v1012_v41  ;;  %v1010_v48 = vadd.f32 1.0, %v1684_v45  ;;  %v2313_v60 = vpop.f32.mrb[26].mxu0  ;;  %v1444_v45 = vmul.f32 -1.442695, %v2311_v18 }
 0x11e   :  { %v1688_v32 = vpop.eup %1687  ;;  %1707 = vrcp.f32 %v1044_v46  ;;  %v1042_v59 = vadd.f32 1.0, %v1686_v26  ;;  %v2315_v1 = vpop.f32.mrb[26].mxu1  ;;  %v725_v46 = vmul.f32 %v2179_v47, %v2050_v38 }
 0x11f   :  { %v1690_v50 = vpop.eup %1689  ;;  %1709 = vrcp.f32 %v1010_v48  ;;  %v1013_v23 = vadd.f32 1.0, %v1688_v32  ;;  %v2321_v24 = vpop.f32.mrb[27].mxu0  ;;  %v691_v32 = vmul.f32 %v2050_v38, %v2189_v7  ;;  %v694_v7 = vmul.f32 %v2201_v13, %v2050_v38 }
 0x120   :  { %v2323_v20 = vpop.f32.mrb[27].mxu1  ;;  %v1692_v57 = vpop.eup %1691  ;;  %1711 = vrcp.f32 %v1042_v59  ;;  %v1045_v31 = vadd.f32 1.0, %v1690_v50 }
 0x121   :  { %v1694_v34 = vpop.eup %1693  ;;  %1713 = vrcp.f32 %v1013_v23  ;;  %v1011_v62 = vadd.f32 1.0, %v1692_v57  ;;  %v723_v23 = vmul.f32 %v2050_v38, %v2191_v8  ;;  %v2342_v57 = vpop.f32.mrb[28].mxu0 }
 0x122   :  { %v1696_v41 = vpop.eup %1695  ;;  %1715 = vrcp.f32 %v1045_v31  ;;  %v1043_v63 = vadd.f32 1.0, %v1694_v34  ;;  %v2344_v47 = vpop.f32.mrb[28].mxu1 }
 0x123   :  { %v1698_v26 = vpop.eup %1697  ;;  %1717 = vrcp.f32 %v1011_v62  ;;  %v1016_v48 = vadd.f32 1.0, %v1696_v41  ;;  %v2348_v62 = vadd.f32 %v2055_v40, %v693_v39  ;;  %v2352_v41 = vpop.f32.mrb[29].mxu0 }
 0x124   :  { %v1700_v59 = vpop.eup %1699  ;;  %1719 = vrcp.f32 %v1043_v63  ;;  %v1048_v50 = vadd.f32 1.0, %v1698_v26  ;;  %v2354_v15 = vpop.f32.mrb[29].mxu1  ;;  %v2358_v26 = vadd.f32 %v2055_v40, %v725_v46  ;;  %v692_v46 = vmul.f32 %v2050_v38, %v2213_v28 }
 0x125   :  { %v1702_v31 = vpop.eup %1701  ;;  %v1233_v34 = vmul.f32 %v1700_v59, %v2126_v55  ;;  %1721 = vrcp.f32 %v1016_v48  ;;  %v726_v55 = vmul.f32 %v2203_v10, %v2050_v38  ;;  %v2362_v48 = vpop.f32.mrb[30].mxu0 }
 0x126   :  { %v1704_v63 = vpop.eup %1703  ;;  %v1199_v8 = vmul.f32 %v1702_v31, %v2130_v61  ;;  %1723 = vrcp.f32 %v1048_v50  ;;  %v2364_v39 = vpop.f32.mrb[30].mxu1  ;;  %v2371_v61 = vadd.f32 %v2055_v40, %v691_v32 }
 0x127   :  { %v1706_v59 = vpop.eup %1705  ;;  %1297 = vst [vmem:[%s2749_s4 + $0x138] sm:$0xff] %v1233_v34  ;;  %v1231_v13 = vmul.f32 %v1704_v63, %v2134_v5  ;;  %1725 = vpow2.f32 %v1409_v9  ;;  %v2375_v50 = vpop.f32.mrb[31].mxu0  ;;  %v1442_v5 = vmul.f32 -1.442695, %v2338_v4  ;;  %v2385_v9 = vadd.f32 %v2055_v40, %v723_v23 }
 0x128   :  { %v2377_v10 = vpop.f32.mrb[31].mxu1  ;;  %v1708_v31 = vpop.eup %1707  ;;  %1263 = vst [vmem:[%s2749_s4 + $0x28] sm:$0xff] %v1199_v8  ;;  %v1204_v34 = vmul.f32 %v1706_v59, %v2139_v14  ;;  %1727 = vpow2.f32 %v1441_v27  ;;  %v1415_v63 = vmul.f32 -1.442695, %v2348_v62  ;;  %v2393_v8 = vadd.f32 %v2055_v40, %v694_v7 }
 0x129   :  { %v1710_v32 = vpop.eup %1709  ;;  %1295 = vst [vmem:[%s2749_s4 + $0x128] sm:$0xff] %v1231_v13  ;;  %v1236_v28 = vmul.f32 %v1708_v31, %v2147_v22  ;;  %1729 = vpow2.f32 %v1412_v35  ;;  %v1447_v23 = vmul.f32 -1.442695, %v2358_v26  ;;  %v2401_v59 = vadd.f32 %v2055_v40, %v726_v55 }
 0x12a   :  { %v1712_v14 = vpop.eup %1711  ;;  %1268 = vst [vmem:[%s2749_s4 + $0x50] sm:$0xff] %v1204_v34  ;;  %v1202_v27 = vmul.f32 %v1710_v32, %v2160_v37  ;;  %1731 = vpow2.f32 %v1444_v45  ;;  %v1413_v7 = vmul.f32 -1.442695, %v2371_v61  ;;  %v2409_v13 = vadd.f32 %v2055_v40, %v692_v46 }
 0x12b   :  { %v1714_v22 = vpop.eup %1713  ;;  %1300 = vst [vmem:[%s2749_s4 + $0x150] sm:$0xff] %v1236_v28  ;;  %v1234_v35 = vmul.f32 %v1712_v14, %v2169_v42  ;;  %1733 = vpow2.f32 %v1410_v33  ;;  %v1445_v55 = vmul.f32 -1.442695, %v2385_v9  ;;  %v1416_v33 = vmul.f32 -1.442695, %v2393_v8 }
 0x12c   :  { %v1716_v37 = vpop.eup %1715  ;;  %1266 = vst [vmem:[%s2749_s4 + $0x40] sm:$0xff] %v1202_v27  ;;  %v1205_v45 = vmul.f32 %v1714_v22, %v2174_v43  ;;  %1735 = vpow2.f32 %v1442_v5  ;;  %v1448_v34 = vmul.f32 -1.442695, %v2401_v59  ;;  %v1414_v32 = vmul.f32 -1.442695, %v2409_v13 }
 0x12d   :  { %v1718_v31 = vpop.eup %1717  ;;  %1298 = vst [vmem:[%s2749_s4 + $0x140] sm:$0xff] %v1234_v35  ;;  %v1237_v42 = vmul.f32 %v1716_v37, %v2186_v51  ;;  %1737 = vpow2.f32 %v1415_v63  ;;  %v695_v37 = vmul.f32 %v2050_v38, %v2257_v0 }
 0x12e   :  { %v1720_v46 = vpop.eup %1719  ;;  %1269 = vst [vmem:[%s2749_s4 + $0x58] sm:$0xff] %v1205_v45  ;;  %v1203_v43 = vmul.f32 %v1718_v31, %v2199_v12  ;;  %1739 = vpow2.f32 %v1447_v23  ;;  %v727_v31 = vmul.f32 %v2050_v38, %v2259_v19 }
 0x12f   :  { %v1722_v5 = vpop.eup %1721  ;;  %1301 = vst [vmem:[%s2749_s4 + $0x158] sm:$0xff] %v1237_v42  ;;  %v1235_v51 = vmul.f32 %v1720_v46, %v2211_v21  ;;  %1741 = vpow2.f32 %v1413_v7  ;;  %v724_v21 = vmul.f32 %v2050_v38, %v2215_v29  ;;  %v729_v29 = vmul.f32 %v2250_v58, %v2050_v38 }
 0x130   :  { %v1724_v28 = vpop.eup %1723  ;;  %1267 = vst [vmem:[%s2749_s4 + $0x48] sm:$0xff] %v1203_v43  ;;  %v1208_v12 = vmul.f32 %v1722_v5, %v2223_v30  ;;  %1743 = vpow2.f32 %v1445_v55  ;;  %v697_v30 = vmul.f32 %v2248_v54, %v2050_v38 }
 0x131   :  { %v1726_v63 = vpop.eup %1725  ;;  %1299 = vst [vmem:[%s2749_s4 + $0x148] sm:$0xff] %v1235_v51  ;;  %v1240_v14 = vmul.f32 %v1724_v28, %v2231_v44  ;;  %1745 = vpow2.f32 %v1416_v33  ;;  %v2454_v54 = vadd.f32 %v2055_v40, %v724_v21  ;;  %v2462_v0 = vadd.f32 %v2055_v40, %v729_v29 }
 0x132   :  { %v1728_v27 = vpop.eup %1727  ;;  %1272 = vst [vmem:[%s2749_s4 + $0x70] sm:$0xff] %v1208_v12  ;;  %v1014_v23 = vadd.f32 1.0, %v1726_v63  ;;  %1747 = vpow2.f32 %v1448_v34  ;;  %v2459_v58 = vadd.f32 %v2055_v40, %v697_v30  ;;  %v2465_v51 = vadd.f32 %v2055_v40, %v695_v37 }
 0x133   :  { %v1730_v22 = vpop.eup %1729  ;;  %1304 = vst [vmem:[%s2749_s4 + $0x170] sm:$0xff] %v1240_v14  ;;  %v1046_v44 = vadd.f32 1.0, %v1728_v27  ;;  %1749 = vpow2.f32 %v1414_v32  ;;  %v1446_v28 = vmul.f32 -1.442695, %v2454_v54  ;;  %v2469_v12 = vadd.f32 %v2055_v40, %v727_v31 }
 0x134   :  { %v1732_v35 = vpop.eup %1731  ;;  %1751 = vrcp.f32 %v1014_v23  ;;  %v1017_v7 = vadd.f32 1.0, %v1730_v22  ;;  %v1419_v21 = vmul.f32 -1.442695, %v2459_v58  ;;  %v698_v27 = vmul.f32 %v2265_v52, %v2050_v38 }
 0x135   :  { %v1734_v45 = vpop.eup %1733  ;;  %1753 = vrcp.f32 %v1046_v44  ;;  %v1049_v55 = vadd.f32 1.0, %v1732_v35  ;;  %v1451_v22 = vmul.f32 -1.442695, %v2462_v0  ;;  %v730_v44 = vmul.f32 %v2267_v6, %v2050_v38 }
 0x136   :  { %v1736_v42 = vpop.eup %1735  ;;  %1755 = vrcp.f32 %v1017_v7  ;;  %v1015_v33 = vadd.f32 1.0, %v1734_v45  ;;  %v1417_v7 = vmul.f32 -1.442695, %v2465_v51  ;;  %v696_v37 = vmul.f32 %v2050_v38, %v2275_v56 }
 0x137   :  { %v1738_v46 = vpop.eup %1737  ;;  %1757 = vrcp.f32 %v1049_v55  ;;  %v1047_v43 = vadd.f32 1.0, %v1736_v42  ;;  %v1449_v52 = vmul.f32 -1.442695, %v2469_v12  ;;  %v728_v31 = vmul.f32 %v2050_v38, %v2277_v17 }
 0x138   :  { %v1740_v34 = vpop.eup %1739  ;;  %1759 = vrcp.f32 %v1015_v33  ;;  %v1020_v5 = vadd.f32 1.0, %v1738_v46  ;;  %v2484_v6 = vadd.f32 %v2055_v40, %v698_v27  ;;  %v701_v46 = vmul.f32 %v2299_v36, %v2050_v38 }
 0x139   :  { %v1742_v32 = vpop.eup %1741  ;;  %1761 = vrcp.f32 %v1047_v43  ;;  %v1052_v19 = vadd.f32 1.0, %v1740_v34  ;;  %v2490_v34 = vadd.f32 %v2055_v40, %v730_v44  ;;  %v699_v36 = vmul.f32 %v2050_v38, %v2306_v3 }
 0x13a   :  { %v1744_v63 = vpop.eup %1743  ;;  %1763 = vrcp.f32 %v1020_v5  ;;  %v1018_v14 = vadd.f32 1.0, %v1742_v32  ;;  %v733_v5 = vmul.f32 %v2301_v2, %v2050_v38  ;;  %v2505_v2 = vadd.f32 %v2055_v40, %v728_v31 }
 0x13b   :  { %v1746_v23 = vpop.eup %1745  ;;  %1765 = vrcp.f32 %v1052_v19  ;;  %v1050_v30 = vadd.f32 1.0, %v1744_v63  ;;  %v2496_v19 = vadd.f32 %v2055_v40, %v696_v37  ;;  %v1420_v27 = vmul.f32 -1.442695, %v2484_v6 }
 0x13c   :  { %v1748_v29 = vpop.eup %1747  ;;  %1767 = vrcp.f32 %v1018_v14  ;;  %v1021_v35 = vadd.f32 1.0, %v1746_v23  ;;  %v2515_v23 = vadd.f32 %v2055_v40, %v701_v46 }
 0x13d   :  { %v1750_v45 = vpop.eup %1749  ;;  %1769 = vrcp.f32 %v1050_v30  ;;  %v1053_v55 = vadd.f32 1.0, %v1748_v29  ;;  %v2523_v30 = vadd.f32 %v2055_v40, %v733_v5  ;;  %v1418_v44 = vmul.f32 -1.442695, %v2496_v19 }
 0x13e   :  { %v1752_v42 = vpop.eup %1751  ;;  %1771 = vrcp.f32 %v1021_v35  ;;  %v1019_v33 = vadd.f32 1.0, %v1750_v45  ;;  %v2531_v29 = vadd.f32 %v2055_v40, %v699_v36  ;;  %v1450_v35 = vmul.f32 -1.442695, %v2505_v2 }
 0x13f   :  { %v1754_v43 = vpop.eup %1753  ;;  %v1206_v56 = vmul.f32 %v1752_v42, %v2292_v16  ;;  %1773 = vrcp.f32 %v1053_v55  ;;  %v1423_v45 = vmul.f32 -1.442695, %v2515_v23 }
 0x140   :  { %v1756_v17 = vpop.eup %1755  ;;  %v1238_v32 = vmul.f32 %v1754_v43, %v2297_v25  ;;  %1775 = vrcp.f32 %v1019_v33  ;;  %v731_v25 = vmul.f32 %v2050_v38, %v2308_v53  ;;  %v1421_v31 = vmul.f32 -1.442695, %v2531_v29 }
 0x141   :  { %v1758_v63 = vpop.eup %1757  ;;  %1270 = vst [vmem:[%s2749_s4 + $0x60] sm:$0xff] %v1206_v56  ;;  %v1209_v16 = vmul.f32 %v1756_v17, %v2304_v49  ;;  %1777 = vpow2.f32 %v1446_v28  ;;  %v1452_v28 = vmul.f32 -1.442695, %v2490_v34 }
 0x142   :  { %v1760_v14 = vpop.eup %1759  ;;  %1302 = vst [vmem:[%s2749_s4 + $0x160] sm:$0xff] %v1238_v32  ;;  %v1241_v3 = vmul.f32 %v1758_v63, %v2311_v18  ;;  %1779 = vpow2.f32 %v1419_v21  ;;  %v2539_v37 = vadd.f32 %v2055_v40, %v731_v25  ;;  %v1455_v40 = vmul.f32 -1.442695, %v2523_v30 }
 0x143   :  { %v1762_v49 = vpop.eup %1761  ;;  %1273 = vst [vmem:[%s2749_s4 + $0x78] sm:$0xff] %v1209_v16  ;;  %v1207_v53 = vmul.f32 %v1760_v14, %v2319_v11  ;;  %1781 = vpow2.f32 %v1451_v22 }
 0x144   :  { %v1764_v18 = vpop.eup %1763  ;;  %1305 = vst [vmem:[%s2749_s4 + $0x178] sm:$0xff] %v1241_v3  ;;  %v1239_v21 = vmul.f32 %v1762_v49, %v2338_v4  ;;  %1783 = vpow2.f32 %v1417_v7  ;;  %v1453_v33 = vmul.f32 -1.442695, %v2539_v37 }
 0x145   :  { %v1766_v11 = vpop.eup %1765  ;;  %1271 = vst [vmem:[%s2749_s4 + $0x68] sm:$0xff] %v1207_v53  ;;  %v1212_v22 = vmul.f32 %v1764_v18, %v2348_v62  ;;  %1785 = vpow2.f32 %v1449_v52 }
 0x146   :  { %v1768_v4 = vpop.eup %1767  ;;  %1303 = vst [vmem:[%s2749_s4 + $0x168] sm:$0xff] %v1239_v21  ;;  %v1244_v7 = vmul.f32 %v1766_v11, %v2358_v26  ;;  %1787 = vpow2.f32 %v1420_v27 }
 0x147   :  { %v1770_v55 = vpop.eup %1769  ;;  %1276 = vst [vmem:[%s2749_s4 + $0x90] sm:$0xff] %v1212_v22  ;;  %v1210_v62 = vmul.f32 %v1768_v4, %v2371_v61  ;;  %1789 = vpow2.f32 %v1452_v28 }
 0x148   :  { %v1772_v52 = vpop.eup %1771  ;;  %1308 = vst [vmem:[%s2749_s4 + $0x190] sm:$0xff] %v1244_v7  ;;  %v1242_v26 = vmul.f32 %v1770_v55, %v2385_v9  ;;  %1791 = vpow2.f32 %v1418_v44 }
 0x149   :  { %v1774_v42 = vpop.eup %1773  ;;  %1274 = vst [vmem:[%s2749_s4 + $0x80] sm:$0xff] %v1210_v62  ;;  %v1213_v61 = vmul.f32 %v1772_v52, %v2393_v8  ;;  %1793 = vpow2.f32 %v1450_v35  ;;  %v702_v8 = vmul.f32 %v2313_v60, %v2050_v38  ;;  %v1877_v60 = vld [vmem:[%s2747_s2] ss:$0 sm:$0xff] }
 0x14a   :  { %v1776_v46 = vpop.eup %1775  ;;  %1306 = vst [vmem:[%s2749_s4 + $0x180] sm:$0xff] %v1242_v26  ;;  %v1245_v9 = vmul.f32 %v1774_v42, %v2401_v59  ;;  %1795 = vpow2.f32 %v1423_v45  ;;  %v734_v59 = vmul.f32 %v2315_v1, %v2050_v38  ;;  %v700_v36 = vmul.f32 %v1877_v60, %v2321_v24  ;;  %v2587_v1 = vld [vmem:[%s2748_s3] ss:$0 sm:$0xff] }
 0x14b   :  { %v1778_v43 = vpop.eup %1777  ;;  %1277 = vst [vmem:[%s2749_s4 + $0x98] sm:$0xff] %v1213_v61  ;;  %v1211_v56 = vmul.f32 %v1776_v46, %v2409_v13  ;;  %1797 = vpow2.f32 %v1455_v40  ;;  %v732_v25 = vmul.f32 %v1877_v60, %v2323_v20  ;;  %v2590_v3 = vadd.f32 %v2587_v1, %v702_v8 }
 0x14c   :  { %v1780_v5 = vpop.eup %1779  ;;  %1309 = vst [vmem:[%s2749_s4 + $0x198] sm:$0xff] %v1245_v9  ;;  %v1051_v17 = vadd.f32 1.0, %v1778_v43  ;;  %1799 = vpow2.f32 %v1421_v31  ;;  %v2593_v24 = vadd.f32 %v2587_v1, %v734_v59  ;;  %v2596_v28 = vadd.f32 %v2587_v1, %v700_v36 }
 0x14d   :  { %v1782_v32 = vpop.eup %1781  ;;  %1275 = vst [vmem:[%s2749_s4 + $0x88] sm:$0xff] %v1211_v56  ;;  %v1024_v13 = vadd.f32 1.0, %v1780_v5  ;;  %1801 = vpow2.f32 %v1453_v33  ;;  %v2599_v44 = vadd.f32 %v2587_v1, %v732_v25  ;;  %v1424_v35 = vmul.f32 -1.442695, %v2590_v3 }
 0x14e   :  { %v1784_v63 = vpop.eup %1783  ;;  %1803 = vrcp.f32 %v1051_v17  ;;  %v1056_v16 = vadd.f32 1.0, %v1782_v32  ;;  %v705_v4 = vmul.f32 %v1877_v60, %v2342_v57  ;;  %v1456_v55 = vmul.f32 -1.442695, %v2593_v24 }
 0x14f   :  { %v1786_v14 = vpop.eup %1785  ;;  %1805 = vrcp.f32 %v1024_v13  ;;  %v1022_v38 = vadd.f32 1.0, %v1784_v63  ;;  %v737_v62 = vmul.f32 %v1877_v60, %v2344_v47  ;;  %v1422_v26 = vmul.f32 -1.442695, %v2596_v28 }
 0x150   :  { %v1788_v27 = vpop.eup %1787  ;;  %1807 = vrcp.f32 %v1056_v16  ;;  %v1054_v49 = vadd.f32 1.0, %v1786_v14  ;;  %v703_v31 = vmul.f32 %v1877_v60, %v2352_v41  ;;  %v1454_v33 = vmul.f32 -1.442695, %v2599_v44 }
 0x151   :  { %v1790_v53 = vpop.eup %1789  ;;  %1809 = vrcp.f32 %v1022_v38  ;;  %v1025_v20 = vadd.f32 1.0, %v1788_v27  ;;  %v735_v57 = vmul.f32 %v1877_v60, %v2354_v15  ;;  %v2610_v43 = vadd.f32 %v2587_v1, %v705_v4 }
 0x152   :  { %v1792_v18 = vpop.eup %1791  ;;  %1811 = vrcp.f32 %v1054_v49  ;;  %v1057_v21 = vadd.f32 1.0, %v1790_v53  ;;  %v706_v47 = vmul.f32 %v1877_v60, %v2362_v48  ;;  %v2614_v41 = vadd.f32 %v2587_v1, %v737_v62 }
 0x153   :  { %v1794_v11 = vpop.eup %1793  ;;  %1813 = vrcp.f32 %v1025_v20  ;;  %v1023_v22 = vadd.f32 1.0, %v1792_v18  ;;  %v738_v5 = vmul.f32 %v1877_v60, %v2364_v39  ;;  %v2619_v15 = vadd.f32 %v2587_v1, %v703_v31 }
 0x154   :  { %v1796_v7 = vpop.eup %1795  ;;  %1815 = vrcp.f32 %v1057_v21  ;;  %v1055_v45 = vadd.f32 1.0, %v1794_v11  ;;  %v704_v32 = vmul.f32 %v1877_v60, %v2375_v50  ;;  %v2624_v36 = vadd.f32 %v2587_v1, %v735_v57 }
 0x155   :  { %v1798_v40 = vpop.eup %1797  ;;  %1817 = vrcp.f32 %v1023_v22  ;;  %v1028_v52 = vadd.f32 1.0, %v1796_v7  ;;  %v736_v63 = vmul.f32 %v1877_v60, %v2377_v10  ;;  %v2633_v50 = vadd.f32 %v2587_v1, %v706_v47 }
 0x156   :  { %v1800_v42 = vpop.eup %1799  ;;  %1819 = vrcp.f32 %v1055_v45  ;;  %v1060_v61 = vadd.f32 1.0, %v1798_v40  ;;  %v1459_v60 = vmul.f32 -1.442695, %v2614_v41  ;;  %v2641_v25 = vadd.f32 %v2587_v1, %v738_v5 }
 0x157   :  { %v1802_v46 = vpop.eup %1801  ;;  %1821 = vrcp.f32 %v1028_v52  ;;  %v1026_v9 = vadd.f32 1.0, %v1800_v42  ;;  %v1425_v38 = vmul.f32 -1.442695, %v2619_v15  ;;  %v2649_v27 = vadd.f32 %v2587_v1, %v704_v32 }
 0x158   :  { %v1804_v56 = vpop.eup %1803  ;;  %1823 = vrcp.f32 %v1060_v61  ;;  %v1058_v8 = vadd.f32 1.0, %v1802_v46  ;;  %v1457_v53 = vmul.f32 -1.442695, %v2624_v36  ;;  %v2657_v20 = vadd.f32 %v2587_v1, %v736_v63 }
 0x159   :  { %v1806_v17 = vpop.eup %1805  ;;  %v1243_v59 = vmul.f32 %v1804_v56, %v2454_v54  ;;  %1825 = vrcp.f32 %v1026_v9  ;;  %v1427_v54 = vmul.f32 -1.442695, %v2610_v43  ;;  %v1428_v21 = vmul.f32 -1.442695, %v2633_v50 }
 0x15a   :  { %v1808_v13 = vpop.eup %1807  ;;  %v1216_v48 = vmul.f32 %v1806_v17, %v2459_v58  ;;  %1827 = vrcp.f32 %v1058_v8  ;;  %v1460_v1 = vmul.f32 -1.442695, %v2641_v25  ;;  %v1458_v7 = vmul.f32 -1.442695, %v2657_v20 }
 0x15b   :  { %v1810_v16 = vpop.eup %1809  ;;  %1307 = vst [vmem:[%s2749_s4 + $0x188] sm:$0xff] %v1243_v59  ;;  %v1248_v39 = vmul.f32 %v1808_v13, %v2462_v0  ;;  %1829 = vpow2.f32 %v1424_v35  ;;  %v1426_v35 = vmul.f32 -1.442695, %v2649_v27 }
 0x15c   :  { %v1812_v58 = vpop.eup %1811  ;;  %1280 = vst [vmem:[%s2749_s4 + $0xb0] sm:$0xff] %v1216_v48  ;;  %v1214_v10 = vmul.f32 %v1810_v16, %v2465_v51  ;;  %1831 = vpow2.f32 %v1456_v55 }
 0x15d   :  { %v1814_v0 = vpop.eup %1813  ;;  %1312 = vst [vmem:[%s2749_s4 + $0x1b0] sm:$0xff] %v1248_v39  ;;  %v1246_v14 = vmul.f32 %v1812_v58, %v2469_v12  ;;  %1833 = vpow2.f32 %v1422_v26 }
 0x15e   :  { %v1816_v51 = vpop.eup %1815  ;;  %1278 = vst [vmem:[%s2749_s4 + $0xa0] sm:$0xff] %v1214_v10  ;;  %v1217_v49 = vmul.f32 %v1814_v0, %v2484_v6  ;;  %1835 = vpow2.f32 %v1454_v33 }
 0x15f   :  { %v1818_v12 = vpop.eup %1817  ;;  %1310 = vst [vmem:[%s2749_s4 + $0x1a0] sm:$0xff] %v1246_v14  ;;  %v1249_v18 = vmul.f32 %v1816_v51, %v2490_v34  ;;  %1837 = vpow2.f32 %v1427_v54 }
 0x160   :  { %v1820_v11 = vpop.eup %1819  ;;  %1281 = vst [vmem:[%s2749_s4 + $0xb8] sm:$0xff] %v1217_v49  ;;  %v1215_v6 = vmul.f32 %v1818_v12, %v2496_v19  ;;  %1839 = vpow2.f32 %v1459_v60 }
 0x161   :  { %v1822_v22 = vpop.eup %1821  ;;  %1313 = vst [vmem:[%s2749_s4 + $0x1b8] sm:$0xff] %v1249_v18  ;;  %v1247_v34 = vmul.f32 %v1820_v11, %v2505_v2  ;;  %1841 = vpow2.f32 %v1425_v38 }
 0x162   :  { %v1824_v4 = vpop.eup %1823  ;;  %1279 = vst [vmem:[%s2749_s4 + $0xa8] sm:$0xff] %v1215_v6  ;;  %v1220_v19 = vmul.f32 %v1822_v22, %v2515_v23  ;;  %1843 = vpow2.f32 %v1457_v53 }
 0x163   :  { %v1826_v45 = vpop.eup %1825  ;;  %1311 = vst [vmem:[%s2749_s4 + $0x1a8] sm:$0xff] %v1247_v34  ;;  %v1252_v2 = vmul.f32 %v1824_v4, %v2523_v30  ;;  %1845 = vpow2.f32 %v1428_v21 }
 0x164   :  { %v1828_v55 = vpop.eup %1827  ;;  %1284 = vst [vmem:[%s2749_s4 + $0xd0] sm:$0xff] %v1220_v19  ;;  %v1218_v62 = vmul.f32 %v1826_v45, %v2531_v29  ;;  %1847 = vpow2.f32 %v1460_v1 }
 0x165   :  { %v1830_v23 = vpop.eup %1829  ;;  %1316 = vst [vmem:[%s2749_s4 + $0x1d0] sm:$0xff] %v1252_v2  ;;  %v1250_v40 = vmul.f32 %v1828_v55, %v2539_v37  ;;  %1849 = vpow2.f32 %v1426_v35 }
 0x166   :  { %v1832_v52 = vpop.eup %1831  ;;  %1282 = vst [vmem:[%s2749_s4 + $0xc0] sm:$0xff] %v1218_v62  ;;  %v1029_v30 = vadd.f32 1.0, %v1830_v23  ;;  %1851 = vpow2.f32 %v1458_v7 }
 0x167   :  { %v1834_v26 = vpop.eup %1833  ;;  %1314 = vst [vmem:[%s2749_s4 + $0x1c0] sm:$0xff] %v1250_v40  ;;  %v1061_v29 = vadd.f32 1.0, %v1832_v52 }
 0x168   :  { %v1836_v31 = vpop.eup %1835  ;;  %1853 = vrcp.f32 %v1029_v30  ;;  %v1027_v42 = vadd.f32 1.0, %v1834_v26 }
 0x169   :  { %v1838_v61 = vpop.eup %1837  ;;  %1855 = vrcp.f32 %v1061_v29  ;;  %v1059_v37 = vadd.f32 1.0, %v1836_v31 }
 0x16a   :  { %v1840_v33 = vpop.eup %1839  ;;  %1857 = vrcp.f32 %v1027_v42  ;;  %v1032_v57 = vadd.f32 1.0, %v1838_v61 }
 0x16b   :  { %v1842_v46 = vpop.eup %1841  ;;  %1859 = vrcp.f32 %v1059_v37  ;;  %v1064_v9 = vadd.f32 1.0, %v1840_v33 }
 0x16c   :  { %v1844_v47 = vpop.eup %1843  ;;  %1861 = vrcp.f32 %v1032_v57  ;;  %v1030_v56 = vadd.f32 1.0, %v1842_v46 }
 0x16d   :  { %v1846_v8 = vpop.eup %1845  ;;  %1863 = vrcp.f32 %v1064_v9  ;;  %v1062_v5 = vadd.f32 1.0, %v1844_v47 }
 0x16e   :  { %v1848_v17 = vpop.eup %1847  ;;  %1865 = vrcp.f32 %v1030_v56  ;;  %v1033_v59 = vadd.f32 1.0, %v1846_v8 }
 0x16f   :  { %v1850_v32 = vpop.eup %1849  ;;  %1867 = vrcp.f32 %v1062_v5  ;;  %v1065_v13 = vadd.f32 1.0, %v1848_v17 }
 0x170   :  { %v1852_v48 = vpop.eup %1851  ;;  %1869 = vrcp.f32 %v1033_v59  ;;  %v1031_v63 = vadd.f32 1.0, %v1850_v32 }
 0x171   :  { %1871 = vrcp.f32 %v1065_v13  ;;  %v1063_v16 = vadd.f32 1.0, %v1852_v48 }
 0x172   :  { %v1854_v39 = vpop.eup %1853  ;;  %1873 = vrcp.f32 %v1031_v63 }
 0x173   :  { %v1856_v54 = vpop.eup %1855  ;;  %v1221_v58 = vmul.f32 %v1854_v39, %v2590_v3  ;;  %1875 = vrcp.f32 %v1063_v16 }
 0x174   :  { %v1858_v10 = vpop.eup %1857  ;;  %v1253_v60 = vmul.f32 %v1856_v54, %v2593_v24 }
 0x175   :  { %v1860_v0 = vpop.eup %1859  ;;  %1285 = vst [vmem:[%s2749_s4 + $0xd8] sm:$0xff] %v1221_v58  ;;  %v1219_v14 = vmul.f32 %v1858_v10, %v2596_v28 }
 0x176   :  { %v1862_v38 = vpop.eup %1861  ;;  %1317 = vst [vmem:[%s2749_s4 + $0x1d8] sm:$0xff] %v1253_v60  ;;  %v1251_v51 = vmul.f32 %v1860_v0, %v2599_v44 }
 0x177   :  { %v1864_v49 = vpop.eup %1863  ;;  %1283 = vst [vmem:[%s2749_s4 + $0xc8] sm:$0xff] %v1219_v14  ;;  %v1224_v3 = vmul.f32 %v1862_v38, %v2610_v43 }
 0x178   :  { %v1866_v24 = vpop.eup %1865  ;;  %1315 = vst [vmem:[%s2749_s4 + $0x1c8] sm:$0xff] %v1251_v51  ;;  %v1256_v28 = vmul.f32 %v1864_v49, %v2614_v41 }
 0x179   :  { %v1868_v53 = vpop.eup %1867  ;;  %1288 = vst [vmem:[%s2749_s4 + $0xf0] sm:$0xff] %v1224_v3  ;;  %v1222_v44 = vmul.f32 %v1866_v24, %v2619_v15 }
 0x17a   :  { %v1870_v12 = vpop.eup %1869  ;;  %1320 = vst [vmem:[%s2749_s4 + $0x1f0] sm:$0xff] %v1256_v28  ;;  %v1254_v43 = vmul.f32 %v1868_v53, %v2624_v36 }
 0x17b   :  { %v1872_v18 = vpop.eup %1871  ;;  %1286 = vst [vmem:[%s2749_s4 + $0xe0] sm:$0xff] %v1222_v44  ;;  %v1225_v41 = vmul.f32 %v1870_v12, %v2633_v50 }
 0x17c   :  { %v1874_v21 = vpop.eup %1873  ;;  %1318 = vst [vmem:[%s2749_s4 + $0x1e0] sm:$0xff] %v1254_v43  ;;  %v1257_v15 = vmul.f32 %v1872_v18, %v2641_v25 }
 0x17d   :  { %v1876_v11 = vpop.eup %1875  ;;  %1289 = vst [vmem:[%s2749_s4 + $0xf8] sm:$0xff] %v1225_v41  ;;  %v1223_v36 = vmul.f32 %v1874_v21, %v2649_v27 }
 0x17e   :  { %1321 = vst [vmem:[%s2749_s4 + $0x1f8] sm:$0xff] %v1257_v15  ;;  %v1255_v50 = vmul.f32 %v1876_v11, %v2657_v20 }
 0x17f   :  { %1287 = vst [vmem:[%s2749_s4 + $0xe8] sm:$0xff] %v1223_v36 }
 0x180   :  { %1319 = vst [vmem:[%s2749_s4 + $0x1e8] sm:$0xff] %v1255_v50 }

// kernel: _lambda_.29
= control target key start
LH: loop header
LB: loop body
LE: loop exit
PB: predicated region body
PF: predicated region fallthrough
CT: control target
= control target key end

     0   :  { %vm250_vm0 = vcmask 130048   ;;  %s2671_s1 = inlined_call_operand.vmem [shape: bf16[16,128], index: 1, kind: input, shape index: {}]   ;;  %s2672_s0 = inlined_call_operand.vmem [shape: bf16[512,16], index: 0, kind: input, shape index: {}]   ;;  %s2673_s2 = inlined_call_operand.vmem [shape: f32[1,128], index: 2, kind: input, shape index: {}]   ;;  %s2674_s3 = inlined_call_operand.vmem [shape: f32[1,128], index: 3, kind: input, shape index: {}]   ;;  %s2675_s4 = inlined_call_operand.vmem [shape: f32[512,128], index: 4, kind: output, shape index: {}]  }
   0x1   :  { %v1526_v0 = vld [vmem:[%s2671_s1] sm:$0xff]   ;;  %v1529_v3 = vld [vmem:[%s2672_s0 + $0x8] sm:$0xff]   ;;  %v1531_v5 = vld [vmem:[%s2672_s0 + $0x10] sm:$0xff]  }
   0x2   :  { %v1527_v1 = vld [vmem:[%s2672_s0] sm:$0xff]   ;;  %1458 = vmatprep.subr.bf16.mxu0 %v1526_v0  ;;  %1524 = vmatprep.subr.bf16.mxu1 %v1526_v0  ;;  %v1530_v4 = vld [vmem:[%s2672_s0 + $0x88] sm:$0xff]   ;;  %v1532_v6 = vld [vmem:[%s2672_s0 + $0x90] sm:$0xff]  }
   0x3   :  { %v1528_v2 = vld [vmem:[%s2672_s0 + $0x80] sm:$0xff]   ;;  %1459 = vmatpush3.bf16.msra.mxu0 %v1526_v0  ;;  %1525 = vmatpush3.bf16.msra.mxu1 %v1526_v0  ;;  %v1533_v7 = vld [vmem:[%s2672_s0 + $0x18] sm:$0xff]   ;;  %v1537_v11 = vld [vmem:[%s2672_s0 + $0x28] sm:$0xff]  }
   0x4   :  { %1460 = vmatprep.mubr.msk.bf16.mxu0 %vm250_vm0, %v1527_v1  ;;  %1492 = vmatprep.mubr.msk.bf16.mxu1 %vm250_vm0, %v1528_v2  ;;  %v1534_v8 = vld [vmem:[%s2672_s0 + $0x98] sm:$0xff]   ;;  %v1535_v9 = vld [vmem:[%s2672_s0 + $0x20] sm:$0xff]   ;;  %v1538_v12 = vld [vmem:[%s2672_s0 + $0xa8] sm:$0xff]  }
   0x5   :  { %v1536_v10 = vld [vmem:[%s2672_s0 + $0xa0] sm:$0xff]   ;;  %v1539_v13 = vld [vmem:[%s2672_s0 + $0x30] sm:$0xff]   ;;  %v1541_v15 = vld [vmem:[%s2672_s0 + $0x38] sm:$0xff]  }
   0x6   :  { %1461 = vmatmul.mubr.msk.bf16.vlgmr.msra.gmra.mrb[0].mxu0 %vm250_vm0, %v1529_v3  ;;  %1493 = vmatmul.mubr.msk.bf16.vlgmr.msra.gmra.mrb[0].mxu1 %vm250_vm0, %v1530_v4  ;;  %v1540_v14 = vld [vmem:[%s2672_s0 + $0xb0] sm:$0xff]   ;;  %v1542_v16 = vld [vmem:[%s2672_s0 + $0xb8] sm:$0xff]   ;;  %v1543_v17 = vld [vmem:[%s2672_s0 + $0x40] sm:$0xff]  }
   0x7   :  { %1464 = vmatprep.mubr.msk.bf16.mxu0 %vm250_vm0, %v1531_v5  ;;  %1496 = vmatprep.mubr.msk.bf16.mxu1 %vm250_vm0, %v1532_v6  ;;  %v1544_v18 = vld [vmem:[%s2672_s0 + $0xc0] sm:$0xff]   ;;  %v1545_v19 = vld [vmem:[%s2672_s0 + $0x48] sm:$0xff]   ;;  %v1547_v21 = vld [vmem:[%s2672_s0 + $0x50] sm:$0xff]  }
   0x8   :  { %v1546_v20 = vld [vmem:[%s2672_s0 + $0xc8] sm:$0xff]   ;;  %v1548_v22 = vld [vmem:[%s2672_s0 + $0xd0] sm:$0xff]   ;;  %v1549_v23 = vld [vmem:[%s2672_s0 + $0x58] sm:$0xff]  }
   0x9   :  { %v1550_v24 = vld [vmem:[%s2672_s0 + $0xd8] sm:$0xff]   ;;  %v1551_v25 = vld [vmem:[%s2672_s0 + $0x60] sm:$0xff]   ;;  %v1553_v27 = vld [vmem:[%s2672_s0 + $0x68] sm:$0xff]  }
   0xa   :  { %v1552_v26 = vld [vmem:[%s2672_s0 + $0xe0] sm:$0xff]   ;;  %v1554_v28 = vld [vmem:[%s2672_s0 + $0xe8] sm:$0xff]   ;;  %v1555_v29 = vld [vmem:[%s2672_s0 + $0x70] sm:$0xff]  }
   0xb   :  { %v1556_v30 = vld [vmem:[%s2672_s0 + $0xf0] sm:$0xff]   ;;  %v1557_v31 = vld [vmem:[%s2672_s0 + $0x78] sm:$0xff]   ;;  %v1976_v33 = vld [vmem:[%s2673_s2] ss:$0 sm:$0xff] }
   0xc   :  { %v1558_v32 = vld [vmem:[%s2672_s0 + $0xf8] sm:$0xff]   ;;  %v1981_v35 = vld [vmem:[%s2674_s3] ss:$0 sm:$0xff] }
   0xe   :  { %1465 = vmatmul.mubr.msk.bf16.gmra.mrb[4].mxu0 %vm250_vm0, %v1533_v7  ;;  %1497 = vmatmul.mubr.msk.bf16.gmra.mrb[4].mxu1 %vm250_vm0, %v1534_v8 }
   0xf   :  { %1468 = vmatprep.mubr.msk.bf16.mxu0 %vm250_vm0, %v1535_v9  ;;  %1500 = vmatprep.mubr.msk.bf16.mxu1 %vm250_vm0, %v1536_v10 }
  0x16   :  { %1469 = vmatmul.mubr.msk.bf16.gmra.mrb[8].mxu0 %vm250_vm0, %v1537_v11  ;;  %1501 = vmatmul.mubr.msk.bf16.gmra.mrb[8].mxu1 %vm250_vm0, %v1538_v12 }
  0x17   :  { %1472 = vmatprep.mubr.msk.bf16.mxu0 %vm250_vm0, %v1539_v13  ;;  %1504 = vmatprep.mubr.msk.bf16.mxu1 %vm250_vm0, %v1540_v14 }
  0x1e   :  { %1473 = vmatmul.mubr.msk.bf16.gmra.mrb[12].mxu0 %vm250_vm0, %v1541_v15  ;;  %1505 = vmatmul.mubr.msk.bf16.gmra.mrb[12].mxu1 %vm250_vm0, %v1542_v16 }
  0x1f   :  { %1476 = vmatprep.mubr.msk.bf16.mxu0 %vm250_vm0, %v1543_v17  ;;  %1508 = vmatprep.mubr.msk.bf16.mxu1 %vm250_vm0, %v1544_v18 }
  0x26   :  { %1477 = vmatmul.mubr.msk.bf16.gmra.mrb[16].mxu0 %vm250_vm0, %v1545_v19  ;;  %1509 = vmatmul.mubr.msk.bf16.gmra.mrb[16].mxu1 %vm250_vm0, %v1546_v20 }
  0x27   :  { %1480 = vmatprep.mubr.msk.bf16.mxu0 %vm250_vm0, %v1547_v21  ;;  %1512 = vmatprep.mubr.msk.bf16.mxu1 %vm250_vm0, %v1548_v22 }
  0x2e   :  { %1481 = vmatmul.mubr.msk.bf16.gmra.mrb[20].mxu0 %vm250_vm0, %v1549_v23  ;;  %1513 = vmatmul.mubr.msk.bf16.gmra.mrb[20].mxu1 %vm250_vm0, %v1550_v24 }
  0x2f   :  { %1484 = vmatprep.mubr.msk.bf16.mxu0 %vm250_vm0, %v1551_v25  ;;  %1516 = vmatprep.mubr.msk.bf16.mxu1 %vm250_vm0, %v1552_v26 }
  0x36   :  { %1485 = vmatmul.mubr.msk.bf16.gmra.mrb[24].mxu0 %vm250_vm0, %v1553_v27  ;;  %1517 = vmatmul.mubr.msk.bf16.gmra.mrb[24].mxu1 %vm250_vm0, %v1554_v28 }
  0x37   :  { %1488 = vmatprep.mubr.msk.bf16.mxu0 %vm250_vm0, %v1555_v29  ;;  %1520 = vmatprep.mubr.msk.bf16.mxu1 %vm250_vm0, %v1556_v30 }
  0x3e   :  { %1489 = vmatmul.mubr.msk.bf16.gmra.mrb[28].mxu0 %vm250_vm0, %v1557_v31  ;;  %1521 = vmatmul.mubr.msk.bf16.gmra.mrb[28].mxu1 %vm250_vm0, %v1558_v32 }
  0xd9   :  { %v1462_v34 = vpop.f32.mrb[0].mxu0  ;;  %v1494_v36 = vpop.f32.mrb[0].mxu1 }
  0xda   :  { %v645_v37 = vmul.f32 %v1462_v34, %v1976_v33  ;;  %v677_v38 = vmul.f32 %v1494_v36, %v1976_v33  ;;  %v381_v39 = vpop.f32.mrb[1].mxu0  ;;  %v509_v40 = vpop.f32.mrb[1].mxu1 }
  0xdb   :  { %v643_v41 = vmul.f32 %v1976_v33, %v381_v39  ;;  %v675_v42 = vmul.f32 %v1976_v33, %v509_v40  ;;  %v1463_v43 = vpop.f32.mrb[2].mxu0  ;;  %v1495_v44 = vpop.f32.mrb[2].mxu1 }
  0xdc   :  { %v1988_v45 = vadd.f32 %v1981_v35, %v645_v37  ;;  %v1991_v46 = vadd.f32 %v1981_v35, %v677_v38  ;;  %v646_v47 = vmul.f32 %v1463_v43, %v1976_v33  ;;  %v678_v48 = vmul.f32 %v1495_v44, %v1976_v33  ;;  %v384_v49 = vpop.f32.mrb[3].mxu0  ;;  %v512_v50 = vpop.f32.mrb[3].mxu1 }
  0xdd   :  { %v1996_v51 = vadd.f32 %v1981_v35, %v643_v41  ;;  %v1999_v52 = vadd.f32 %v1981_v35, %v675_v42  ;;  %v644_v53 = vmul.f32 %v1976_v33, %v384_v49  ;;  %v676_v54 = vmul.f32 %v1976_v33, %v512_v50 }
  0xde   :  { %v1363_v55 = vmul.f32 -1.442695, %v1988_v45  ;;  %v1395_v56 = vmul.f32 -1.442695, %v1991_v46  ;;  %v2006_v57 = vadd.f32 %v1981_v35, %v646_v47  ;;  %v2009_v58 = vadd.f32 %v1981_v35, %v678_v48 }
  0xdf   :  { %v1361_v59 = vmul.f32 -1.442695, %v1996_v51  ;;  %v1393_v60 = vmul.f32 -1.442695, %v1999_v52  ;;  %v2014_v61 = vadd.f32 %v1981_v35, %v644_v53  ;;  %v2017_v62 = vadd.f32 %v1981_v35, %v676_v54 }
  0xe0   :  { %1559 = vpow2.f32 %v1363_v55  ;;  %v1364_v63 = vmul.f32 -1.442695, %v2006_v57  ;;  %v1396_v0 = vmul.f32 -1.442695, %v2009_v58 }
  0xe1   :  { %1561 = vpow2.f32 %v1395_v56  ;;  %v1466_v1 = vpop.f32.mrb[4].mxu0  ;;  %v1498_v2 = vpop.f32.mrb[4].mxu1  ;;  %v1362_v3 = vmul.f32 -1.442695, %v2014_v61  ;;  %v1394_v8 = vmul.f32 -1.442695, %v2017_v62 }
  0xe2   :  { %1563 = vpow2.f32 %v1361_v59  ;;  %v649_v4 = vmul.f32 %v1466_v1, %v1976_v33  ;;  %v681_v5 = vmul.f32 %v1498_v2, %v1976_v33  ;;  %v397_v6 = vpop.f32.mrb[5].mxu0  ;;  %v525_v7 = vpop.f32.mrb[5].mxu1 }
  0xe3   :  { %1565 = vpow2.f32 %v1393_v60  ;;  %v647_v9 = vmul.f32 %v1976_v33, %v397_v6  ;;  %v679_v10 = vmul.f32 %v1976_v33, %v525_v7  ;;  %v1467_v11 = vpop.f32.mrb[6].mxu0  ;;  %v1499_v12 = vpop.f32.mrb[6].mxu1 }
  0xe4   :  { %1567 = vpow2.f32 %v1364_v63  ;;  %v2028_v13 = vadd.f32 %v1981_v35, %v649_v4  ;;  %v2031_v14 = vadd.f32 %v1981_v35, %v681_v5  ;;  %v650_v15 = vmul.f32 %v1467_v11, %v1976_v33  ;;  %v400_v16 = vpop.f32.mrb[7].mxu0  ;;  %v528_v17 = vpop.f32.mrb[7].mxu1 }
  0xe5   :  { %1569 = vpow2.f32 %v1396_v0  ;;  %v2035_v18 = vadd.f32 %v1981_v35, %v647_v9  ;;  %v2038_v19 = vadd.f32 %v1981_v35, %v679_v10  ;;  %v682_v29 = vmul.f32 %v1499_v12, %v1976_v33 }
  0xe6   :  { %1571 = vpow2.f32 %v1362_v3  ;;  %v1367_v20 = vmul.f32 -1.442695, %v2028_v13  ;;  %v1399_v21 = vmul.f32 -1.442695, %v2031_v14  ;;  %v2043_v22 = vadd.f32 %v1981_v35, %v650_v15 }
  0xe7   :  { %1573 = vpow2.f32 %v1394_v8  ;;  %v1365_v23 = vmul.f32 -1.442695, %v2035_v18  ;;  %v1397_v24 = vmul.f32 -1.442695, %v2038_v19  ;;  %v648_v36 = vmul.f32 %v1976_v33, %v400_v16 }
  0xe8   :  { %1575 = vpow2.f32 %v1367_v20  ;;  %v1368_v25 = vmul.f32 -1.442695, %v2043_v22  ;;  %v680_v41 = vmul.f32 %v1976_v33, %v528_v17  ;;  %v2052_v50 = vadd.f32 %v1981_v35, %v682_v29 }
  0xe9   :  { %1577 = vpow2.f32 %v1399_v21  ;;  %v1470_v26 = vpop.f32.mrb[8].mxu0  ;;  %v1502_v27 = vpop.f32.mrb[8].mxu1  ;;  %v2056_v56 = vadd.f32 %v1981_v35, %v648_v36 }
  0xea   :  { %v1560_v28 = vpop.eup %1559  ;;  %1579 = vpow2.f32 %v1365_v23  ;;  %v413_v30 = vpop.f32.mrb[9].mxu0  ;;  %v653_v53 = vmul.f32 %v1470_v26, %v1976_v33  ;;  %v685_v59 = vmul.f32 %v1502_v27, %v1976_v33  ;;  %v2060_v0 = vadd.f32 %v1981_v35, %v680_v41 }
  0xeb   :  { %v541_v31 = vpop.f32.mrb[9].mxu1  ;;  %v1562_v32 = vpop.eup %1561  ;;  %v972_v34 = vadd.f32 1.0, %v1560_v28  ;;  %1581 = vpow2.f32 %v1397_v24  ;;  %v651_v3 = vmul.f32 %v1976_v33, %v413_v30  ;;  %v1400_v8 = vmul.f32 -1.442695, %v2052_v50 }
  0xec   :  { %v1471_v37 = vpop.f32.mrb[10].mxu0  ;;  %v1503_v38 = vpop.f32.mrb[10].mxu1  ;;  %v1004_v40 = vadd.f32 1.0, %v1562_v32  ;;  %1583 = vpow2.f32 %v1368_v25  ;;  %v2065_v9 = vadd.f32 %v1981_v35, %v653_v53  ;;  %v1366_v16 = vmul.f32 -1.442695, %v2056_v56 }
  0xed   :  { %v1564_v39 = vpop.eup %1563  ;;  %v416_v42 = vpop.f32.mrb[11].mxu0  ;;  %1585 = vrcp.f32 %v972_v34  ;;  %v2073_v17 = vadd.f32 %v1981_v35, %v685_v59  ;;  %v1398_v25 = vmul.f32 -1.442695, %v2060_v0  ;;  %v683_v26 = vmul.f32 %v1976_v33, %v541_v31 }
  0xee   :  { %v1566_v43 = vpop.eup %1565  ;;  %v970_v44 = vadd.f32 1.0, %v1564_v39  ;;  %v544_v47 = vpop.f32.mrb[11].mxu1  ;;  %1587 = vrcp.f32 %v1004_v40  ;;  %v2086_v32 = vadd.f32 %v1981_v35, %v651_v3  ;;  %v654_v34 = vmul.f32 %v1471_v37, %v1976_v33 }
  0xef   :  { %v1568_v48 = vpop.eup %1567  ;;  %v1002_v49 = vadd.f32 1.0, %v1566_v43  ;;  %v1371_v40 = vmul.f32 -1.442695, %v2065_v9  ;;  %v686_v41 = vmul.f32 %v1503_v38, %v1976_v33  ;;  %v2095_v37 = vadd.f32 %v1981_v35, %v683_v26 }
  0xf0   :  { %v1570_v54 = vpop.eup %1569  ;;  %1589 = vrcp.f32 %v970_v44  ;;  %v973_v55 = vadd.f32 1.0, %v1568_v48  ;;  %v1403_v44 = vmul.f32 -1.442695, %v2073_v17  ;;  %v652_v48 = vmul.f32 %v1976_v33, %v416_v42 }
  0xf1   :  { %v1572_v60 = vpop.eup %1571  ;;  %1591 = vrcp.f32 %v1002_v49  ;;  %v1005_v63 = vadd.f32 1.0, %v1570_v54  ;;  %v1474_v4 = vpop.f32.mrb[12].mxu0  ;;  %v684_v54 = vmul.f32 %v1976_v33, %v544_v47  ;;  %v2100_v38 = vadd.f32 %v1981_v35, %v654_v34 }
  0xf2   :  { %v1574_v1 = vpop.eup %1573  ;;  %1593 = vrcp.f32 %v973_v55  ;;  %v971_v2 = vadd.f32 1.0, %v1572_v60  ;;  %v1506_v5 = vpop.f32.mrb[12].mxu1  ;;  %v657_v60 = vmul.f32 %v1474_v4, %v1976_v33 }
  0xf3   :  { %v1576_v6 = vpop.eup %1575  ;;  %1595 = vrcp.f32 %v1005_v63  ;;  %v1003_v7 = vadd.f32 1.0, %v1574_v1  ;;  %v2067_v10 = vpop.f32.mrb[13].mxu0  ;;  %v689_v1 = vmul.f32 %v1506_v5, %v1976_v33 }
  0xf4   :  { %v2069_v11 = vpop.f32.mrb[13].mxu1  ;;  %v1578_v12 = vpop.eup %1577  ;;  %1597 = vrcp.f32 %v971_v2  ;;  %v976_v15 = vadd.f32 1.0, %v1576_v6 }
  0xf5   :  { %v2075_v20 = vpop.f32.mrb[14].mxu0  ;;  %v2077_v21 = vpop.f32.mrb[14].mxu1  ;;  %1599 = vrcp.f32 %v1003_v7  ;;  %v1008_v24 = vadd.f32 1.0, %v1578_v12  ;;  %v2125_v7 = vadd.f32 %v1981_v35, %v652_v48 }
  0xf6   :  { %v1580_v23 = vpop.eup %1579  ;;  %v2081_v27 = vpop.f32.mrb[15].mxu0  ;;  %1601 = vrcp.f32 %v976_v15 }
  0xf7   :  { %v2083_v28 = vpop.f32.mrb[15].mxu1  ;;  %v1582_v29 = vpop.eup %1581  ;;  %v974_v30 = vadd.f32 1.0, %v1580_v23  ;;  %1603 = vrcp.f32 %v1008_v24 }
  0xf8   :  { %v1584_v36 = vpop.eup %1583  ;;  %v1006_v39 = vadd.f32 1.0, %v1582_v29 }
  0xf9   :  { %v1586_v31 = vpop.eup %1585  ;;  %1605 = vrcp.f32 %v974_v30  ;;  %v977_v43 = vadd.f32 1.0, %v1584_v36  ;;  %v2103_v63 = vpop.f32.mrb[16].mxu0 }
  0xfa   :  { %v1588_v49 = vpop.eup %1587  ;;  %v1164_v53 = vmul.f32 %v1586_v31, %v1988_v45  ;;  %1607 = vrcp.f32 %v1006_v39  ;;  %v2105_v42 = vpop.f32.mrb[16].mxu1  ;;  %v2157_v39 = vadd.f32 %v1981_v35, %v689_v1 }
  0xfb   :  { %v1590_v55 = vpop.eup %1589  ;;  %v1196_v59 = vmul.f32 %v1588_v49, %v1991_v46  ;;  %1609 = vrcp.f32 %v977_v43  ;;  %v2112_v46 = vadd.f32 %v1981_v35, %v686_v41  ;;  %v2115_v2 = vpop.f32.mrb[17].mxu0  ;;  %v1370_v41 = vmul.f32 -1.442695, %v2125_v7 }
  0xfc   :  { %v1592_v45 = vpop.eup %1591  ;;  %1228 = vst [vmem:[%s2675_s4 + $0x10] sm:$0xff] %v1164_v53  ;;  %v1162_v47 = vmul.f32 %v1590_v55, %v1996_v51  ;;  %1611 = vpow2.f32 %v1400_v8  ;;  %v2117_v3 = vpop.f32.mrb[17].mxu1  ;;  %v1369_v51 = vmul.f32 -1.442695, %v2086_v32  ;;  %v1407_v55 = vmul.f32 -1.442695, %v2157_v39 }
  0xfd   :  { %v1594_v4 = vpop.eup %1593  ;;  %1260 = vst [vmem:[%s2675_s4 + $0x110] sm:$0xff] %v1196_v59  ;;  %v1194_v6 = vmul.f32 %v1592_v45, %v1999_v52  ;;  %1613 = vpow2.f32 %v1366_v16  ;;  %v2127_v8 = vpop.f32.mrb[18].mxu0  ;;  %v1401_v52 = vmul.f32 -1.442695, %v2095_v37  ;;  %v2137_v16 = vadd.f32 %v1981_v35, %v684_v54 }
  0xfe   :  { %v2129_v5 = vpop.f32.mrb[18].mxu1  ;;  %v1596_v12 = vpop.eup %1595  ;;  %1226 = vst [vmem:[%s2675_s4] sm:$0xff] %v1162_v47  ;;  %v1165_v15 = vmul.f32 %v1594_v4, %v2006_v57  ;;  %1615 = vpow2.f32 %v1398_v25  ;;  %v1372_v57 = vmul.f32 -1.442695, %v2100_v38  ;;  %v2149_v25 = vadd.f32 %v1981_v35, %v657_v60 }
  0xff   :  { %v2139_v23 = vpop.f32.mrb[19].mxu0  ;;  %v2141_v24 = vpop.f32.mrb[19].mxu1  ;;  %1258 = vst [vmem:[%s2675_s4 + $0x100] sm:$0xff] %v1194_v6  ;;  %v1197_v29 = vmul.f32 %v1596_v12, %v2009_v58  ;;  %1617 = vpow2.f32 %v1371_v40  ;;  %v1404_v36 = vmul.f32 -1.442695, %v2112_v46  ;;  %v655_v6 = vmul.f32 %v1976_v33, %v2067_v10 }
 0x100   :  { %v1598_v26 = vpop.eup %1597  ;;  %1229 = vst [vmem:[%s2675_s4 + $0x18] sm:$0xff] %v1165_v15  ;;  %1619 = vpow2.f32 %v1403_v44  ;;  %v1402_v43 = vmul.f32 -1.442695, %v2137_v16  ;;  %v1375_v48 = vmul.f32 -1.442695, %v2149_v25  ;;  %v658_v10 = vmul.f32 %v2075_v20, %v1976_v33 }
 0x101   :  { %v1600_v30 = vpop.eup %1599  ;;  %v1163_v34 = vmul.f32 %v1598_v26, %v2014_v61  ;;  %1261 = vst [vmem:[%s2675_s4 + $0x118] sm:$0xff] %v1197_v29  ;;  %1621 = vpow2.f32 %v1369_v51  ;;  %v2174_v49 = vpop.f32.mrb[20].mxu0 }
 0x102   :  { %v1602_v58 = vpop.eup %1601  ;;  %v1195_v40 = vmul.f32 %v1600_v30, %v2017_v62  ;;  %1623 = vpow2.f32 %v1401_v52  ;;  %v2176_v53 = vpop.f32.mrb[20].mxu1  ;;  %v687_v52 = vmul.f32 %v1976_v33, %v2069_v11  ;;  %v690_v30 = vmul.f32 %v2077_v21, %v1976_v33 }
 0x103   :  { %v1604_v31 = vpop.eup %1603  ;;  %1227 = vst [vmem:[%s2675_s4 + $0x8] sm:$0xff] %v1163_v34  ;;  %v1168_v61 = vmul.f32 %v1602_v58, %v2028_v13  ;;  %1625 = vpow2.f32 %v1372_v57  ;;  %v2183_v59 = vpop.f32.mrb[21].mxu0  ;;  %v2218_v11 = vadd.f32 %v1981_v35, %v655_v6  ;;  %v656_v58 = vmul.f32 %v1976_v33, %v2081_v27 }
 0x104   :  { %v1606_v44 = vpop.eup %1605  ;;  %1259 = vst [vmem:[%s2675_s4 + $0x108] sm:$0xff] %v1195_v40  ;;  %v1200_v62 = vmul.f32 %v1604_v31, %v2031_v14  ;;  %1627 = vpow2.f32 %v1404_v36  ;;  %v2185_v14 = vpop.f32.mrb[21].mxu1  ;;  %v2223_v20 = vadd.f32 %v1981_v35, %v687_v52 }
 0x105   :  { %v1608_v54 = vpop.eup %1607  ;;  %1232 = vst [vmem:[%s2675_s4 + $0x30] sm:$0xff] %v1168_v61  ;;  %v1166_v13 = vmul.f32 %v1606_v44, %v2035_v18  ;;  %1629 = vpow2.f32 %v1370_v41  ;;  %v2191_v47 = vpop.f32.mrb[22].mxu0  ;;  %v2230_v44 = vadd.f32 %v1981_v35, %v658_v10  ;;  %v2245_v6 = vadd.f32 %v1981_v35, %v656_v58 }
 0x106   :  { %v1610_v60 = vpop.eup %1609  ;;  %1264 = vst [vmem:[%s2675_s4 + $0x130] sm:$0xff] %v1200_v62  ;;  %v1198_v45 = vmul.f32 %v1608_v54, %v2038_v19  ;;  %v2193_v1 = vpop.f32.mrb[22].mxu1  ;;  %1631 = vpow2.f32 %v1402_v43  ;;  %v688_v10 = vmul.f32 %v1976_v33, %v2083_v28 }
 0x107   :  { %v1612_v18 = vpop.eup %1611  ;;  %1230 = vst [vmem:[%s2675_s4 + $0x20] sm:$0xff] %v1166_v13  ;;  %v1169_v4 = vmul.f32 %v1610_v60, %v2043_v22  ;;  %v2201_v51 = vpop.f32.mrb[23].mxu0  ;;  %1633 = vpow2.f32 %v1375_v48  ;;  %v2237_v13 = vadd.f32 %v1981_v35, %v690_v30  ;;  %v1376_v30 = vmul.f32 -1.442695, %v2230_v44 }
 0x108   :  { %v2203_v12 = vpop.f32.mrb[23].mxu1  ;;  %v1614_v19 = vpop.eup %1613  ;;  %1262 = vst [vmem:[%s2675_s4 + $0x120] sm:$0xff] %v1198_v45  ;;  %v1009_v15 = vadd.f32 1.0, %v1612_v18  ;;  %1635 = vpow2.f32 %v1407_v55  ;;  %v1374_v28 = vmul.f32 -1.442695, %v2245_v6 }
 0x109   :  { %v1616_v26 = vpop.eup %1615  ;;  %1233 = vst [vmem:[%s2675_s4 + $0x38] sm:$0xff] %v1169_v4  ;;  %v975_v22 = vadd.f32 1.0, %v1614_v19  ;;  %v2225_v31 = vpop.f32.mrb[24].mxu0  ;;  %v1373_v4 = vmul.f32 -1.442695, %v2218_v11 }
 0x10a   :  { %v1618_v29 = vpop.eup %1617  ;;  %1637 = vrcp.f32 %v1009_v15  ;;  %v1007_v57 = vadd.f32 1.0, %v1616_v26  ;;  %v2227_v61 = vpop.f32.mrb[24].mxu1 }
 0x10b   :  { %v1620_v34 = vpop.eup %1619  ;;  %1639 = vrcp.f32 %v975_v22  ;;  %v980_v36 = vadd.f32 1.0, %v1618_v29  ;;  %v2232_v62 = vpop.f32.mrb[25].mxu0  ;;  %v1405_v22 = vmul.f32 -1.442695, %v2223_v20 }
 0x10c   :  { %v1622_v40 = vpop.eup %1621  ;;  %1641 = vrcp.f32 %v1007_v57  ;;  %v1012_v41 = vadd.f32 1.0, %v1620_v34  ;;  %v2234_v48 = vpop.f32.mrb[25].mxu1  ;;  %v661_v34 = vmul.f32 %v2103_v63, %v1976_v33  ;;  %v2264_v63 = vadd.f32 %v1981_v35, %v688_v10 }
 0x10d   :  { %v1624_v21 = vpop.eup %1623  ;;  %1643 = vrcp.f32 %v980_v36  ;;  %v978_v43 = vadd.f32 1.0, %v1622_v40  ;;  %v2239_v55 = vpop.f32.mrb[26].mxu0  ;;  %v1408_v40 = vmul.f32 -1.442695, %v2237_v13 }
 0x10e   :  { %v1626_v27 = vpop.eup %1625  ;;  %1645 = vrcp.f32 %v1012_v41  ;;  %v1010_v54 = vadd.f32 1.0, %v1624_v21  ;;  %v2241_v60 = vpop.f32.mrb[26].mxu1  ;;  %v693_v41 = vmul.f32 %v2105_v42, %v1976_v33 }
 0x10f   :  { %v1628_v45 = vpop.eup %1627  ;;  %1647 = vrcp.f32 %v978_v43  ;;  %v981_v18 = vadd.f32 1.0, %v1626_v27  ;;  %v2247_v19 = vpop.f32.mrb[27].mxu0  ;;  %v659_v27 = vmul.f32 %v1976_v33, %v2115_v2  ;;  %v662_v2 = vmul.f32 %v2127_v8, %v1976_v33 }
 0x110   :  { %v2249_v15 = vpop.f32.mrb[27].mxu1  ;;  %v1630_v52 = vpop.eup %1629  ;;  %1649 = vrcp.f32 %v1010_v54  ;;  %v1013_v26 = vadd.f32 1.0, %v1628_v45 }
 0x111   :  { %v1632_v29 = vpop.eup %1631  ;;  %1651 = vrcp.f32 %v981_v18  ;;  %v979_v57 = vadd.f32 1.0, %v1630_v52  ;;  %v691_v18 = vmul.f32 %v1976_v33, %v2117_v3  ;;  %v2268_v52 = vpop.f32.mrb[28].mxu0 }
 0x112   :  { %v1634_v36 = vpop.eup %1633  ;;  %1653 = vrcp.f32 %v1013_v26  ;;  %v1011_v58 = vadd.f32 1.0, %v1632_v29  ;;  %v2270_v42 = vpop.f32.mrb[28].mxu1 }
 0x113   :  { %v1636_v21 = vpop.eup %1635  ;;  %1655 = vrcp.f32 %v979_v57  ;;  %v984_v43 = vadd.f32 1.0, %v1634_v36  ;;  %v2274_v57 = vadd.f32 %v1981_v35, %v661_v34  ;;  %v2278_v36 = vpop.f32.mrb[29].mxu0 }
 0x114   :  { %v1638_v54 = vpop.eup %1637  ;;  %1657 = vrcp.f32 %v1011_v58  ;;  %v1016_v45 = vadd.f32 1.0, %v1636_v21  ;;  %v2280_v10 = vpop.f32.mrb[29].mxu1  ;;  %v2284_v21 = vadd.f32 %v1981_v35, %v693_v41  ;;  %v660_v41 = vmul.f32 %v1976_v33, %v2139_v23 }
 0x115   :  { %v1640_v26 = vpop.eup %1639  ;;  %v1201_v29 = vmul.f32 %v1638_v54, %v2052_v50  ;;  %1659 = vrcp.f32 %v984_v43  ;;  %v694_v50 = vmul.f32 %v2129_v5, %v1976_v33  ;;  %v2288_v43 = vpop.f32.mrb[30].mxu0 }
 0x116   :  { %v1642_v58 = vpop.eup %1641  ;;  %v1167_v3 = vmul.f32 %v1640_v26, %v2056_v56  ;;  %1661 = vrcp.f32 %v1016_v45  ;;  %v2290_v34 = vpop.f32.mrb[30].mxu1  ;;  %v2297_v56 = vadd.f32 %v1981_v35, %v659_v27 }
 0x117   :  { %v1644_v54 = vpop.eup %1643  ;;  %1265 = vst [vmem:[%s2675_s4 + $0x138] sm:$0xff] %v1201_v29  ;;  %v1199_v8 = vmul.f32 %v1642_v58, %v2060_v0  ;;  %1663 = vpow2.f32 %v1373_v4  ;;  %v2301_v45 = vpop.f32.mrb[31].mxu0  ;;  %v1406_v0 = vmul.f32 -1.442695, %v2264_v63  ;;  %v2311_v4 = vadd.f32 %v1981_v35, %v691_v18 }
 0x118   :  { %v2303_v5 = vpop.f32.mrb[31].mxu1  ;;  %v1646_v26 = vpop.eup %1645  ;;  %1231 = vst [vmem:[%s2675_s4 + $0x28] sm:$0xff] %v1167_v3  ;;  %v1172_v29 = vmul.f32 %v1644_v54, %v2065_v9  ;;  %1665 = vpow2.f32 %v1405_v22  ;;  %v1379_v58 = vmul.f32 -1.442695, %v2274_v57  ;;  %v2319_v3 = vadd.f32 %v1981_v35, %v662_v2 }
 0x119   :  { %v1648_v27 = vpop.eup %1647  ;;  %1263 = vst [vmem:[%s2675_s4 + $0x128] sm:$0xff] %v1199_v8  ;;  %v1204_v23 = vmul.f32 %v1646_v26, %v2073_v17  ;;  %1667 = vpow2.f32 %v1376_v30  ;;  %v1411_v18 = vmul.f32 -1.442695, %v2284_v21  ;;  %v2327_v54 = vadd.f32 %v1981_v35, %v694_v50 }
 0x11a   :  { %v1650_v9 = vpop.eup %1649  ;;  %1236 = vst [vmem:[%s2675_s4 + $0x50] sm:$0xff] %v1172_v29  ;;  %v1170_v22 = vmul.f32 %v1648_v27, %v2086_v32  ;;  %1669 = vpow2.f32 %v1408_v40  ;;  %v1377_v2 = vmul.f32 -1.442695, %v2297_v56  ;;  %v2335_v8 = vadd.f32 %v1981_v35, %v660_v41 }
 0x11b   :  { %v1652_v17 = vpop.eup %1651  ;;  %1268 = vst [vmem:[%s2675_s4 + $0x150] sm:$0xff] %v1204_v23  ;;  %v1202_v30 = vmul.f32 %v1650_v9, %v2095_v37  ;;  %1671 = vpow2.f32 %v1374_v28  ;;  %v1409_v50 = vmul.f32 -1.442695, %v2311_v4  ;;  %v1380_v28 = vmul.f32 -1.442695, %v2319_v3 }
 0x11c   :  { %v1654_v32 = vpop.eup %1653  ;;  %1234 = vst [vmem:[%s2675_s4 + $0x40] sm:$0xff] %v1170_v22  ;;  %v1173_v40 = vmul.f32 %v1652_v17, %v2100_v38  ;;  %1673 = vpow2.f32 %v1406_v0  ;;  %v1412_v29 = vmul.f32 -1.442695, %v2327_v54  ;;  %v1378_v27 = vmul.f32 -1.442695, %v2335_v8 }
 0x11d   :  { %v1656_v26 = vpop.eup %1655  ;;  %1266 = vst [vmem:[%s2675_s4 + $0x140] sm:$0xff] %v1202_v30  ;;  %v1205_v37 = vmul.f32 %v1654_v32, %v2112_v46  ;;  %1675 = vpow2.f32 %v1379_v58  ;;  %v663_v32 = vmul.f32 %v1976_v33, %v2183_v59 }
 0x11e   :  { %v1658_v41 = vpop.eup %1657  ;;  %1237 = vst [vmem:[%s2675_s4 + $0x58] sm:$0xff] %v1173_v40  ;;  %v1171_v38 = vmul.f32 %v1656_v26, %v2125_v7  ;;  %1677 = vpow2.f32 %v1411_v18  ;;  %v695_v26 = vmul.f32 %v1976_v33, %v2185_v14 }
 0x11f   :  { %v1660_v0 = vpop.eup %1659  ;;  %1269 = vst [vmem:[%s2675_s4 + $0x158] sm:$0xff] %v1205_v37  ;;  %v1203_v46 = vmul.f32 %v1658_v41, %v2137_v16  ;;  %1679 = vpow2.f32 %v1377_v2  ;;  %v692_v16 = vmul.f32 %v1976_v33, %v2141_v24  ;;  %v697_v24 = vmul.f32 %v2176_v53, %v1976_v33 }
 0x120   :  { %v1662_v23 = vpop.eup %1661  ;;  %1235 = vst [vmem:[%s2675_s4 + $0x48] sm:$0xff] %v1171_v38  ;;  %v1176_v7 = vmul.f32 %v1660_v0, %v2149_v25  ;;  %1681 = vpow2.f32 %v1409_v50  ;;  %v665_v25 = vmul.f32 %v2174_v49, %v1976_v33 }
 0x121   :  { %v1664_v58 = vpop.eup %1663  ;;  %1267 = vst [vmem:[%s2675_s4 + $0x148] sm:$0xff] %v1203_v46  ;;  %v1208_v9 = vmul.f32 %v1662_v23, %v2157_v39  ;;  %1683 = vpow2.f32 %v1380_v28  ;;  %v2380_v49 = vadd.f32 %v1981_v35, %v692_v16  ;;  %v2388_v59 = vadd.f32 %v1981_v35, %v697_v24 }
 0x122   :  { %v1666_v22 = vpop.eup %1665  ;;  %1240 = vst [vmem:[%s2675_s4 + $0x70] sm:$0xff] %v1176_v7  ;;  %v982_v18 = vadd.f32 1.0, %v1664_v58  ;;  %1685 = vpow2.f32 %v1412_v29  ;;  %v2385_v53 = vadd.f32 %v1981_v35, %v665_v25  ;;  %v2391_v46 = vadd.f32 %v1981_v35, %v663_v32 }
 0x123   :  { %v1668_v17 = vpop.eup %1667  ;;  %1272 = vst [vmem:[%s2675_s4 + $0x170] sm:$0xff] %v1208_v9  ;;  %v1014_v39 = vadd.f32 1.0, %v1666_v22  ;;  %1687 = vpow2.f32 %v1378_v27  ;;  %v1410_v23 = vmul.f32 -1.442695, %v2380_v49  ;;  %v2395_v7 = vadd.f32 %v1981_v35, %v695_v26 }
 0x124   :  { %v1670_v30 = vpop.eup %1669  ;;  %1689 = vrcp.f32 %v982_v18  ;;  %v985_v2 = vadd.f32 1.0, %v1668_v17  ;;  %v1383_v16 = vmul.f32 -1.442695, %v2385_v53  ;;  %v666_v22 = vmul.f32 %v2191_v47, %v1976_v33 }
 0x125   :  { %v1672_v40 = vpop.eup %1671  ;;  %1691 = vrcp.f32 %v1014_v39  ;;  %v1017_v50 = vadd.f32 1.0, %v1670_v30  ;;  %v1415_v17 = vmul.f32 -1.442695, %v2388_v59  ;;  %v698_v39 = vmul.f32 %v2193_v1, %v1976_v33 }
 0x126   :  { %v1674_v37 = vpop.eup %1673  ;;  %1693 = vrcp.f32 %v985_v2  ;;  %v983_v28 = vadd.f32 1.0, %v1672_v40  ;;  %v1381_v2 = vmul.f32 -1.442695, %v2391_v46  ;;  %v664_v32 = vmul.f32 %v1976_v33, %v2201_v51 }
 0x127   :  { %v1676_v41 = vpop.eup %1675  ;;  %1695 = vrcp.f32 %v1017_v50  ;;  %v1015_v38 = vadd.f32 1.0, %v1674_v37  ;;  %v1413_v47 = vmul.f32 -1.442695, %v2395_v7  ;;  %v696_v26 = vmul.f32 %v1976_v33, %v2203_v12 }
 0x128   :  { %v1678_v29 = vpop.eup %1677  ;;  %1697 = vrcp.f32 %v983_v28  ;;  %v988_v0 = vadd.f32 1.0, %v1676_v41  ;;  %v2410_v1 = vadd.f32 %v1981_v35, %v666_v22  ;;  %v669_v41 = vmul.f32 %v2225_v31, %v1976_v33 }
 0x129   :  { %v1680_v27 = vpop.eup %1679  ;;  %1699 = vrcp.f32 %v1015_v38  ;;  %v1020_v14 = vadd.f32 1.0, %v1678_v29  ;;  %v2416_v29 = vadd.f32 %v1981_v35, %v698_v39  ;;  %v667_v31 = vmul.f32 %v1976_v33, %v2232_v62 }
 0x12a   :  { %v1682_v58 = vpop.eup %1681  ;;  %1701 = vrcp.f32 %v988_v0  ;;  %v986_v9 = vadd.f32 1.0, %v1680_v27  ;;  %v701_v0 = vmul.f32 %v2227_v61, %v1976_v33  ;;  %v2431_v61 = vadd.f32 %v1981_v35, %v696_v26 }
 0x12b   :  { %v1684_v18 = vpop.eup %1683  ;;  %1703 = vrcp.f32 %v1020_v14  ;;  %v1018_v25 = vadd.f32 1.0, %v1682_v58  ;;  %v2422_v14 = vadd.f32 %v1981_v35, %v664_v32  ;;  %v1384_v22 = vmul.f32 -1.442695, %v2410_v1 }
 0x12c   :  { %v1686_v24 = vpop.eup %1685  ;;  %1705 = vrcp.f32 %v986_v9  ;;  %v989_v30 = vadd.f32 1.0, %v1684_v18  ;;  %v2441_v18 = vadd.f32 %v1981_v35, %v669_v41 }
 0x12d   :  { %v1688_v40 = vpop.eup %1687  ;;  %1707 = vrcp.f32 %v1018_v25  ;;  %v1021_v50 = vadd.f32 1.0, %v1686_v24  ;;  %v2449_v25 = vadd.f32 %v1981_v35, %v701_v0  ;;  %v1382_v39 = vmul.f32 -1.442695, %v2422_v14 }
 0x12e   :  { %v1690_v37 = vpop.eup %1689  ;;  %1709 = vrcp.f32 %v989_v30  ;;  %v987_v28 = vadd.f32 1.0, %v1688_v40  ;;  %v2457_v24 = vadd.f32 %v1981_v35, %v667_v31  ;;  %v1414_v30 = vmul.f32 -1.442695, %v2431_v61 }
 0x12f   :  { %v1692_v38 = vpop.eup %1691  ;;  %v1174_v51 = vmul.f32 %v1690_v37, %v2218_v11  ;;  %1711 = vrcp.f32 %v1021_v50  ;;  %v1387_v40 = vmul.f32 -1.442695, %v2441_v18 }
 0x130   :  { %v1694_v12 = vpop.eup %1693  ;;  %v1206_v27 = vmul.f32 %v1692_v38, %v2223_v20  ;;  %1713 = vrcp.f32 %v987_v28  ;;  %v699_v20 = vmul.f32 %v1976_v33, %v2234_v48  ;;  %v1385_v26 = vmul.f32 -1.442695, %v2457_v24 }
 0x131   :  { %v1696_v58 = vpop.eup %1695  ;;  %1238 = vst [vmem:[%s2675_s4 + $0x60] sm:$0xff] %v1174_v51  ;;  %v1177_v11 = vmul.f32 %v1694_v12, %v2230_v44  ;;  %1715 = vpow2.f32 %v1410_v23  ;;  %v1416_v23 = vmul.f32 -1.442695, %v2416_v29 }
 0x132   :  { %v1698_v9 = vpop.eup %1697  ;;  %1270 = vst [vmem:[%s2675_s4 + $0x160] sm:$0xff] %v1206_v27  ;;  %v1209_v62 = vmul.f32 %v1696_v58, %v2237_v13  ;;  %1717 = vpow2.f32 %v1383_v16  ;;  %v2465_v32 = vadd.f32 %v1981_v35, %v699_v20  ;;  %v1419_v35 = vmul.f32 -1.442695, %v2449_v25 }
 0x133   :  { %v1700_v44 = vpop.eup %1699  ;;  %1241 = vst [vmem:[%s2675_s4 + $0x78] sm:$0xff] %v1177_v11  ;;  %v1175_v48 = vmul.f32 %v1698_v9, %v2245_v6  ;;  %1719 = vpow2.f32 %v1415_v17 }
 0x134   :  { %v1702_v13 = vpop.eup %1701  ;;  %1273 = vst [vmem:[%s2675_s4 + $0x178] sm:$0xff] %v1209_v62  ;;  %v1207_v16 = vmul.f32 %v1700_v44, %v2264_v63  ;;  %1721 = vpow2.f32 %v1381_v2  ;;  %v1417_v28 = vmul.f32 -1.442695, %v2465_v32 }
 0x135   :  { %v1704_v6 = vpop.eup %1703  ;;  %1239 = vst [vmem:[%s2675_s4 + $0x68] sm:$0xff] %v1175_v48  ;;  %v1180_v17 = vmul.f32 %v1702_v13, %v2274_v57  ;;  %1723 = vpow2.f32 %v1413_v47 }
 0x136   :  { %v1706_v63 = vpop.eup %1705  ;;  %1271 = vst [vmem:[%s2675_s4 + $0x168] sm:$0xff] %v1207_v16  ;;  %v1212_v2 = vmul.f32 %v1704_v6, %v2284_v21  ;;  %1725 = vpow2.f32 %v1384_v22 }
 0x137   :  { %v1708_v50 = vpop.eup %1707  ;;  %1244 = vst [vmem:[%s2675_s4 + $0x90] sm:$0xff] %v1180_v17  ;;  %v1178_v57 = vmul.f32 %v1706_v63, %v2297_v56  ;;  %1727 = vpow2.f32 %v1416_v23 }
 0x138   :  { %v1710_v47 = vpop.eup %1709  ;;  %1276 = vst [vmem:[%s2675_s4 + $0x190] sm:$0xff] %v1212_v2  ;;  %v1210_v21 = vmul.f32 %v1708_v50, %v2311_v4  ;;  %1729 = vpow2.f32 %v1382_v39 }
 0x139   :  { %v1712_v37 = vpop.eup %1711  ;;  %1242 = vst [vmem:[%s2675_s4 + $0x80] sm:$0xff] %v1178_v57  ;;  %v1181_v56 = vmul.f32 %v1710_v47, %v2319_v3  ;;  %1731 = vpow2.f32 %v1414_v30  ;;  %v670_v3 = vmul.f32 %v2239_v55, %v1976_v33  ;;  %v1815_v55 = vld [vmem:[%s2673_s2] ss:$0 sm:$0xff] }
 0x13a   :  { %v1714_v41 = vpop.eup %1713  ;;  %1274 = vst [vmem:[%s2675_s4 + $0x180] sm:$0xff] %v1210_v21  ;;  %v1213_v4 = vmul.f32 %v1712_v37, %v2327_v54  ;;  %1733 = vpow2.f32 %v1387_v40  ;;  %v702_v54 = vmul.f32 %v2241_v60, %v1976_v33  ;;  %v668_v31 = vmul.f32 %v1815_v55, %v2247_v19  ;;  %v2513_v60 = vld [vmem:[%s2674_s3] ss:$0 sm:$0xff] }
 0x13b   :  { %v1716_v38 = vpop.eup %1715  ;;  %1245 = vst [vmem:[%s2675_s4 + $0x98] sm:$0xff] %v1181_v56  ;;  %v1179_v51 = vmul.f32 %v1714_v41, %v2335_v8  ;;  %1735 = vpow2.f32 %v1419_v35  ;;  %v700_v20 = vmul.f32 %v1815_v55, %v2249_v15  ;;  %v2516_v62 = vadd.f32 %v2513_v60, %v670_v3 }
 0x13c   :  { %v1718_v0 = vpop.eup %1717  ;;  %1277 = vst [vmem:[%s2675_s4 + $0x198] sm:$0xff] %v1213_v4  ;;  %v1019_v12 = vadd.f32 1.0, %v1716_v38  ;;  %1737 = vpow2.f32 %v1385_v26  ;;  %v2519_v19 = vadd.f32 %v2513_v60, %v702_v54  ;;  %v2522_v23 = vadd.f32 %v2513_v60, %v668_v31 }
 0x13d   :  { %v1720_v27 = vpop.eup %1719  ;;  %1243 = vst [vmem:[%s2675_s4 + $0x88] sm:$0xff] %v1179_v51  ;;  %v992_v8 = vadd.f32 1.0, %v1718_v0  ;;  %1739 = vpow2.f32 %v1417_v28  ;;  %v2525_v39 = vadd.f32 %v2513_v60, %v700_v20  ;;  %v1388_v30 = vmul.f32 -1.442695, %v2516_v62 }
 0x13e   :  { %v1722_v58 = vpop.eup %1721  ;;  %1741 = vrcp.f32 %v1019_v12  ;;  %v1024_v11 = vadd.f32 1.0, %v1720_v27  ;;  %v673_v63 = vmul.f32 %v1815_v55, %v2268_v52  ;;  %v1420_v50 = vmul.f32 -1.442695, %v2519_v19 }
 0x13f   :  { %v1724_v9 = vpop.eup %1723  ;;  %1743 = vrcp.f32 %v992_v8  ;;  %v990_v33 = vadd.f32 1.0, %v1722_v58  ;;  %v705_v57 = vmul.f32 %v1815_v55, %v2270_v42  ;;  %v1386_v21 = vmul.f32 -1.442695, %v2522_v23 }
 0x140   :  { %v1726_v22 = vpop.eup %1725  ;;  %1745 = vrcp.f32 %v1024_v11  ;;  %v1022_v44 = vadd.f32 1.0, %v1724_v9  ;;  %v671_v26 = vmul.f32 %v1815_v55, %v2278_v36  ;;  %v1418_v28 = vmul.f32 -1.442695, %v2525_v39 }
 0x141   :  { %v1728_v48 = vpop.eup %1727  ;;  %1747 = vrcp.f32 %v990_v33  ;;  %v993_v15 = vadd.f32 1.0, %v1726_v22  ;;  %v703_v52 = vmul.f32 %v1815_v55, %v2280_v10  ;;  %v2536_v38 = vadd.f32 %v2513_v60, %v673_v63 }
 0x142   :  { %v1730_v13 = vpop.eup %1729  ;;  %1749 = vrcp.f32 %v1022_v44  ;;  %v1025_v16 = vadd.f32 1.0, %v1728_v48  ;;  %v674_v42 = vmul.f32 %v1815_v55, %v2288_v43  ;;  %v2540_v36 = vadd.f32 %v2513_v60, %v705_v57 }
 0x143   :  { %v1732_v6 = vpop.eup %1731  ;;  %1751 = vrcp.f32 %v993_v15  ;;  %v991_v17 = vadd.f32 1.0, %v1730_v13  ;;  %v706_v0 = vmul.f32 %v1815_v55, %v2290_v34  ;;  %v2545_v10 = vadd.f32 %v2513_v60, %v671_v26 }
 0x144   :  { %v1734_v2 = vpop.eup %1733  ;;  %1753 = vrcp.f32 %v1025_v16  ;;  %v1023_v40 = vadd.f32 1.0, %v1732_v6  ;;  %v672_v27 = vmul.f32 %v1815_v55, %v2301_v45  ;;  %v2550_v31 = vadd.f32 %v2513_v60, %v703_v52 }
 0x145   :  { %v1736_v35 = vpop.eup %1735  ;;  %1755 = vrcp.f32 %v991_v17  ;;  %v996_v47 = vadd.f32 1.0, %v1734_v2  ;;  %v704_v58 = vmul.f32 %v1815_v55, %v2303_v5  ;;  %v2559_v45 = vadd.f32 %v2513_v60, %v674_v42 }
 0x146   :  { %v1738_v37 = vpop.eup %1737  ;;  %1757 = vrcp.f32 %v1023_v40  ;;  %v1028_v56 = vadd.f32 1.0, %v1736_v35  ;;  %v1423_v55 = vmul.f32 -1.442695, %v2540_v36  ;;  %v2567_v20 = vadd.f32 %v2513_v60, %v706_v0 }
 0x147   :  { %v1740_v41 = vpop.eup %1739  ;;  %1759 = vrcp.f32 %v996_v47  ;;  %v994_v4 = vadd.f32 1.0, %v1738_v37  ;;  %v1389_v33 = vmul.f32 -1.442695, %v2545_v10  ;;  %v2575_v22 = vadd.f32 %v2513_v60, %v672_v27 }
 0x148   :  { %v1742_v51 = vpop.eup %1741  ;;  %1761 = vrcp.f32 %v1028_v56  ;;  %v1026_v3 = vadd.f32 1.0, %v1740_v41  ;;  %v1421_v48 = vmul.f32 -1.442695, %v2550_v31  ;;  %v2583_v15 = vadd.f32 %v2513_v60, %v704_v58 }
 0x149   :  { %v1744_v12 = vpop.eup %1743  ;;  %v1211_v54 = vmul.f32 %v1742_v51, %v2380_v49  ;;  %1763 = vrcp.f32 %v994_v4  ;;  %v1391_v49 = vmul.f32 -1.442695, %v2536_v38  ;;  %v1392_v16 = vmul.f32 -1.442695, %v2559_v45 }
 0x14a   :  { %v1746_v8 = vpop.eup %1745  ;;  %v1184_v43 = vmul.f32 %v1744_v12, %v2385_v53  ;;  %1765 = vrcp.f32 %v1026_v3  ;;  %v1424_v60 = vmul.f32 -1.442695, %v2567_v20  ;;  %v1422_v2 = vmul.f32 -1.442695, %v2583_v15 }
 0x14b   :  { %v1748_v11 = vpop.eup %1747  ;;  %1275 = vst [vmem:[%s2675_s4 + $0x188] sm:$0xff] %v1211_v54  ;;  %v1216_v34 = vmul.f32 %v1746_v8, %v2388_v59  ;;  %1767 = vpow2.f32 %v1388_v30  ;;  %v1390_v30 = vmul.f32 -1.442695, %v2575_v22 }
 0x14c   :  { %v1750_v53 = vpop.eup %1749  ;;  %1248 = vst [vmem:[%s2675_s4 + $0xb0] sm:$0xff] %v1184_v43  ;;  %v1182_v5 = vmul.f32 %v1748_v11, %v2391_v46  ;;  %1769 = vpow2.f32 %v1420_v50 }
 0x14d   :  { %v1752_v59 = vpop.eup %1751  ;;  %1280 = vst [vmem:[%s2675_s4 + $0x1b0] sm:$0xff] %v1216_v34  ;;  %v1214_v9 = vmul.f32 %v1750_v53, %v2395_v7  ;;  %1771 = vpow2.f32 %v1386_v21 }
 0x14e   :  { %v1754_v46 = vpop.eup %1753  ;;  %1246 = vst [vmem:[%s2675_s4 + $0xa0] sm:$0xff] %v1182_v5  ;;  %v1185_v44 = vmul.f32 %v1752_v59, %v2410_v1  ;;  %1773 = vpow2.f32 %v1418_v28 }
 0x14f   :  { %v1756_v7 = vpop.eup %1755  ;;  %1278 = vst [vmem:[%s2675_s4 + $0x1a0] sm:$0xff] %v1214_v9  ;;  %v1217_v13 = vmul.f32 %v1754_v46, %v2416_v29  ;;  %1775 = vpow2.f32 %v1391_v49 }
 0x150   :  { %v1758_v6 = vpop.eup %1757  ;;  %1249 = vst [vmem:[%s2675_s4 + $0xb8] sm:$0xff] %v1185_v44  ;;  %v1183_v1 = vmul.f32 %v1756_v7, %v2422_v14  ;;  %1777 = vpow2.f32 %v1423_v55 }
 0x151   :  { %v1760_v17 = vpop.eup %1759  ;;  %1281 = vst [vmem:[%s2675_s4 + $0x1b8] sm:$0xff] %v1217_v13  ;;  %v1215_v29 = vmul.f32 %v1758_v6, %v2431_v61  ;;  %1779 = vpow2.f32 %v1389_v33 }
 0x152   :  { %v1762_v63 = vpop.eup %1761  ;;  %1247 = vst [vmem:[%s2675_s4 + $0xa8] sm:$0xff] %v1183_v1  ;;  %v1188_v14 = vmul.f32 %v1760_v17, %v2441_v18  ;;  %1781 = vpow2.f32 %v1421_v48 }
 0x153   :  { %v1764_v40 = vpop.eup %1763  ;;  %1279 = vst [vmem:[%s2675_s4 + $0x1a8] sm:$0xff] %v1215_v29  ;;  %v1220_v61 = vmul.f32 %v1762_v63, %v2449_v25  ;;  %1783 = vpow2.f32 %v1392_v16 }
 0x154   :  { %v1766_v50 = vpop.eup %1765  ;;  %1252 = vst [vmem:[%s2675_s4 + $0xd0] sm:$0xff] %v1188_v14  ;;  %v1186_v57 = vmul.f32 %v1764_v40, %v2457_v24  ;;  %1785 = vpow2.f32 %v1424_v60 }
 0x155   :  { %v1768_v18 = vpop.eup %1767  ;;  %1284 = vst [vmem:[%s2675_s4 + $0x1d0] sm:$0xff] %v1220_v61  ;;  %v1218_v35 = vmul.f32 %v1766_v50, %v2465_v32  ;;  %1787 = vpow2.f32 %v1390_v30 }
 0x156   :  { %v1770_v47 = vpop.eup %1769  ;;  %1250 = vst [vmem:[%s2675_s4 + $0xc0] sm:$0xff] %v1186_v57  ;;  %v997_v25 = vadd.f32 1.0, %v1768_v18  ;;  %1789 = vpow2.f32 %v1422_v2 }
 0x157   :  { %v1772_v21 = vpop.eup %1771  ;;  %1282 = vst [vmem:[%s2675_s4 + $0x1c0] sm:$0xff] %v1218_v35  ;;  %v1029_v24 = vadd.f32 1.0, %v1770_v47 }
 0x158   :  { %v1774_v26 = vpop.eup %1773  ;;  %1791 = vrcp.f32 %v997_v25  ;;  %v995_v37 = vadd.f32 1.0, %v1772_v21 }
 0x159   :  { %v1776_v56 = vpop.eup %1775  ;;  %1793 = vrcp.f32 %v1029_v24  ;;  %v1027_v32 = vadd.f32 1.0, %v1774_v26 }
 0x15a   :  { %v1778_v28 = vpop.eup %1777  ;;  %1795 = vrcp.f32 %v995_v37  ;;  %v1000_v52 = vadd.f32 1.0, %v1776_v56 }
 0x15b   :  { %v1780_v41 = vpop.eup %1779  ;;  %1797 = vrcp.f32 %v1027_v32  ;;  %v1032_v4 = vadd.f32 1.0, %v1778_v28 }
 0x15c   :  { %v1782_v42 = vpop.eup %1781  ;;  %1799 = vrcp.f32 %v1000_v52  ;;  %v998_v51 = vadd.f32 1.0, %v1780_v41 }
 0x15d   :  { %v1784_v3 = vpop.eup %1783  ;;  %1801 = vrcp.f32 %v1032_v4  ;;  %v1030_v0 = vadd.f32 1.0, %v1782_v42 }
 0x15e   :  { %v1786_v12 = vpop.eup %1785  ;;  %1803 = vrcp.f32 %v998_v51  ;;  %v1001_v54 = vadd.f32 1.0, %v1784_v3 }
 0x15f   :  { %v1788_v27 = vpop.eup %1787  ;;  %1805 = vrcp.f32 %v1030_v0  ;;  %v1033_v8 = vadd.f32 1.0, %v1786_v12 }
 0x160   :  { %v1790_v43 = vpop.eup %1789  ;;  %1807 = vrcp.f32 %v1001_v54  ;;  %v999_v58 = vadd.f32 1.0, %v1788_v27 }
 0x161   :  { %1809 = vrcp.f32 %v1033_v8  ;;  %v1031_v11 = vadd.f32 1.0, %v1790_v43 }
 0x162   :  { %v1792_v34 = vpop.eup %1791  ;;  %1811 = vrcp.f32 %v999_v58 }
 0x163   :  { %v1794_v49 = vpop.eup %1793  ;;  %v1189_v53 = vmul.f32 %v1792_v34, %v2516_v62  ;;  %1813 = vrcp.f32 %v1031_v11 }
 0x164   :  { %v1796_v5 = vpop.eup %1795  ;;  %v1221_v55 = vmul.f32 %v1794_v49, %v2519_v19 }
 0x165   :  { %v1798_v59 = vpop.eup %1797  ;;  %1253 = vst [vmem:[%s2675_s4 + $0xd8] sm:$0xff] %v1189_v53  ;;  %v1187_v9 = vmul.f32 %v1796_v5, %v2522_v23 }
 0x166   :  { %v1800_v33 = vpop.eup %1799  ;;  %1285 = vst [vmem:[%s2675_s4 + $0x1d8] sm:$0xff] %v1221_v55  ;;  %v1219_v46 = vmul.f32 %v1798_v59, %v2525_v39 }
 0x167   :  { %v1802_v44 = vpop.eup %1801  ;;  %1251 = vst [vmem:[%s2675_s4 + $0xc8] sm:$0xff] %v1187_v9  ;;  %v1192_v62 = vmul.f32 %v1800_v33, %v2536_v38 }
 0x168   :  { %v1804_v19 = vpop.eup %1803  ;;  %1283 = vst [vmem:[%s2675_s4 + $0x1c8] sm:$0xff] %v1219_v46  ;;  %v1224_v23 = vmul.f32 %v1802_v44, %v2540_v36 }
 0x169   :  { %v1806_v48 = vpop.eup %1805  ;;  %1256 = vst [vmem:[%s2675_s4 + $0xf0] sm:$0xff] %v1192_v62  ;;  %v1190_v39 = vmul.f32 %v1804_v19, %v2545_v10 }
 0x16a   :  { %v1808_v7 = vpop.eup %1807  ;;  %1288 = vst [vmem:[%s2675_s4 + $0x1f0] sm:$0xff] %v1224_v23  ;;  %v1222_v38 = vmul.f32 %v1806_v48, %v2550_v31 }
 0x16b   :  { %v1810_v13 = vpop.eup %1809  ;;  %1254 = vst [vmem:[%s2675_s4 + $0xe0] sm:$0xff] %v1190_v39  ;;  %v1193_v36 = vmul.f32 %v1808_v7, %v2559_v45 }
 0x16c   :  { %v1812_v16 = vpop.eup %1811  ;;  %1286 = vst [vmem:[%s2675_s4 + $0x1e0] sm:$0xff] %v1222_v38  ;;  %v1225_v10 = vmul.f32 %v1810_v13, %v2567_v20 }
 0x16d   :  { %v1814_v6 = vpop.eup %1813  ;;  %1257 = vst [vmem:[%s2675_s4 + $0xf8] sm:$0xff] %v1193_v36  ;;  %v1191_v31 = vmul.f32 %v1812_v16, %v2575_v22 }
 0x16e   :  { %1289 = vst [vmem:[%s2675_s4 + $0x1f8] sm:$0xff] %v1225_v10  ;;  %v1223_v45 = vmul.f32 %v1814_v6, %v2583_v15 }
 0x16f   :  { %1255 = vst [vmem:[%s2675_s4 + $0xe8] sm:$0xff] %v1191_v31 }
 0x170   :  { %1287 = vst [vmem:[%s2675_s4 + $0x1e8] sm:$0xff] %v1223_v45 }

// kernel: _lambda_.30
= control target key start
LH: loop header
LB: loop body
LE: loop exit
PB: predicated region body
PF: predicated region fallthrough
CT: control target
= control target key end

     0   :  { %vm340_vm0 = vcmask 1043456   ;;  %vm243_vm1 = vcmask 64512   ;;  %s2668_s1 = inlined_call_operand.vmem [shape: bf16[8,128], index: 1, kind: input, shape index: {}]   ;;  %s2669_s0 = inlined_call_operand.vmem [shape: bf16[512,8], index: 0, kind: input, shape index: {}]   ;;  %s2670_s2 = inlined_call_operand.vmem [shape: f32[1,128], index: 2, kind: input, shape index: {}]   ;;  %s2671_s3 = inlined_call_operand.vmem [shape: f32[1,128], index: 3, kind: input, shape index: {}]   ;;  %s2672_s4 = inlined_call_operand.vmem [shape: f32[512,128], index: 4, kind: output, shape index: {}]  }
   0x1   :  { %v82_v0 = vld [vmem:[%s2668_s1] sm:$0xf]  ;;  %v1526_v4 = vld [vmem:[%s2669_s0 + $0x8] sm:$0xff]   ;;  %v1528_v6 = vld [vmem:[%s2669_s0 + $0x10] sm:$0xff]  }
   0x2   :  { %1522 = vmatprep.subr.msk.bf16.mxu0 %vm340_vm0, %v82_v0  ;;  %1523 = vmatprep.subr.msk.bf16.mxu1 %vm340_vm0, %v82_v0  ;;  %v342_v1 = vsel %vm340_vm0, %v82_v0, 0  ;;  %v1524_v2 = vld [vmem:[%s2669_s0] sm:$0xff]   ;;  %v1527_v5 = vld [vmem:[%s2669_s0 + $0x88] sm:$0xff]   ;;  %v1529_v7 = vld [vmem:[%s2669_s0 + $0x90] sm:$0xff]  }
   0x3   :  { %1455 = vmatpush3.bf16.msra.mxu0 %v342_v1  ;;  %1521 = vmatpush3.bf16.msra.mxu1 %v342_v1  ;;  %v1525_v3 = vld [vmem:[%s2669_s0 + $0x80] sm:$0xff]   ;;  %v1530_v8 = vld [vmem:[%s2669_s0 + $0x18] sm:$0xff]   ;;  %v1534_v12 = vld [vmem:[%s2669_s0 + $0x28] sm:$0xff]  }
   0x4   :  { %1456 = vmatprep.mubr.msk.bf16.mxu0 %vm243_vm1, %v1524_v2  ;;  %1488 = vmatprep.mubr.msk.bf16.mxu1 %vm243_vm1, %v1525_v3  ;;  %v1531_v9 = vld [vmem:[%s2669_s0 + $0x98] sm:$0xff]   ;;  %v1532_v10 = vld [vmem:[%s2669_s0 + $0x20] sm:$0xff]   ;;  %v1535_v13 = vld [vmem:[%s2669_s0 + $0xa8] sm:$0xff]  }
   0x5   :  { %v1533_v11 = vld [vmem:[%s2669_s0 + $0xa0] sm:$0xff]   ;;  %v1536_v14 = vld [vmem:[%s2669_s0 + $0x30] sm:$0xff]   ;;  %v1538_v16 = vld [vmem:[%s2669_s0 + $0x38] sm:$0xff]  }
   0x6   :  { %1457 = vmatmul.mubr.msk.bf16.vlgmr.msra.gmra.mrb[0].mxu0 %vm243_vm1, %v1526_v4  ;;  %1489 = vmatmul.mubr.msk.bf16.vlgmr.msra.gmra.mrb[0].mxu1 %vm243_vm1, %v1527_v5  ;;  %v1537_v15 = vld [vmem:[%s2669_s0 + $0xb0] sm:$0xff]   ;;  %v1539_v17 = vld [vmem:[%s2669_s0 + $0xb8] sm:$0xff]   ;;  %v1540_v18 = vld [vmem:[%s2669_s0 + $0x40] sm:$0xff]  }
   0x7   :  { %1460 = vmatprep.mubr.msk.bf16.mxu0 %vm243_vm1, %v1528_v6  ;;  %1492 = vmatprep.mubr.msk.bf16.mxu1 %vm243_vm1, %v1529_v7  ;;  %v1541_v19 = vld [vmem:[%s2669_s0 + $0xc0] sm:$0xff]   ;;  %v1542_v20 = vld [vmem:[%s2669_s0 + $0x48] sm:$0xff]   ;;  %v1544_v22 = vld [vmem:[%s2669_s0 + $0x50] sm:$0xff]  }
   0x8   :  { %v1543_v21 = vld [vmem:[%s2669_s0 + $0xc8] sm:$0xff]   ;;  %v1545_v23 = vld [vmem:[%s2669_s0 + $0xd0] sm:$0xff]   ;;  %v1546_v24 = vld [vmem:[%s2669_s0 + $0x58] sm:$0xff]  }
   0x9   :  { %v1547_v25 = vld [vmem:[%s2669_s0 + $0xd8] sm:$0xff]   ;;  %v1548_v26 = vld [vmem:[%s2669_s0 + $0x60] sm:$0xff]   ;;  %v1550_v28 = vld [vmem:[%s2669_s0 + $0x68] sm:$0xff]  }
   0xa   :  { %v1549_v27 = vld [vmem:[%s2669_s0 + $0xe0] sm:$0xff]   ;;  %v1551_v29 = vld [vmem:[%s2669_s0 + $0xe8] sm:$0xff]   ;;  %v1552_v30 = vld [vmem:[%s2669_s0 + $0x70] sm:$0xff]  }
   0xb   :  { %v1553_v31 = vld [vmem:[%s2669_s0 + $0xf0] sm:$0xff]   ;;  %v1554_v32 = vld [vmem:[%s2669_s0 + $0x78] sm:$0xff]   ;;  %v1973_v34 = vld [vmem:[%s2670_s2] ss:$0 sm:$0xff] }
   0xc   :  { %v1555_v33 = vld [vmem:[%s2669_s0 + $0xf8] sm:$0xff]   ;;  %v1978_v36 = vld [vmem:[%s2671_s3] ss:$0 sm:$0xff] }
   0xe   :  { %1461 = vmatmul.mubr.msk.bf16.gmra.mrb[4].mxu0 %vm243_vm1, %v1530_v8  ;;  %1493 = vmatmul.mubr.msk.bf16.gmra.mrb[4].mxu1 %vm243_vm1, %v1531_v9 }
   0xf   :  { %1464 = vmatprep.mubr.msk.bf16.mxu0 %vm243_vm1, %v1532_v10  ;;  %1496 = vmatprep.mubr.msk.bf16.mxu1 %vm243_vm1, %v1533_v11 }
  0x16   :  { %1465 = vmatmul.mubr.msk.bf16.gmra.mrb[8].mxu0 %vm243_vm1, %v1534_v12  ;;  %1497 = vmatmul.mubr.msk.bf16.gmra.mrb[8].mxu1 %vm243_vm1, %v1535_v13 }
  0x17   :  { %1468 = vmatprep.mubr.msk.bf16.mxu0 %vm243_vm1, %v1536_v14  ;;  %1500 = vmatprep.mubr.msk.bf16.mxu1 %vm243_vm1, %v1537_v15 }
  0x1e   :  { %1469 = vmatmul.mubr.msk.bf16.gmra.mrb[12].mxu0 %vm243_vm1, %v1538_v16  ;;  %1501 = vmatmul.mubr.msk.bf16.gmra.mrb[12].mxu1 %vm243_vm1, %v1539_v17 }
  0x1f   :  { %1472 = vmatprep.mubr.msk.bf16.mxu0 %vm243_vm1, %v1540_v18  ;;  %1504 = vmatprep.mubr.msk.bf16.mxu1 %vm243_vm1, %v1541_v19 }
  0x26   :  { %1473 = vmatmul.mubr.msk.bf16.gmra.mrb[16].mxu0 %vm243_vm1, %v1542_v20  ;;  %1505 = vmatmul.mubr.msk.bf16.gmra.mrb[16].mxu1 %vm243_vm1, %v1543_v21 }
  0x27   :  { %1476 = vmatprep.mubr.msk.bf16.mxu0 %vm243_vm1, %v1544_v22  ;;  %1508 = vmatprep.mubr.msk.bf16.mxu1 %vm243_vm1, %v1545_v23 }
  0x2e   :  { %1477 = vmatmul.mubr.msk.bf16.gmra.mrb[20].mxu0 %vm243_vm1, %v1546_v24  ;;  %1509 = vmatmul.mubr.msk.bf16.gmra.mrb[20].mxu1 %vm243_vm1, %v1547_v25 }
  0x2f   :  { %1480 = vmatprep.mubr.msk.bf16.mxu0 %vm243_vm1, %v1548_v26  ;;  %1512 = vmatprep.mubr.msk.bf16.mxu1 %vm243_vm1, %v1549_v27 }
  0x36   :  { %1481 = vmatmul.mubr.msk.bf16.gmra.mrb[24].mxu0 %vm243_vm1, %v1550_v28  ;;  %1513 = vmatmul.mubr.msk.bf16.gmra.mrb[24].mxu1 %vm243_vm1, %v1551_v29 }
  0x37   :  { %1484 = vmatprep.mubr.msk.bf16.mxu0 %vm243_vm1, %v1552_v30  ;;  %1516 = vmatprep.mubr.msk.bf16.mxu1 %vm243_vm1, %v1553_v31 }
  0x3e   :  { %1485 = vmatmul.mubr.msk.bf16.gmra.mrb[28].mxu0 %vm243_vm1, %v1554_v32  ;;  %1517 = vmatmul.mubr.msk.bf16.gmra.mrb[28].mxu1 %vm243_vm1, %v1555_v33 }
  0xd9   :  { %v1458_v35 = vpop.f32.mrb[0].mxu0  ;;  %v1490_v38 = vpop.f32.mrb[0].mxu1 }
  0xda   :  { %v642_v37 = vmul.f32 %v1458_v35, %v1973_v34  ;;  %v378_v39 = vpop.f32.mrb[1].mxu0  ;;  %v674_v40 = vmul.f32 %v1490_v38, %v1973_v34  ;;  %v506_v42 = vpop.f32.mrb[1].mxu1 }
  0xdb   :  { %v640_v41 = vmul.f32 %v1973_v34, %v378_v39  ;;  %v1459_v43 = vpop.f32.mrb[2].mxu0  ;;  %v672_v45 = vmul.f32 %v1973_v34, %v506_v42  ;;  %v1491_v47 = vpop.f32.mrb[2].mxu1 }
  0xdc   :  { %v1984_v44 = vadd.f32 %v1978_v36, %v642_v37  ;;  %v643_v46 = vmul.f32 %v1459_v43, %v1973_v34  ;;  %v381_v48 = vpop.f32.mrb[3].mxu0  ;;  %v1989_v49 = vadd.f32 %v1978_v36, %v674_v40  ;;  %v675_v51 = vmul.f32 %v1491_v47, %v1973_v34  ;;  %v509_v53 = vpop.f32.mrb[3].mxu1 }
  0xdd   :  { %v1992_v50 = vadd.f32 %v1978_v36, %v640_v41  ;;  %v641_v52 = vmul.f32 %v1973_v34, %v381_v48  ;;  %v1998_v55 = vadd.f32 %v1978_v36, %v672_v45  ;;  %v673_v57 = vmul.f32 %v1973_v34, %v509_v53 }
  0xde   :  { %v1359_v54 = vmul.f32 -1.442695, %v1984_v44  ;;  %v2001_v56 = vadd.f32 %v1978_v36, %v643_v46  ;;  %v1391_v58 = vmul.f32 -1.442695, %v1989_v49  ;;  %v2007_v60 = vadd.f32 %v1978_v36, %v675_v51 }
  0xdf   :  { %v1357_v59 = vmul.f32 -1.442695, %v1992_v50  ;;  %v2010_v61 = vadd.f32 %v1978_v36, %v641_v52  ;;  %v1389_v62 = vmul.f32 -1.442695, %v1998_v55  ;;  %v2015_v0 = vadd.f32 %v1978_v36, %v673_v57 }
  0xe0   :  { %1556 = vpow2.f32 %v1359_v54  ;;  %v1360_v63 = vmul.f32 -1.442695, %v2001_v56  ;;  %v1392_v1 = vmul.f32 -1.442695, %v2007_v60 }
  0xe1   :  { %1558 = vpow2.f32 %v1391_v58  ;;  %v1462_v2 = vpop.f32.mrb[4].mxu0  ;;  %v1358_v3 = vmul.f32 -1.442695, %v2010_v61  ;;  %v1494_v5 = vpop.f32.mrb[4].mxu1  ;;  %v1390_v7 = vmul.f32 -1.442695, %v2015_v0 }
  0xe2   :  { %1560 = vpow2.f32 %v1357_v59  ;;  %v646_v4 = vmul.f32 %v1462_v2, %v1973_v34  ;;  %v394_v6 = vpop.f32.mrb[5].mxu0  ;;  %v678_v8 = vmul.f32 %v1494_v5, %v1973_v34  ;;  %v522_v10 = vpop.f32.mrb[5].mxu1 }
  0xe3   :  { %1562 = vpow2.f32 %v1389_v62  ;;  %v644_v9 = vmul.f32 %v1973_v34, %v394_v6  ;;  %v1463_v11 = vpop.f32.mrb[6].mxu0  ;;  %v676_v13 = vmul.f32 %v1973_v34, %v522_v10  ;;  %v1495_v15 = vpop.f32.mrb[6].mxu1 }
  0xe4   :  { %1564 = vpow2.f32 %v1360_v63  ;;  %v2024_v12 = vadd.f32 %v1978_v36, %v646_v4  ;;  %v647_v14 = vmul.f32 %v1463_v11, %v1973_v34  ;;  %v397_v16 = vpop.f32.mrb[7].mxu0  ;;  %v2029_v17 = vadd.f32 %v1978_v36, %v678_v8  ;;  %v525_v19 = vpop.f32.mrb[7].mxu1 }
  0xe5   :  { %1566 = vpow2.f32 %v1392_v1  ;;  %v2032_v18 = vadd.f32 %v1978_v36, %v644_v9  ;;  %v2036_v21 = vadd.f32 %v1978_v36, %v676_v13  ;;  %v679_v29 = vmul.f32 %v1495_v15, %v1973_v34 }
  0xe6   :  { %1568 = vpow2.f32 %v1358_v3  ;;  %v1363_v20 = vmul.f32 -1.442695, %v2024_v12  ;;  %v2039_v22 = vadd.f32 %v1978_v36, %v647_v14  ;;  %v1395_v23 = vmul.f32 -1.442695, %v2029_v17 }
  0xe7   :  { %1570 = vpow2.f32 %v1390_v7  ;;  %v1361_v24 = vmul.f32 -1.442695, %v2032_v18  ;;  %v1393_v25 = vmul.f32 -1.442695, %v2036_v21  ;;  %v645_v35 = vmul.f32 %v1973_v34, %v397_v16 }
  0xe8   :  { %1572 = vpow2.f32 %v1363_v20  ;;  %v1364_v26 = vmul.f32 -1.442695, %v2039_v22  ;;  %v677_v41 = vmul.f32 %v1973_v34, %v525_v19  ;;  %v2050_v53 = vadd.f32 %v1978_v36, %v679_v29 }
  0xe9   :  { %1574 = vpow2.f32 %v1395_v23  ;;  %v1466_v27 = vpop.f32.mrb[8].mxu0  ;;  %v1498_v30 = vpop.f32.mrb[8].mxu1  ;;  %v2054_v59 = vadd.f32 %v1978_v36, %v645_v35 }
  0xea   :  { %v1557_v28 = vpop.eup %1556  ;;  %1576 = vpow2.f32 %v1361_v24  ;;  %v410_v31 = vpop.f32.mrb[9].mxu0  ;;  %v650_v47 = vmul.f32 %v1466_v27, %v1973_v34  ;;  %v682_v54 = vmul.f32 %v1498_v30, %v1973_v34  ;;  %v2057_v1 = vadd.f32 %v1978_v36, %v677_v41 }
  0xeb   :  { %v1559_v32 = vpop.eup %1558  ;;  %v969_v33 = vadd.f32 1.0, %v1557_v28  ;;  %1578 = vpow2.f32 %v1393_v25  ;;  %v538_v37 = vpop.f32.mrb[9].mxu1  ;;  %v1396_v8 = vmul.f32 -1.442695, %v2050_v53  ;;  %v1362_v15 = vmul.f32 -1.442695, %v2054_v59 }
  0xec   :  { %v1467_v38 = vpop.f32.mrb[10].mxu0  ;;  %v1561_v39 = vpop.eup %1560  ;;  %v1001_v40 = vadd.f32 1.0, %v1559_v32  ;;  %1580 = vpow2.f32 %v1364_v26  ;;  %v2060_v4 = vadd.f32 %v1978_v36, %v650_v47  ;;  %v2064_v9 = vadd.f32 %v1978_v36, %v682_v54 }
  0xed   :  { %v1499_v42 = vpop.f32.mrb[10].mxu1  ;;  %v413_v43 = vpop.f32.mrb[11].mxu0  ;;  %1582 = vrcp.f32 %v969_v33  ;;  %v967_v46 = vadd.f32 1.0, %v1561_v39  ;;  %v648_v16 = vmul.f32 %v1973_v34, %v410_v31  ;;  %v1394_v25 = vmul.f32 -1.442695, %v2057_v1 }
  0xee   :  { %v1563_v45 = vpop.eup %1562  ;;  %v541_v48 = vpop.f32.mrb[11].mxu1  ;;  %1584 = vrcp.f32 %v1001_v40  ;;  %v680_v26 = vmul.f32 %v1973_v34, %v538_v37  ;;  %v1367_v31 = vmul.f32 -1.442695, %v2060_v4  ;;  %v651_v32 = vmul.f32 %v1467_v38, %v1973_v34 }
  0xef   :  { %v1565_v51 = vpop.eup %1564  ;;  %v999_v52 = vadd.f32 1.0, %v1563_v45  ;;  %1586 = vrcp.f32 %v967_v46  ;;  %v1399_v40 = vmul.f32 -1.442695, %v2064_v9  ;;  %v683_v37 = vmul.f32 %v1499_v42, %v1973_v34 }
  0xf0   :  { %v1567_v57 = vpop.eup %1566  ;;  %v970_v58 = vadd.f32 1.0, %v1565_v51  ;;  %v2087_v46 = vadd.f32 %v1978_v36, %v648_v16  ;;  %v649_v47 = vmul.f32 %v1973_v34, %v413_v43  ;;  %v681_v54 = vmul.f32 %v1973_v34, %v541_v48 }
  0xf1   :  { %v1569_v62 = vpop.eup %1568  ;;  %1588 = vrcp.f32 %v999_v52  ;;  %v1002_v63 = vadd.f32 1.0, %v1567_v57  ;;  %v1470_v5 = vpop.f32.mrb[12].mxu0  ;;  %v2092_v52 = vadd.f32 %v1978_v36, %v680_v26  ;;  %v2107_v48 = vadd.f32 %v1978_v36, %v683_v37 }
  0xf2   :  { %v1571_v2 = vpop.eup %1570  ;;  %1590 = vrcp.f32 %v970_v58  ;;  %v968_v3 = vadd.f32 1.0, %v1569_v62  ;;  %v1502_v10 = vpop.f32.mrb[12].mxu1  ;;  %v2097_v58 = vadd.f32 %v1978_v36, %v651_v32  ;;  %v654_v62 = vmul.f32 %v1470_v5, %v1973_v34 }
  0xf3   :  { %v1573_v6 = vpop.eup %1572  ;;  %1592 = vrcp.f32 %v1002_v63  ;;  %v1000_v7 = vadd.f32 1.0, %v1571_v2  ;;  %v2066_v11 = vpop.f32.mrb[13].mxu0 }
  0xf4   :  { %v1575_v13 = vpop.eup %1574  ;;  %1594 = vrcp.f32 %v968_v3  ;;  %v973_v14 = vadd.f32 1.0, %v1573_v6  ;;  %v2070_v19 = vpop.f32.mrb[13].mxu1 }
  0xf5   :  { %v2072_v20 = vpop.f32.mrb[14].mxu0  ;;  %v1577_v23 = vpop.eup %1576  ;;  %1596 = vrcp.f32 %v1000_v7  ;;  %v1005_v24 = vadd.f32 1.0, %v1575_v13  ;;  %v2120_v7 = vadd.f32 %v1978_v36, %v649_v47 }
  0xf6   :  { %v2076_v27 = vpop.f32.mrb[14].mxu1  ;;  %v2078_v28 = vpop.f32.mrb[15].mxu0  ;;  %1598 = vrcp.f32 %v973_v14  ;;  %v971_v30 = vadd.f32 1.0, %v1577_v23 }
  0xf7   :  { %v1579_v29 = vpop.eup %1578  ;;  %v2082_v33 = vpop.f32.mrb[15].mxu1  ;;  %1600 = vrcp.f32 %v1005_v24  ;;  %v1366_v37 = vmul.f32 -1.442695, %v2120_v7 }
  0xf8   :  { %v1581_v35 = vpop.eup %1580  ;;  %v1003_v39 = vadd.f32 1.0, %v1579_v29  ;;  %1602 = vrcp.f32 %v971_v30 }
  0xf9   :  { %v1583_v41 = vpop.eup %1582  ;;  %v974_v45 = vadd.f32 1.0, %v1581_v35  ;;  %v2100_v63 = vpop.f32.mrb[16].mxu0  ;;  %v1400_v35 = vmul.f32 -1.442695, %v2107_v48 }
  0xfa   :  { %v1585_v51 = vpop.eup %1584  ;;  %v1161_v38 = vmul.f32 %v1583_v41, %v1984_v44  ;;  %1604 = vrcp.f32 %v1003_v39  ;;  %v2110_v2 = vpop.f32.mrb[16].mxu1 }
  0xfb   :  { %v1587_v57 = vpop.eup %1586  ;;  %v1193_v42 = vmul.f32 %v1585_v51, %v1989_v49  ;;  %1606 = vrcp.f32 %v974_v45  ;;  %v686_v49 = vmul.f32 %v1502_v10, %v1973_v34  ;;  %v2112_v3 = vpop.f32.mrb[17].mxu0 }
  0xfc   :  { %v1589_v43 = vpop.eup %1588  ;;  %1225 = vst [vmem:[%s2672_s4 + $0x10] sm:$0xff] %v1161_v38  ;;  %v1159_v44 = vmul.f32 %v1587_v57, %v1992_v50  ;;  %1608 = vpow2.f32 %v1396_v8  ;;  %v1365_v50 = vmul.f32 -1.442695, %v2087_v46  ;;  %v2122_v8 = vpop.f32.mrb[17].mxu1 }
  0xfd   :  { %v1591_v5 = vpop.eup %1590  ;;  %1257 = vst [vmem:[%s2672_s4 + $0x110] sm:$0xff] %v1193_v42  ;;  %v1191_v6 = vmul.f32 %v1589_v43, %v1998_v55  ;;  %1610 = vpow2.f32 %v1362_v15  ;;  %v2124_v10 = vpop.f32.mrb[18].mxu0  ;;  %v1397_v55 = vmul.f32 -1.442695, %v2092_v52  ;;  %v2132_v15 = vadd.f32 %v1978_v36, %v681_v54 }
  0xfe   :  { %v1593_v13 = vpop.eup %1592  ;;  %1223 = vst [vmem:[%s2672_s4] sm:$0xff] %v1159_v44  ;;  %v1162_v14 = vmul.f32 %v1591_v5, %v2001_v56  ;;  %1612 = vpow2.f32 %v1394_v25  ;;  %v2134_v16 = vpop.f32.mrb[18].mxu1  ;;  %v1368_v56 = vmul.f32 -1.442695, %v2097_v58  ;;  %v2144_v25 = vadd.f32 %v1978_v36, %v654_v62 }
  0xff   :  { %v2136_v23 = vpop.f32.mrb[19].mxu0  ;;  %v1595_v24 = vpop.eup %1594  ;;  %1255 = vst [vmem:[%s2672_s4 + $0x100] sm:$0xff] %v1191_v6  ;;  %v1194_v26 = vmul.f32 %v1593_v13, %v2007_v60  ;;  %1614 = vpow2.f32 %v1367_v31  ;;  %v2154_v60 = vadd.f32 %v1978_v36, %v686_v49  ;;  %v652_v5 = vmul.f32 %v1973_v34, %v2066_v11 }
 0x100   :  { %v2146_v29 = vpop.f32.mrb[19].mxu1  ;;  %v1597_v30 = vpop.eup %1596  ;;  %1226 = vst [vmem:[%s2672_s4 + $0x18] sm:$0xff] %v1162_v14  ;;  %v1160_v32 = vmul.f32 %v1595_v24, %v2010_v61  ;;  %1616 = vpow2.f32 %v1399_v40  ;;  %v1398_v40 = vmul.f32 -1.442695, %v2132_v15  ;;  %v1371_v47 = vmul.f32 -1.442695, %v2144_v25 }
 0x101   :  { %v1599_v31 = vpop.eup %1598  ;;  %1258 = vst [vmem:[%s2672_s4 + $0x118] sm:$0xff] %v1194_v26  ;;  %v1192_v39 = vmul.f32 %v1597_v30, %v2015_v0  ;;  %1618 = vpow2.f32 %v1365_v50  ;;  %v2171_v51 = vpop.f32.mrb[20].mxu0  ;;  %v1403_v54 = vmul.f32 -1.442695, %v2154_v60  ;;  %v684_v14 = vmul.f32 %v1973_v34, %v2070_v19 }
 0x102   :  { %v1601_v41 = vpop.eup %1600  ;;  %1224 = vst [vmem:[%s2672_s4 + $0x8] sm:$0xff] %v1160_v32  ;;  %v1165_v61 = vmul.f32 %v1599_v31, %v2024_v12  ;;  %1620 = vpow2.f32 %v1397_v55  ;;  %v2178_v57 = vpop.f32.mrb[20].mxu1  ;;  %v655_v24 = vmul.f32 %v2072_v20, %v1973_v34  ;;  %v687_v30 = vmul.f32 %v2076_v27, %v1973_v34 }
 0x103   :  { %v1603_v45 = vpop.eup %1602  ;;  %1256 = vst [vmem:[%s2672_s4 + $0x108] sm:$0xff] %v1192_v39  ;;  %v1197_v0 = vmul.f32 %v1601_v41, %v2029_v17  ;;  %1622 = vpow2.f32 %v1368_v56  ;;  %v2180_v42 = vpop.f32.mrb[21].mxu0  ;;  %v653_v20 = vmul.f32 %v1973_v34, %v2078_v28 }
 0x104   :  { %v1605_v38 = vpop.eup %1604  ;;  %1229 = vst [vmem:[%s2672_s4 + $0x30] sm:$0xff] %v1165_v61  ;;  %v1163_v12 = vmul.f32 %v1603_v45, %v2032_v18  ;;  %1624 = vpow2.f32 %v1400_v35  ;;  %v2186_v43 = vpop.f32.mrb[21].mxu1  ;;  %v2215_v35 = vadd.f32 %v1978_v36, %v652_v5 }
 0x105   :  { %v1607_v17 = vpop.eup %1606  ;;  %1261 = vst [vmem:[%s2672_s4 + $0x130] sm:$0xff] %v1197_v0  ;;  %v1195_v62 = vmul.f32 %v1605_v38, %v2036_v21  ;;  %1626 = vpow2.f32 %v1366_v37  ;;  %v2188_v44 = vpop.f32.mrb[22].mxu0  ;;  %v2218_v37 = vadd.f32 %v1978_v36, %v684_v14 }
 0x106   :  { %v1609_v18 = vpop.eup %1608  ;;  %1227 = vst [vmem:[%s2672_s4 + $0x20] sm:$0xff] %v1163_v12  ;;  %v1166_v49 = vmul.f32 %v1607_v17, %v2039_v22  ;;  %1628 = vpow2.f32 %v1398_v40  ;;  %v2196_v6 = vpop.f32.mrb[22].mxu1  ;;  %v2225_v40 = vadd.f32 %v1978_v36, %v655_v24  ;;  %v2232_v12 = vadd.f32 %v1978_v36, %v687_v30 }
 0x107   :  { %v2198_v50 = vpop.f32.mrb[23].mxu0  ;;  %v1611_v21 = vpop.eup %1610  ;;  %1259 = vst [vmem:[%s2672_s4 + $0x120] sm:$0xff] %v1195_v62  ;;  %v1006_v13 = vadd.f32 1.0, %v1609_v18  ;;  %1630 = vpow2.f32 %v1371_v47  ;;  %v1369_v18 = vmul.f32 -1.442695, %v2215_v35 }
 0x108   :  { %v2205_v55 = vpop.f32.mrb[23].mxu1  ;;  %v1613_v22 = vpop.eup %1612  ;;  %1230 = vst [vmem:[%s2672_s4 + $0x38] sm:$0xff] %v1166_v49  ;;  %v972_v11 = vadd.f32 1.0, %v1611_v21  ;;  %1632 = vpow2.f32 %v1403_v54  ;;  %v685_v49 = vmul.f32 %v1973_v34, %v2082_v33  ;;  %v1372_v30 = vmul.f32 -1.442695, %v2225_v40 }
 0x109   :  { %v1615_v26 = vpop.eup %1614  ;;  %1634 = vrcp.f32 %v1006_v13  ;;  %v1004_v56 = vadd.f32 1.0, %v1613_v22  ;;  %v2222_v41 = vpop.f32.mrb[24].mxu0  ;;  %v1401_v22 = vmul.f32 -1.442695, %v2218_v37  ;;  %v658_v33 = vmul.f32 %v2100_v63, %v1973_v34 }
 0x10a   :  { %v1617_v32 = vpop.eup %1616  ;;  %1636 = vrcp.f32 %v972_v11  ;;  %v977_v19 = vadd.f32 1.0, %v1615_v26  ;;  %v2227_v45 = vpop.f32.mrb[24].mxu1  ;;  %v2247_v11 = vadd.f32 %v1978_v36, %v653_v20 }
 0x10b   :  { %v1619_v31 = vpop.eup %1618  ;;  %1638 = vrcp.f32 %v1004_v56  ;;  %v1009_v39 = vadd.f32 1.0, %v1617_v32  ;;  %v2229_v0 = vpop.f32.mrb[25].mxu0 }
 0x10c   :  { %v1621_v61 = vpop.eup %1620  ;;  %1640 = vrcp.f32 %v977_v19  ;;  %v975_v27 = vadd.f32 1.0, %v1619_v31  ;;  %v2234_v54 = vpop.f32.mrb[25].mxu1  ;;  %v1404_v31 = vmul.f32 -1.442695, %v2232_v12 }
 0x10d   :  { %v1623_v47 = vpop.eup %1622  ;;  %1642 = vrcp.f32 %v1009_v39  ;;  %v1007_v38 = vadd.f32 1.0, %v1621_v61  ;;  %v2236_v28 = vpop.f32.mrb[26].mxu0  ;;  %v690_v39 = vmul.f32 %v2110_v2, %v1973_v34 }
 0x10e   :  { %v1625_v17 = vpop.eup %1624  ;;  %1644 = vrcp.f32 %v975_v27  ;;  %v978_v62 = vadd.f32 1.0, %v1623_v47  ;;  %v2241_v5 = vpop.f32.mrb[26].mxu1  ;;  %v2258_v27 = vadd.f32 %v1978_v36, %v685_v49  ;;  %v656_v47 = vmul.f32 %v1973_v34, %v2112_v3 }
 0x10f   :  { %v2243_v21 = vpop.f32.mrb[27].mxu0  ;;  %v1627_v13 = vpop.eup %1626  ;;  %1646 = vrcp.f32 %v1007_v38  ;;  %v1010_v14 = vadd.f32 1.0, %v1625_v17  ;;  %v1370_v17 = vmul.f32 -1.442695, %v2247_v11  ;;  %v2269_v49 = vadd.f32 %v1978_v36, %v658_v33 }
 0x110   :  { %v2249_v24 = vpop.f32.mrb[27].mxu1  ;;  %v1629_v26 = vpop.eup %1628  ;;  %1648 = vrcp.f32 %v978_v62  ;;  %v976_v56 = vadd.f32 1.0, %v1627_v13  ;;  %v688_v62 = vmul.f32 %v1973_v34, %v2122_v8  ;;  %v659_v3 = vmul.f32 %v2124_v10, %v1973_v34 }
 0x111   :  { %v1631_v32 = vpop.eup %1630  ;;  %1650 = vrcp.f32 %v1010_v14  ;;  %v1008_v19 = vadd.f32 1.0, %v1629_v26  ;;  %v2265_v13 = vpop.f32.mrb[28].mxu0  ;;  %v2279_v8 = vadd.f32 %v1978_v36, %v690_v39  ;;  %v657_v39 = vmul.f32 %v1973_v34, %v2136_v23 }
 0x112   :  { %v1633_v20 = vpop.eup %1632  ;;  %1652 = vrcp.f32 %v976_v56  ;;  %v981_v61 = vadd.f32 1.0, %v1631_v32  ;;  %v2273_v26 = vpop.f32.mrb[28].mxu1 }
 0x113   :  { %v1635_v38 = vpop.eup %1634  ;;  %1654 = vrcp.f32 %v1008_v19  ;;  %v1013_v63 = vadd.f32 1.0, %v1633_v20  ;;  %v2275_v56 = vpop.f32.mrb[29].mxu0 }
 0x114   :  { %v1637_v2 = vpop.eup %1636  ;;  %v1198_v14 = vmul.f32 %v1635_v38, %v2050_v53  ;;  %1656 = vrcp.f32 %v981_v61  ;;  %v691_v53 = vmul.f32 %v2134_v16, %v1973_v34  ;;  %v2283_v20 = vpop.f32.mrb[29].mxu1 }
 0x115   :  { %v1639_v32 = vpop.eup %1638  ;;  %v1164_v19 = vmul.f32 %v1637_v2, %v2054_v59  ;;  %1658 = vrcp.f32 %v1013_v63  ;;  %v2285_v33 = vpop.f32.mrb[30].mxu0  ;;  %v2292_v59 = vadd.f32 %v1978_v36, %v656_v47 }
 0x116   :  { %v1641_v61 = vpop.eup %1640  ;;  %1262 = vst [vmem:[%s2672_s4 + $0x138] sm:$0xff] %v1198_v14  ;;  %v1196_v10 = vmul.f32 %v1639_v32, %v2057_v1  ;;  %1660 = vpow2.f32 %v1369_v18  ;;  %v2296_v38 = vpop.f32.mrb[30].mxu1  ;;  %v1402_v1 = vmul.f32 -1.442695, %v2258_v27  ;;  %v2306_v18 = vadd.f32 %v1978_v36, %v688_v62 }
 0x117   :  { %v2298_v16 = vpop.f32.mrb[31].mxu0  ;;  %v1643_v63 = vpop.eup %1642  ;;  %1228 = vst [vmem:[%s2672_s4 + $0x28] sm:$0xff] %v1164_v19  ;;  %v1169_v2 = vmul.f32 %v1641_v61, %v2060_v4  ;;  %1662 = vpow2.f32 %v1401_v22  ;;  %v1375_v32 = vmul.f32 -1.442695, %v2269_v49  ;;  %v2316_v4 = vadd.f32 %v1978_v36, %v659_v3 }
 0x118   :  { %v2308_v47 = vpop.f32.mrb[31].mxu1  ;;  %v1645_v23 = vpop.eup %1644  ;;  %1260 = vst [vmem:[%s2672_s4 + $0x128] sm:$0xff] %v1196_v10  ;;  %v1201_v14 = vmul.f32 %v1643_v63, %v2064_v9  ;;  %1664 = vpow2.f32 %v1372_v30  ;;  %v1407_v19 = vmul.f32 -1.442695, %v2279_v8  ;;  %v2324_v61 = vadd.f32 %v1978_v36, %v691_v53 }
 0x119   :  { %v1647_v22 = vpop.eup %1646  ;;  %1233 = vst [vmem:[%s2672_s4 + $0x50] sm:$0xff] %v1169_v2  ;;  %v1167_v62 = vmul.f32 %v1645_v23, %v2087_v46  ;;  %1666 = vpow2.f32 %v1404_v31  ;;  %v1373_v3 = vmul.f32 -1.442695, %v2292_v59  ;;  %v2332_v10 = vadd.f32 %v1978_v36, %v657_v39 }
 0x11a   :  { %v1649_v9 = vpop.eup %1648  ;;  %1265 = vst [vmem:[%s2672_s4 + $0x150] sm:$0xff] %v1201_v14  ;;  %v1199_v30 = vmul.f32 %v1647_v22, %v2092_v52  ;;  %1668 = vpow2.f32 %v1370_v17  ;;  %v1405_v53 = vmul.f32 -1.442695, %v2306_v18  ;;  %v1376_v17 = vmul.f32 -1.442695, %v2316_v4 }
 0x11b   :  { %v1651_v46 = vpop.eup %1650  ;;  %1231 = vst [vmem:[%s2672_s4 + $0x40] sm:$0xff] %v1167_v62  ;;  %v1170_v31 = vmul.f32 %v1649_v9, %v2097_v58  ;;  %1670 = vpow2.f32 %v1402_v1  ;;  %v1408_v2 = vmul.f32 -1.442695, %v2324_v61  ;;  %v1374_v23 = vmul.f32 -1.442695, %v2332_v10 }
 0x11c   :  { %v1653_v63 = vpop.eup %1652  ;;  %1263 = vst [vmem:[%s2672_s4 + $0x140] sm:$0xff] %v1199_v30  ;;  %v1202_v52 = vmul.f32 %v1651_v46, %v2107_v48  ;;  %1672 = vpow2.f32 %v1375_v32  ;;  %v660_v46 = vmul.f32 %v1973_v34, %v2180_v42 }
 0x11d   :  { %v1655_v39 = vpop.eup %1654  ;;  %1234 = vst [vmem:[%s2672_s4 + $0x58] sm:$0xff] %v1170_v31  ;;  %v1168_v58 = vmul.f32 %v1653_v63, %v2120_v7  ;;  %1674 = vpow2.f32 %v1407_v19 }
 0x11e   :  { %v1657_v1 = vpop.eup %1656  ;;  %1266 = vst [vmem:[%s2672_s4 + $0x158] sm:$0xff] %v1202_v52  ;;  %v1200_v48 = vmul.f32 %v1655_v39, %v2132_v15  ;;  %1676 = vpow2.f32 %v1373_v3  ;;  %v689_v15 = vmul.f32 %v1973_v34, %v2146_v29  ;;  %v694_v29 = vmul.f32 %v2178_v57, %v1973_v34 }
 0x11f   :  { %v1659_v14 = vpop.eup %1658  ;;  %1232 = vst [vmem:[%s2672_s4 + $0x48] sm:$0xff] %v1168_v58  ;;  %v1173_v7 = vmul.f32 %v1657_v1, %v2144_v25  ;;  %1678 = vpow2.f32 %v1405_v53  ;;  %v662_v25 = vmul.f32 %v2171_v51, %v1973_v34  ;;  %v692_v57 = vmul.f32 %v1973_v34, %v2186_v43 }
 0x120   :  { %v1661_v32 = vpop.eup %1660  ;;  %1264 = vst [vmem:[%s2672_s4 + $0x148] sm:$0xff] %v1200_v48  ;;  %v1205_v22 = vmul.f32 %v1659_v14, %v2154_v60  ;;  %1680 = vpow2.f32 %v1376_v17  ;;  %v2377_v51 = vadd.f32 %v1978_v36, %v689_v15  ;;  %v2385_v42 = vadd.f32 %v1978_v36, %v694_v29 }
 0x121   :  { %v1663_v62 = vpop.eup %1662  ;;  %1237 = vst [vmem:[%s2672_s4 + $0x70] sm:$0xff] %v1173_v7  ;;  %v979_v19 = vadd.f32 1.0, %v1661_v32  ;;  %1682 = vpow2.f32 %v1408_v2  ;;  %v2380_v17 = vadd.f32 %v1978_v36, %v662_v25  ;;  %v2388_v48 = vadd.f32 %v1978_v36, %v660_v46 }
 0x122   :  { %v1665_v9 = vpop.eup %1664  ;;  %1269 = vst [vmem:[%s2672_s4 + $0x170] sm:$0xff] %v1205_v22  ;;  %v1011_v60 = vadd.f32 1.0, %v1663_v62  ;;  %1684 = vpow2.f32 %v1374_v23  ;;  %v1406_v7 = vmul.f32 -1.442695, %v2377_v51  ;;  %v663_v43 = vmul.f32 %v2188_v44, %v1973_v34 }
 0x123   :  { %v1667_v30 = vpop.eup %1666  ;;  %1686 = vrcp.f32 %v979_v19  ;;  %v982_v3 = vadd.f32 1.0, %v1665_v9  ;;  %v1379_v15 = vmul.f32 -1.442695, %v2380_v17  ;;  %v2395_v62 = vadd.f32 %v1978_v36, %v692_v57 }
 0x124   :  { %v1669_v31 = vpop.eup %1668  ;;  %1688 = vrcp.f32 %v1011_v60  ;;  %v1014_v53 = vadd.f32 1.0, %v1667_v30  ;;  %v1411_v9 = vmul.f32 -1.442695, %v2385_v42  ;;  %v695_v60 = vmul.f32 %v2196_v6, %v1973_v34 }
 0x125   :  { %v1671_v63 = vpop.eup %1670  ;;  %1690 = vrcp.f32 %v982_v3  ;;  %v980_v52 = vadd.f32 1.0, %v1669_v31  ;;  %v1377_v44 = vmul.f32 -1.442695, %v2388_v48  ;;  %v661_v3 = vmul.f32 %v1973_v34, %v2198_v50 }
 0x126   :  { %v1673_v39 = vpop.eup %1672  ;;  %1692 = vrcp.f32 %v1014_v53  ;;  %v1012_v58 = vadd.f32 1.0, %v1671_v63  ;;  %v2404_v53 = vadd.f32 %v1978_v36, %v663_v43  ;;  %v693_v63 = vmul.f32 %v1973_v34, %v2205_v55 }
 0x127   :  { %v1675_v2 = vpop.eup %1674  ;;  %1694 = vrcp.f32 %v980_v52  ;;  %v985_v1 = vadd.f32 1.0, %v1673_v39  ;;  %v1409_v57 = vmul.f32 -1.442695, %v2395_v62  ;;  %v666_v39 = vmul.f32 %v2222_v41, %v1973_v34 }
 0x128   :  { %v1677_v23 = vpop.eup %1676  ;;  %1696 = vrcp.f32 %v1012_v58  ;;  %v1017_v14 = vadd.f32 1.0, %v1675_v2  ;;  %v2413_v2 = vadd.f32 %v1978_v36, %v695_v60  ;;  %v664_v41 = vmul.f32 %v1973_v34, %v2229_v0 }
 0x129   :  { %v1679_v32 = vpop.eup %1678  ;;  %1698 = vrcp.f32 %v985_v1  ;;  %v983_v22 = vadd.f32 1.0, %v1677_v23  ;;  %v698_v1 = vmul.f32 %v2227_v45, %v1973_v34  ;;  %v2428_v45 = vadd.f32 %v1978_v36, %v693_v63 }
 0x12a   :  { %v1681_v19 = vpop.eup %1680  ;;  %1700 = vrcp.f32 %v1017_v14  ;;  %v1015_v25 = vadd.f32 1.0, %v1679_v32  ;;  %v2419_v14 = vadd.f32 %v1978_v36, %v661_v3 }
 0x12b   :  { %v1683_v29 = vpop.eup %1682  ;;  %1702 = vrcp.f32 %v983_v22  ;;  %v986_v30 = vadd.f32 1.0, %v1681_v19  ;;  %v1380_v22 = vmul.f32 -1.442695, %v2404_v53  ;;  %v2438_v19 = vadd.f32 %v1978_v36, %v666_v39 }
 0x12c   :  { %v1685_v46 = vpop.eup %1684  ;;  %1704 = vrcp.f32 %v1015_v25  ;;  %v1018_v31 = vadd.f32 1.0, %v1683_v29  ;;  %v2446_v25 = vadd.f32 %v1978_v36, %v698_v1  ;;  %v1378_v60 = vmul.f32 -1.442695, %v2419_v14 }
 0x12d   :  { %v1687_v52 = vpop.eup %1686  ;;  %1706 = vrcp.f32 %v986_v30  ;;  %v984_v6 = vadd.f32 1.0, %v1685_v46  ;;  %v2454_v29 = vadd.f32 %v1978_v36, %v664_v41  ;;  %v1410_v30 = vmul.f32 -1.442695, %v2428_v45 }
 0x12e   :  { %v1689_v58 = vpop.eup %1688  ;;  %v1171_v50 = vmul.f32 %v1687_v52, %v2215_v35  ;;  %1708 = vrcp.f32 %v1018_v31  ;;  %v1383_v46 = vmul.f32 -1.442695, %v2438_v19 }
 0x12f   :  { %v1691_v23 = vpop.eup %1690  ;;  %v1203_v55 = vmul.f32 %v1689_v58, %v2218_v37  ;;  %1710 = vrcp.f32 %v984_v6  ;;  %v696_v37 = vmul.f32 %v1973_v34, %v2234_v54  ;;  %v1381_v52 = vmul.f32 -1.442695, %v2454_v29 }
 0x130   :  { %v1693_v43 = vpop.eup %1692  ;;  %1235 = vst [vmem:[%s2672_s4 + $0x60] sm:$0xff] %v1171_v50  ;;  %v1174_v35 = vmul.f32 %v1691_v23, %v2225_v40  ;;  %1712 = vpow2.f32 %v1406_v7  ;;  %v1412_v7 = vmul.f32 -1.442695, %v2413_v2 }
 0x131   :  { %v1695_v32 = vpop.eup %1694  ;;  %1267 = vst [vmem:[%s2672_s4 + $0x160] sm:$0xff] %v1203_v55  ;;  %v1206_v0 = vmul.f32 %v1693_v43, %v2232_v12  ;;  %1714 = vpow2.f32 %v1379_v15  ;;  %v2462_v3 = vadd.f32 %v1978_v36, %v696_v37  ;;  %v1415_v36 = vmul.f32 -1.442695, %v2446_v25 }
 0x132   :  { %v1697_v40 = vpop.eup %1696  ;;  %1238 = vst [vmem:[%s2672_s4 + $0x78] sm:$0xff] %v1174_v35  ;;  %v1172_v54 = vmul.f32 %v1695_v32, %v2247_v11  ;;  %1716 = vpow2.f32 %v1411_v9 }
 0x133   :  { %v1699_v12 = vpop.eup %1698  ;;  %1270 = vst [vmem:[%s2672_s4 + $0x178] sm:$0xff] %v1206_v0  ;;  %v1204_v15 = vmul.f32 %v1697_v40, %v2258_v27  ;;  %1718 = vpow2.f32 %v1377_v44 }
 0x134   :  { %v1701_v11 = vpop.eup %1700  ;;  %1236 = vst [vmem:[%s2672_s4 + $0x68] sm:$0xff] %v1172_v54  ;;  %v1177_v9 = vmul.f32 %v1699_v12, %v2269_v49  ;;  %1720 = vpow2.f32 %v1409_v57  ;;  %v1413_v57 = vmul.f32 -1.442695, %v2462_v3 }
 0x135   :  { %v1703_v27 = vpop.eup %1702  ;;  %1268 = vst [vmem:[%s2672_s4 + $0x168] sm:$0xff] %v1204_v15  ;;  %v1209_v44 = vmul.f32 %v1701_v11, %v2279_v8  ;;  %1722 = vpow2.f32 %v1380_v22 }
 0x136   :  { %v1705_v31 = vpop.eup %1704  ;;  %1241 = vst [vmem:[%s2672_s4 + $0x90] sm:$0xff] %v1177_v9  ;;  %v1175_v49 = vmul.f32 %v1703_v27, %v2292_v59  ;;  %1724 = vpow2.f32 %v1412_v7 }
 0x137   :  { %v1707_v63 = vpop.eup %1706  ;;  %1273 = vst [vmem:[%s2672_s4 + $0x190] sm:$0xff] %v1209_v44  ;;  %v1207_v8 = vmul.f32 %v1705_v31, %v2306_v18  ;;  %1726 = vpow2.f32 %v1378_v60 }
 0x138   :  { %v1709_v6 = vpop.eup %1708  ;;  %1239 = vst [vmem:[%s2672_s4 + $0x80] sm:$0xff] %v1175_v49  ;;  %v1178_v59 = vmul.f32 %v1707_v63, %v2316_v4  ;;  %1728 = vpow2.f32 %v1410_v30  ;;  %v667_v4 = vmul.f32 %v2236_v28, %v1973_v34  ;;  %v1812_v28 = vld [vmem:[%s2670_s2] ss:$0 sm:$0xff] }
 0x139   :  { %v1711_v39 = vpop.eup %1710  ;;  %1271 = vst [vmem:[%s2672_s4 + $0x180] sm:$0xff] %v1207_v8  ;;  %v1210_v18 = vmul.f32 %v1709_v6, %v2324_v61  ;;  %1730 = vpow2.f32 %v1383_v46  ;;  %v699_v61 = vmul.f32 %v2241_v5, %v1973_v34  ;;  %v665_v41 = vmul.f32 %v1812_v28, %v2243_v21  ;;  %v2509_v34 = vld [vmem:[%s2671_s3] ss:$0 sm:$0xff] }
 0x13a   :  { %v1713_v58 = vpop.eup %1712  ;;  %1242 = vst [vmem:[%s2672_s4 + $0x98] sm:$0xff] %v1178_v59  ;;  %v1176_v50 = vmul.f32 %v1711_v39, %v2332_v10  ;;  %1732 = vpow2.f32 %v1415_v36  ;;  %v2512_v5 = vadd.f32 %v2509_v34, %v667_v4  ;;  %v697_v0 = vmul.f32 %v1812_v28, %v2249_v24 }
 0x13b   :  { %v1715_v1 = vpop.eup %1714  ;;  %1274 = vst [vmem:[%s2672_s4 + $0x198] sm:$0xff] %v1210_v18  ;;  %v1016_v23 = vadd.f32 1.0, %v1713_v58  ;;  %1734 = vpow2.f32 %v1381_v52  ;;  %v2516_v21 = vadd.f32 %v2509_v34, %v699_v61  ;;  %v2519_v12 = vadd.f32 %v2509_v34, %v665_v41 }
 0x13c   :  { %v1717_v55 = vpop.eup %1716  ;;  %1240 = vst [vmem:[%s2672_s4 + $0x88] sm:$0xff] %v1176_v50  ;;  %v989_v10 = vadd.f32 1.0, %v1715_v1  ;;  %1736 = vpow2.f32 %v1413_v57  ;;  %v670_v11 = vmul.f32 %v1812_v28, %v2265_v13  ;;  %v1384_v30 = vmul.f32 -1.442695, %v2512_v5 }
 0x13d   :  { %v1719_v43 = vpop.eup %1718  ;;  %1738 = vrcp.f32 %v1016_v23  ;;  %v1021_v35 = vadd.f32 1.0, %v1717_v55  ;;  %v2524_v27 = vadd.f32 %v2509_v34, %v697_v0  ;;  %v1416_v31 = vmul.f32 -1.442695, %v2516_v21 }
 0x13e   :  { %v1721_v37 = vpop.eup %1720  ;;  %1740 = vrcp.f32 %v989_v10  ;;  %v987_v32 = vadd.f32 1.0, %v1719_v43  ;;  %v702_v49 = vmul.f32 %v1812_v28, %v2273_v26  ;;  %v1382_v13 = vmul.f32 -1.442695, %v2519_v12 }
 0x13f   :  { %v1723_v22 = vpop.eup %1722  ;;  %1742 = vrcp.f32 %v1021_v35  ;;  %v1019_v40 = vadd.f32 1.0, %v1721_v37  ;;  %v668_v8 = vmul.f32 %v1812_v28, %v2275_v56  ;;  %v2531_v59 = vadd.f32 %v2509_v34, %v670_v11 }
 0x140   :  { %v1725_v54 = vpop.eup %1724  ;;  %1744 = vrcp.f32 %v987_v32  ;;  %v990_v7 = vadd.f32 1.0, %v1723_v22  ;;  %v700_v57 = vmul.f32 %v1812_v28, %v2283_v20  ;;  %v1414_v26 = vmul.f32 -1.442695, %v2524_v27 }
 0x141   :  { %v1727_v15 = vpop.eup %1726  ;;  %1746 = vrcp.f32 %v1019_v40  ;;  %v1022_v60 = vadd.f32 1.0, %v1725_v54  ;;  %v671_v58 = vmul.f32 %v1812_v28, %v2285_v33  ;;  %v2537_v56 = vadd.f32 %v2509_v34, %v702_v49 }
 0x142   :  { %v1729_v9 = vpop.eup %1728  ;;  %1748 = vrcp.f32 %v990_v7  ;;  %v988_v24 = vadd.f32 1.0, %v1727_v15  ;;  %v703_v1 = vmul.f32 %v1812_v28, %v2296_v38  ;;  %v2542_v20 = vadd.f32 %v2509_v34, %v668_v8 }
 0x143   :  { %v1731_v44 = vpop.eup %1730  ;;  %1750 = vrcp.f32 %v1022_v60  ;;  %v1020_v46 = vadd.f32 1.0, %v1729_v9  ;;  %v669_v55 = vmul.f32 %v1812_v28, %v2298_v16  ;;  %v2547_v41 = vadd.f32 %v2509_v34, %v700_v57 }
 0x144   :  { %v1733_v36 = vpop.eup %1732  ;;  %1752 = vrcp.f32 %v988_v24  ;;  %v993_v63 = vadd.f32 1.0, %v1731_v44  ;;  %v701_v43 = vmul.f32 %v1812_v28, %v2308_v47  ;;  %v2556_v16 = vadd.f32 %v2509_v34, %v671_v58 }
 0x145   :  { %v1735_v52 = vpop.eup %1734  ;;  %1754 = vrcp.f32 %v1020_v46  ;;  %v1025_v6 = vadd.f32 1.0, %v1733_v36  ;;  %v1419_v28 = vmul.f32 -1.442695, %v2537_v56  ;;  %v2564_v37 = vadd.f32 %v2509_v34, %v703_v1 }
 0x146   :  { %v1737_v39 = vpop.eup %1736  ;;  %1756 = vrcp.f32 %v993_v63  ;;  %v991_v18 = vadd.f32 1.0, %v1735_v52  ;;  %v1385_v0 = vmul.f32 -1.442695, %v2542_v20  ;;  %v2572_v22 = vadd.f32 %v2509_v34, %v669_v55 }
 0x147   :  { %v1739_v50 = vpop.eup %1738  ;;  %1758 = vrcp.f32 %v1025_v6  ;;  %v1023_v4 = vadd.f32 1.0, %v1737_v39  ;;  %v1417_v54 = vmul.f32 -1.442695, %v2547_v41  ;;  %v2580_v7 = vadd.f32 %v2509_v34, %v701_v43 }
 0x148   :  { %v1741_v23 = vpop.eup %1740  ;;  %v1208_v61 = vmul.f32 %v1739_v50, %v2377_v51  ;;  %1760 = vrcp.f32 %v991_v18  ;;  %v1387_v51 = vmul.f32 -1.442695, %v2531_v59  ;;  %v1388_v60 = vmul.f32 -1.442695, %v2556_v16 }
 0x149   :  { %v1743_v10 = vpop.eup %1742  ;;  %v1181_v33 = vmul.f32 %v1741_v23, %v2380_v17  ;;  %1762 = vrcp.f32 %v1023_v4  ;;  %v1420_v34 = vmul.f32 -1.442695, %v2564_v37  ;;  %v1386_v24 = vmul.f32 -1.442695, %v2572_v22 }
 0x14a   :  { %v1745_v35 = vpop.eup %1744  ;;  %1272 = vst [vmem:[%s2672_s4 + $0x188] sm:$0xff] %v1208_v61  ;;  %v1213_v38 = vmul.f32 %v1743_v10, %v2385_v42  ;;  %1764 = vpow2.f32 %v1384_v30  ;;  %v1418_v44 = vmul.f32 -1.442695, %v2580_v7 }
 0x14b   :  { %v1747_v17 = vpop.eup %1746  ;;  %1245 = vst [vmem:[%s2672_s4 + $0xb0] sm:$0xff] %v1181_v33  ;;  %v1179_v47 = vmul.f32 %v1745_v35, %v2388_v48  ;;  %1766 = vpow2.f32 %v1416_v31 }
 0x14c   :  { %v1749_v42 = vpop.eup %1748  ;;  %1277 = vst [vmem:[%s2672_s4 + $0x1b0] sm:$0xff] %v1213_v38  ;;  %v1211_v32 = vmul.f32 %v1747_v17, %v2395_v62  ;;  %1768 = vpow2.f32 %v1382_v13 }
 0x14d   :  { %v1751_v48 = vpop.eup %1750  ;;  %1243 = vst [vmem:[%s2672_s4 + $0xa0] sm:$0xff] %v1179_v47  ;;  %v1182_v40 = vmul.f32 %v1749_v42, %v2404_v53  ;;  %1770 = vpow2.f32 %v1414_v26 }
 0x14e   :  { %v1753_v62 = vpop.eup %1752  ;;  %1275 = vst [vmem:[%s2672_s4 + $0x1a0] sm:$0xff] %v1211_v32  ;;  %v1214_v15 = vmul.f32 %v1751_v48, %v2413_v2  ;;  %1772 = vpow2.f32 %v1387_v51 }
 0x14f   :  { %v1755_v11 = vpop.eup %1754  ;;  %1246 = vst [vmem:[%s2672_s4 + $0xb8] sm:$0xff] %v1182_v40  ;;  %v1180_v53 = vmul.f32 %v1753_v62, %v2419_v14  ;;  %1774 = vpow2.f32 %v1419_v28 }
 0x150   :  { %v1757_v9 = vpop.eup %1756  ;;  %1278 = vst [vmem:[%s2672_s4 + $0x1b8] sm:$0xff] %v1214_v15  ;;  %v1212_v2 = vmul.f32 %v1755_v11, %v2428_v45  ;;  %1776 = vpow2.f32 %v1385_v0 }
 0x151   :  { %v1759_v30 = vpop.eup %1758  ;;  %1244 = vst [vmem:[%s2672_s4 + $0xa8] sm:$0xff] %v1180_v53  ;;  %v1185_v14 = vmul.f32 %v1757_v9, %v2438_v19  ;;  %1778 = vpow2.f32 %v1417_v54 }
 0x152   :  { %v1761_v46 = vpop.eup %1760  ;;  %1276 = vst [vmem:[%s2672_s4 + $0x1a8] sm:$0xff] %v1212_v2  ;;  %v1217_v45 = vmul.f32 %v1759_v30, %v2446_v25  ;;  %1780 = vpow2.f32 %v1388_v60 }
 0x153   :  { %v1763_v31 = vpop.eup %1762  ;;  %1249 = vst [vmem:[%s2672_s4 + $0xd0] sm:$0xff] %v1185_v14  ;;  %v1183_v49 = vmul.f32 %v1761_v46, %v2454_v29  ;;  %1782 = vpow2.f32 %v1420_v34 }
 0x154   :  { %v1765_v19 = vpop.eup %1764  ;;  %1281 = vst [vmem:[%s2672_s4 + $0x1d0] sm:$0xff] %v1217_v45  ;;  %v1215_v36 = vmul.f32 %v1763_v31, %v2462_v3  ;;  %1784 = vpow2.f32 %v1386_v24 }
 0x155   :  { %v1767_v63 = vpop.eup %1766  ;;  %1247 = vst [vmem:[%s2672_s4 + $0xc0] sm:$0xff] %v1183_v49  ;;  %v994_v25 = vadd.f32 1.0, %v1765_v19  ;;  %1786 = vpow2.f32 %v1418_v44 }
 0x156   :  { %v1769_v13 = vpop.eup %1768  ;;  %1279 = vst [vmem:[%s2672_s4 + $0x1c0] sm:$0xff] %v1215_v36  ;;  %v1026_v29 = vadd.f32 1.0, %v1767_v63 }
 0x157   :  { %v1771_v8 = vpop.eup %1770  ;;  %1788 = vrcp.f32 %v994_v25  ;;  %v992_v52 = vadd.f32 1.0, %v1769_v13 }
 0x158   :  { %v1773_v6 = vpop.eup %1772  ;;  %1790 = vrcp.f32 %v1026_v29  ;;  %v1024_v3 = vadd.f32 1.0, %v1771_v8 }
 0x159   :  { %v1775_v57 = vpop.eup %1774  ;;  %1792 = vrcp.f32 %v992_v52  ;;  %v997_v39 = vadd.f32 1.0, %v1773_v6 }
 0x15a   :  { %v1777_v18 = vpop.eup %1776  ;;  %1794 = vrcp.f32 %v1024_v3  ;;  %v1029_v26 = vadd.f32 1.0, %v1775_v57 }
 0x15b   :  { %v1779_v58 = vpop.eup %1778  ;;  %1796 = vrcp.f32 %v997_v39  ;;  %v995_v50 = vadd.f32 1.0, %v1777_v18 }
 0x15c   :  { %v1781_v4 = vpop.eup %1780  ;;  %1798 = vrcp.f32 %v1029_v26  ;;  %v1027_v1 = vadd.f32 1.0, %v1779_v58 }
 0x15d   :  { %v1783_v23 = vpop.eup %1782  ;;  %1800 = vrcp.f32 %v995_v50  ;;  %v998_v61 = vadd.f32 1.0, %v1781_v4 }
 0x15e   :  { %v1785_v55 = vpop.eup %1784  ;;  %1802 = vrcp.f32 %v1027_v1  ;;  %v1030_v10 = vadd.f32 1.0, %v1783_v23 }
 0x15f   :  { %v1787_v33 = vpop.eup %1786  ;;  %1804 = vrcp.f32 %v998_v61  ;;  %v996_v43 = vadd.f32 1.0, %v1785_v55 }
 0x160   :  { %1806 = vrcp.f32 %v1030_v10  ;;  %v1028_v35 = vadd.f32 1.0, %v1787_v33 }
 0x161   :  { %v1789_v38 = vpop.eup %1788  ;;  %1808 = vrcp.f32 %v996_v43 }
 0x162   :  { %v1791_v51 = vpop.eup %1790  ;;  %v1186_v17 = vmul.f32 %v1789_v38, %v2512_v5  ;;  %1810 = vrcp.f32 %v1028_v35 }
 0x163   :  { %v1793_v47 = vpop.eup %1792  ;;  %v1218_v28 = vmul.f32 %v1791_v51, %v2516_v21 }
 0x164   :  { %v1795_v42 = vpop.eup %1794  ;;  %1250 = vst [vmem:[%s2672_s4 + $0xd8] sm:$0xff] %v1186_v17  ;;  %v1184_v32 = vmul.f32 %v1793_v47, %v2519_v12 }
 0x165   :  { %v1797_v0 = vpop.eup %1796  ;;  %1282 = vst [vmem:[%s2672_s4 + $0x1d8] sm:$0xff] %v1218_v28  ;;  %v1216_v48 = vmul.f32 %v1795_v42, %v2524_v27 }
 0x166   :  { %v1799_v40 = vpop.eup %1798  ;;  %1248 = vst [vmem:[%s2672_s4 + $0xc8] sm:$0xff] %v1184_v32  ;;  %v1189_v5 = vmul.f32 %v1797_v0, %v2531_v59 }
 0x167   :  { %v1801_v21 = vpop.eup %1800  ;;  %1280 = vst [vmem:[%s2672_s4 + $0x1c8] sm:$0xff] %v1216_v48  ;;  %v1221_v12 = vmul.f32 %v1799_v40, %v2537_v56 }
 0x168   :  { %v1803_v54 = vpop.eup %1802  ;;  %1253 = vst [vmem:[%s2672_s4 + $0xf0] sm:$0xff] %v1189_v5  ;;  %v1187_v27 = vmul.f32 %v1801_v21, %v2542_v20 }
 0x169   :  { %v1805_v62 = vpop.eup %1804  ;;  %1285 = vst [vmem:[%s2672_s4 + $0x1f0] sm:$0xff] %v1221_v12  ;;  %v1219_v59 = vmul.f32 %v1803_v54, %v2547_v41 }
 0x16a   :  { %v1807_v15 = vpop.eup %1806  ;;  %1251 = vst [vmem:[%s2672_s4 + $0xe0] sm:$0xff] %v1187_v27  ;;  %v1190_v56 = vmul.f32 %v1805_v62, %v2556_v16 }
 0x16b   :  { %v1809_v60 = vpop.eup %1808  ;;  %1283 = vst [vmem:[%s2672_s4 + $0x1e0] sm:$0xff] %v1219_v59  ;;  %v1222_v20 = vmul.f32 %v1807_v15, %v2564_v37 }
 0x16c   :  { %v1811_v11 = vpop.eup %1810  ;;  %1254 = vst [vmem:[%s2672_s4 + $0xf8] sm:$0xff] %v1190_v56  ;;  %v1188_v41 = vmul.f32 %v1809_v60, %v2572_v22 }
 0x16d   :  { %1286 = vst [vmem:[%s2672_s4 + $0x1f8] sm:$0xff] %v1222_v20  ;;  %v1220_v16 = vmul.f32 %v1811_v11, %v2580_v7 }
 0x16e   :  { %1252 = vst [vmem:[%s2672_s4 + $0xe8] sm:$0xff] %v1188_v41 }
 0x16f   :  { %1284 = vst [vmem:[%s2672_s4 + $0x1e8] sm:$0xff] %v1220_v16 }

// kernel: _lambda_.34
= control target key start
LH: loop header
LB: loop body
LE: loop exit
PB: predicated region body
PF: predicated region fallthrough
CT: control target
= control target key end

     0   :  { %9 = vsyncpa [#allocation3], 0  ;;  %s1004_s0 = inlined_call_operand.vmem [shape: bf16[128,144], index: 0, kind: input, shape index: {}]   ;;  %s1005_s1 = inlined_call_operand.vmem [shape: bf16[144,128], index: 1, kind: input, shape index: {}]   ;;  %s1006_s2 = inlined_call_operand.hbm [shape: f32[1,128], index: 2, kind: input, shape index: {}]   ;;  %s1007_s3 = inlined_call_operand.hbm [shape: f32[1,128], index: 3, kind: input, shape index: {}]   ;;  %s1008_s4 = inlined_call_operand.vmem [shape: f32[128,128], index: 4, kind: output, shape index: {}]  }
   0x1   :  { %10 = vsyncpa [#allocation5], 0  ;;  %s721_s15 = smov [#allocation2]   ;;  %s722_s17 = smov [#allocation4]  }
   0x2   :  { %s21_s16 = sshll.u32 %s721_s15, 4  ;;  %s31_s18 = sshll.u32 %s722_s17, 4  ;;  %s22_s16 = int_to_ptr.vmem [resolvable:$true] %s21_s16  ;;  %s32_s18 = int_to_ptr.vmem [resolvable:$true] %s31_s18 }
   0x3   :  { %s673_s21 = scalar_lea.hbm %s1006_s2, 16 }
   0x4   :  { %p674_p0 = scmp.ne.s32.totalorder %s1006_s2, %s673_s21  ;;  %p677_p1 = scmp.lt.u32.totalorder %s673_s21, %s1006_s2 }
   0x6   :  { %p679_p2 = pnand %p677_p1, %p674_p0 }
   0x8   :  { %682 = shalt.err (!%p679_p2)
}
   0x9   :  { %s683_s26 = scalar_lea.vmem %s22_s16, 16  ;;  %s687_s27 = scalar_lea.vmem %s22_s16, 32 }
   0xa   :  { %p684_p3 = scmp.ne.s32.totalorder %s22_s16, %s683_s26  ;;  %p688_p4 = scmp.lt.s32.totalorder %s22_s16, %s22_s16 }
   0xb   :  { %p689_p5 = scmp.lt.s32.totalorder %s687_s27, %s683_s26 }
   0xd   :  { %p690_p6 = por %p689_p5, %p688_p4 }
   0xf   :  { %p691_p7 = pnand %p690_p6, %p684_p3 }
  0x11   :  { %694 = shalt.err (!%p691_p7)
}
  0x12   :  { %24 = dma.hbm_to_vmem [thread:$0]  %s1006_s2, 16, %s22_s16, [#allocation3]  }
  0x13   :  { %s695_s6 = scalar_lea.hbm %s1007_s3, 16 }
  0x14   :  { %p696_p8 = scmp.ne.s32.totalorder %s1007_s3, %s695_s6  ;;  %p699_p9 = scmp.lt.u32.totalorder %s695_s6, %s1007_s3 }
  0x16   :  { %p701_p10 = pnand %p699_p9, %p696_p8 }
  0x18   :  { %704 = shalt.err (!%p701_p10)
}
  0x19   :  { %s705_s11 = scalar_lea.vmem %s32_s18, 16  ;;  %s709_s12 = scalar_lea.vmem %s32_s18, 32 }
  0x1a   :  { %p706_p11 = scmp.ne.s32.totalorder %s32_s18, %s705_s11  ;;  %p710_p12 = scmp.lt.s32.totalorder %s32_s18, %s32_s18 }
  0x1b   :  { %p711_p13 = scmp.lt.s32.totalorder %s709_s12, %s705_s11 }
  0x1d   :  { %p712_p0 = por %p711_p13, %p710_p12 }
  0x1f   :  { %p713_p1 = pnand %p712_p0, %p706_p11 }
  0x21   :  { %716 = shalt.err (!%p713_p1)
}
  0x22   :  { %34 = dma.hbm_to_vmem [thread:$0]  %s1007_s3, 16, %s32_s18, [#allocation5]  }
  0x23   :  { %717 = dma.done.wait [#allocation3], 16  }
  0x24   :  { %718 = vsyncadd [#allocation3], 4294967280 }
  0x25   :  { %719 = dma.done.wait [#allocation5], 16  }
  0x26   :  { %720 = vsyncadd [#allocation5], 4294967280  ;;  %v723_v0 = vmov 0   ;;  %v576_v1 = vld [vmem:[%s1005_s1] sm:$0xff]   ;;  %v577_v2 = vld [vmem:[%s1005_s1 + $0x8] sm:$0xff]   ;;  %vm202_vm0 = vcmask 130048  }
  0x27   :  { %227 = vmatprep.subr.bf16.mxu0 %v723_v0  ;;  %555 = vmatprep.subr.bf16.mxu1 %v723_v0  ;;  %v578_v3 = vld [vmem:[%s1005_s1 + $0x10] sm:$0xff]   ;;  %v579_v4 = vld [vmem:[%s1005_s1 + $0x18] sm:$0xff]   ;;  %v587_v5 = vld [vmem:[%s1004_s0 + $0x4] ss:$8 sps:$4 sm:$0xff]  }
  0x28   :  { %228 = vmatpush1.bf16.msra.mxu0 %v576_v1  ;;  %564 = vmatpush1.bf16.msra.mxu1 %v576_v1  ;;  %v590_v6 = vld [vmem:[%s1004_s0 + $0x44] ss:$8 sps:$4 sm:$0xff]   ;;  %v582_v9 = vld [vmem:[%s1005_s1 + $0x30] sm:$0xff]   ;;  %v583_v10 = vld [vmem:[%s1005_s1 + $0x38] sm:$0xff]  }
  0x29   :  { %229 = vmatprep.subr.bf16.mxu0 %v723_v0  ;;  %556 = vmatprep.subr.bf16.mxu1 %v723_v0  ;;  %v580_v7 = vld [vmem:[%s1005_s1 + $0x20] sm:$0xff]   ;;  %v581_v8 = vld [vmem:[%s1005_s1 + $0x28] sm:$0xff]   ;;  %v591_v14 = vld [vmem:[%s1004_s0 + $0x14] ss:$8 sps:$4 sm:$0xff]  }
  0x2a   :  { %529 = vmatprep.mubr.msk.bf16.mxu0 %vm202_vm0, %v587_v5  ;;  %533 = vmatprep.mubr.msk.bf16.mxu1 %vm202_vm0, %v590_v6  ;;  %v584_v11 = vld [vmem:[%s1005_s1 + $0x40] sm:$0xff]   ;;  %v593_v15 = vld [vmem:[%s1004_s0 + $0x54] ss:$8 sps:$4 sm:$0xff]   ;;  %v595_v16 = vld [vmem:[%s1004_s0 + $0x10] ss:$8 sps:$4 sm:$0xff]  }
  0x2b   :  { %v585_v12 = vld [vmem:[%s1004_s0] ss:$8 sps:$4 sm:$0xff]   ;;  %v596_v17 = vld [vmem:[%s1004_s0 + $0x50] ss:$8 sps:$4 sm:$0xff]   ;;  %v597_v18 = vld [vmem:[%s1004_s0 + $0x24] ss:$8 sps:$4 sm:$0xff]  }
  0x2c   :  { %230 = vmatpush1.bf16.msra.mxu0 %v577_v2  ;;  %565 = vmatpush1.bf16.msra.mxu1 %v577_v2  ;;  %v588_v13 = vld [vmem:[%s1004_s0 + $0x40] ss:$8 sps:$4 sm:$0xff]   ;;  %v599_v19 = vld [vmem:[%s1004_s0 + $0x64] ss:$8 sps:$4 sm:$0xff]   ;;  %v603_v22 = vld [vmem:[%s1004_s0 + $0x34] ss:$8 sps:$4 sm:$0xff]  }
  0x2d   :  { %231 = vmatprep.subr.bf16.mxu0 %v723_v0  ;;  %557 = vmatprep.subr.bf16.mxu1 %v723_v0  ;;  %v601_v20 = vld [vmem:[%s1004_s0 + $0x20] ss:$8 sps:$4 sm:$0xff]   ;;  %v605_v23 = vld [vmem:[%s1004_s0 + $0x74] ss:$8 sps:$4 sm:$0xff]   ;;  %v607_v24 = vld [vmem:[%s1004_s0 + $0x30] ss:$8 sps:$4 sm:$0xff]  }
  0x2e   :  { %v602_v21 = vld [vmem:[%s1004_s0 + $0x60] ss:$8 sps:$4 sm:$0xff]   ;;  %v608_v25 = vld [vmem:[%s1004_s0 + $0x70] ss:$8 sps:$4 sm:$0xff]  }
  0x2f   :  { %v856_v26 = vld [vmem:[#allocation2] ss:$0 sm:$0xff]  ;;  %v858_v28 = vld [vmem:[#allocation4] ss:$0 sm:$0xff] }
  0x30   :  { %232 = vmatpush1.bf16.msra.mxu0 %v578_v3  ;;  %566 = vmatpush1.bf16.msra.mxu1 %v578_v3 }
  0x31   :  { %233 = vmatprep.subr.bf16.mxu0 %v723_v0  ;;  %558 = vmatprep.subr.bf16.mxu1 %v723_v0 }
  0x34   :  { %234 = vmatpush1.bf16.msra.mxu0 %v579_v4  ;;  %567 = vmatpush1.bf16.msra.mxu1 %v579_v4 }
  0x35   :  { %235 = vmatprep.subr.bf16.mxu0 %v723_v0  ;;  %559 = vmatprep.subr.bf16.mxu1 %v723_v0 }
  0x38   :  { %236 = vmatpush1.bf16.msra.mxu0 %v580_v7  ;;  %568 = vmatpush1.bf16.msra.mxu1 %v580_v7 }
  0x39   :  { %237 = vmatprep.subr.bf16.mxu0 %v723_v0  ;;  %560 = vmatprep.subr.bf16.mxu1 %v723_v0 }
  0x3c   :  { %238 = vmatpush1.bf16.msra.mxu0 %v581_v8  ;;  %569 = vmatpush1.bf16.msra.mxu1 %v581_v8 }
  0x3d   :  { %239 = vmatprep.subr.bf16.mxu0 %v723_v0  ;;  %561 = vmatprep.subr.bf16.mxu1 %v723_v0 }
  0x40   :  { %240 = vmatpush1.bf16.msra.mxu0 %v582_v9  ;;  %570 = vmatpush1.bf16.msra.mxu1 %v582_v9 }
  0x41   :  { %241 = vmatprep.subr.bf16.mxu0 %v723_v0  ;;  %562 = vmatprep.subr.bf16.mxu1 %v723_v0 }
  0x44   :  { %242 = vmatpush1.bf16.msra.mxu0 %v583_v10  ;;  %571 = vmatpush1.bf16.msra.mxu1 %v583_v10 }
  0x45   :  { %243 = vmatprep.subr.bf16.mxu0 %v723_v0  ;;  %563 = vmatprep.subr.bf16.mxu1 %v723_v0 }
  0x48   :  { %244 = vmatpush1.bf16.msra.mxu0 %v584_v11  ;;  %572 = vmatpush1.bf16.msra.mxu1 %v584_v11 }
  0x4b   :  { %260 = vmatmul.mubr.bf16.vlgmr.msra.gmra.mrb[0].mxu0 %v585_v12  ;;  %292 = vmatmul.mubr.bf16.vlgmr.msra.gmra.mrb[0].mxu1 %v588_v13 }
  0x4c   :  { %530 = vmatprep.mubr.msk.bf16.mxu0 %vm202_vm0, %v591_v14  ;;  %534 = vmatprep.mubr.msk.bf16.mxu1 %vm202_vm0, %v593_v15 }
  0x53   :  { %268 = vmatmul.mubr.bf16.gmra.mrb[4].mxu0 %v595_v16  ;;  %300 = vmatmul.mubr.bf16.gmra.mrb[4].mxu1 %v596_v17 }
  0x54   :  { %531 = vmatprep.mubr.msk.bf16.mxu0 %vm202_vm0, %v597_v18  ;;  %535 = vmatprep.mubr.msk.bf16.mxu1 %vm202_vm0, %v599_v19 }
  0x5b   :  { %276 = vmatmul.mubr.bf16.gmra.mrb[8].mxu0 %v601_v20  ;;  %308 = vmatmul.mubr.bf16.gmra.mrb[8].mxu1 %v602_v21 }
  0x5c   :  { %532 = vmatprep.mubr.msk.bf16.mxu0 %vm202_vm0, %v603_v22  ;;  %536 = vmatprep.mubr.msk.bf16.mxu1 %vm202_vm0, %v605_v23 }
  0x63   :  { %284 = vmatmul.mubr.bf16.gmra.mrb[12].mxu0 %v607_v24  ;;  %316 = vmatmul.mubr.bf16.gmra.mrb[12].mxu1 %v608_v25 }
 0x11e   :  { %v261_v27 = vpop.f32.mrb[0].mxu0  ;;  %v293_v29 = vpop.f32.mrb[0].mxu1 }
 0x11f   :  { %v331_v30 = vmul.f32 %v856_v26, %v261_v27  ;;  %v339_v31 = vmul.f32 %v856_v26, %v293_v29  ;;  %v263_v32 = vpop.f32.mrb[1].mxu0  ;;  %v295_v33 = vpop.f32.mrb[1].mxu1 }
 0x120   :  { %v264_v34 = vpop.f32.mrb[2].mxu0  ;;  %v296_v35 = vpop.f32.mrb[2].mxu1 }
 0x121   :  { %v863_v36 = vadd.f32 %v858_v28, %v331_v30  ;;  %v866_v37 = vadd.f32 %v858_v28, %v339_v31  ;;  %v332_v38 = vmul.f32 %v856_v26, %v264_v34  ;;  %v340_v39 = vmul.f32 %v856_v26, %v296_v35  ;;  %v266_v40 = vpop.f32.mrb[3].mxu0  ;;  %v298_v41 = vpop.f32.mrb[3].mxu1 }
 0x123   :  { %v539_v42 = vmul.f32 -1.442695, %v863_v36  ;;  %v547_v43 = vmul.f32 -1.442695, %v866_v37  ;;  %v873_v44 = vadd.f32 %v858_v28, %v332_v38  ;;  %v876_v45 = vadd.f32 %v858_v28, %v340_v39 }
 0x125   :  { %609 = vpow2.f32 %v539_v42  ;;  %v540_v46 = vmul.f32 -1.442695, %v873_v44  ;;  %v548_v47 = vmul.f32 -1.442695, %v876_v45 }
 0x126   :  { %611 = vpow2.f32 %v547_v43  ;;  %v269_v48 = vpop.f32.mrb[4].mxu0  ;;  %v301_v49 = vpop.f32.mrb[4].mxu1 }
 0x127   :  { %613 = vpow2.f32 %v540_v46  ;;  %v333_v50 = vmul.f32 %v856_v26, %v269_v48  ;;  %v341_v51 = vmul.f32 %v856_v26, %v301_v49  ;;  %v271_v52 = vpop.f32.mrb[5].mxu0  ;;  %v303_v53 = vpop.f32.mrb[5].mxu1 }
 0x128   :  { %615 = vpow2.f32 %v548_v47  ;;  %v272_v54 = vpop.f32.mrb[6].mxu0  ;;  %v304_v55 = vpop.f32.mrb[6].mxu1 }
 0x129   :  { %v883_v56 = vadd.f32 %v858_v28, %v333_v50  ;;  %v886_v57 = vadd.f32 %v858_v28, %v341_v51  ;;  %v334_v58 = vmul.f32 %v856_v26, %v272_v54  ;;  %v342_v59 = vmul.f32 %v856_v26, %v304_v55  ;;  %v274_v60 = vpop.f32.mrb[7].mxu0  ;;  %v306_v61 = vpop.f32.mrb[7].mxu1 }
 0x12b   :  { %v541_v62 = vmul.f32 -1.442695, %v883_v56  ;;  %v549_v63 = vmul.f32 -1.442695, %v886_v57  ;;  %v893_v0 = vadd.f32 %v858_v28, %v334_v58  ;;  %v896_v1 = vadd.f32 %v858_v28, %v342_v59 }
 0x12d   :  { %617 = vpow2.f32 %v541_v62  ;;  %v542_v2 = vmul.f32 -1.442695, %v893_v0  ;;  %v550_v3 = vmul.f32 -1.442695, %v896_v1 }
 0x12e   :  { %619 = vpow2.f32 %v549_v63  ;;  %v277_v4 = vpop.f32.mrb[8].mxu0  ;;  %v309_v5 = vpop.f32.mrb[8].mxu1 }
 0x12f   :  { %v610_v6 = vpop.eup %609  ;;  %621 = vpow2.f32 %v542_v2  ;;  %v335_v7 = vmul.f32 %v856_v26, %v277_v4  ;;  %v343_v8 = vmul.f32 %v856_v26, %v309_v5  ;;  %v279_v9 = vpop.f32.mrb[9].mxu0 }
 0x130   :  { %v311_v10 = vpop.f32.mrb[9].mxu1  ;;  %v612_v11 = vpop.eup %611  ;;  %v418_v12 = vadd.f32 1.0, %v610_v6  ;;  %623 = vpow2.f32 %v550_v3 }
 0x131   :  { %v280_v13 = vpop.f32.mrb[10].mxu0  ;;  %v312_v14 = vpop.f32.mrb[10].mxu1  ;;  %v426_v16 = vadd.f32 1.0, %v612_v11  ;;  %v903_v17 = vadd.f32 %v858_v28, %v335_v7  ;;  %v906_v18 = vadd.f32 %v858_v28, %v343_v8 }
 0x132   :  { %v614_v15 = vpop.eup %613  ;;  %v336_v19 = vmul.f32 %v856_v26, %v280_v13  ;;  %v282_v20 = vpop.f32.mrb[11].mxu0  ;;  %625 = vrcp.f32 %v418_v12  ;;  %v344_v24 = vmul.f32 %v856_v26, %v312_v14 }
 0x133   :  { %v314_v21 = vpop.f32.mrb[11].mxu1  ;;  %v616_v22 = vpop.eup %615  ;;  %v419_v23 = vadd.f32 1.0, %v614_v15  ;;  %627 = vrcp.f32 %v426_v16  ;;  %v543_v27 = vmul.f32 -1.442695, %v903_v17  ;;  %v551_v29 = vmul.f32 -1.442695, %v906_v18 }
 0x134   :  { %v427_v25 = vadd.f32 1.0, %v616_v22  ;;  %v913_v30 = vadd.f32 %v858_v28, %v336_v19  ;;  %v916_v31 = vadd.f32 %v858_v28, %v344_v24 }
 0x135   :  { %629 = vrcp.f32 %v419_v23 }
 0x136   :  { %631 = vrcp.f32 %v427_v25  ;;  %v544_v32 = vmul.f32 -1.442695, %v913_v30  ;;  %v552_v33 = vmul.f32 -1.442695, %v916_v31  ;;  %v285_v34 = vpop.f32.mrb[12].mxu0  ;;  %v317_v35 = vpop.f32.mrb[12].mxu1 }
 0x137   :  { %633 = vpow2.f32 %v543_v27  ;;  %v618_v38 = vpop.eup %617  ;;  %v337_v39 = vmul.f32 %v856_v26, %v285_v34  ;;  %v345_v40 = vmul.f32 %v856_v26, %v317_v35  ;;  %v287_v41 = vpop.f32.mrb[13].mxu0 }
 0x138   :  { %635 = vpow2.f32 %v551_v29  ;;  %v319_v42 = vpop.f32.mrb[13].mxu1  ;;  %v620_v43 = vpop.eup %619  ;;  %v420_v46 = vadd.f32 1.0, %v618_v38 }
 0x139   :  { %637 = vpow2.f32 %v544_v32  ;;  %v288_v47 = vpop.f32.mrb[14].mxu0  ;;  %v320_v48 = vpop.f32.mrb[14].mxu1  ;;  %v428_v50 = vadd.f32 1.0, %v620_v43  ;;  %v923_v51 = vadd.f32 %v858_v28, %v337_v39  ;;  %v926_v52 = vadd.f32 %v858_v28, %v345_v40 }
 0x13a   :  { %v622_v49 = vpop.eup %621  ;;  %639 = vpow2.f32 %v552_v33  ;;  %v290_v53 = vpop.f32.mrb[15].mxu0  ;;  %v338_v59 = vmul.f32 %v856_v26, %v288_v47  ;;  %v346_v60 = vmul.f32 %v856_v26, %v320_v48 }
 0x13b   :  { %v322_v54 = vpop.f32.mrb[15].mxu1  ;;  %v624_v55 = vpop.eup %623  ;;  %641 = vrcp.f32 %v420_v46  ;;  %v421_v58 = vadd.f32 1.0, %v622_v49  ;;  %v545_v62 = vmul.f32 -1.442695, %v923_v51  ;;  %v553_v63 = vmul.f32 -1.442695, %v926_v52 }
 0x13c   :  { %643 = vrcp.f32 %v428_v50  ;;  %v429_v61 = vadd.f32 1.0, %v624_v55  ;;  %v626_v2 = vpop.eup %625  ;;  %v933_v3 = vadd.f32 %v858_v28, %v338_v59  ;;  %v936_v4 = vadd.f32 %v858_v28, %v346_v60 }
 0x13d   :  { %645 = vrcp.f32 %v421_v58  ;;  %v628_v5 = vpop.eup %627  ;;  %v466_v6 = vmul.f32 %v626_v2, %v863_v36 }
 0x13e   :  { %647 = vrcp.f32 %v429_v61  ;;  %v474_v26 = vmul.f32 %v628_v5, %v866_v37  ;;  %v546_v8 = vmul.f32 -1.442695, %v933_v3  ;;  %v554_v9 = vmul.f32 -1.442695, %v936_v4 }
 0x13f   :  { %v630_v7 = vpop.eup %629  ;;  %649 = vpow2.f32 %v545_v62  ;;  %482 = vst [vmem:[%s1008_s4] sm:$0xff] %v466_v6 }
 0x140   :  { %v632_v10 = vpop.eup %631  ;;  %v467_v28 = vmul.f32 %v630_v7, %v873_v44  ;;  %651 = vpow2.f32 %v553_v63  ;;  %490 = vst [vmem:[%s1008_s4 + $0x40] sm:$0xff] %v474_v26 }
 0x141   :  { %v634_v11 = vpop.eup %633  ;;  %v475_v36 = vmul.f32 %v632_v10, %v876_v45  ;;  %653 = vpow2.f32 %v546_v8 }
 0x142   :  { %v636_v37 = vpop.eup %635  ;;  %483 = vst [vmem:[%s1008_s4 + $0x8] sm:$0xff] %v467_v28  ;;  %v422_v12 = vadd.f32 1.0, %v634_v11  ;;  %655 = vpow2.f32 %v554_v9 }
 0x143   :  { %v638_v13 = vpop.eup %637  ;;  %491 = vst [vmem:[%s1008_s4 + $0x48] sm:$0xff] %v475_v36  ;;  %v430_v44 = vadd.f32 1.0, %v636_v37 }
 0x144   :  { %v640_v14 = vpop.eup %639  ;;  %657 = vrcp.f32 %v422_v12  ;;  %v423_v15 = vadd.f32 1.0, %v638_v13 }
 0x145   :  { %v642_v16 = vpop.eup %641  ;;  %659 = vrcp.f32 %v430_v44  ;;  %v431_v45 = vadd.f32 1.0, %v640_v14 }
 0x146   :  { %v644_v19 = vpop.eup %643  ;;  %v468_v20 = vmul.f32 %v642_v16, %v883_v56  ;;  %661 = vrcp.f32 %v423_v15 }
 0x147   :  { %v646_v21 = vpop.eup %645  ;;  %v476_v22 = vmul.f32 %v644_v19, %v886_v57  ;;  %663 = vrcp.f32 %v431_v45 }
 0x148   :  { %v648_v23 = vpop.eup %647  ;;  %484 = vst [vmem:[%s1008_s4 + $0x10] sm:$0xff] %v468_v20  ;;  %v469_v24 = vmul.f32 %v646_v21, %v893_v0 }
 0x149   :  { %v650_v25 = vpop.eup %649  ;;  %492 = vst [vmem:[%s1008_s4 + $0x50] sm:$0xff] %v476_v22  ;;  %v477_v27 = vmul.f32 %v648_v23, %v896_v1 }
 0x14a   :  { %v652_v56 = vpop.eup %651  ;;  %485 = vst [vmem:[%s1008_s4 + $0x18] sm:$0xff] %v469_v24  ;;  %v424_v57 = vadd.f32 1.0, %v650_v25 }
 0x14b   :  { %v654_v29 = vpop.eup %653  ;;  %493 = vst [vmem:[%s1008_s4 + $0x58] sm:$0xff] %v477_v27  ;;  %v432_v32 = vadd.f32 1.0, %v652_v56 }
 0x14c   :  { %v656_v0 = vpop.eup %655  ;;  %665 = vrcp.f32 %v424_v57  ;;  %v425_v33 = vadd.f32 1.0, %v654_v29 }
 0x14d   :  { %667 = vrcp.f32 %v432_v32  ;;  %v433_v34 = vadd.f32 1.0, %v656_v0 }
 0x14e   :  { %v658_v35 = vpop.eup %657  ;;  %669 = vrcp.f32 %v425_v33 }
 0x14f   :  { %v660_v1 = vpop.eup %659  ;;  %v470_v38 = vmul.f32 %v658_v35, %v903_v17  ;;  %671 = vrcp.f32 %v433_v34 }
 0x150   :  { %v662_v39 = vpop.eup %661  ;;  %v478_v40 = vmul.f32 %v660_v1, %v906_v18 }
 0x151   :  { %v664_v41 = vpop.eup %663  ;;  %486 = vst [vmem:[%s1008_s4 + $0x20] sm:$0xff] %v470_v38  ;;  %v471_v42 = vmul.f32 %v662_v39, %v913_v30 }
 0x152   :  { %494 = vst [vmem:[%s1008_s4 + $0x60] sm:$0xff] %v478_v40  ;;  %v479_v43 = vmul.f32 %v664_v41, %v916_v31 }
 0x153   :  { %487 = vst [vmem:[%s1008_s4 + $0x28] sm:$0xff] %v471_v42 }
 0x154   :  { %495 = vst [vmem:[%s1008_s4 + $0x68] sm:$0xff] %v479_v43 }
 0x156   :  { %v666_v17 = vpop.eup %665 }
 0x157   :  { %v668_v18 = vpop.eup %667  ;;  %v472_v46 = vmul.f32 %v666_v17, %v923_v51 }
 0x158   :  { %v670_v47 = vpop.eup %669  ;;  %v480_v30 = vmul.f32 %v668_v18, %v926_v52 }
 0x159   :  { %v672_v48 = vpop.eup %671  ;;  %488 = vst [vmem:[%s1008_s4 + $0x30] sm:$0xff] %v472_v46  ;;  %v473_v31 = vmul.f32 %v670_v47, %v933_v3 }
 0x15a   :  { %496 = vst [vmem:[%s1008_s4 + $0x70] sm:$0xff] %v480_v30  ;;  %v481_v49 = vmul.f32 %v672_v48, %v936_v4 }
 0x15b   :  { %489 = vst [vmem:[%s1008_s4 + $0x38] sm:$0xff] %v473_v31 }
 0x15c   :  { %497 = vst [vmem:[%s1008_s4 + $0x78] sm:$0xff] %v481_v49 }
 0x15d   :  { %502 = vsyncpa [#allocation3], 1 }
 0x15e   :  { %503 = vsyncpa [#allocation5], 1 }

// kernel: _lambda_.35
= control target key start
LH: loop header
LB: loop body
LE: loop exit
PB: predicated region body
PF: predicated region fallthrough
CT: control target
= control target key end

     0   :  { %9 = vsyncpa [#allocation3], 0  ;;  %s847_s0 = inlined_call_operand.vmem [shape: bf16[128,32], index: 0, kind: input, shape index: {}]   ;;  %s848_s1 = inlined_call_operand.vmem [shape: bf16[32,128], index: 1, kind: input, shape index: {}]   ;;  %s849_s2 = inlined_call_operand.hbm [shape: f32[1,128], index: 2, kind: input, shape index: {}]   ;;  %s850_s3 = inlined_call_operand.hbm [shape: f32[1,128], index: 3, kind: input, shape index: {}]   ;;  %s851_s4 = inlined_call_operand.vmem [shape: f32[128,128], index: 4, kind: output, shape index: {}]  }
   0x1   :  { %10 = vsyncpa [#allocation5], 0  ;;  %s610_s15 = smov [#allocation2]   ;;  %s611_s17 = smov [#allocation4]  }
   0x2   :  { %s21_s16 = sshll.u32 %s610_s15, 4  ;;  %s31_s18 = sshll.u32 %s611_s17, 4  ;;  %s22_s16 = int_to_ptr.vmem [resolvable:$true] %s21_s16  ;;  %s32_s18 = int_to_ptr.vmem [resolvable:$true] %s31_s18 }
   0x3   :  { %s562_s21 = scalar_lea.hbm %s849_s2, 16 }
   0x4   :  { %p563_p0 = scmp.ne.s32.totalorder %s849_s2, %s562_s21  ;;  %p566_p1 = scmp.lt.u32.totalorder %s562_s21, %s849_s2 }
   0x6   :  { %p568_p2 = pnand %p566_p1, %p563_p0 }
   0x8   :  { %571 = shalt.err (!%p568_p2)
}
   0x9   :  { %s572_s26 = scalar_lea.vmem %s22_s16, 16  ;;  %s576_s27 = scalar_lea.vmem %s22_s16, 32 }
   0xa   :  { %p573_p3 = scmp.ne.s32.totalorder %s22_s16, %s572_s26  ;;  %p577_p4 = scmp.lt.s32.totalorder %s22_s16, %s22_s16 }
   0xb   :  { %p578_p5 = scmp.lt.s32.totalorder %s576_s27, %s572_s26 }
   0xd   :  { %p579_p6 = por %p578_p5, %p577_p4 }
   0xf   :  { %p580_p7 = pnand %p579_p6, %p573_p3 }
  0x11   :  { %583 = shalt.err (!%p580_p7)
}
  0x12   :  { %24 = dma.hbm_to_vmem [thread:$0]  %s849_s2, 16, %s22_s16, [#allocation3]  }
  0x13   :  { %s584_s6 = scalar_lea.hbm %s850_s3, 16 }
  0x14   :  { %p585_p8 = scmp.ne.s32.totalorder %s850_s3, %s584_s6  ;;  %p588_p9 = scmp.lt.u32.totalorder %s584_s6, %s850_s3 }
  0x16   :  { %p590_p10 = pnand %p588_p9, %p585_p8 }
  0x18   :  { %593 = shalt.err (!%p590_p10)
}
  0x19   :  { %s594_s11 = scalar_lea.vmem %s32_s18, 16  ;;  %s598_s12 = scalar_lea.vmem %s32_s18, 32 }
  0x1a   :  { %p595_p11 = scmp.ne.s32.totalorder %s32_s18, %s594_s11  ;;  %p599_p12 = scmp.lt.s32.totalorder %s32_s18, %s32_s18 }
  0x1b   :  { %p600_p13 = scmp.lt.s32.totalorder %s598_s12, %s594_s11 }
  0x1d   :  { %p601_p0 = por %p600_p13, %p599_p12 }
  0x1f   :  { %p602_p1 = pnand %p601_p0, %p595_p11 }
  0x21   :  { %605 = shalt.err (!%p602_p1)
}
  0x22   :  { %34 = dma.hbm_to_vmem [thread:$0]  %s850_s3, 16, %s32_s18, [#allocation5]  }
  0x23   :  { %606 = dma.done.wait [#allocation3], 16  }
  0x24   :  { %607 = vsyncadd [#allocation3], 4294967280 }
  0x25   :  { %608 = dma.done.wait [#allocation5], 16  }
  0x26   :  { %609 = vsyncadd [#allocation5], 4294967280  ;;  %v488_v0 = vld [vmem:[%s848_s1] sm:$0xff]   ;;  %v489_v1 = vld [vmem:[%s848_s1 + $0x8] sm:$0xff]   ;;  %vm114_vm0 = vcmask 261120  }
  0x27   :  { %462 = vmatprep.subr.bf16.mxu0 %v488_v0  ;;  %482 = vmatprep.subr.bf16.mxu1 %v488_v0  ;;  %v490_v2 = vld [vmem:[%s847_s0] sm:$0xff]   ;;  %v492_v4 = vld [vmem:[%s847_s0 + $0x8] sm:$0xff]   ;;  %v494_v6 = vld [vmem:[%s847_s0 + $0x10] sm:$0xff]  }
  0x28   :  { %463 = vmatpush3.bf16.msra.mxu0 %v488_v0  ;;  %484 = vmatpush3.bf16.msra.mxu1 %v488_v0  ;;  %v491_v3 = vld [vmem:[%s847_s0 + $0x20] sm:$0xff]   ;;  %v493_v5 = vld [vmem:[%s847_s0 + $0x28] sm:$0xff]   ;;  %v495_v7 = vld [vmem:[%s847_s0 + $0x30] sm:$0xff]  }
  0x29   :  { %464 = vmatprep.subr.bf16.mxu0 %v489_v1  ;;  %483 = vmatprep.subr.bf16.mxu1 %v489_v1  ;;  %v496_v8 = vld [vmem:[%s847_s0 + $0x18] sm:$0xff]   ;;  %v699_v10 = vld [vmem:[#allocation2] ss:$0 sm:$0xff]  ;;  %v701_v12 = vld [vmem:[#allocation4] ss:$0 sm:$0xff] }
  0x2a   :  { %466 = vmatprep.mubr.msk.bf16.mxu0 %vm114_vm0, %v490_v2  ;;  %474 = vmatprep.mubr.msk.bf16.mxu1 %vm114_vm0, %v491_v3  ;;  %v497_v9 = vld [vmem:[%s847_s0 + $0x38] sm:$0xff]  }
  0x2c   :  { %465 = vmatpush3.bf16.msra.mxu0 %v489_v1  ;;  %485 = vmatpush3.bf16.msra.mxu1 %v489_v1 }
  0x2f   :  { %467 = vmatmul.mubr.msk.bf16.vlgmr.msra.gmra.mrb[0].mxu0 %vm114_vm0, %v492_v4  ;;  %475 = vmatmul.mubr.msk.bf16.vlgmr.msra.gmra.mrb[0].mxu1 %vm114_vm0, %v493_v5 }
  0x30   :  { %470 = vmatprep.mubr.msk.bf16.mxu0 %vm114_vm0, %v494_v6  ;;  %478 = vmatprep.mubr.msk.bf16.mxu1 %vm114_vm0, %v495_v7 }
  0x37   :  { %471 = vmatmul.mubr.msk.bf16.gmra.mrb[4].mxu0 %vm114_vm0, %v496_v8  ;;  %479 = vmatmul.mubr.msk.bf16.gmra.mrb[4].mxu1 %vm114_vm0, %v497_v9 }
 0x102   :  { %v468_v11 = vpop.f32.mrb[0].mxu0  ;;  %v476_v13 = vpop.f32.mrb[0].mxu1 }
 0x103   :  { %v245_v14 = vmul.f32 %v468_v11, %v699_v10  ;;  %v253_v15 = vmul.f32 %v476_v13, %v699_v10  ;;  %v173_v16 = vpop.f32.mrb[1].mxu0  ;;  %v205_v17 = vpop.f32.mrb[1].mxu1 }
 0x104   :  { %v243_v18 = vmul.f32 %v699_v10, %v173_v16  ;;  %v251_v19 = vmul.f32 %v699_v10, %v205_v17  ;;  %v469_v20 = vpop.f32.mrb[2].mxu0  ;;  %v477_v21 = vpop.f32.mrb[2].mxu1 }
 0x105   :  { %v708_v22 = vadd.f32 %v701_v12, %v245_v14  ;;  %v711_v23 = vadd.f32 %v701_v12, %v253_v15  ;;  %v246_v24 = vmul.f32 %v469_v20, %v699_v10  ;;  %v254_v25 = vmul.f32 %v477_v21, %v699_v10  ;;  %v176_v26 = vpop.f32.mrb[3].mxu0  ;;  %v208_v27 = vpop.f32.mrb[3].mxu1 }
 0x106   :  { %v716_v28 = vadd.f32 %v701_v12, %v243_v18  ;;  %v719_v29 = vadd.f32 %v701_v12, %v251_v19  ;;  %v244_v30 = vmul.f32 %v699_v10, %v176_v26  ;;  %v252_v31 = vmul.f32 %v699_v10, %v208_v27 }
 0x107   :  { %v438_v32 = vmul.f32 -1.442695, %v708_v22  ;;  %v446_v33 = vmul.f32 -1.442695, %v711_v23  ;;  %v726_v34 = vadd.f32 %v701_v12, %v246_v24  ;;  %v729_v35 = vadd.f32 %v701_v12, %v254_v25 }
 0x108   :  { %v436_v36 = vmul.f32 -1.442695, %v716_v28  ;;  %v444_v37 = vmul.f32 -1.442695, %v719_v29  ;;  %v734_v38 = vadd.f32 %v701_v12, %v244_v30  ;;  %v737_v39 = vadd.f32 %v701_v12, %v252_v31 }
 0x109   :  { %498 = vpow2.f32 %v438_v32  ;;  %v439_v40 = vmul.f32 -1.442695, %v726_v34  ;;  %v447_v41 = vmul.f32 -1.442695, %v729_v35 }
 0x10a   :  { %500 = vpow2.f32 %v446_v33  ;;  %v472_v42 = vpop.f32.mrb[4].mxu0  ;;  %v480_v43 = vpop.f32.mrb[4].mxu1  ;;  %v437_v44 = vmul.f32 -1.442695, %v734_v38  ;;  %v445_v49 = vmul.f32 -1.442695, %v737_v39 }
 0x10b   :  { %502 = vpow2.f32 %v436_v36  ;;  %v249_v45 = vmul.f32 %v472_v42, %v699_v10  ;;  %v257_v46 = vmul.f32 %v480_v43, %v699_v10  ;;  %v189_v47 = vpop.f32.mrb[5].mxu0  ;;  %v221_v48 = vpop.f32.mrb[5].mxu1 }
 0x10c   :  { %504 = vpow2.f32 %v444_v37  ;;  %v247_v50 = vmul.f32 %v699_v10, %v189_v47  ;;  %v255_v51 = vmul.f32 %v699_v10, %v221_v48  ;;  %v473_v52 = vpop.f32.mrb[6].mxu0  ;;  %v481_v53 = vpop.f32.mrb[6].mxu1 }
 0x10d   :  { %506 = vpow2.f32 %v439_v40  ;;  %v748_v54 = vadd.f32 %v701_v12, %v249_v45  ;;  %v751_v55 = vadd.f32 %v701_v12, %v257_v46  ;;  %v250_v56 = vmul.f32 %v473_v52, %v699_v10  ;;  %v192_v57 = vpop.f32.mrb[7].mxu0  ;;  %v224_v58 = vpop.f32.mrb[7].mxu1 }
 0x10e   :  { %508 = vpow2.f32 %v447_v41  ;;  %v755_v59 = vadd.f32 %v701_v12, %v247_v50  ;;  %v758_v60 = vadd.f32 %v701_v12, %v255_v51  ;;  %v258_v14 = vmul.f32 %v481_v53, %v699_v10 }
 0x10f   :  { %510 = vpow2.f32 %v437_v44  ;;  %v442_v61 = vmul.f32 -1.442695, %v748_v54  ;;  %v450_v62 = vmul.f32 -1.442695, %v751_v55  ;;  %v763_v63 = vadd.f32 %v701_v12, %v250_v56 }
 0x110   :  { %512 = vpow2.f32 %v445_v49  ;;  %v440_v0 = vmul.f32 -1.442695, %v755_v59  ;;  %v448_v1 = vmul.f32 -1.442695, %v758_v60  ;;  %v248_v17 = vmul.f32 %v699_v10, %v192_v57 }
 0x111   :  { %514 = vpow2.f32 %v442_v61  ;;  %v443_v2 = vmul.f32 -1.442695, %v763_v63  ;;  %v256_v20 = vmul.f32 %v699_v10, %v224_v58  ;;  %v772_v27 = vadd.f32 %v701_v12, %v258_v14 }
 0x112   :  { %516 = vpow2.f32 %v450_v62  ;;  %v775_v32 = vadd.f32 %v701_v12, %v248_v17 }
 0x113   :  { %v499_v3 = vpop.eup %498  ;;  %518 = vpow2.f32 %v440_v0  ;;  %v778_v10 = vadd.f32 %v701_v12, %v256_v20  ;;  %v451_v43 = vmul.f32 -1.442695, %v772_v27 }
 0x114   :  { %v501_v4 = vpop.eup %500  ;;  %v332_v5 = vadd.f32 1.0, %v499_v3  ;;  %520 = vpow2.f32 %v448_v1  ;;  %v441_v46 = vmul.f32 -1.442695, %v775_v32 }
 0x115   :  { %v503_v6 = vpop.eup %502  ;;  %v340_v7 = vadd.f32 1.0, %v501_v4  ;;  %522 = vpow2.f32 %v443_v2  ;;  %v449_v12 = vmul.f32 -1.442695, %v778_v10 }
 0x116   :  { %v505_v8 = vpop.eup %504  ;;  %524 = vrcp.f32 %v332_v5  ;;  %v330_v9 = vadd.f32 1.0, %v503_v6 }
 0x117   :  { %v507_v11 = vpop.eup %506  ;;  %526 = vrcp.f32 %v340_v7  ;;  %v338_v13 = vadd.f32 1.0, %v505_v8 }
 0x118   :  { %v509_v15 = vpop.eup %508  ;;  %528 = vrcp.f32 %v330_v9  ;;  %v333_v16 = vadd.f32 1.0, %v507_v11 }
 0x119   :  { %v511_v18 = vpop.eup %510  ;;  %530 = vrcp.f32 %v338_v13  ;;  %v341_v19 = vadd.f32 1.0, %v509_v15 }
 0x11a   :  { %v513_v21 = vpop.eup %512  ;;  %532 = vrcp.f32 %v333_v16  ;;  %v331_v24 = vadd.f32 1.0, %v511_v18 }
 0x11b   :  { %v515_v25 = vpop.eup %514  ;;  %534 = vrcp.f32 %v341_v19  ;;  %v339_v26 = vadd.f32 1.0, %v513_v21 }
 0x11c   :  { %v517_v30 = vpop.eup %516  ;;  %536 = vrcp.f32 %v331_v24  ;;  %v336_v31 = vadd.f32 1.0, %v515_v25 }
 0x11d   :  { %v519_v33 = vpop.eup %518  ;;  %538 = vrcp.f32 %v339_v26  ;;  %v344_v36 = vadd.f32 1.0, %v517_v30 }
 0x11e   :  { %v521_v37 = vpop.eup %520  ;;  %540 = vrcp.f32 %v336_v31  ;;  %v334_v40 = vadd.f32 1.0, %v519_v33 }
 0x11f   :  { %v523_v41 = vpop.eup %522  ;;  %542 = vrcp.f32 %v344_v36  ;;  %v342_v42 = vadd.f32 1.0, %v521_v37 }
 0x120   :  { %v525_v44 = vpop.eup %524  ;;  %544 = vrcp.f32 %v334_v40  ;;  %v337_v45 = vadd.f32 1.0, %v523_v41 }
 0x121   :  { %v527_v47 = vpop.eup %526  ;;  %v380_v48 = vmul.f32 %v525_v44, %v708_v22  ;;  %546 = vrcp.f32 %v342_v42 }
 0x122   :  { %v529_v49 = vpop.eup %528  ;;  %v388_v50 = vmul.f32 %v527_v47, %v711_v23  ;;  %548 = vrcp.f32 %v337_v45 }
 0x123   :  { %v531_v51 = vpop.eup %530  ;;  %396 = vst [vmem:[%s851_s4 + $0x10] sm:$0xff] %v380_v48  ;;  %v378_v52 = vmul.f32 %v529_v49, %v716_v28  ;;  %550 = vpow2.f32 %v451_v43 }
 0x124   :  { %v533_v53 = vpop.eup %532  ;;  %404 = vst [vmem:[%s851_s4 + $0x50] sm:$0xff] %v388_v50  ;;  %v386_v22 = vmul.f32 %v531_v51, %v719_v29  ;;  %552 = vpow2.f32 %v441_v46 }
 0x125   :  { %v535_v56 = vpop.eup %534  ;;  %394 = vst [vmem:[%s851_s4] sm:$0xff] %v378_v52  ;;  %v381_v23 = vmul.f32 %v533_v53, %v726_v34  ;;  %554 = vpow2.f32 %v449_v12 }
 0x126   :  { %v537_v57 = vpop.eup %536  ;;  %402 = vst [vmem:[%s851_s4 + $0x40] sm:$0xff] %v386_v22  ;;  %v389_v28 = vmul.f32 %v535_v56, %v729_v35 }
 0x127   :  { %v539_v58 = vpop.eup %538  ;;  %397 = vst [vmem:[%s851_s4 + $0x18] sm:$0xff] %v381_v23  ;;  %v379_v29 = vmul.f32 %v537_v57, %v734_v38 }
 0x128   :  { %v541_v61 = vpop.eup %540  ;;  %405 = vst [vmem:[%s851_s4 + $0x58] sm:$0xff] %v389_v28  ;;  %v387_v34 = vmul.f32 %v539_v58, %v737_v39 }
 0x129   :  { %v543_v62 = vpop.eup %542  ;;  %395 = vst [vmem:[%s851_s4 + $0x8] sm:$0xff] %v379_v29  ;;  %v384_v35 = vmul.f32 %v541_v61, %v748_v54 }
 0x12a   :  { %v545_v0 = vpop.eup %544  ;;  %403 = vst [vmem:[%s851_s4 + $0x48] sm:$0xff] %v387_v34  ;;  %v392_v38 = vmul.f32 %v543_v62, %v751_v55 }
 0x12b   :  { %v547_v1 = vpop.eup %546  ;;  %400 = vst [vmem:[%s851_s4 + $0x30] sm:$0xff] %v384_v35  ;;  %v382_v39 = vmul.f32 %v545_v0, %v755_v59 }
 0x12c   :  { %v549_v2 = vpop.eup %548  ;;  %408 = vst [vmem:[%s851_s4 + $0x70] sm:$0xff] %v392_v38  ;;  %v390_v54 = vmul.f32 %v547_v1, %v758_v60 }
 0x12d   :  { %v551_v3 = vpop.eup %550  ;;  %398 = vst [vmem:[%s851_s4 + $0x20] sm:$0xff] %v382_v39  ;;  %v385_v55 = vmul.f32 %v549_v2, %v763_v63 }
 0x12e   :  { %v553_v4 = vpop.eup %552  ;;  %406 = vst [vmem:[%s851_s4 + $0x60] sm:$0xff] %v390_v54  ;;  %v345_v59 = vadd.f32 1.0, %v551_v3 }
 0x12f   :  { %v555_v5 = vpop.eup %554  ;;  %401 = vst [vmem:[%s851_s4 + $0x38] sm:$0xff] %v385_v55  ;;  %v335_v6 = vadd.f32 1.0, %v553_v4 }
 0x130   :  { %556 = vrcp.f32 %v345_v59  ;;  %v343_v60 = vadd.f32 1.0, %v555_v5 }
 0x131   :  { %558 = vrcp.f32 %v335_v6 }
 0x132   :  { %560 = vrcp.f32 %v343_v60 }
 0x13a   :  { %v557_v7 = vpop.eup %556 }
 0x13b   :  { %v559_v8 = vpop.eup %558  ;;  %v393_v63 = vmul.f32 %v557_v7, %v772_v27 }
 0x13c   :  { %v561_v9 = vpop.eup %560  ;;  %v383_v11 = vmul.f32 %v559_v8, %v775_v32 }
 0x13d   :  { %409 = vst [vmem:[%s851_s4 + $0x78] sm:$0xff] %v393_v63  ;;  %v391_v13 = vmul.f32 %v561_v9, %v778_v10 }
 0x13e   :  { %399 = vst [vmem:[%s851_s4 + $0x28] sm:$0xff] %v383_v11 }
 0x13f   :  { %407 = vst [vmem:[%s851_s4 + $0x68] sm:$0xff] %v391_v13 }
 0x140   :  { %414 = vsyncpa [#allocation3], 1 }
 0x141   :  { %415 = vsyncpa [#allocation5], 1 }

// kernel: _lambda_.36
= control target key start
LH: loop header
LB: loop body
LE: loop exit
PB: predicated region body
PF: predicated region fallthrough
CT: control target
= control target key end

     0   :  { %9 = vsyncpa [#allocation3], 0  ;;  %s829_s0 = inlined_call_operand.vmem [shape: bf16[128,16], index: 0, kind: input, shape index: {}]   ;;  %s830_s1 = inlined_call_operand.vmem [shape: bf16[16,128], index: 1, kind: input, shape index: {}]   ;;  %s831_s2 = inlined_call_operand.hbm [shape: f32[1,128], index: 2, kind: input, shape index: {}]   ;;  %s832_s3 = inlined_call_operand.hbm [shape: f32[1,128], index: 3, kind: input, shape index: {}]   ;;  %s833_s4 = inlined_call_operand.vmem [shape: f32[128,128], index: 4, kind: output, shape index: {}]  }
   0x1   :  { %10 = vsyncpa [#allocation5], 0  ;;  %s595_s15 = smov [#allocation2]   ;;  %s596_s17 = smov [#allocation4]  }
   0x2   :  { %s21_s16 = sshll.u32 %s595_s15, 4  ;;  %s31_s18 = sshll.u32 %s596_s17, 4  ;;  %s22_s16 = int_to_ptr.vmem [resolvable:$true] %s21_s16  ;;  %s32_s18 = int_to_ptr.vmem [resolvable:$true] %s31_s18 }
   0x3   :  { %s547_s21 = scalar_lea.hbm %s831_s2, 16 }
   0x4   :  { %p548_p0 = scmp.ne.s32.totalorder %s831_s2, %s547_s21  ;;  %p551_p1 = scmp.lt.u32.totalorder %s547_s21, %s831_s2 }
   0x6   :  { %p553_p2 = pnand %p551_p1, %p548_p0 }
   0x8   :  { %556 = shalt.err (!%p553_p2)
}
   0x9   :  { %s557_s26 = scalar_lea.vmem %s22_s16, 16  ;;  %s561_s27 = scalar_lea.vmem %s22_s16, 32 }
   0xa   :  { %p558_p3 = scmp.ne.s32.totalorder %s22_s16, %s557_s26  ;;  %p562_p4 = scmp.lt.s32.totalorder %s22_s16, %s22_s16 }
   0xb   :  { %p563_p5 = scmp.lt.s32.totalorder %s561_s27, %s557_s26 }
   0xd   :  { %p564_p6 = por %p563_p5, %p562_p4 }
   0xf   :  { %p565_p7 = pnand %p564_p6, %p558_p3 }
  0x11   :  { %568 = shalt.err (!%p565_p7)
}
  0x12   :  { %24 = dma.hbm_to_vmem [thread:$0]  %s831_s2, 16, %s22_s16, [#allocation3]  }
  0x13   :  { %s569_s6 = scalar_lea.hbm %s832_s3, 16 }
  0x14   :  { %p570_p8 = scmp.ne.s32.totalorder %s832_s3, %s569_s6  ;;  %p573_p9 = scmp.lt.u32.totalorder %s569_s6, %s832_s3 }
  0x16   :  { %p575_p10 = pnand %p573_p9, %p570_p8 }
  0x18   :  { %578 = shalt.err (!%p575_p10)
}
  0x19   :  { %s579_s11 = scalar_lea.vmem %s32_s18, 16  ;;  %s583_s12 = scalar_lea.vmem %s32_s18, 32 }
  0x1a   :  { %p580_p11 = scmp.ne.s32.totalorder %s32_s18, %s579_s11  ;;  %p584_p12 = scmp.lt.s32.totalorder %s32_s18, %s32_s18 }
  0x1b   :  { %p585_p13 = scmp.lt.s32.totalorder %s583_s12, %s579_s11 }
  0x1d   :  { %p586_p0 = por %p585_p13, %p584_p12 }
  0x1f   :  { %p587_p1 = pnand %p586_p0, %p580_p11 }
  0x21   :  { %590 = shalt.err (!%p587_p1)
}
  0x22   :  { %34 = dma.hbm_to_vmem [thread:$0]  %s832_s3, 16, %s32_s18, [#allocation5]  }
  0x23   :  { %591 = dma.done.wait [#allocation3], 16  }
  0x24   :  { %592 = vsyncadd [#allocation3], 4294967280 }
  0x25   :  { %593 = dma.done.wait [#allocation5], 16  }
  0x26   :  { %594 = vsyncadd [#allocation5], 4294967280  ;;  %v474_v0 = vld [vmem:[%s830_s1] sm:$0xff]   ;;  %vm106_vm0 = vcmask 130048   ;;  %v477_v3 = vld [vmem:[%s829_s0 + $0x8] sm:$0xff]  }
  0x27   :  { %v475_v1 = vld [vmem:[%s829_s0] sm:$0xff]   ;;  %452 = vmatprep.subr.bf16.mxu0 %v474_v0  ;;  %470 = vmatprep.subr.bf16.mxu1 %v474_v0  ;;  %v478_v4 = vld [vmem:[%s829_s0 + $0x28] sm:$0xff]   ;;  %v479_v5 = vld [vmem:[%s829_s0 + $0x10] sm:$0xff]  }
  0x28   :  { %v476_v2 = vld [vmem:[%s829_s0 + $0x20] sm:$0xff]   ;;  %453 = vmatpush3.bf16.msra.mxu0 %v474_v0  ;;  %471 = vmatpush3.bf16.msra.mxu1 %v474_v0  ;;  %v480_v6 = vld [vmem:[%s829_s0 + $0x30] sm:$0xff]   ;;  %v481_v7 = vld [vmem:[%s829_s0 + $0x18] sm:$0xff]  }
  0x29   :  { %454 = vmatprep.mubr.msk.bf16.mxu0 %vm106_vm0, %v475_v1  ;;  %462 = vmatprep.mubr.msk.bf16.mxu1 %vm106_vm0, %v476_v2  ;;  %v482_v8 = vld [vmem:[%s829_s0 + $0x38] sm:$0xff]   ;;  %v681_v9 = vld [vmem:[#allocation2] ss:$0 sm:$0xff]  ;;  %v683_v11 = vld [vmem:[#allocation4] ss:$0 sm:$0xff] }
  0x2b   :  { %455 = vmatmul.mubr.msk.bf16.vlgmr.msra.gmra.mrb[0].mxu0 %vm106_vm0, %v477_v3  ;;  %463 = vmatmul.mubr.msk.bf16.vlgmr.msra.gmra.mrb[0].mxu1 %vm106_vm0, %v478_v4 }
  0x2c   :  { %458 = vmatprep.mubr.msk.bf16.mxu0 %vm106_vm0, %v479_v5  ;;  %466 = vmatprep.mubr.msk.bf16.mxu1 %vm106_vm0, %v480_v6 }
  0x33   :  { %459 = vmatmul.mubr.msk.bf16.gmra.mrb[4].mxu0 %vm106_vm0, %v481_v7  ;;  %467 = vmatmul.mubr.msk.bf16.gmra.mrb[4].mxu1 %vm106_vm0, %v482_v8 }
  0xfe   :  { %v456_v10 = vpop.f32.mrb[0].mxu0  ;;  %v464_v12 = vpop.f32.mrb[0].mxu1 }
  0xff   :  { %v237_v13 = vmul.f32 %v456_v10, %v681_v9  ;;  %v245_v14 = vmul.f32 %v464_v12, %v681_v9  ;;  %v165_v15 = vpop.f32.mrb[1].mxu0  ;;  %v197_v16 = vpop.f32.mrb[1].mxu1 }
 0x100   :  { %v235_v17 = vmul.f32 %v681_v9, %v165_v15  ;;  %v243_v18 = vmul.f32 %v681_v9, %v197_v16  ;;  %v457_v19 = vpop.f32.mrb[2].mxu0  ;;  %v465_v20 = vpop.f32.mrb[2].mxu1 }
 0x101   :  { %v690_v21 = vadd.f32 %v683_v11, %v237_v13  ;;  %v693_v22 = vadd.f32 %v683_v11, %v245_v14  ;;  %v238_v23 = vmul.f32 %v457_v19, %v681_v9  ;;  %v246_v24 = vmul.f32 %v465_v20, %v681_v9  ;;  %v168_v25 = vpop.f32.mrb[3].mxu0  ;;  %v200_v26 = vpop.f32.mrb[3].mxu1 }
 0x102   :  { %v698_v27 = vadd.f32 %v683_v11, %v235_v17  ;;  %v701_v28 = vadd.f32 %v683_v11, %v243_v18  ;;  %v236_v29 = vmul.f32 %v681_v9, %v168_v25  ;;  %v244_v30 = vmul.f32 %v681_v9, %v200_v26 }
 0x103   :  { %v429_v31 = vmul.f32 -1.442695, %v690_v21  ;;  %v437_v32 = vmul.f32 -1.442695, %v693_v22  ;;  %v708_v33 = vadd.f32 %v683_v11, %v238_v23  ;;  %v711_v34 = vadd.f32 %v683_v11, %v246_v24 }
 0x104   :  { %v427_v35 = vmul.f32 -1.442695, %v698_v27  ;;  %v435_v36 = vmul.f32 -1.442695, %v701_v28  ;;  %v716_v37 = vadd.f32 %v683_v11, %v236_v29  ;;  %v719_v38 = vadd.f32 %v683_v11, %v244_v30 }
 0x105   :  { %483 = vpow2.f32 %v429_v31  ;;  %v430_v39 = vmul.f32 -1.442695, %v708_v33  ;;  %v438_v40 = vmul.f32 -1.442695, %v711_v34 }
 0x106   :  { %485 = vpow2.f32 %v437_v32  ;;  %v460_v41 = vpop.f32.mrb[4].mxu0  ;;  %v468_v42 = vpop.f32.mrb[4].mxu1  ;;  %v428_v43 = vmul.f32 -1.442695, %v716_v37  ;;  %v436_v48 = vmul.f32 -1.442695, %v719_v38 }
 0x107   :  { %487 = vpow2.f32 %v427_v35  ;;  %v241_v44 = vmul.f32 %v460_v41, %v681_v9  ;;  %v249_v45 = vmul.f32 %v468_v42, %v681_v9  ;;  %v181_v46 = vpop.f32.mrb[5].mxu0  ;;  %v213_v47 = vpop.f32.mrb[5].mxu1 }
 0x108   :  { %489 = vpow2.f32 %v435_v36  ;;  %v239_v49 = vmul.f32 %v681_v9, %v181_v46  ;;  %v247_v50 = vmul.f32 %v681_v9, %v213_v47  ;;  %v461_v51 = vpop.f32.mrb[6].mxu0  ;;  %v469_v52 = vpop.f32.mrb[6].mxu1 }
 0x109   :  { %491 = vpow2.f32 %v430_v39  ;;  %v730_v53 = vadd.f32 %v683_v11, %v241_v44  ;;  %v733_v54 = vadd.f32 %v683_v11, %v249_v45  ;;  %v242_v55 = vmul.f32 %v461_v51, %v681_v9  ;;  %v184_v56 = vpop.f32.mrb[7].mxu0  ;;  %v216_v57 = vpop.f32.mrb[7].mxu1 }
 0x10a   :  { %493 = vpow2.f32 %v438_v40  ;;  %v737_v58 = vadd.f32 %v683_v11, %v239_v49  ;;  %v740_v59 = vadd.f32 %v683_v11, %v247_v50  ;;  %v250_v13 = vmul.f32 %v469_v52, %v681_v9 }
 0x10b   :  { %495 = vpow2.f32 %v428_v43  ;;  %v433_v60 = vmul.f32 -1.442695, %v730_v53  ;;  %v441_v61 = vmul.f32 -1.442695, %v733_v54  ;;  %v745_v62 = vadd.f32 %v683_v11, %v242_v55 }
 0x10c   :  { %497 = vpow2.f32 %v436_v48  ;;  %v431_v63 = vmul.f32 -1.442695, %v737_v58  ;;  %v439_v0 = vmul.f32 -1.442695, %v740_v59  ;;  %v240_v16 = vmul.f32 %v681_v9, %v184_v56 }
 0x10d   :  { %499 = vpow2.f32 %v433_v60  ;;  %v434_v1 = vmul.f32 -1.442695, %v745_v62  ;;  %v248_v19 = vmul.f32 %v681_v9, %v216_v57  ;;  %v754_v26 = vadd.f32 %v683_v11, %v250_v13 }
 0x10e   :  { %501 = vpow2.f32 %v441_v61  ;;  %v757_v31 = vadd.f32 %v683_v11, %v240_v16 }
 0x10f   :  { %v484_v2 = vpop.eup %483  ;;  %503 = vpow2.f32 %v431_v63  ;;  %v760_v9 = vadd.f32 %v683_v11, %v248_v19  ;;  %v442_v42 = vmul.f32 -1.442695, %v754_v26 }
 0x110   :  { %v486_v3 = vpop.eup %485  ;;  %v324_v4 = vadd.f32 1.0, %v484_v2  ;;  %505 = vpow2.f32 %v439_v0  ;;  %v432_v45 = vmul.f32 -1.442695, %v757_v31 }
 0x111   :  { %v488_v5 = vpop.eup %487  ;;  %v332_v6 = vadd.f32 1.0, %v486_v3  ;;  %507 = vpow2.f32 %v434_v1  ;;  %v440_v11 = vmul.f32 -1.442695, %v760_v9 }
 0x112   :  { %v490_v7 = vpop.eup %489  ;;  %509 = vrcp.f32 %v324_v4  ;;  %v322_v8 = vadd.f32 1.0, %v488_v5 }
 0x113   :  { %v492_v10 = vpop.eup %491  ;;  %511 = vrcp.f32 %v332_v6  ;;  %v330_v12 = vadd.f32 1.0, %v490_v7 }
 0x114   :  { %v494_v14 = vpop.eup %493  ;;  %513 = vrcp.f32 %v322_v8  ;;  %v325_v15 = vadd.f32 1.0, %v492_v10 }
 0x115   :  { %v496_v17 = vpop.eup %495  ;;  %515 = vrcp.f32 %v330_v12  ;;  %v333_v18 = vadd.f32 1.0, %v494_v14 }
 0x116   :  { %v498_v20 = vpop.eup %497  ;;  %517 = vrcp.f32 %v325_v15  ;;  %v323_v23 = vadd.f32 1.0, %v496_v17 }
 0x117   :  { %v500_v24 = vpop.eup %499  ;;  %519 = vrcp.f32 %v333_v18  ;;  %v331_v25 = vadd.f32 1.0, %v498_v20 }
 0x118   :  { %v502_v29 = vpop.eup %501  ;;  %521 = vrcp.f32 %v323_v23  ;;  %v328_v30 = vadd.f32 1.0, %v500_v24 }
 0x119   :  { %v504_v32 = vpop.eup %503  ;;  %523 = vrcp.f32 %v331_v25  ;;  %v336_v35 = vadd.f32 1.0, %v502_v29 }
 0x11a   :  { %v506_v36 = vpop.eup %505  ;;  %525 = vrcp.f32 %v328_v30  ;;  %v326_v39 = vadd.f32 1.0, %v504_v32 }
 0x11b   :  { %v508_v40 = vpop.eup %507  ;;  %527 = vrcp.f32 %v336_v35  ;;  %v334_v41 = vadd.f32 1.0, %v506_v36 }
 0x11c   :  { %v510_v43 = vpop.eup %509  ;;  %529 = vrcp.f32 %v326_v39  ;;  %v329_v44 = vadd.f32 1.0, %v508_v40 }
 0x11d   :  { %v512_v46 = vpop.eup %511  ;;  %v372_v47 = vmul.f32 %v510_v43, %v690_v21  ;;  %531 = vrcp.f32 %v334_v41 }
 0x11e   :  { %v514_v48 = vpop.eup %513  ;;  %v380_v49 = vmul.f32 %v512_v46, %v693_v22  ;;  %533 = vrcp.f32 %v329_v44 }
 0x11f   :  { %v516_v50 = vpop.eup %515  ;;  %388 = vst [vmem:[%s833_s4 + $0x10] sm:$0xff] %v372_v47  ;;  %v370_v51 = vmul.f32 %v514_v48, %v698_v27  ;;  %535 = vpow2.f32 %v442_v42 }
 0x120   :  { %v518_v52 = vpop.eup %517  ;;  %396 = vst [vmem:[%s833_s4 + $0x50] sm:$0xff] %v380_v49  ;;  %v378_v21 = vmul.f32 %v516_v50, %v701_v28  ;;  %537 = vpow2.f32 %v432_v45 }
 0x121   :  { %v520_v55 = vpop.eup %519  ;;  %386 = vst [vmem:[%s833_s4] sm:$0xff] %v370_v51  ;;  %v373_v22 = vmul.f32 %v518_v52, %v708_v33  ;;  %539 = vpow2.f32 %v440_v11 }
 0x122   :  { %v522_v56 = vpop.eup %521  ;;  %394 = vst [vmem:[%s833_s4 + $0x40] sm:$0xff] %v378_v21  ;;  %v381_v27 = vmul.f32 %v520_v55, %v711_v34 }
 0x123   :  { %v524_v57 = vpop.eup %523  ;;  %389 = vst [vmem:[%s833_s4 + $0x18] sm:$0xff] %v373_v22  ;;  %v371_v28 = vmul.f32 %v522_v56, %v716_v37 }
 0x124   :  { %v526_v60 = vpop.eup %525  ;;  %397 = vst [vmem:[%s833_s4 + $0x58] sm:$0xff] %v381_v27  ;;  %v379_v33 = vmul.f32 %v524_v57, %v719_v38 }
 0x125   :  { %v528_v61 = vpop.eup %527  ;;  %387 = vst [vmem:[%s833_s4 + $0x8] sm:$0xff] %v371_v28  ;;  %v376_v34 = vmul.f32 %v526_v60, %v730_v53 }
 0x126   :  { %v530_v63 = vpop.eup %529  ;;  %395 = vst [vmem:[%s833_s4 + $0x48] sm:$0xff] %v379_v33  ;;  %v384_v37 = vmul.f32 %v528_v61, %v733_v54 }
 0x127   :  { %v532_v0 = vpop.eup %531  ;;  %392 = vst [vmem:[%s833_s4 + $0x30] sm:$0xff] %v376_v34  ;;  %v374_v38 = vmul.f32 %v530_v63, %v737_v58 }
 0x128   :  { %v534_v1 = vpop.eup %533  ;;  %400 = vst [vmem:[%s833_s4 + $0x70] sm:$0xff] %v384_v37  ;;  %v382_v53 = vmul.f32 %v532_v0, %v740_v59 }
 0x129   :  { %v536_v2 = vpop.eup %535  ;;  %390 = vst [vmem:[%s833_s4 + $0x20] sm:$0xff] %v374_v38  ;;  %v377_v54 = vmul.f32 %v534_v1, %v745_v62 }
 0x12a   :  { %v538_v3 = vpop.eup %537  ;;  %398 = vst [vmem:[%s833_s4 + $0x60] sm:$0xff] %v382_v53  ;;  %v337_v58 = vadd.f32 1.0, %v536_v2 }
 0x12b   :  { %v540_v4 = vpop.eup %539  ;;  %393 = vst [vmem:[%s833_s4 + $0x38] sm:$0xff] %v377_v54  ;;  %v327_v5 = vadd.f32 1.0, %v538_v3 }
 0x12c   :  { %541 = vrcp.f32 %v337_v58  ;;  %v335_v59 = vadd.f32 1.0, %v540_v4 }
 0x12d   :  { %543 = vrcp.f32 %v327_v5 }
 0x12e   :  { %545 = vrcp.f32 %v335_v59 }
 0x136   :  { %v542_v6 = vpop.eup %541 }
 0x137   :  { %v544_v7 = vpop.eup %543  ;;  %v385_v62 = vmul.f32 %v542_v6, %v754_v26 }
 0x138   :  { %v546_v8 = vpop.eup %545  ;;  %v375_v10 = vmul.f32 %v544_v7, %v757_v31 }
 0x139   :  { %401 = vst [vmem:[%s833_s4 + $0x78] sm:$0xff] %v385_v62  ;;  %v383_v12 = vmul.f32 %v546_v8, %v760_v9 }
 0x13a   :  { %391 = vst [vmem:[%s833_s4 + $0x28] sm:$0xff] %v375_v10 }
 0x13b   :  { %399 = vst [vmem:[%s833_s4 + $0x68] sm:$0xff] %v383_v12 }
 0x13c   :  { %406 = vsyncpa [#allocation3], 1 }
 0x13d   :  { %407 = vsyncpa [#allocation5], 1 }

// kernel: _lambda_.39
= control target key start
LH: loop header
LB: loop body
LE: loop exit
PB: predicated region body
PF: predicated region fallthrough
CT: control target
= control target key end

     0   :  { %vm90_vm0 = vcmask 261120   ;;  %s751_s1 = inlined_call_operand.vmem [shape: bf16[32,128], index: 1, kind: input, shape index: {}]   ;;  %s752_s0 = inlined_call_operand.vmem [shape: bf16[128,32], index: 0, kind: input, shape index: {}]   ;;  %s753_s2 = inlined_call_operand.vmem [shape: f32[1,128], index: 2, kind: input, shape index: {}]   ;;  %s754_s3 = inlined_call_operand.vmem [shape: f32[1,128], index: 3, kind: input, shape index: {}]   ;;  %s755_s4 = inlined_call_operand.vmem [shape: f32[128,128], index: 4, kind: output, shape index: {}]  }
   0x1   :  { %v460_v0 = vld [vmem:[%s751_s1] sm:$0xff]   ;;  %v461_v1 = vld [vmem:[%s751_s1 + $0x8] sm:$0xff]   ;;  %v466_v6 = vld [vmem:[%s752_s0 + $0x10] sm:$0xff]  }
   0x2   :  { %436 = vmatprep.subr.bf16.mxu0 %v460_v0  ;;  %456 = vmatprep.subr.bf16.mxu1 %v460_v0  ;;  %v462_v2 = vld [vmem:[%s752_s0] sm:$0xff]   ;;  %v464_v4 = vld [vmem:[%s752_s0 + $0x8] sm:$0xff]   ;;  %v467_v7 = vld [vmem:[%s752_s0 + $0x30] sm:$0xff]  }
   0x3   :  { %437 = vmatpush3.bf16.msra.mxu0 %v460_v0  ;;  %458 = vmatpush3.bf16.msra.mxu1 %v460_v0  ;;  %v463_v3 = vld [vmem:[%s752_s0 + $0x20] sm:$0xff]   ;;  %v465_v5 = vld [vmem:[%s752_s0 + $0x28] sm:$0xff]   ;;  %v468_v8 = vld [vmem:[%s752_s0 + $0x18] sm:$0xff]  }
   0x4   :  { %438 = vmatprep.subr.bf16.mxu0 %v461_v1  ;;  %457 = vmatprep.subr.bf16.mxu1 %v461_v1  ;;  %v469_v9 = vld [vmem:[%s752_s0 + $0x38] sm:$0xff]   ;;  %v600_v10 = vld [vmem:[%s753_s2] ss:$0 sm:$0xff] }
   0x5   :  { %440 = vmatprep.mubr.msk.bf16.mxu0 %vm90_vm0, %v462_v2  ;;  %448 = vmatprep.mubr.msk.bf16.mxu1 %vm90_vm0, %v463_v3  ;;  %v605_v12 = vld [vmem:[%s754_s3] ss:$0 sm:$0xff] }
   0x7   :  { %439 = vmatpush3.bf16.msra.mxu0 %v461_v1  ;;  %459 = vmatpush3.bf16.msra.mxu1 %v461_v1 }
   0xa   :  { %441 = vmatmul.mubr.msk.bf16.vlgmr.msra.gmra.mrb[0].mxu0 %vm90_vm0, %v464_v4  ;;  %449 = vmatmul.mubr.msk.bf16.vlgmr.msra.gmra.mrb[0].mxu1 %vm90_vm0, %v465_v5 }
   0xb   :  { %444 = vmatprep.mubr.msk.bf16.mxu0 %vm90_vm0, %v466_v6  ;;  %452 = vmatprep.mubr.msk.bf16.mxu1 %vm90_vm0, %v467_v7 }
  0x12   :  { %445 = vmatmul.mubr.msk.bf16.gmra.mrb[4].mxu0 %vm90_vm0, %v468_v8  ;;  %453 = vmatmul.mubr.msk.bf16.gmra.mrb[4].mxu1 %vm90_vm0, %v469_v9 }
  0xdd   :  { %v442_v11 = vpop.f32.mrb[0].mxu0  ;;  %v450_v13 = vpop.f32.mrb[0].mxu1 }
  0xde   :  { %v221_v14 = vmul.f32 %v442_v11, %v600_v10  ;;  %v229_v15 = vmul.f32 %v450_v13, %v600_v10  ;;  %v149_v16 = vpop.f32.mrb[1].mxu0  ;;  %v181_v17 = vpop.f32.mrb[1].mxu1 }
  0xdf   :  { %v219_v18 = vmul.f32 %v600_v10, %v149_v16  ;;  %v227_v19 = vmul.f32 %v600_v10, %v181_v17  ;;  %v443_v20 = vpop.f32.mrb[2].mxu0  ;;  %v451_v21 = vpop.f32.mrb[2].mxu1 }
  0xe0   :  { %v612_v22 = vadd.f32 %v605_v12, %v221_v14  ;;  %v615_v23 = vadd.f32 %v605_v12, %v229_v15  ;;  %v222_v24 = vmul.f32 %v443_v20, %v600_v10  ;;  %v230_v25 = vmul.f32 %v451_v21, %v600_v10  ;;  %v152_v26 = vpop.f32.mrb[3].mxu0  ;;  %v184_v27 = vpop.f32.mrb[3].mxu1 }
  0xe1   :  { %v620_v28 = vadd.f32 %v605_v12, %v219_v18  ;;  %v623_v29 = vadd.f32 %v605_v12, %v227_v19  ;;  %v220_v30 = vmul.f32 %v600_v10, %v152_v26  ;;  %v228_v31 = vmul.f32 %v600_v10, %v184_v27 }
  0xe2   :  { %v412_v32 = vmul.f32 -1.442695, %v612_v22  ;;  %v420_v33 = vmul.f32 -1.442695, %v615_v23  ;;  %v630_v34 = vadd.f32 %v605_v12, %v222_v24  ;;  %v633_v35 = vadd.f32 %v605_v12, %v230_v25 }
  0xe3   :  { %v410_v36 = vmul.f32 -1.442695, %v620_v28  ;;  %v418_v37 = vmul.f32 -1.442695, %v623_v29  ;;  %v638_v38 = vadd.f32 %v605_v12, %v220_v30  ;;  %v641_v39 = vadd.f32 %v605_v12, %v228_v31 }
  0xe4   :  { %470 = vpow2.f32 %v412_v32  ;;  %v413_v40 = vmul.f32 -1.442695, %v630_v34  ;;  %v421_v41 = vmul.f32 -1.442695, %v633_v35 }
  0xe5   :  { %472 = vpow2.f32 %v420_v33  ;;  %v446_v42 = vpop.f32.mrb[4].mxu0  ;;  %v454_v43 = vpop.f32.mrb[4].mxu1  ;;  %v411_v44 = vmul.f32 -1.442695, %v638_v38  ;;  %v419_v49 = vmul.f32 -1.442695, %v641_v39 }
  0xe6   :  { %474 = vpow2.f32 %v410_v36  ;;  %v225_v45 = vmul.f32 %v446_v42, %v600_v10  ;;  %v233_v46 = vmul.f32 %v454_v43, %v600_v10  ;;  %v165_v47 = vpop.f32.mrb[5].mxu0  ;;  %v197_v48 = vpop.f32.mrb[5].mxu1 }
  0xe7   :  { %476 = vpow2.f32 %v418_v37  ;;  %v223_v50 = vmul.f32 %v600_v10, %v165_v47  ;;  %v231_v51 = vmul.f32 %v600_v10, %v197_v48  ;;  %v447_v52 = vpop.f32.mrb[6].mxu0  ;;  %v455_v53 = vpop.f32.mrb[6].mxu1 }
  0xe8   :  { %478 = vpow2.f32 %v413_v40  ;;  %v652_v54 = vadd.f32 %v605_v12, %v225_v45  ;;  %v655_v55 = vadd.f32 %v605_v12, %v233_v46  ;;  %v226_v56 = vmul.f32 %v447_v52, %v600_v10  ;;  %v168_v57 = vpop.f32.mrb[7].mxu0  ;;  %v200_v58 = vpop.f32.mrb[7].mxu1 }
  0xe9   :  { %480 = vpow2.f32 %v421_v41  ;;  %v659_v59 = vadd.f32 %v605_v12, %v223_v50  ;;  %v662_v60 = vadd.f32 %v605_v12, %v231_v51  ;;  %v234_v14 = vmul.f32 %v455_v53, %v600_v10 }
  0xea   :  { %482 = vpow2.f32 %v411_v44  ;;  %v416_v61 = vmul.f32 -1.442695, %v652_v54  ;;  %v424_v62 = vmul.f32 -1.442695, %v655_v55  ;;  %v667_v63 = vadd.f32 %v605_v12, %v226_v56 }
  0xeb   :  { %484 = vpow2.f32 %v419_v49  ;;  %v414_v0 = vmul.f32 -1.442695, %v659_v59  ;;  %v422_v1 = vmul.f32 -1.442695, %v662_v60  ;;  %v224_v17 = vmul.f32 %v600_v10, %v168_v57 }
  0xec   :  { %486 = vpow2.f32 %v416_v61  ;;  %v417_v2 = vmul.f32 -1.442695, %v667_v63  ;;  %v232_v20 = vmul.f32 %v600_v10, %v200_v58  ;;  %v676_v27 = vadd.f32 %v605_v12, %v234_v14 }
  0xed   :  { %488 = vpow2.f32 %v424_v62  ;;  %v679_v32 = vadd.f32 %v605_v12, %v224_v17 }
  0xee   :  { %v471_v3 = vpop.eup %470  ;;  %490 = vpow2.f32 %v414_v0  ;;  %v682_v10 = vadd.f32 %v605_v12, %v232_v20  ;;  %v425_v43 = vmul.f32 -1.442695, %v676_v27 }
  0xef   :  { %v473_v4 = vpop.eup %472  ;;  %v308_v5 = vadd.f32 1.0, %v471_v3  ;;  %492 = vpow2.f32 %v422_v1  ;;  %v415_v46 = vmul.f32 -1.442695, %v679_v32 }
  0xf0   :  { %v475_v6 = vpop.eup %474  ;;  %v316_v7 = vadd.f32 1.0, %v473_v4  ;;  %494 = vpow2.f32 %v417_v2  ;;  %v423_v12 = vmul.f32 -1.442695, %v682_v10 }
  0xf1   :  { %v477_v8 = vpop.eup %476  ;;  %496 = vrcp.f32 %v308_v5  ;;  %v306_v9 = vadd.f32 1.0, %v475_v6 }
  0xf2   :  { %v479_v11 = vpop.eup %478  ;;  %498 = vrcp.f32 %v316_v7  ;;  %v314_v13 = vadd.f32 1.0, %v477_v8 }
  0xf3   :  { %v481_v15 = vpop.eup %480  ;;  %500 = vrcp.f32 %v306_v9  ;;  %v309_v16 = vadd.f32 1.0, %v479_v11 }
  0xf4   :  { %v483_v18 = vpop.eup %482  ;;  %502 = vrcp.f32 %v314_v13  ;;  %v317_v19 = vadd.f32 1.0, %v481_v15 }
  0xf5   :  { %v485_v21 = vpop.eup %484  ;;  %504 = vrcp.f32 %v309_v16  ;;  %v307_v24 = vadd.f32 1.0, %v483_v18 }
  0xf6   :  { %v487_v25 = vpop.eup %486  ;;  %506 = vrcp.f32 %v317_v19  ;;  %v315_v26 = vadd.f32 1.0, %v485_v21 }
  0xf7   :  { %v489_v30 = vpop.eup %488  ;;  %508 = vrcp.f32 %v307_v24  ;;  %v312_v31 = vadd.f32 1.0, %v487_v25 }
  0xf8   :  { %v491_v33 = vpop.eup %490  ;;  %510 = vrcp.f32 %v315_v26  ;;  %v320_v36 = vadd.f32 1.0, %v489_v30 }
  0xf9   :  { %v493_v37 = vpop.eup %492  ;;  %512 = vrcp.f32 %v312_v31  ;;  %v310_v40 = vadd.f32 1.0, %v491_v33 }
  0xfa   :  { %v495_v41 = vpop.eup %494  ;;  %514 = vrcp.f32 %v320_v36  ;;  %v318_v42 = vadd.f32 1.0, %v493_v37 }
  0xfb   :  { %v497_v44 = vpop.eup %496  ;;  %516 = vrcp.f32 %v310_v40  ;;  %v313_v45 = vadd.f32 1.0, %v495_v41 }
  0xfc   :  { %v499_v47 = vpop.eup %498  ;;  %v356_v48 = vmul.f32 %v497_v44, %v612_v22  ;;  %518 = vrcp.f32 %v318_v42 }
  0xfd   :  { %v501_v49 = vpop.eup %500  ;;  %v364_v50 = vmul.f32 %v499_v47, %v615_v23  ;;  %520 = vrcp.f32 %v313_v45 }
  0xfe   :  { %v503_v51 = vpop.eup %502  ;;  %372 = vst [vmem:[%s755_s4 + $0x10] sm:$0xff] %v356_v48  ;;  %v354_v52 = vmul.f32 %v501_v49, %v620_v28  ;;  %522 = vpow2.f32 %v425_v43 }
  0xff   :  { %v505_v53 = vpop.eup %504  ;;  %380 = vst [vmem:[%s755_s4 + $0x50] sm:$0xff] %v364_v50  ;;  %v362_v22 = vmul.f32 %v503_v51, %v623_v29  ;;  %524 = vpow2.f32 %v415_v46 }
 0x100   :  { %v507_v56 = vpop.eup %506  ;;  %370 = vst [vmem:[%s755_s4] sm:$0xff] %v354_v52  ;;  %v357_v23 = vmul.f32 %v505_v53, %v630_v34  ;;  %526 = vpow2.f32 %v423_v12 }
 0x101   :  { %v509_v57 = vpop.eup %508  ;;  %378 = vst [vmem:[%s755_s4 + $0x40] sm:$0xff] %v362_v22  ;;  %v365_v28 = vmul.f32 %v507_v56, %v633_v35 }
 0x102   :  { %v511_v58 = vpop.eup %510  ;;  %373 = vst [vmem:[%s755_s4 + $0x18] sm:$0xff] %v357_v23  ;;  %v355_v29 = vmul.f32 %v509_v57, %v638_v38 }
 0x103   :  { %v513_v61 = vpop.eup %512  ;;  %381 = vst [vmem:[%s755_s4 + $0x58] sm:$0xff] %v365_v28  ;;  %v363_v34 = vmul.f32 %v511_v58, %v641_v39 }
 0x104   :  { %v515_v62 = vpop.eup %514  ;;  %371 = vst [vmem:[%s755_s4 + $0x8] sm:$0xff] %v355_v29  ;;  %v360_v35 = vmul.f32 %v513_v61, %v652_v54 }
 0x105   :  { %v517_v0 = vpop.eup %516  ;;  %379 = vst [vmem:[%s755_s4 + $0x48] sm:$0xff] %v363_v34  ;;  %v368_v38 = vmul.f32 %v515_v62, %v655_v55 }
 0x106   :  { %v519_v1 = vpop.eup %518  ;;  %376 = vst [vmem:[%s755_s4 + $0x30] sm:$0xff] %v360_v35  ;;  %v358_v39 = vmul.f32 %v517_v0, %v659_v59 }
 0x107   :  { %v521_v2 = vpop.eup %520  ;;  %384 = vst [vmem:[%s755_s4 + $0x70] sm:$0xff] %v368_v38  ;;  %v366_v54 = vmul.f32 %v519_v1, %v662_v60 }
 0x108   :  { %v523_v3 = vpop.eup %522  ;;  %374 = vst [vmem:[%s755_s4 + $0x20] sm:$0xff] %v358_v39  ;;  %v361_v55 = vmul.f32 %v521_v2, %v667_v63 }
 0x109   :  { %v525_v4 = vpop.eup %524  ;;  %382 = vst [vmem:[%s755_s4 + $0x60] sm:$0xff] %v366_v54  ;;  %v321_v59 = vadd.f32 1.0, %v523_v3 }
 0x10a   :  { %v527_v5 = vpop.eup %526  ;;  %377 = vst [vmem:[%s755_s4 + $0x38] sm:$0xff] %v361_v55  ;;  %v311_v6 = vadd.f32 1.0, %v525_v4 }
 0x10b   :  { %528 = vrcp.f32 %v321_v59  ;;  %v319_v60 = vadd.f32 1.0, %v527_v5 }
 0x10c   :  { %530 = vrcp.f32 %v311_v6 }
 0x10d   :  { %532 = vrcp.f32 %v319_v60 }
 0x115   :  { %v529_v7 = vpop.eup %528 }
 0x116   :  { %v531_v8 = vpop.eup %530  ;;  %v369_v63 = vmul.f32 %v529_v7, %v676_v27 }
 0x117   :  { %v533_v9 = vpop.eup %532  ;;  %v359_v11 = vmul.f32 %v531_v8, %v679_v32 }
 0x118   :  { %385 = vst [vmem:[%s755_s4 + $0x78] sm:$0xff] %v369_v63  ;;  %v367_v13 = vmul.f32 %v533_v9, %v682_v10 }
 0x119   :  { %375 = vst [vmem:[%s755_s4 + $0x28] sm:$0xff] %v359_v11 }
 0x11a   :  { %383 = vst [vmem:[%s755_s4 + $0x68] sm:$0xff] %v367_v13 }

// kernel: _lambda_.41
= control target key start
LH: loop header
LB: loop body
LE: loop exit
PB: predicated region body
PF: predicated region fallthrough
CT: control target
= control target key end

     0   :  { %vm64_vm0 = vcmask 523264   ;;  %s293_s1 = inlined_call_operand.vmem [shape: bf16[64,128], index: 1, kind: input, shape index: {}]   ;;  %s294_s0 = inlined_call_operand.vmem [shape: bf16[32,64], index: 0, kind: input, shape index: {}]   ;;  %s295_s2 = inlined_call_operand.vmem [shape: f32[1,128], index: 2, kind: input, shape index: {}]   ;;  %s296_s3 = inlined_call_operand.vmem [shape: f32[1,128], index: 3, kind: input, shape index: {}]   ;;  %s297_s4 = inlined_call_operand.vmem [shape: f32[32,128], index: 4, kind: output, shape index: {}]  }
   0x1   :  { %v210_v0 = vld [vmem:[%s293_s1] sm:$0xff]   ;;  %v211_v1 = vld [vmem:[%s293_s1 + $0x8] sm:$0xff]   ;;  %v212_v2 = vld [vmem:[%s293_s1 + $0x10] sm:$0xff]  }
   0x2   :  { %198 = vmatprep.subr.bf16.mxu0 %v210_v0  ;;  %v214_v3 = vld [vmem:[%s294_s0] sm:$0xff]   ;;  %v213_v4 = vld [vmem:[%s293_s1 + $0x18] sm:$0xff]   ;;  %v215_v5 = vld [vmem:[%s294_s0 + $0x8] sm:$0xff]  }
   0x3   :  { %199 = vmatpush3.bf16.msra.mxu0 %v210_v0  ;;  %206 = vmatprep.mubr.msk.bf16.mxu0 %vm64_vm0, %v214_v3  ;;  %v186_v6 = vld [vmem:[%s295_s2] ss:$0 sm:$0xff] }
   0x4   :  { %200 = vmatprep.subr.bf16.mxu0 %v211_v1  ;;  %v187_v8 = vld [vmem:[%s296_s3] ss:$0 sm:$0xff] }
   0x7   :  { %201 = vmatpush3.bf16.msra.mxu0 %v211_v1 }
   0x8   :  { %202 = vmatprep.subr.bf16.mxu0 %v212_v2 }
   0xb   :  { %203 = vmatpush3.bf16.msra.mxu0 %v212_v2 }
   0xc   :  { %204 = vmatprep.subr.bf16.mxu0 %v213_v4 }
   0xf   :  { %205 = vmatpush3.bf16.msra.mxu0 %v213_v4 }
  0x12   :  { %207 = vmatmul.mubr.msk.bf16.vlgmr.msra.gmra.mrb[0].mxu0 %vm64_vm0, %v215_v5 }
  0xe5   :  { %v208_v7 = vpop.f32.mrb[0].mxu0 }
  0xe6   :  { %v129_v9 = vmul.f32 %v208_v7, %v186_v6  ;;  %v105_v10 = vpop.f32.mrb[1].mxu0 }
  0xe7   :  { %v127_v11 = vmul.f32 %v186_v6, %v105_v10  ;;  %v209_v12 = vpop.f32.mrb[2].mxu0 }
  0xe8   :  { %v140_v13 = vadd.f32 %v187_v8, %v129_v9  ;;  %v130_v14 = vmul.f32 %v209_v12, %v186_v6  ;;  %v108_v15 = vpop.f32.mrb[3].mxu0 }
  0xe9   :  { %v138_v16 = vadd.f32 %v187_v8, %v127_v11  ;;  %v128_v17 = vmul.f32 %v186_v6, %v108_v15 }
  0xea   :  { %v190_v18 = vmul.f32 -1.442695, %v140_v13  ;;  %v141_v19 = vadd.f32 %v187_v8, %v130_v14 }
  0xeb   :  { %v188_v20 = vmul.f32 -1.442695, %v138_v16  ;;  %v139_v21 = vadd.f32 %v187_v8, %v128_v17 }
  0xec   :  { %216 = vpow2.f32 %v190_v18  ;;  %v191_v22 = vmul.f32 -1.442695, %v141_v19 }
  0xed   :  { %218 = vpow2.f32 %v188_v20  ;;  %v189_v23 = vmul.f32 -1.442695, %v139_v21 }
  0xee   :  { %220 = vpow2.f32 %v191_v22 }
  0xef   :  { %222 = vpow2.f32 %v189_v23 }
  0xf6   :  { %v217_v24 = vpop.eup %216 }
  0xf7   :  { %v219_v25 = vpop.eup %218  ;;  %v156_v26 = vadd.f32 1.0, %v217_v24 }
  0xf8   :  { %v221_v27 = vpop.eup %220  ;;  %v154_v28 = vadd.f32 1.0, %v219_v25 }
  0xf9   :  { %v223_v29 = vpop.eup %222  ;;  %224 = vrcp.f32 %v156_v26  ;;  %v157_v30 = vadd.f32 1.0, %v221_v27 }
  0xfa   :  { %226 = vrcp.f32 %v154_v28  ;;  %v155_v31 = vadd.f32 1.0, %v223_v29 }
  0xfb   :  { %228 = vrcp.f32 %v157_v30 }
  0xfc   :  { %230 = vrcp.f32 %v155_v31 }
 0x103   :  { %v225_v32 = vpop.eup %224 }
 0x104   :  { %v227_v33 = vpop.eup %226  ;;  %v168_v34 = vmul.f32 %v225_v32, %v140_v13 }
 0x105   :  { %v229_v35 = vpop.eup %228  ;;  %v166_v36 = vmul.f32 %v227_v33, %v138_v16 }
 0x106   :  { %v231_v37 = vpop.eup %230  ;;  %172 = vst [vmem:[%s297_s4 + $0x10] sm:$0xff] %v168_v34  ;;  %v169_v38 = vmul.f32 %v229_v35, %v141_v19 }
 0x107   :  { %170 = vst [vmem:[%s297_s4] sm:$0xff] %v166_v36  ;;  %v167_v39 = vmul.f32 %v231_v37, %v139_v21 }
 0x108   :  { %173 = vst [vmem:[%s297_s4 + $0x18] sm:$0xff] %v169_v38 }
 0x109   :  { %171 = vst [vmem:[%s297_s4 + $0x8] sm:$0xff] %v167_v39 }

// kernel: _lambda_.40
= control target key start
LH: loop header
LB: loop body
LE: loop exit
PB: predicated region body
PF: predicated region fallthrough
CT: control target
= control target key end

     0   :  { %vm200_vm0 = vcmask 261120   ;;  %s592_s1 = inlined_call_operand.vmem [shape: bf16[288,128], index: 1, kind: input, shape index: {}]   ;;  %s593_s0 = inlined_call_operand.vmem [shape: bf16[32,288], index: 0, kind: input, shape index: {}]   ;;  %s594_s2 = inlined_call_operand.vmem [shape: f32[1,128], index: 2, kind: input, shape index: {}]   ;;  %s595_s3 = inlined_call_operand.vmem [shape: f32[1,128], index: 3, kind: input, shape index: {}]   ;;  %s596_s4 = inlined_call_operand.vmem [shape: f32[32,128], index: 4, kind: output, shape index: {}]  }
   0x1   :  { %v435_v0 = vld [vmem:[%s592_s1 + $0x40] sm:$0xff]   ;;  %v437_v2 = vld [vmem:[%s592_s1 + $0x48] sm:$0xff]   ;;  %v439_v4 = vld [vmem:[%s592_s1 + $0x50] sm:$0xff]  }
   0x2   :  { %v436_v1 = vld [vmem:[%s592_s1] sm:$0xff]   ;;  %395 = vmatprep.subr.bf16.mxu0 %v435_v0  ;;  %v438_v3 = vld [vmem:[%s592_s1 + $0x8] sm:$0xff]   ;;  %v440_v5 = vld [vmem:[%s592_s1 + $0x10] sm:$0xff]  }
   0x3   :  { %396 = vmatpush3.bf16.msra.mxu0 %v436_v1  ;;  %v441_v6 = vld [vmem:[%s592_s1 + $0x58] sm:$0xff]   ;;  %v443_v8 = vld [vmem:[%s592_s1 + $0x60] sm:$0xff]   ;;  %v445_v11 = vld [vmem:[%s592_s1 + $0x68] sm:$0xff]  }
   0x4   :  { %397 = vmatprep.subr.bf16.mxu0 %v437_v2  ;;  %v442_v7 = vld [vmem:[%s592_s1 + $0x18] sm:$0xff]   ;;  %v449_v9 = vld [vmem:[%s592_s1 + $0x80] sm:$0xff]   ;;  %v446_v12 = vld [vmem:[%s592_s1 + $0x28] sm:$0xff]  }
   0x5   :  { %v444_v10 = vld [vmem:[%s592_s1 + $0x20] sm:$0xff]   ;;  %427 = vmatprep.subr.bf16.mxu1 %v449_v9  ;;  %v452_v13 = vld [vmem:[%s592_s1 + $0x88] sm:$0xff]   ;;  %v447_v14 = vld [vmem:[%s592_s1 + $0x70] sm:$0xff]  }
   0x6   :  { %428 = vmatpush3.bf16.msra.mxu1 %v449_v9  ;;  %v455_v15 = vld [vmem:[%s593_s0 + $0x4] ss:$12 sps:$4 sm:$0xff]   ;;  %v456_v16 = vld [vmem:[%s593_s0 + $0x8] ss:$12 sps:$4 sm:$0xff]   ;;  %v457_v17 = vld [vmem:[%s593_s0 + $0x20] ss:$12 sps:$4 sm:$0xff]  }
   0x7   :  { %398 = vmatpush3.bf16.msra.mxu0 %v438_v3  ;;  %429 = vmatprep.subr.bf16.mxu1 %v452_v13  ;;  %v448_v18 = vld [vmem:[%s592_s1 + $0x30] sm:$0xff]   ;;  %v450_v19 = vld [vmem:[%s592_s1 + $0x78] sm:$0xff]   ;;  %v453_v21 = vld [vmem:[%s593_s0] ss:$12 sps:$4 sm:$0xff]  }
   0x8   :  { %399 = vmatprep.subr.bf16.mxu0 %v439_v4  ;;  %239 = vmatprep.mubr.bf16.mxu0 %v455_v15  ;;  %v451_v20 = vld [vmem:[%s592_s1 + $0x38] sm:$0xff]   ;;  %v389_v33 = vld [vmem:[%s594_s2] ss:$0 sm:$0xff] }
   0x9   :  { %431 = vmatprep.mubr.msk.bf16.mxu1 %vm200_vm0, %v456_v16  ;;  %v458_v22 = vld [vmem:[%s593_s0 + $0x1c] ss:$12 sps:$4 sm:$0xff]   ;;  %v460_v23 = vld [vmem:[%s593_s0 + $0x18] ss:$12 sps:$4 sm:$0xff]   ;;  %v390_v36 = vld [vmem:[%s595_s3] ss:$0 sm:$0xff] }
   0xa   :  { %430 = vmatpush3.bf16.msra.mxu1 %v452_v13 }
   0xb   :  { %400 = vmatpush3.bf16.msra.mxu0 %v440_v5 }
   0xc   :  { %401 = vmatprep.subr.bf16.mxu0 %v441_v6 }
   0xd   :  { %432 = vmatmul.mubr.msk.bf16.vlgmr.msra.gmra.mrb[0].mxu1 %vm200_vm0, %v457_v17 }
   0xf   :  { %402 = vmatpush3.bf16.msra.mxu0 %v442_v7 }
  0x10   :  { %403 = vmatprep.subr.bf16.mxu0 %v443_v8 }
  0x13   :  { %404 = vmatpush3.bf16.msra.mxu0 %v444_v10 }
  0x14   :  { %405 = vmatprep.subr.bf16.mxu0 %v445_v11 }
  0x17   :  { %406 = vmatpush3.bf16.msra.mxu0 %v446_v12 }
  0x18   :  { %407 = vmatprep.subr.bf16.mxu0 %v447_v14 }
  0x1b   :  { %408 = vmatpush3.bf16.msra.mxu0 %v448_v18 }
  0x1c   :  { %409 = vmatprep.subr.bf16.mxu0 %v450_v19 }
  0x1f   :  { %410 = vmatpush3.bf16.msra.mxu0 %v451_v20 }
  0x22   :  { %240 = vmatmul.mubr.bf16.vlgmr.msra.gmra.mrb[0].mxu0 %v453_v21 }
  0x23   :  { %247 = vmatprep.mubr.bf16.mxu0 %v458_v22 }
  0x2a   :  { %248 = vmatmul.mubr.bf16.gmra.mrb[4].mxu0 %v460_v23 }
  0xe0   :  { %v433_v24 = vpop.f32.mrb[0].mxu1 }
  0xe1   :  { %v290_v25 = vpop.f32.mrb[1].mxu1 }
  0xe2   :  { %v434_v26 = vpop.f32.mrb[2].mxu1 }
  0xe3   :  { %v293_v27 = vpop.f32.mrb[3].mxu1 }
  0xf5   :  { %v411_v28 = vpop.f32.mrb[0].mxu0 }
  0xf6   :  { %v412_v29 = vpop.f32.mrb[1].mxu0 }
  0xf7   :  { %v413_v30 = vadd.f32 %v412_v29, %v411_v28  ;;  %v414_v31 = vpop.f32.mrb[2].mxu0 }
  0xf8   :  { %v415_v32 = vpop.f32.mrb[3].mxu0 }
  0xf9   :  { %v416_v34 = vadd.f32 %v415_v32, %v414_v31  ;;  %v291_v35 = vadd.f32 %v413_v30, %v290_v25 }
  0xfb   :  { %v312_v37 = vmul.f32 %v389_v33, %v291_v35  ;;  %v294_v38 = vadd.f32 %v416_v34, %v293_v27 }
  0xfd   :  { %v323_v39 = vadd.f32 %v390_v36, %v312_v37  ;;  %v313_v40 = vmul.f32 %v389_v33, %v294_v38  ;;  %v417_v41 = vpop.f32.mrb[4].mxu0 }
  0xfe   :  { %v418_v42 = vpop.f32.mrb[5].mxu0 }
  0xff   :  { %v391_v43 = vmul.f32 -1.442695, %v323_v39  ;;  %v324_v44 = vadd.f32 %v390_v36, %v313_v40  ;;  %v419_v45 = vadd.f32 %v418_v42, %v417_v41  ;;  %v420_v46 = vpop.f32.mrb[6].mxu0 }
 0x100   :  { %v421_v47 = vpop.f32.mrb[7].mxu0 }
 0x101   :  { %461 = vpow2.f32 %v391_v43  ;;  %v392_v48 = vmul.f32 -1.442695, %v324_v44  ;;  %v299_v49 = vadd.f32 %v433_v24, %v419_v45  ;;  %v422_v50 = vadd.f32 %v421_v47, %v420_v46 }
 0x103   :  { %463 = vpow2.f32 %v392_v48  ;;  %v314_v51 = vmul.f32 %v389_v33, %v299_v49  ;;  %v302_v52 = vadd.f32 %v434_v26, %v422_v50 }
 0x105   :  { %v325_v53 = vadd.f32 %v390_v36, %v314_v51  ;;  %v315_v54 = vmul.f32 %v389_v33, %v302_v52 }
 0x107   :  { %v393_v55 = vmul.f32 -1.442695, %v325_v53  ;;  %v326_v56 = vadd.f32 %v390_v36, %v315_v54 }
 0x109   :  { %465 = vpow2.f32 %v393_v55  ;;  %v394_v57 = vmul.f32 -1.442695, %v326_v56 }
 0x10b   :  { %v462_v58 = vpop.eup %461  ;;  %467 = vpow2.f32 %v394_v57 }
 0x10c   :  { %v339_v59 = vadd.f32 1.0, %v462_v58 }
 0x10d   :  { %v464_v60 = vpop.eup %463 }
 0x10e   :  { %469 = vrcp.f32 %v339_v59  ;;  %v340_v61 = vadd.f32 1.0, %v464_v60 }
 0x110   :  { %471 = vrcp.f32 %v340_v61 }
 0x113   :  { %v466_v62 = vpop.eup %465 }
 0x114   :  { %v341_v63 = vadd.f32 1.0, %v466_v62 }
 0x115   :  { %v468_v0 = vpop.eup %467 }
 0x116   :  { %473 = vrcp.f32 %v341_v63  ;;  %v342_v1 = vadd.f32 1.0, %v468_v0 }
 0x118   :  { %v470_v2 = vpop.eup %469  ;;  %475 = vrcp.f32 %v342_v1 }
 0x119   :  { %v351_v3 = vmul.f32 %v470_v2, %v323_v39 }
 0x11a   :  { %v472_v4 = vpop.eup %471 }
 0x11b   :  { %355 = vst [vmem:[%s596_s4] sm:$0xff] %v351_v3  ;;  %v352_v5 = vmul.f32 %v472_v4, %v324_v44 }
 0x11d   :  { %356 = vst [vmem:[%s596_s4 + $0x8] sm:$0xff] %v352_v5 }
 0x120   :  { %v474_v6 = vpop.eup %473 }
 0x121   :  { %v353_v7 = vmul.f32 %v474_v6, %v325_v53 }
 0x122   :  { %v476_v8 = vpop.eup %475 }
 0x123   :  { %357 = vst [vmem:[%s596_s4 + $0x10] sm:$0xff] %v353_v7  ;;  %v354_v9 = vmul.f32 %v476_v8, %v326_v56 }
 0x125   :  { %358 = vst [vmem:[%s596_s4 + $0x18] sm:$0xff] %v354_v9 }

// kernel: _lambda_.42
= control target key start
LH: loop header
LB: loop body
LE: loop exit
PB: predicated region body
PF: predicated region fallthrough
CT: control target
= control target key end

     0   :  { %vm48_vm0 = vcmask 261120   ;;  %s261_s1 = inlined_call_operand.vmem [shape: bf16[32,128], index: 1, kind: input, shape index: {}]   ;;  %s262_s0 = inlined_call_operand.vmem [shape: bf16[32,32], index: 0, kind: input, shape index: {}]   ;;  %s263_s2 = inlined_call_operand.vmem [shape: f32[1,128], index: 2, kind: input, shape index: {}]   ;;  %s264_s3 = inlined_call_operand.vmem [shape: f32[1,128], index: 3, kind: input, shape index: {}]   ;;  %s265_s4 = inlined_call_operand.vmem [shape: f32[32,128], index: 4, kind: output, shape index: {}]  }
   0x1   :  { %v186_v0 = vld [vmem:[%s261_s1] sm:$0xff]   ;;  %v187_v1 = vld [vmem:[%s261_s1 + $0x8] sm:$0xff]  }
   0x2   :  { %178 = vmatprep.subr.bf16.mxu0 %v186_v0  ;;  %v188_v2 = vld [vmem:[%s262_s0] sm:$0xff]   ;;  %v189_v3 = vld [vmem:[%s262_s0 + $0x8] sm:$0xff]  }
   0x3   :  { %179 = vmatpush3.bf16.msra.mxu0 %v186_v0  ;;  %182 = vmatprep.mubr.msk.bf16.mxu0 %vm48_vm0, %v188_v2  ;;  %v168_v4 = vld [vmem:[%s263_s2] ss:$0 sm:$0xff] }
   0x4   :  { %180 = vmatprep.subr.bf16.mxu0 %v187_v1  ;;  %v169_v6 = vld [vmem:[%s264_s3] ss:$0 sm:$0xff] }
   0x7   :  { %181 = vmatpush3.bf16.msra.mxu0 %v187_v1 }
   0xa   :  { %183 = vmatmul.mubr.msk.bf16.vlgmr.msra.gmra.mrb[0].mxu0 %vm48_vm0, %v189_v3 }
  0xdd   :  { %v184_v5 = vpop.f32.mrb[0].mxu0 }
  0xde   :  { %v113_v7 = vmul.f32 %v184_v5, %v168_v4  ;;  %v89_v8 = vpop.f32.mrb[1].mxu0 }
  0xdf   :  { %v111_v9 = vmul.f32 %v168_v4, %v89_v8  ;;  %v185_v10 = vpop.f32.mrb[2].mxu0 }
  0xe0   :  { %v124_v11 = vadd.f32 %v169_v6, %v113_v7  ;;  %v114_v12 = vmul.f32 %v185_v10, %v168_v4  ;;  %v92_v13 = vpop.f32.mrb[3].mxu0 }
  0xe1   :  { %v122_v14 = vadd.f32 %v169_v6, %v111_v9  ;;  %v112_v15 = vmul.f32 %v168_v4, %v92_v13 }
  0xe2   :  { %v172_v16 = vmul.f32 -1.442695, %v124_v11  ;;  %v125_v17 = vadd.f32 %v169_v6, %v114_v12 }
  0xe3   :  { %v170_v18 = vmul.f32 -1.442695, %v122_v14  ;;  %v123_v19 = vadd.f32 %v169_v6, %v112_v15 }
  0xe4   :  { %190 = vpow2.f32 %v172_v16  ;;  %v173_v20 = vmul.f32 -1.442695, %v125_v17 }
  0xe5   :  { %192 = vpow2.f32 %v170_v18  ;;  %v171_v21 = vmul.f32 -1.442695, %v123_v19 }
  0xe6   :  { %194 = vpow2.f32 %v173_v20 }
  0xe7   :  { %196 = vpow2.f32 %v171_v21 }
  0xee   :  { %v191_v22 = vpop.eup %190 }
  0xef   :  { %v193_v23 = vpop.eup %192  ;;  %v140_v24 = vadd.f32 1.0, %v191_v22 }
  0xf0   :  { %v195_v25 = vpop.eup %194  ;;  %v138_v26 = vadd.f32 1.0, %v193_v23 }
  0xf1   :  { %v197_v27 = vpop.eup %196  ;;  %198 = vrcp.f32 %v140_v24  ;;  %v141_v28 = vadd.f32 1.0, %v195_v25 }
  0xf2   :  { %200 = vrcp.f32 %v138_v26  ;;  %v139_v29 = vadd.f32 1.0, %v197_v27 }
  0xf3   :  { %202 = vrcp.f32 %v141_v28 }
  0xf4   :  { %204 = vrcp.f32 %v139_v29 }
  0xfb   :  { %v199_v30 = vpop.eup %198 }
  0xfc   :  { %v201_v31 = vpop.eup %200  ;;  %v152_v32 = vmul.f32 %v199_v30, %v124_v11 }
  0xfd   :  { %v203_v33 = vpop.eup %202  ;;  %v150_v34 = vmul.f32 %v201_v31, %v122_v14 }
  0xfe   :  { %v205_v35 = vpop.eup %204  ;;  %156 = vst [vmem:[%s265_s4 + $0x10] sm:$0xff] %v152_v32  ;;  %v153_v36 = vmul.f32 %v203_v33, %v125_v17 }
  0xff   :  { %154 = vst [vmem:[%s265_s4] sm:$0xff] %v150_v34  ;;  %v151_v37 = vmul.f32 %v205_v35, %v123_v19 }
 0x100   :  { %157 = vst [vmem:[%s265_s4 + $0x18] sm:$0xff] %v153_v36 }
 0x101   :  { %155 = vst [vmem:[%s265_s4 + $0x8] sm:$0xff] %v151_v37 }

// kernel: _lambda_.46
= control target key start
LH: loop header
LB: loop body
LE: loop exit
PB: predicated region body
PF: predicated region fallthrough
CT: control target
= control target key end

     0   :  { %v631_v36 = vmov 0.0   ;;  %vm632_vm0 = vmmov 0   ;;  %vm326_vm1 = vcmask 523264   ;;  %s784_s1 = inlined_call_operand.vmem [shape: bf16[576,128], index: 1, kind: input, shape index: {}]   ;;  %s785_s0 = inlined_call_operand.vmem [shape: bf16[8,576], index: 0, kind: input, shape index: {}]   ;;  %s786_s2 = inlined_call_operand.vmem [shape: f32[1,128], index: 2, kind: input, shape index: {}]   ;;  %s787_s3 = inlined_call_operand.vmem [shape: f32[1,128], index: 3, kind: input, shape index: {}]   ;;  %s788_s4 = inlined_call_operand.vmem [shape: f32[8,128], index: 4, kind: output, shape index: {}]  }
   0x1   :  { %v586_v0 = vld [vmem:[%s784_s1 + $0x40] sm:$0xff]   ;;  %v590_v4 = vld [vmem:[%s784_s1 + $0x48] sm:$0xff]   ;;  %v594_v8 = vld [vmem:[%s784_s1 + $0x50] sm:$0xff]  }
   0x2   :  { %v587_v1 = vld [vmem:[%s784_s1 + $0xc0] sm:$0xff]   ;;  %523 = vmatprep.subr.bf16.mxu0 %v586_v0  ;;  %v591_v5 = vld [vmem:[%s784_s1 + $0xc8] sm:$0xff]   ;;  %v595_v9 = vld [vmem:[%s784_s1 + $0xd0] sm:$0xff]  }
   0x3   :  { %v588_v2 = vld [vmem:[%s784_s1] sm:$0xff]   ;;  %545 = vmatprep.subr.bf16.mxu1 %v587_v1  ;;  %v592_v6 = vld [vmem:[%s784_s1 + $0x8] sm:$0xff]   ;;  %v596_v10 = vld [vmem:[%s784_s1 + $0x10] sm:$0xff]  }
   0x4   :  { %v589_v3 = vld [vmem:[%s784_s1 + $0x80] sm:$0xff]   ;;  %524 = vmatpush3.bf16.msra.mxu0 %v588_v2  ;;  %v593_v7 = vld [vmem:[%s784_s1 + $0x88] sm:$0xff]   ;;  %v597_v11 = vld [vmem:[%s784_s1 + $0x90] sm:$0xff]  }
   0x5   :  { %546 = vmatpush3.bf16.msra.mxu1 %v589_v3  ;;  %525 = vmatprep.subr.bf16.mxu0 %v590_v4  ;;  %v598_v12 = vld [vmem:[%s784_s1 + $0x58] sm:$0xff]   ;;  %v602_v16 = vld [vmem:[%s784_s1 + $0x60] sm:$0xff]   ;;  %v606_v20 = vld [vmem:[%s784_s1 + $0x68] sm:$0xff]  }
   0x6   :  { %547 = vmatprep.subr.bf16.mxu1 %v591_v5  ;;  %v599_v13 = vld [vmem:[%s784_s1 + $0xd8] sm:$0xff]   ;;  %v603_v17 = vld [vmem:[%s784_s1 + $0xe0] sm:$0xff]   ;;  %v607_v21 = vld [vmem:[%s784_s1 + $0xe8] sm:$0xff]  }
   0x7   :  { %v600_v14 = vld [vmem:[%s784_s1 + $0x18] sm:$0xff]   ;;  %v604_v18 = vld [vmem:[%s784_s1 + $0x20] sm:$0xff]   ;;  %v608_v22 = vld [vmem:[%s784_s1 + $0x28] sm:$0xff]  }
   0x8   :  { %526 = vmatpush3.bf16.msra.mxu0 %v592_v6  ;;  %v601_v15 = vld [vmem:[%s784_s1 + $0x98] sm:$0xff]   ;;  %v605_v19 = vld [vmem:[%s784_s1 + $0xa0] sm:$0xff]   ;;  %v609_v23 = vld [vmem:[%s784_s1 + $0xa8] sm:$0xff]  }
   0x9   :  { %548 = vmatpush3.bf16.msra.mxu1 %v593_v7  ;;  %527 = vmatprep.subr.bf16.mxu0 %v594_v8  ;;  %v610_v24 = vld [vmem:[%s784_s1 + $0x70] sm:$0xff]   ;;  %v614_v28 = vld [vmem:[%s784_s1 + $0x78] sm:$0xff]   ;;  %v18_v32 = vld [vmem:[%s785_s0] sm:$0xff] }
   0xa   :  { %549 = vmatprep.subr.bf16.mxu1 %v595_v9  ;;  %v611_v25 = vld [vmem:[%s784_s1 + $0xf0] sm:$0xff]   ;;  %v615_v29 = vld [vmem:[%s784_s1 + $0xf8] sm:$0xff]   ;;  %v478_v33 = vcombine.low %v18_v32, %v18_v32  ;;  %v479_v34 = vcombine.high %v18_v32, %v18_v32  ;;  %v19_v35 = vld [vmem:[%s785_s0 + $0x8] sm:$0xff] }
   0xb   :  { %v612_v26 = vld [vmem:[%s784_s1 + $0x30] sm:$0xff]   ;;  %v616_v30 = vld [vmem:[%s784_s1 + $0x38] sm:$0xff]   ;;  %v480_v37 = vcombine.low %v19_v35, %v19_v35  ;;  %v481_v38 = vcombine.high %v19_v35, %v19_v35  ;;  %v623_v39 = vld [vmem:[%s784_s1 + $0x100] sm:$0xff]  }
   0xc   :  { %528 = vmatpush3.bf16.msra.mxu0 %v596_v10  ;;  %v613_v27 = vld [vmem:[%s784_s1 + $0xb0] sm:$0xff]   ;;  %v617_v31 = vld [vmem:[%s784_s1 + $0xb8] sm:$0xff]   ;;  %362 = vmatprep.mubr.bf16.mxu0 %v479_v34  ;;  %v624_v40 = vld [vmem:[%s784_s1 + $0x108] sm:$0xff]  }
   0xd   :  { %550 = vmatpush3.bf16.msra.mxu1 %v597_v11  ;;  %529 = vmatprep.subr.bf16.mxu0 %v598_v12  ;;  %v625_v41 = vld [vmem:[%s784_s1 + $0x110] sm:$0xff]   ;;  %v626_v42 = vld [vmem:[%s784_s1 + $0x118] sm:$0xff]   ;;  %v520_v56 = vld [vmem:[%s786_s2] ss:$0 sm:$0xff] }
   0xe   :  { %551 = vmatprep.subr.bf16.mxu1 %v599_v13  ;;  %402 = vmatprep.mubr.bf16.mxu1 %v481_v38  ;;  %v620_v43 = vld [vmem:[%s785_s0 + $0x10] ss:$0 sps:$4 sm:$0xff]   ;;  %v521_v59 = vld [vmem:[%s787_s3] ss:$0 sm:$0xff] }
  0x10   :  { %530 = vmatpush3.bf16.msra.mxu0 %v600_v14 }
  0x11   :  { %552 = vmatpush3.bf16.msra.mxu1 %v601_v15  ;;  %531 = vmatprep.subr.bf16.mxu0 %v602_v16 }
  0x12   :  { %553 = vmatprep.subr.bf16.mxu1 %v603_v17 }
  0x14   :  { %532 = vmatpush3.bf16.msra.mxu0 %v604_v18 }
  0x15   :  { %554 = vmatpush3.bf16.msra.mxu1 %v605_v19  ;;  %533 = vmatprep.subr.bf16.mxu0 %v606_v20 }
  0x16   :  { %555 = vmatprep.subr.bf16.mxu1 %v607_v21 }
  0x18   :  { %534 = vmatpush3.bf16.msra.mxu0 %v608_v22 }
  0x19   :  { %556 = vmatpush3.bf16.msra.mxu1 %v609_v23  ;;  %535 = vmatprep.subr.bf16.mxu0 %v610_v24 }
  0x1a   :  { %557 = vmatprep.subr.bf16.mxu1 %v611_v25 }
  0x1c   :  { %536 = vmatpush3.bf16.msra.mxu0 %v612_v26 }
  0x1d   :  { %558 = vmatpush3.bf16.msra.mxu1 %v613_v27  ;;  %537 = vmatprep.subr.bf16.mxu0 %v614_v28 }
  0x1e   :  { %559 = vmatprep.subr.bf16.mxu1 %v615_v29 }
  0x20   :  { %538 = vmatpush3.bf16.msra.mxu0 %v616_v30 }
  0x21   :  { %560 = vmatpush3.bf16.msra.mxu1 %v617_v31  ;;  %572 = vmatprep.subr.bf16.mxu0 %v631_v36 }
  0x23   :  { %363 = vmatmul.mubr.bf16.vlgmr.msra.gmra.mrb[0].mxu0 %v478_v33 }
  0x24   :  { %403 = vmatmul.mubr.bf16.vlgmr.msra.gmra.mrb[0].mxu1 %v480_v37  ;;  %573 = vmatpush3.bf16.msra.mxu0 %v623_v39 }
  0x25   :  { %574 = vmatprep.subr.bf16.mxu0 %v631_v36  ;;  %580 = vmatprep.mubr.msk.bf16.mxu0 %vm632_vm0, %v631_v36 }
  0x28   :  { %575 = vmatpush3.bf16.msra.mxu0 %v624_v40 }
  0x29   :  { %576 = vmatprep.subr.bf16.mxu0 %v631_v36 }
  0x2c   :  { %577 = vmatpush3.bf16.msra.mxu0 %v625_v41 }
  0x2d   :  { %578 = vmatprep.subr.bf16.mxu0 %v631_v36 }
  0x30   :  { %579 = vmatpush3.bf16.msra.mxu0 %v626_v42 }
  0x33   :  { %581 = vmatmul.mubr.msk.bf16.vlgmr.msra.gmra.mrb[4].mxu0 %vm326_vm1, %v620_v43 }
  0xf6   :  { %v539_v44 = vpop.f32.mrb[0].mxu0 }
  0xf7   :  { %v561_v45 = vpop.f32.mrb[0].mxu1  ;;  %v540_v46 = vpop.f32.mrb[1].mxu0 }
  0xf8   :  { %v541_v47 = vadd.f32 %v540_v46, %v539_v44  ;;  %v562_v48 = vpop.f32.mrb[1].mxu1  ;;  %v542_v49 = vpop.f32.mrb[2].mxu0 }
  0xf9   :  { %v563_v50 = vadd.f32 %v562_v48, %v561_v45  ;;  %v543_v51 = vpop.f32.mrb[3].mxu0  ;;  %v564_v52 = vpop.f32.mrb[2].mxu1 }
  0xfa   :  { %v565_v53 = vpop.f32.mrb[3].mxu1 }
  0xfb   :  { %v405_v54 = vadd.f32 %v563_v50, %v541_v47 }
 0x106   :  { %v444_v55 = vpop.f32.mrb[4].mxu0 }
 0x107   :  { %v445_v57 = vadd.f32 %v444_v55, %v405_v54  ;;  %v582_v58 = vpop.f32.mrb[5].mxu0 }
 0x108   :  { %v447_v60 = vpop.f32.mrb[6].mxu0 }
 0x109   :  { %v457_v61 = vmul.f32 %v520_v56, %v445_v57  ;;  %v583_v62 = vpop.f32.mrb[7].mxu0 }
 0x10b   :  { %v465_v63 = vadd.f32 %v521_v59, %v457_v61 }
 0x10d   :  { %v522_v0 = vmul.f32 -1.442695, %v465_v63 }
 0x10f   :  { %627 = vpow2.f32 %v522_v0 }
 0x119   :  { %v628_v1 = vpop.eup %627 }
 0x11a   :  { %v469_v2 = vadd.f32 1.0, %v628_v1 }
 0x11c   :  { %629 = vrcp.f32 %v469_v2 }
 0x126   :  { %v630_v3 = vpop.eup %629 }
 0x127   :  { %v472_v4 = vmul.f32 %v630_v3, %v465_v63 }
 0x129   :  { %473 = vst [vmem:[%s788_s4] sm:$0xff] %v472_v4 }

// kernel: _lambda_.47
= control target key start
LH: loop header
LB: loop body
LE: loop exit
PB: predicated region body
PF: predicated region fallthrough
CT: control target
= control target key end

     0   :  { %9 = vsyncpa [#allocation3], 0  ;;  %s305_s0 = inlined_call_operand.vmem [shape: bf16[8,64], index: 0, kind: input, shape index: {}]   ;;  %s306_s1 = inlined_call_operand.vmem [shape: bf16[64,128], index: 1, kind: input, shape index: {}]   ;;  %s307_s2 = inlined_call_operand.hbm [shape: f32[1,128], index: 2, kind: input, shape index: {}]   ;;  %s308_s3 = inlined_call_operand.hbm [shape: f32[1,128], index: 3, kind: input, shape index: {}]   ;;  %s309_s4 = inlined_call_operand.vmem [shape: f32[8,128], index: 4, kind: output, shape index: {}]  }
   0x1   :  { %10 = vsyncpa [#allocation5], 0  ;;  %s234_s15 = smov [#allocation2]   ;;  %s235_s17 = smov [#allocation4]  }
   0x2   :  { %s21_s16 = sshll.u32 %s234_s15, 4  ;;  %s31_s18 = sshll.u32 %s235_s17, 4  ;;  %s22_s16 = int_to_ptr.vmem [resolvable:$true] %s21_s16  ;;  %s32_s18 = int_to_ptr.vmem [resolvable:$true] %s31_s18 }
   0x3   :  { %s186_s21 = scalar_lea.hbm %s307_s2, 16 }
   0x4   :  { %p187_p0 = scmp.ne.s32.totalorder %s307_s2, %s186_s21  ;;  %p190_p1 = scmp.lt.u32.totalorder %s186_s21, %s307_s2 }
   0x6   :  { %p192_p2 = pnand %p190_p1, %p187_p0 }
   0x8   :  { %195 = shalt.err (!%p192_p2)
}
   0x9   :  { %s196_s26 = scalar_lea.vmem %s22_s16, 16  ;;  %s200_s27 = scalar_lea.vmem %s22_s16, 32 }
   0xa   :  { %p197_p3 = scmp.ne.s32.totalorder %s22_s16, %s196_s26  ;;  %p201_p4 = scmp.lt.s32.totalorder %s22_s16, %s22_s16 }
   0xb   :  { %p202_p5 = scmp.lt.s32.totalorder %s200_s27, %s196_s26 }
   0xd   :  { %p203_p6 = por %p202_p5, %p201_p4 }
   0xf   :  { %p204_p7 = pnand %p203_p6, %p197_p3 }
  0x11   :  { %207 = shalt.err (!%p204_p7)
}
  0x12   :  { %24 = dma.hbm_to_vmem [thread:$0]  %s307_s2, 16, %s22_s16, [#allocation3]  }
  0x13   :  { %s208_s6 = scalar_lea.hbm %s308_s3, 16 }
  0x14   :  { %p209_p8 = scmp.ne.s32.totalorder %s308_s3, %s208_s6  ;;  %p212_p9 = scmp.lt.u32.totalorder %s208_s6, %s308_s3 }
  0x16   :  { %p214_p10 = pnand %p212_p9, %p209_p8 }
  0x18   :  { %217 = shalt.err (!%p214_p10)
}
  0x19   :  { %s218_s11 = scalar_lea.vmem %s32_s18, 16  ;;  %s222_s12 = scalar_lea.vmem %s32_s18, 32 }
  0x1a   :  { %p219_p11 = scmp.ne.s32.totalorder %s32_s18, %s218_s11  ;;  %p223_p12 = scmp.lt.s32.totalorder %s32_s18, %s32_s18 }
  0x1b   :  { %p224_p13 = scmp.lt.s32.totalorder %s222_s12, %s218_s11 }
  0x1d   :  { %p225_p0 = por %p224_p13, %p223_p12 }
  0x1f   :  { %p226_p1 = pnand %p225_p0, %p219_p11 }
  0x21   :  { %229 = shalt.err (!%p226_p1)
}
  0x22   :  { %34 = dma.hbm_to_vmem [thread:$0]  %s308_s3, 16, %s32_s18, [#allocation5]  }
  0x23   :  { %230 = dma.done.wait [#allocation3], 16  }
  0x24   :  { %231 = vsyncadd [#allocation3], 4294967280 }
  0x25   :  { %232 = dma.done.wait [#allocation5], 16  }
  0x26   :  { %233 = vsyncadd [#allocation5], 4294967280  ;;  %v236_v0 = vmov 0.0   ;;  %vm237_vm0 = vmmov 0   ;;  %v178_v1 = vld [vmem:[%s306_s1] sm:$0xff]   ;;  %v179_v2 = vld [vmem:[%s306_s1 + $0x8] sm:$0xff]  }
  0x27   :  { %162 = vmatprep.subr.bf16.mxu0 %v236_v0  ;;  %170 = vmatprep.mubr.msk.bf16.mxu0 %vm237_vm0, %v236_v0  ;;  %v180_v3 = vld [vmem:[%s306_s1 + $0x10] sm:$0xff]   ;;  %v181_v4 = vld [vmem:[%s306_s1 + $0x18] sm:$0xff]   ;;  %v42_v5 = vld [vmem:[%s305_s0] sm:$0xf]  ;;  %vm75_vm1 = vcmask 523264  }
  0x28   :  { %163 = vmatpush3.bf16.msra.mxu0 %v178_v1  ;;  %v154_v6 = vld [vmem:[#allocation2] ss:$0 sm:$0xff]  ;;  %v155_v8 = vld [vmem:[#allocation4] ss:$0 sm:$0xff] }
  0x29   :  { %164 = vmatprep.subr.bf16.mxu0 %v236_v0 }
  0x2c   :  { %165 = vmatpush3.bf16.msra.mxu0 %v179_v2 }
  0x2d   :  { %166 = vmatprep.subr.bf16.mxu0 %v236_v0 }
  0x30   :  { %167 = vmatpush3.bf16.msra.mxu0 %v180_v3 }
  0x31   :  { %168 = vmatprep.subr.bf16.mxu0 %v236_v0 }
  0x34   :  { %169 = vmatpush3.bf16.msra.mxu0 %v181_v4 }
  0x37   :  { %171 = vmatmul.mubr.msk.bf16.vlgmr.msra.gmra.mrb[0].mxu0 %vm75_vm1, %v42_v5 }
 0x10a   :  { %v113_v7 = vpop.f32.mrb[0].mxu0 }
 0x10b   :  { %v126_v9 = vmul.f32 %v154_v6, %v113_v7  ;;  %v172_v10 = vpop.f32.mrb[1].mxu0 }
 0x10c   :  { %v116_v11 = vpop.f32.mrb[2].mxu0 }
 0x10d   :  { %v134_v12 = vadd.f32 %v155_v8, %v126_v9  ;;  %v173_v13 = vpop.f32.mrb[3].mxu0 }
 0x10f   :  { %v156_v14 = vmul.f32 -1.442695, %v134_v12 }
 0x111   :  { %182 = vpow2.f32 %v156_v14 }
 0x11b   :  { %v183_v15 = vpop.eup %182 }
 0x11c   :  { %v138_v16 = vadd.f32 1.0, %v183_v15 }
 0x11e   :  { %184 = vrcp.f32 %v138_v16 }
 0x128   :  { %v185_v17 = vpop.eup %184 }
 0x129   :  { %v141_v18 = vmul.f32 %v185_v17, %v134_v12 }
 0x12b   :  { %142 = vst [vmem:[%s309_s4] sm:$0xff] %v141_v18 }
 0x12c   :  { %147 = vsyncpa [#allocation3], 1 }
 0x12d   :  { %148 = vsyncpa [#allocation5], 1 }

// kernel: _lambda_.48
= control target key start
LH: loop header
LB: loop body
LE: loop exit
PB: predicated region body
PF: predicated region fallthrough
CT: control target
= control target key end

     0   :  { %9 = vsyncpa [#allocation3], 0  ;;  %s273_s0 = inlined_call_operand.vmem [shape: bf16[8,32], index: 0, kind: input, shape index: {}]   ;;  %s274_s1 = inlined_call_operand.vmem [shape: bf16[32,128], index: 1, kind: input, shape index: {}]   ;;  %s275_s2 = inlined_call_operand.hbm [shape: f32[1,128], index: 2, kind: input, shape index: {}]   ;;  %s276_s3 = inlined_call_operand.hbm [shape: f32[1,128], index: 3, kind: input, shape index: {}]   ;;  %s277_s4 = inlined_call_operand.vmem [shape: f32[8,128], index: 4, kind: output, shape index: {}]  }
   0x1   :  { %10 = vsyncpa [#allocation5], 0  ;;  %s208_s15 = smov [#allocation2]   ;;  %s209_s17 = smov [#allocation4]  }
   0x2   :  { %s21_s16 = sshll.u32 %s208_s15, 4  ;;  %s31_s18 = sshll.u32 %s209_s17, 4  ;;  %s22_s16 = int_to_ptr.vmem [resolvable:$true] %s21_s16  ;;  %s32_s18 = int_to_ptr.vmem [resolvable:$true] %s31_s18 }
   0x3   :  { %s160_s21 = scalar_lea.hbm %s275_s2, 16 }
   0x4   :  { %p161_p0 = scmp.ne.s32.totalorder %s275_s2, %s160_s21  ;;  %p164_p1 = scmp.lt.u32.totalorder %s160_s21, %s275_s2 }
   0x6   :  { %p166_p2 = pnand %p164_p1, %p161_p0 }
   0x8   :  { %169 = shalt.err (!%p166_p2)
}
   0x9   :  { %s170_s26 = scalar_lea.vmem %s22_s16, 16  ;;  %s174_s27 = scalar_lea.vmem %s22_s16, 32 }
   0xa   :  { %p171_p3 = scmp.ne.s32.totalorder %s22_s16, %s170_s26  ;;  %p175_p4 = scmp.lt.s32.totalorder %s22_s16, %s22_s16 }
   0xb   :  { %p176_p5 = scmp.lt.s32.totalorder %s174_s27, %s170_s26 }
   0xd   :  { %p177_p6 = por %p176_p5, %p175_p4 }
   0xf   :  { %p178_p7 = pnand %p177_p6, %p171_p3 }
  0x11   :  { %181 = shalt.err (!%p178_p7)
}
  0x12   :  { %24 = dma.hbm_to_vmem [thread:$0]  %s275_s2, 16, %s22_s16, [#allocation3]  }
  0x13   :  { %s182_s6 = scalar_lea.hbm %s276_s3, 16 }
  0x14   :  { %p183_p8 = scmp.ne.s32.totalorder %s276_s3, %s182_s6  ;;  %p186_p9 = scmp.lt.u32.totalorder %s182_s6, %s276_s3 }
  0x16   :  { %p188_p10 = pnand %p186_p9, %p183_p8 }
  0x18   :  { %191 = shalt.err (!%p188_p10)
}
  0x19   :  { %s192_s11 = scalar_lea.vmem %s32_s18, 16  ;;  %s196_s12 = scalar_lea.vmem %s32_s18, 32 }
  0x1a   :  { %p193_p11 = scmp.ne.s32.totalorder %s32_s18, %s192_s11  ;;  %p197_p12 = scmp.lt.s32.totalorder %s32_s18, %s32_s18 }
  0x1b   :  { %p198_p13 = scmp.lt.s32.totalorder %s196_s12, %s192_s11 }
  0x1d   :  { %p199_p0 = por %p198_p13, %p197_p12 }
  0x1f   :  { %p200_p1 = pnand %p199_p0, %p193_p11 }
  0x21   :  { %203 = shalt.err (!%p200_p1)
}
  0x22   :  { %34 = dma.hbm_to_vmem [thread:$0]  %s276_s3, 16, %s32_s18, [#allocation5]  }
  0x23   :  { %204 = dma.done.wait [#allocation3], 16  }
  0x24   :  { %205 = vsyncadd [#allocation3], 4294967280 }
  0x25   :  { %206 = dma.done.wait [#allocation5], 16  }
  0x26   :  { %207 = vsyncadd [#allocation5], 4294967280  ;;  %v210_v0 = vmov 0.0   ;;  %vm211_vm0 = vmmov 0   ;;  %v154_v1 = vld [vmem:[%s274_s1] sm:$0xff]   ;;  %v155_v2 = vld [vmem:[%s274_s1 + $0x8] sm:$0xff]  }
  0x27   :  { %142 = vmatprep.subr.bf16.mxu0 %v210_v0  ;;  %146 = vmatprep.mubr.msk.bf16.mxu0 %vm211_vm0, %v210_v0  ;;  %v42_v3 = vld [vmem:[%s273_s0] sm:$0xf]  ;;  %vm59_vm1 = vcmask 261120  }
  0x28   :  { %143 = vmatpush3.bf16.msra.mxu0 %v154_v1  ;;  %v136_v4 = vld [vmem:[#allocation2] ss:$0 sm:$0xff]  ;;  %v137_v6 = vld [vmem:[#allocation4] ss:$0 sm:$0xff] }
  0x29   :  { %144 = vmatprep.subr.bf16.mxu0 %v210_v0 }
  0x2c   :  { %145 = vmatpush3.bf16.msra.mxu0 %v155_v2 }
  0x2f   :  { %147 = vmatmul.mubr.msk.bf16.vlgmr.msra.gmra.mrb[0].mxu0 %vm59_vm1, %v42_v3 }
 0x102   :  { %v97_v5 = vpop.f32.mrb[0].mxu0 }
 0x103   :  { %v110_v7 = vmul.f32 %v136_v4, %v97_v5  ;;  %v148_v8 = vpop.f32.mrb[1].mxu0 }
 0x104   :  { %v100_v9 = vpop.f32.mrb[2].mxu0 }
 0x105   :  { %v118_v10 = vadd.f32 %v137_v6, %v110_v7  ;;  %v149_v11 = vpop.f32.mrb[3].mxu0 }
 0x107   :  { %v138_v12 = vmul.f32 -1.442695, %v118_v10 }
 0x109   :  { %156 = vpow2.f32 %v138_v12 }
 0x113   :  { %v157_v13 = vpop.eup %156 }
 0x114   :  { %v122_v14 = vadd.f32 1.0, %v157_v13 }
 0x116   :  { %158 = vrcp.f32 %v122_v14 }
 0x120   :  { %v159_v15 = vpop.eup %158 }
 0x121   :  { %v125_v16 = vmul.f32 %v159_v15, %v118_v10 }
 0x123   :  { %126 = vst [vmem:[%s277_s4] sm:$0xff] %v125_v16 }
 0x124   :  { %131 = vsyncpa [#allocation3], 1 }
 0x125   :  { %132 = vsyncpa [#allocation5], 1 }

// kernel: _lambda_.51
= control target key start
LH: loop header
LB: loop body
LE: loop exit
PB: predicated region body
PF: predicated region fallthrough
CT: control target
= control target key end

     0   :  { %v158_v0 = vmov 0.0   ;;  %vm159_vm0 = vmmov 0   ;;  %vm51_vm1 = vcmask 523264   ;;  %s209_s1 = inlined_call_operand.vmem [shape: bf16[64,128], index: 1, kind: input, shape index: {}]   ;;  %s210_s0 = inlined_call_operand.vmem [shape: bf16[8,64], index: 0, kind: input, shape index: {}]   ;;  %s211_s2 = inlined_call_operand.vmem [shape: f32[1,128], index: 2, kind: input, shape index: {}]   ;;  %s212_s3 = inlined_call_operand.vmem [shape: f32[1,128], index: 3, kind: input, shape index: {}]   ;;  %s213_s4 = inlined_call_operand.vmem [shape: f32[8,128], index: 4, kind: output, shape index: {}]  }
   0x1   :  { %136 = vmatprep.subr.bf16.mxu0 %v158_v0  ;;  %v150_v1 = vld [vmem:[%s209_s1] sm:$0xff]   ;;  %144 = vmatprep.mubr.msk.bf16.mxu0 %vm159_vm0, %v158_v0  ;;  %v151_v2 = vld [vmem:[%s209_s1 + $0x8] sm:$0xff]   ;;  %v152_v3 = vld [vmem:[%s209_s1 + $0x10] sm:$0xff]  }
   0x2   :  { %137 = vmatpush3.bf16.msra.mxu0 %v150_v1  ;;  %v153_v4 = vld [vmem:[%s209_s1 + $0x18] sm:$0xff]   ;;  %v18_v5 = vld [vmem:[%s210_s0] sm:$0xf] }
   0x3   :  { %138 = vmatprep.subr.bf16.mxu0 %v158_v0  ;;  %v128_v6 = vld [vmem:[%s211_s2] ss:$0 sm:$0xff] }
   0x4   :  { %v129_v8 = vld [vmem:[%s212_s3] ss:$0 sm:$0xff] }
   0x6   :  { %139 = vmatpush3.bf16.msra.mxu0 %v151_v2 }
   0x7   :  { %140 = vmatprep.subr.bf16.mxu0 %v158_v0 }
   0xa   :  { %141 = vmatpush3.bf16.msra.mxu0 %v152_v3 }
   0xb   :  { %142 = vmatprep.subr.bf16.mxu0 %v158_v0 }
   0xe   :  { %143 = vmatpush3.bf16.msra.mxu0 %v153_v4 }
  0x11   :  { %145 = vmatmul.mubr.msk.bf16.vlgmr.msra.gmra.mrb[0].mxu0 %vm51_vm1, %v18_v5 }
  0xe4   :  { %v89_v7 = vpop.f32.mrb[0].mxu0 }
  0xe5   :  { %v102_v9 = vmul.f32 %v128_v6, %v89_v7  ;;  %v146_v10 = vpop.f32.mrb[1].mxu0 }
  0xe6   :  { %v92_v11 = vpop.f32.mrb[2].mxu0 }
  0xe7   :  { %v110_v12 = vadd.f32 %v129_v8, %v102_v9  ;;  %v147_v13 = vpop.f32.mrb[3].mxu0 }
  0xe9   :  { %v130_v14 = vmul.f32 -1.442695, %v110_v12 }
  0xeb   :  { %154 = vpow2.f32 %v130_v14 }
  0xf5   :  { %v155_v15 = vpop.eup %154 }
  0xf6   :  { %v114_v16 = vadd.f32 1.0, %v155_v15 }
  0xf8   :  { %156 = vrcp.f32 %v114_v16 }
 0x102   :  { %v157_v17 = vpop.eup %156 }
 0x103   :  { %v117_v18 = vmul.f32 %v157_v17, %v110_v12 }
 0x105   :  { %118 = vst [vmem:[%s213_s4] sm:$0xff] %v117_v18 }

// kernel: _lambda_.53
= control target key start
LH: loop header
LB: loop body
LE: loop exit
PB: predicated region body
PF: predicated region fallthrough
CT: control target
= control target key end

     0   :  { %v241_v1 = vmov 0.0   ;;  %vm242_vm0 = vmmov 0   ;;  %s314_s0 = inlined_call_operand.vmem [shape: bf16[8,128], index: 0, kind: input, shape index: {}]   ;;  %s315_s1 = inlined_call_operand.vmem [shape: bf16[128,128], index: 1, kind: input, shape index: {}]   ;;  %s316_s2 = inlined_call_operand.vmem [shape: f32[1,128], index: 2, kind: input, shape index: {}]   ;;  %s317_s3 = inlined_call_operand.vmem [shape: f32[1,128], index: 3, kind: input, shape index: {}]   ;;  %s318_s4 = inlined_call_operand.hbm [shape: f32[8,128], index: 4, kind: output, shape index: {}]  }
   0x1   :  { %v205_v0 = vld [vmem:[%s315_s1] sm:$0xff]   ;;  %182 = vmatprep.subr.bf16.mxu0 %v241_v1  ;;  %v206_v2 = vld [vmem:[%s315_s1 + $0x8] sm:$0xff]   ;;  %198 = vmatprep.mubr.msk.bf16.mxu0 %vm242_vm0, %v241_v1  ;;  %v207_v3 = vld [vmem:[%s315_s1 + $0x10] sm:$0xff]  }
   0x2   :  { %183 = vmatpush3.bf16.msra.mxu0 %v205_v0 }
   0x3   :  { %184 = vmatprep.subr.bf16.mxu0 %v241_v1 }
   0x6   :  { %185 = vmatpush3.bf16.msra.mxu0 %v206_v2 }
   0x7   :  { %186 = vmatprep.subr.bf16.mxu0 %v241_v1 }
   0x8   :  { %9 = vsyncpa [#allocation3], 0  ;;  %v208_v4 = vld [vmem:[%s315_s1 + $0x18] sm:$0xff]   ;;  %v209_v5 = vld [vmem:[%s315_s1 + $0x20] sm:$0xff]  }
   0x9   :  { %v210_v6 = vld [vmem:[%s315_s1 + $0x28] sm:$0xff]   ;;  %v211_v7 = vld [vmem:[%s315_s1 + $0x30] sm:$0xff]   ;;  %v212_v8 = vld [vmem:[%s315_s1 + $0x38] sm:$0xff]  }
   0xa   :  { %187 = vmatpush3.bf16.msra.mxu0 %v207_v3  ;;  %v19_v9 = vld [vmem:[%s314_s0] sm:$0xf]  ;;  %s243_s0 = smov [#allocation2]  }
   0xb   :  { %188 = vmatprep.subr.bf16.mxu0 %v241_v1  ;;  %v170_v10 = vld [vmem:[%s316_s2] ss:$0 sm:$0xff]  ;;  %s154_s1 = sshll.u32 %s243_s0, 4  ;;  %s155_s1 = int_to_ptr.vmem [resolvable:$true] %s154_s1 }
   0xc   :  { %v171_v12 = vld [vmem:[%s317_s3] ss:$0 sm:$0xff]  ;;  %s217_s2 = scalar_lea.vmem %s155_s1, 128  ;;  %p222_p1 = scmp.lt.s32.totalorder %s155_s1, %s155_s1 }
   0xd   :  { %p218_p0 = scmp.ne.s32.totalorder %s155_s1, %s217_s2  ;;  %p223_p2 = scmp.lt.s32.totalorder %s217_s2, %s217_s2 }
   0xe   :  { %189 = vmatpush3.bf16.msra.mxu0 %v208_v4 }
   0xf   :  { %190 = vmatprep.subr.bf16.mxu0 %v241_v1  ;;  %p224_p3 = por %p223_p2, %p222_p1 }
  0x11   :  { %p225_p4 = pnand %p224_p3, %p218_p0 }
  0x12   :  { %191 = vmatpush3.bf16.msra.mxu0 %v209_v5 }
  0x13   :  { %192 = vmatprep.subr.bf16.mxu0 %v241_v1 }
  0x16   :  { %193 = vmatpush3.bf16.msra.mxu0 %v210_v6 }
  0x17   :  { %194 = vmatprep.subr.bf16.mxu0 %v241_v1 }
  0x1a   :  { %195 = vmatpush3.bf16.msra.mxu0 %v211_v7 }
  0x1b   :  { %196 = vmatprep.subr.bf16.mxu0 %v241_v1 }
  0x1e   :  { %197 = vmatpush3.bf16.msra.mxu0 %v212_v8 }
  0x21   :  { %199 = vmatmul.mubr.bf16.vlgmr.msra.gmra.mrb[0].mxu0 %v19_v9 }
  0xf4   :  { %v118_v11 = vpop.f32.mrb[0].mxu0 }
  0xf5   :  { %v131_v13 = vmul.f32 %v170_v10, %v118_v11  ;;  %v200_v14 = vpop.f32.mrb[1].mxu0 }
  0xf6   :  { %v121_v15 = vpop.f32.mrb[2].mxu0 }
  0xf7   :  { %v139_v16 = vadd.f32 %v171_v12, %v131_v13  ;;  %v201_v17 = vpop.f32.mrb[3].mxu0 }
  0xf9   :  { %v172_v18 = vmul.f32 -1.442695, %v139_v16 }
  0xfb   :  { %213 = vpow2.f32 %v172_v18 }
 0x105   :  { %v214_v19 = vpop.eup %213 }
 0x106   :  { %v143_v20 = vadd.f32 1.0, %v214_v19 }
 0x108   :  { %215 = vrcp.f32 %v143_v20 }
 0x112   :  { %v216_v21 = vpop.eup %215 }
 0x113   :  { %v146_v22 = vmul.f32 %v216_v21, %v139_v16 }
 0x115   :  { %147 = vst [vmem:[#allocation2] sm:$0xff] %v146_v22 }
 0x116   :  { %228 = shalt.err (!%p225_p4)
}
 0x117   :  { %s229_s12 = scalar_lea.hbm %s318_s4, 128 }
 0x118   :  { %p230_p5 = scmp.ne.s32.totalorder %s318_s4, %s229_s12  ;;  %p233_p6 = scmp.lt.u32.totalorder %s229_s12, %s318_s4 }
 0x11a   :  { %p235_p7 = pnand %p233_p6, %p230_p5 }
 0x11c   :  { %238 = shalt.err (!%p235_p7)
}
 0x11d   :  { %157 = dma.vmem_to_hbm [thread:$0]  %s155_s1, 128, %s318_s4, [#allocation3]  }
 0x11e   :  { %239 = dma.done.wait [#allocation3], 128  }
 0x11f   :  { %240 = vsyncadd [#allocation3], 4294967168 }
 0x120   :  { %161 = vsyncpa [#allocation3], 1 }

// kernel: _lambda_.49
= control target key start
LH: loop header
LB: loop body
LE: loop exit
PB: predicated region body
PF: predicated region fallthrough
CT: control target
= control target key end

     0   :  { %v371_v1 = vmov 0.0   ;;  %vm372_vm0 = vmmov 0   ;;  %vm174_vm1 = vcmask 261120   ;;  %s467_s1 = inlined_call_operand.vmem [shape: bf16[288,128], index: 1, kind: input, shape index: {}]   ;;  %s468_s0 = inlined_call_operand.vmem [shape: bf16[8,288], index: 0, kind: input, shape index: {}]   ;;  %s469_s2 = inlined_call_operand.vmem [shape: f32[1,128], index: 2, kind: input, shape index: {}]   ;;  %s470_s3 = inlined_call_operand.vmem [shape: f32[1,128], index: 3, kind: input, shape index: {}]   ;;  %s471_s4 = inlined_call_operand.vmem [shape: f32[8,128], index: 4, kind: output, shape index: {}]  }
   0x1   :  { %v346_v0 = vld [vmem:[%s467_s1 + $0x40] sm:$0xff]   ;;  %336 = vmatprep.subr.bf16.mxu1 %v371_v1  ;;  %340 = vmatprep.mubr.msk.bf16.mxu1 %vm372_vm0, %v371_v1  ;;  %v348_v3 = vld [vmem:[%s467_s1 + $0x48] sm:$0xff]   ;;  %v350_v5 = vld [vmem:[%s467_s1 + $0x50] sm:$0xff]  }
   0x2   :  { %v347_v2 = vld [vmem:[%s467_s1] sm:$0xff]   ;;  %311 = vmatprep.subr.bf16.mxu0 %v346_v0  ;;  %v349_v4 = vld [vmem:[%s467_s1 + $0x8] sm:$0xff]   ;;  %v351_v6 = vld [vmem:[%s467_s1 + $0x10] sm:$0xff]  }
   0x3   :  { %312 = vmatpush3.bf16.msra.mxu0 %v347_v2  ;;  %v352_v7 = vld [vmem:[%s467_s1 + $0x58] sm:$0xff]   ;;  %v354_v9 = vld [vmem:[%s467_s1 + $0x60] sm:$0xff]   ;;  %v356_v12 = vld [vmem:[%s467_s1 + $0x68] sm:$0xff]  }
   0x4   :  { %313 = vmatprep.subr.bf16.mxu0 %v348_v3  ;;  %v353_v8 = vld [vmem:[%s467_s1 + $0x18] sm:$0xff]   ;;  %v360_v10 = vld [vmem:[%s467_s1 + $0x80] sm:$0xff]   ;;  %v363_v13 = vld [vmem:[%s467_s1 + $0x88] sm:$0xff]  }
   0x5   :  { %v355_v11 = vld [vmem:[%s467_s1 + $0x20] sm:$0xff]   ;;  %337 = vmatpush3.bf16.msra.mxu1 %v360_v10  ;;  %v357_v15 = vld [vmem:[%s467_s1 + $0x28] sm:$0xff]   ;;  %v358_v18 = vld [vmem:[%s467_s1 + $0x70] sm:$0xff]  }
   0x6   :  { %338 = vmatprep.subr.bf16.mxu1 %v371_v1  ;;  %v18_v14 = vld [vmem:[%s468_s0] sm:$0xff]  ;;  %v366_v17 = vld [vmem:[%s468_s0 + $0x8] ss:$0 sps:$4 sm:$0xff]   ;;  %v359_v19 = vld [vmem:[%s467_s1 + $0x30] sm:$0xff]  }
   0x7   :  { %314 = vmatpush3.bf16.msra.mxu0 %v349_v4  ;;  %v287_v16 = vcombine.high %v18_v14, %v18_v14  ;;  %v361_v20 = vld [vmem:[%s467_s1 + $0x78] sm:$0xff]   ;;  %v286_v22 = vcombine.low %v18_v14, %v18_v14  ;;  %v308_v31 = vld [vmem:[%s469_s2] ss:$0 sm:$0xff] }
   0x8   :  { %315 = vmatprep.subr.bf16.mxu0 %v350_v5  ;;  %v362_v21 = vld [vmem:[%s467_s1 + $0x38] sm:$0xff]   ;;  %v309_v34 = vld [vmem:[%s470_s3] ss:$0 sm:$0xff] }
   0x9   :  { %339 = vmatpush3.bf16.msra.mxu1 %v363_v13  ;;  %210 = vmatprep.mubr.bf16.mxu0 %v287_v16 }
   0xb   :  { %316 = vmatpush3.bf16.msra.mxu0 %v351_v6 }
   0xc   :  { %317 = vmatprep.subr.bf16.mxu0 %v352_v7  ;;  %341 = vmatmul.mubr.msk.bf16.vlgmr.msra.gmra.mrb[0].mxu1 %vm174_vm1, %v366_v17 }
   0xf   :  { %318 = vmatpush3.bf16.msra.mxu0 %v353_v8 }
  0x10   :  { %319 = vmatprep.subr.bf16.mxu0 %v354_v9 }
  0x13   :  { %320 = vmatpush3.bf16.msra.mxu0 %v355_v11 }
  0x14   :  { %321 = vmatprep.subr.bf16.mxu0 %v356_v12 }
  0x17   :  { %322 = vmatpush3.bf16.msra.mxu0 %v357_v15 }
  0x18   :  { %323 = vmatprep.subr.bf16.mxu0 %v358_v18 }
  0x1b   :  { %324 = vmatpush3.bf16.msra.mxu0 %v359_v19 }
  0x1c   :  { %325 = vmatprep.subr.bf16.mxu0 %v361_v20 }
  0x1f   :  { %326 = vmatpush3.bf16.msra.mxu0 %v362_v21 }
  0x22   :  { %211 = vmatmul.mubr.bf16.vlgmr.msra.gmra.mrb[0].mxu0 %v286_v22 }
  0xdf   :  { %v252_v23 = vpop.f32.mrb[0].mxu1 }
  0xe0   :  { %v342_v24 = vpop.f32.mrb[1].mxu1 }
  0xe1   :  { %v255_v25 = vpop.f32.mrb[2].mxu1 }
  0xe2   :  { %v343_v26 = vpop.f32.mrb[3].mxu1 }
  0xf5   :  { %v327_v27 = vpop.f32.mrb[0].mxu0 }
  0xf6   :  { %v328_v28 = vpop.f32.mrb[1].mxu0 }
  0xf7   :  { %v329_v29 = vadd.f32 %v328_v28, %v327_v27  ;;  %v330_v30 = vpop.f32.mrb[2].mxu0 }
  0xf8   :  { %v331_v32 = vpop.f32.mrb[3].mxu0 }
  0xf9   :  { %v253_v33 = vadd.f32 %v329_v29, %v252_v23 }
  0xfb   :  { %v265_v35 = vmul.f32 %v308_v31, %v253_v33 }
  0xfd   :  { %v273_v36 = vadd.f32 %v309_v34, %v265_v35 }
  0xff   :  { %v310_v37 = vmul.f32 -1.442695, %v273_v36 }
 0x101   :  { %367 = vpow2.f32 %v310_v37 }
 0x10b   :  { %v368_v38 = vpop.eup %367 }
 0x10c   :  { %v277_v39 = vadd.f32 1.0, %v368_v38 }
 0x10e   :  { %369 = vrcp.f32 %v277_v39 }
 0x118   :  { %v370_v40 = vpop.eup %369 }
 0x119   :  { %v280_v41 = vmul.f32 %v370_v40, %v273_v36 }
 0x11b   :  { %281 = vst [vmem:[%s471_s4] sm:$0xff] %v280_v41 }

</bundles_post_ra>
